<compile_context>
chip_gen: v7x
topology: tpu7x:2x2x1
jax: 0.10.0
libtpu: 0.0.40
codegen_flags: <defaults>
</compile_context>

<pallas_src>
import functools

import jax
import jax.numpy as jnp
from jax.experimental import pallas as pl
from jax.experimental.pallas import tpu as pltpu

LANE = 128      # lane tile
SUBLANE = 8     # sublane tile


def _round_up(v, m):
    return (v + m - 1) // m * m


# ----------------------------------------------------------------------------
# Fused kernel: 3 x GATv2Conv (DGL semantics, eval mode) + classifier epilogue.
# One grid step == Bt graphs.
#   feat_src = X @ W_src + b_src   feat_dst = X @ W_dst + b_dst   (per head)
#   e[d,s,h] = attn_h . leaky_relu(feat_src[s] + feat_dst[d])
#   alpha    = edge softmax over incoming edges of each destination
#   out[d]   = sum_s alpha[d,s,h] * feat_src[s]   (heads concatenated)
# Padded nodes have no edges -> zero in-degree -> zero output
# (allow_zero_in_degree=True).
# ----------------------------------------------------------------------------
def gat_bert_kernel(*refs, num_layers, neg_slope):
    x_ref, bias_ref, aw_ref, pooled_ref = refs[:4]
    layer_refs = refs[4:4 + 4 * num_layers]
    (w1g_ref, w1b_ref, b1_ref,
     w2_ref, b2_ref, w3_ref, b3_ref) = refs[4 + 4 * num_layers:-1]
    out_ref = refs[-1]

    h = x_ref[0]             # (Bt, n, fin_pad) f32 node features
    bias = bias_ref[0]       # (Bt, n, n, LANE) f32 additive edge mask (0 / -1e30)
    off_edge = bias < 0.0    # (Bt, n, n, LANE) bool

    bt, n = h.shape[0], h.shape[1]

    for li in range(num_layers):          # static unroll; h never leaves VMEM
        w_ref, b_ref, attn_ref, gsum_ref = layer_refs[4 * li:4 * li + 4]
        hfp = w_ref.shape[1] // 2         # lane-aligned src|dst split boundary

        # (1) fused fc_src|fc_dst projection: one MXU matmul over all Bt*n rows
        fsd = jnp.dot(h.reshape(bt * n, h.shape[-1]), w_ref[...],
                      preferred_element_type=jnp.float32) + b_ref[...]
        fs = fsd[:, :hfp].reshape(bt, n, hfp)        # 128-aligned lane slices
        fd = fsd[:, hfp:].reshape(bt, n, hfp)

        # (2) pairwise GATv2 logits in f32 on the VPU (precision-safe)
        pair = fd[:, :, None, :] + fs[:, None, :, :]          # (Bt, nd, ns, hfp)
        pair = jnp.where(pair >= 0.0, pair, neg_slope * pair)  # LeakyReLU
        weighted = pair * attn_ref[...]                        # per-lane attn coeff

        # (3) per-head score, broadcast across that head's feature lanes, via a
        #     single dense (hfp x hfp) block-diagonal group-sum matmul — full
        #     128-lane MXU work instead of degenerate N=heads / K=heads dots.
        #     The f32 reshape is (8,128)-tile aligned (free); bf16 cast after it.
        weighted2d = weighted.reshape(bt * n * n, hfp).astype(jnp.bfloat16)
        scores = jnp.dot(weighted2d, gsum_ref[...],
                         preferred_element_type=jnp.float32)
        scores = scores.reshape(bt, n, n, hfp)

        # (4) masked edge softmax over incoming edges (per destination, per head)
        masked = scores + bias
        m = jnp.max(masked, axis=2, keepdims=True)
        p = jnp.where(off_edge, 0.0, jnp.exp(masked - m))
        denom = jnp.sum(p, axis=2, keepdims=True)
        alpha = p * pl.reciprocal(jnp.where(denom > 0.0, denom, 1.0), approx=True)

        # (5) aggregate: out[d] = sum_s alpha[d,s] * fs[s]  — fully lane-dense
        h = jnp.sum(alpha * fs[:, None, :, :], axis=2)         # (Bt, n, hfp)

    # ---- fused classifier epilogue (no HBM round trip of the GAT features) ----
    # aspect mean over aspect nodes == weighted sum with precomputed weights
    aspect = jnp.sum(aw_ref[0] * h, axis=1)                    # (Bt, hfp_last)
    # split w1 (GAT half / BERT half): two dots + add, no concat materialization
    z = (jnp.dot(aspect, w1g_ref[...], preferred_element_type=jnp.float32)
         + jnp.dot(pooled_ref[0], w1b_ref[...], preferred_element_type=jnp.float32)
         + b1_ref[...])
    z = jnp.dot(z, w2_ref[...], preferred_element_type=jnp.float32) + b2_ref[...]
    z = jnp.maximum(z, 0.0)                                    # ReLU; Dropout=id (eval)
    out_ref[0] = (jnp.dot(z, w3_ref[...], preferred_element_type=jnp.float32)
                  + b3_ref[...])                               # lane-dense (Bt,128) store


def _choose_bt(batch, n_pad, target_rows=256):
    """Graphs per grid step: fill the MXU M dimension (~256 rows on v6e/v7x,
    128 already saturates v5e) while keeping the grid length >= 2 so v7x
    megacore still shards blocks across its two TensorCores."""
    bt = max(1, min(batch, target_rows // n_pad))
    if batch >= 2:
        bt = min(bt, batch // 2)
    while batch % bt:
        bt -= 1
    return bt


def gat_bert_forward(x_pad, edge_bias, aw_dense, pooled_pad, packed_layers, clf,
                     *, neg_slope, bt=None):
    B, n, finp = x_pad.shape
    lane = edge_bias.shape[-1]
    for p in packed_layers:
        assert p["hfp"] == lane, "edge-bias lane width must match every layer's hfp"
    assert aw_dense.shape[-1] == packed_layers[-1]["hfp"]

    if bt is None:
        bt = _choose_bt(B, n)
    g = B // bt
    cls_p = clf["out_pad"]

    # reshape every per-graph array to (G, Bt, ...) so each block is a full
    # trailing slab (trivially (8,128)-tile legal) and index maps are (i, 0, ...)
    xg = x_pad.reshape(g, bt, n, finp)
    biasg = edge_bias.reshape(g, bt, n, n, lane)
    awg = aw_dense.reshape(g, bt, n, aw_dense.shape[-1])
    pooledg = pooled_pad.reshape(g, bt, pooled_pad.shape[-1])

    params = []
    for p in packed_layers:
        params += [p["w"], p["b"], p["attn_lane"], p["gsum"]]
    params += [clf["w1_gat"], clf["w1_bert"], clf["b1"], clf["w2"], clf["b2"],
               clf["w3"], clf["b3"]]
    assert all(p.ndim == 2 for p in params)

    kernel = functools.partial(gat_bert_kernel, num_layers=len(packed_layers),
                               neg_slope=neg_slope)
    in_specs = [
        pl.BlockSpec((1, bt, n, finp), lambda i: (i, 0, 0, 0)),
        pl.BlockSpec((1, bt, n, n, lane), lambda i: (i, 0, 0, 0, 0)),
        pl.BlockSpec((1, bt, n, awg.shape[-1]), lambda i: (i, 0, 0, 0)),
        pl.BlockSpec((1, bt, pooledg.shape[-1]), lambda i: (i, 0, 0)),
    ] + [pl.BlockSpec(p.shape, lambda i: (0, 0)) for p in params]   # constant index

    out = pl.pallas_call(
        kernel,
        out_shape=jax.ShapeDtypeStruct((g, bt, cls_p), jnp.float32),
        grid=(g,),
        in_specs=in_specs,
        out_specs=pl.BlockSpec((1, bt, cls_p), lambda i: (i, 0, 0)),
        compiler_params=pltpu.CompilerParams(
            dimension_semantics=("parallel",),           # graph blocks -> megacore
            vmem_limit_bytes=32 * 1024 * 1024),          # safe inside v7x's 64 MiB
    )(xg, biasg, awg, pooledg, *params)
    return out.reshape(B, cls_p)


# ----------------------------------------------------------------------------
# Deterministic parameter init (module parametrization) + TPU-friendly packing
# ----------------------------------------------------------------------------
def init_linear(key, fan_in, fan_out):
    k1, k2 = jax.random.split(key)
    bound = 1.0 / (fan_in ** 0.5)
    w = jax.random.uniform(k1, (fan_in, fan_out), jnp.float32, -bound, bound)
    b = jax.random.uniform(k2, (1, fan_out), jnp.float32, -bound, bound)
    return w, b


def init_gat_layer(key, fin, fout, heads):
    k1, k2, k3 = jax.random.split(key, 3)
    w_src, b_src = init_linear(k1, fin, heads * fout)
    w_dst, b_dst = init_linear(k2, fin, heads * fout)
    attn = jax.random.normal(k3, (heads, fout), jnp.float32) * 0.1
    return dict(w_src=w_src, b_src=b_src, w_dst=w_dst, b_dst=b_dst, attn=attn)


def pack_gat_layer(raw, fin, fin_pad, heads, fout):
    """Fuse [W_src | W_dst] with a 128-aligned split; build the per-lane attn
    coefficient row and the block-diagonal within-head group-sum matrix."""
    hf = heads * fout
    hfp = _round_up(hf, LANE)
    w = jnp.zeros((fin_pad, 2 * hfp), jnp.float32)
    w = w.at[:fin, :hf].set(raw["w_src"])
    w = w.at[:fin, hfp:hfp + hf].set(raw["w_dst"])
    b = jnp.zeros((1, 2 * hfp), jnp.float32)
    b = b.at[:, :hf].set(raw["b_src"])
    b = b.at[:, hfp:hfp + hf].set(raw["b_dst"])
    attn_lane = jnp.zeros((1, hfp), jnp.float32)
    attn_lane = attn_lane.at[0, :hf].set(raw["attn"].reshape(hf))
    gmat = jnp.zeros((hfp, hfp), jnp.float32)
    for h in range(heads):
        gmat = gmat.at[h * fout:(h + 1) * fout, h * fout:(h + 1) * fout].set(1.0)
    return dict(w=w, b=b, attn_lane=attn_lane, gsum=gmat.astype(jnp.bfloat16),
                hf=hf, hfp=hfp)


def pack_classifier(raw, gat_dim, gat_pad, bert_dim, bert_pad, hidden, num_class):
    hid_p = _round_up(hidden, LANE)
    cls_p = _round_up(num_class, LANE)
    w1_gat = jnp.zeros((gat_pad, hid_p), jnp.float32)
    w1_gat = w1_gat.at[:gat_dim, :hidden].set(raw["w1"][:gat_dim])
    w1_bert = jnp.zeros((bert_pad, hid_p), jnp.float32)
    w1_bert = w1_bert.at[:bert_dim, :hidden].set(raw["w1"][gat_dim:])
    b1 = jnp.zeros((1, hid_p), jnp.float32).at[:, :hidden].set(raw["b1"])
    w2 = jnp.zeros((hid_p, hid_p), jnp.float32).at[:hidden, :hidden].set(raw["w2"])
    b2 = jnp.zeros((1, hid_p), jnp.float32).at[:, :hidden].set(raw["b2"])
    w3 = jnp.zeros((hid_p, cls_p), jnp.float32).at[:hidden, :num_class].set(raw["w3"])
    b3 = jnp.zeros((1, cls_p), jnp.float32).at[:, :num_class].set(raw["b3"])
    return dict(w1_gat=w1_gat, w1_bert=w1_bert, b1=b1, w2=w2, b2=b2, w3=w3, b3=b3,
                out_pad=cls_p)


# ----------------------------------------------------------------------------
# Host-side glue mirroring find_ordered_mappings (exact ordered-match branch).
# ----------------------------------------------------------------------------
def ordered_mapping(graph_words, bert_tokens):
    mapping, j0 = [], 0
    for w in graph_words:
        hit = -1
        for j in range(j0, len(bert_tokens)):
            if bert_tokens[j] == w:
                hit, j0 = j, j + 1
                break
        assert hit >= 0, "token miss: span-averaging fallback not implemented"
        mapping.append(hit)
    return mapping


if __name__ == "__main__":
    key = jax.random.PRNGKey(0)

    # --- small "args" ---------------------------------------------------------
    B, S = 8, 8                       # 8 graphs -> Bt=4 graphs/step, grid=(2,)
    bert_dim = 32
    gat_hidden_dim, attn_head = 16, 2
    gat_output_dim, num_class = 32, 3
    num_gat_layer = 3
    alpha = 0.2                       # negative_slope
    nodes_per_graph = 6

    n_pad = _round_up(nodes_per_graph, SUBLANE)   # sublane-aligned node count
    feat_pad = _round_up(bert_dim, LANE)          # lane-aligned feature width

    keys = jax.random.split(key, 10)

    # --- synthetic frozen-BERT outputs (see TODO(synk) above) -----------------
    last_hidden_states = jax.random.normal(keys[0], (B, S, bert_dim), jnp.float32)
    pooled_output = jax.random.normal(keys[1], (B, bert_dim), jnp.float32)

    # --- synthetic tokenization / dependency graphs ---------------------------
    text_bert_indices = [[101] + [100 * (b + 1) + t for t in range(1, nodes_per_graph + 1)] + [102]
                         for b in range(B)]
    graph_words = [[100 * (b + 1) + t for t in range(1, nodes_per_graph + 1)]
                   for b in range(B)]
    aspect_indices = [[graph_words[b][2], 0, 0, 0] for b in range(B)]

    # _get_embeddings: gather BERT hidden states onto graph nodes, zero-pad
    x_pad = jnp.zeros((B, n_pad, feat_pad), jnp.float32)
    for b in range(B):
        pos = ordered_mapping(graph_words[b], text_bert_indices[b])
        feats = last_hidden_states[b, jnp.array(pos, jnp.int32), :]
        x_pad = x_pad.at[b, :nodes_per_graph, :bert_dim].set(feats)

    # adjacency adj[b, dst, src] (chain + self loops); padded nodes have no
    # edges -> zero in-degree -> zero GAT output (allow_zero_in_degree=True).
    adj = jnp.zeros((B, n_pad, n_pad), jnp.float32)
    for b in range(B):
        for i in range(nodes_per_graph):
            adj = adj.at[b, i, i].set(1.0)
            if i + 1 < nodes_per_graph:
                adj = adj.at[b, i, i + 1].set(1.0)
                adj = adj.at[b, i + 1, i].set(1.0)
    assert float(jnp.sum(adj[:, nodes_per_graph:, :])) == 0.0   # padded rows edge-free
    assert float(jnp.sum(adj[:, :, nodes_per_graph:])) == 0.0   # padded cols edge-free

    # _find_aspect_indices + mean -> per-node weights (1 / #aspect_nodes)
    aw = jnp.zeros((B, n_pad), jnp.float32)
    for b in range(B):
        idxs = [node for a in aspect_indices[b] if a != 0
                for node, w in enumerate(graph_words[b]) if w == a]
        for i in idxs:
            aw = aw.at[b, i].set(1.0 / len(idxs))

    pooled_pad = jnp.zeros((B, feat_pad), jnp.float32).at[:, :bert_dim].set(pooled_output)

    # --- GAT stack params (raw module parametrization, then packed) -----------
    gat_cfgs = [(bert_dim, gat_hidden_dim, attn_head),
                (gat_hidden_dim * attn_head, gat_hidden_dim, attn_head),
                (gat_hidden_dim * attn_head, gat_output_dim, 1)]
    assert len(gat_cfgs) == num_gat_layer
    raw_layers = [init_gat_layer(keys[2 + i], fin, fout, heads)
                  for i, (fin, fout, heads) in enumerate(gat_cfgs)]
    packed_layers = []
    fin_pad = feat_pad
    for (fin, fout, heads), raw in zip(gat_cfgs, raw_layers):
        packed = pack_gat_layer(raw, fin, fin_pad, heads, fout)
        packed_layers.append(packed)
        fin_pad = packed["hfp"]

    # --- classifier params -----------------------------------------------------
    w1, b1 = init_linear(keys[6], gat_output_dim + bert_dim, gat_output_dim)
    w2, b2 = init_linear(keys[7], gat_output_dim, gat_output_dim)
    w3, b3 = init_linear(keys[8], gat_output_dim, num_class)
    clf = pack_classifier(dict(w1=w1, b1=b1, w2=w2, b2=b2, w3=w3, b3=b3),
                          gat_output_dim, packed_layers[-1]["hfp"],
                          bert_dim, feat_pad, gat_output_dim, num_class)

    # --- lane-dense mask / aspect-weight slabs (no trailing size-1 dims) -------
    hfp_last = packed_layers[-1]["hfp"]
    edge_bias = jnp.broadcast_to(
        jnp.where(adj > 0.0, 0.0, -1e30)[:, :, :, None].astype(jnp.float32),
        (B, n_pad, n_pad, LANE))
    aw_dense = jnp.broadcast_to(aw[:, :, None], (B, n_pad, hfp_last)).astype(jnp.float32)

    # --- fused forward ----------------------------------------------------------
    logits_pad = gat_bert_forward(x_pad, edge_bias, aw_dense, pooled_pad,
                                  packed_layers, clf, neg_slope=alpha)   # (B, 128)
    logits_pad = jax.block_until_ready(logits_pad)
    logits = logits_pad[:, :num_class]                                    # (B, num_class)

    assert logits.shape == (B, num_class)
    assert bool(jnp.all(jnp.isfinite(logits)))
    print("KERNEL_OK")
</pallas_src>

<mosaic_0001>
module attributes {stable_mosaic.version = 11 : i64} {
  func.func @gat_bert_kernel(%arg0: i32, %arg1: memref<1x4x8x128xf32, #tpu.memory_space<vmem>>, %arg2: memref<1x4x8x8x128xf32, #tpu.memory_space<vmem>>, %arg3: memref<1x4x8x128xf32, #tpu.memory_space<vmem>>, %arg4: memref<1x4x128xf32, #tpu.memory_space<vmem>>, %arg5: memref<128x256xf32, #tpu.memory_space<vmem>>, %arg6: memref<1x256xf32, #tpu.memory_space<vmem>>, %arg7: memref<1x128xf32, #tpu.memory_space<vmem>>, %arg8: memref<128x128xbf16, #tpu.memory_space<vmem>>, %arg9: memref<128x256xf32, #tpu.memory_space<vmem>>, %arg10: memref<1x256xf32, #tpu.memory_space<vmem>>, %arg11: memref<1x128xf32, #tpu.memory_space<vmem>>, %arg12: memref<128x128xbf16, #tpu.memory_space<vmem>>, %arg13: memref<128x256xf32, #tpu.memory_space<vmem>>, %arg14: memref<1x256xf32, #tpu.memory_space<vmem>>, %arg15: memref<1x128xf32, #tpu.memory_space<vmem>>, %arg16: memref<128x128xbf16, #tpu.memory_space<vmem>>, %arg17: memref<128x128xf32, #tpu.memory_space<vmem>>, %arg18: memref<128x128xf32, #tpu.memory_space<vmem>>, %arg19: memref<1x128xf32, #tpu.memory_space<vmem>>, %arg20: memref<128x128xf32, #tpu.memory_space<vmem>>, %arg21: memref<1x128xf32, #tpu.memory_space<vmem>>, %arg22: memref<128x128xf32, #tpu.memory_space<vmem>>, %arg23: memref<1x128xf32, #tpu.memory_space<vmem>>, %arg24: memref<1x4x128xf32, #tpu.memory_space<vmem>>) attributes {dimension_semantics = [#tpu.dimension_semantics<parallel>], iteration_bounds = array<i64: 2>, scalar_prefetch = 0 : i64, scratch_operands = 0 : i64, tpu.core_type = #tpu.core_type<tc>, window_params = [{transform_indices = @transform_0, window_bounds = array<i64: 1, 4, 8, 128>}, {transform_indices = @transform_1, window_bounds = array<i64: 1, 4, 8, 8, 128>}, {transform_indices = @transform_2, window_bounds = array<i64: 1, 4, 8, 128>}, {transform_indices = @transform_3, window_bounds = array<i64: 1, 4, 128>}, {pipeline_mode = #tpu.pipeline_mode<synchronous>, transform_indices = @transform_4, window_bounds = array<i64: 128, 256>}, {pipeline_mode = #tpu.pipeline_mode<synchronous>, transform_indices = @transform_5, window_bounds = array<i64: 1, 256>}, {pipeline_mode = #tpu.pipeline_mode<synchronous>, transform_indices = @transform_6, window_bounds = array<i64: 1, 128>}, {pipeline_mode = #tpu.pipeline_mode<synchronous>, transform_indices = @transform_7, window_bounds = array<i64: 128, 128>}, {pipeline_mode = #tpu.pipeline_mode<synchronous>, transform_indices = @transform_8, window_bounds = array<i64: 128, 256>}, {pipeline_mode = #tpu.pipeline_mode<synchronous>, transform_indices = @transform_9, window_bounds = array<i64: 1, 256>}, {pipeline_mode = #tpu.pipeline_mode<synchronous>, transform_indices = @transform_10, window_bounds = array<i64: 1, 128>}, {pipeline_mode = #tpu.pipeline_mode<synchronous>, transform_indices = @transform_11, window_bounds = array<i64: 128, 128>}, {pipeline_mode = #tpu.pipeline_mode<synchronous>, transform_indices = @transform_12, window_bounds = array<i64: 128, 256>}, {pipeline_mode = #tpu.pipeline_mode<synchronous>, transform_indices = @transform_13, window_bounds = array<i64: 1, 256>}, {pipeline_mode = #tpu.pipeline_mode<synchronous>, transform_indices = @transform_14, window_bounds = array<i64: 1, 128>}, {pipeline_mode = #tpu.pipeline_mode<synchronous>, transform_indices = @transform_15, window_bounds = array<i64: 128, 128>}, {pipeline_mode = #tpu.pipeline_mode<synchronous>, transform_indices = @transform_16, window_bounds = array<i64: 128, 128>}, {pipeline_mode = #tpu.pipeline_mode<synchronous>, transform_indices = @transform_17, window_bounds = array<i64: 128, 128>}, {pipeline_mode = #tpu.pipeline_mode<synchronous>, transform_indices = @transform_18, window_bounds = array<i64: 1, 128>}, {pipeline_mode = #tpu.pipeline_mode<synchronous>, transform_indices = @transform_19, window_bounds = array<i64: 128, 128>}, {pipeline_mode = #tpu.pipeline_mode<synchronous>, transform_indices = @transform_20, window_bounds = array<i64: 1, 128>}, {pipeline_mode = #tpu.pipeline_mode<synchronous>, transform_indices = @transform_21, window_bounds = array<i64: 128, 128>}, {pipeline_mode = #tpu.pipeline_mode<synchronous>, transform_indices = @transform_22, window_bounds = array<i64: 1, 128>}, {transform_indices = @transform_23, window_bounds = array<i64: 1, 4, 128>}]} {
    %c0 = arith.constant 0 : index
    %c0_0 = arith.constant 0 : index
    %c0_1 = arith.constant 0 : index
    %c0_2 = arith.constant 0 : index
    %0 = vector.load %arg1[%c0, %c0_0, %c0_1, %c0_2] : memref<1x4x8x128xf32, #tpu.memory_space<vmem>>, vector<1x4x8x128xf32>
    %1 = vector.shape_cast %0 : vector<1x4x8x128xf32> to vector<4x8x128xf32>
    %c0_3 = arith.constant 0 : index
    %c0_4 = arith.constant 0 : index
    %c0_5 = arith.constant 0 : index
    %c0_6 = arith.constant 0 : index
    %c0_7 = arith.constant 0 : index
    %2 = vector.load %arg2[%c0_3, %c0_4, %c0_5, %c0_6, %c0_7] : memref<1x4x8x8x128xf32, #tpu.memory_space<vmem>>, vector<1x4x8x8x128xf32>
    %3 = vector.shape_cast %2 : vector<1x4x8x8x128xf32> to vector<4x8x8x128xf32>
    %cst = arith.constant 0.000000e+00 : f32
    %4 = vector.broadcast %cst : f32 to vector<4x8x8x128xf32>
    %5 = arith.cmpf olt, %3, %4 : vector<4x8x8x128xf32>
    %6 = vector.shape_cast %1 : vector<4x8x128xf32> to vector<32x128xf32>
    %c0_8 = arith.constant 0 : index
    %c0_9 = arith.constant 0 : index
    %7 = vector.load %arg5[%c0_8, %c0_9] : memref<128x256xf32, #tpu.memory_space<vmem>>, vector<128x256xf32>
    %cst_10 = arith.constant dense<0.000000e+00> : vector<32x256xf32>
    %8 = tpu.matmul %6, %7, %cst_10 {dimension_numbers = #tpu.dot_dimension_numbers<[1], [0], [0], [1], [0, 0, 1, 1], [], []>} : vector<32x128xf32>, vector<128x256xf32>, vector<32x256xf32> -> vector<32x256xf32>
    %c0_11 = arith.constant 0 : index
    %c0_12 = arith.constant 0 : index
    %9 = vector.load %arg6[%c0_11, %c0_12] : memref<1x256xf32, #tpu.memory_space<vmem>>, vector<1x256xf32>
    %10 = vector.broadcast %9 : vector<1x256xf32> to vector<32x256xf32>
    %11 = arith.addf %8, %10 : vector<32x256xf32>
    %12 = vector.extract_strided_slice %11 {offsets = [0, 0], sizes = [32, 128], strides = [1, 1]} : vector<32x256xf32> to vector<32x128xf32>
    %13 = vector.shape_cast %12 : vector<32x128xf32> to vector<4x8x128xf32>
    %14 = vector.extract_strided_slice %11 {offsets = [0, 128], sizes = [32, 128], strides = [1, 1]} : vector<32x256xf32> to vector<32x128xf32>
    %15 = vector.shape_cast %14 : vector<32x128xf32> to vector<4x8x128xf32>
    %16 = vector.shape_cast %15 : vector<4x8x128xf32> to vector<4x8x1x128xf32>
    %17 = vector.shape_cast %13 : vector<4x8x128xf32> to vector<4x1x8x128xf32>
    %18 = vector.broadcast %16 : vector<4x8x1x128xf32> to vector<4x8x8x128xf32>
    %19 = vector.broadcast %17 : vector<4x1x8x128xf32> to vector<4x8x8x128xf32>
    %20 = arith.addf %18, %19 : vector<4x8x8x128xf32>
    %cst_13 = arith.constant 0.000000e+00 : f32
    %21 = vector.broadcast %cst_13 : f32 to vector<4x8x8x128xf32>
    %22 = arith.cmpf oge, %20, %21 : vector<4x8x8x128xf32>
    %cst_14 = arith.constant 2.000000e-01 : f32
    %23 = vector.broadcast %cst_14 : f32 to vector<4x8x8x128xf32>
    %24 = arith.mulf %23, %20 : vector<4x8x8x128xf32>
    %25 = arith.select %22, %20, %24 : vector<4x8x8x128xi1>, vector<4x8x8x128xf32>
    %c0_15 = arith.constant 0 : index
    %c0_16 = arith.constant 0 : index
    %26 = vector.load %arg7[%c0_15, %c0_16] : memref<1x128xf32, #tpu.memory_space<vmem>>, vector<1x128xf32>
    %27 = vector.shape_cast %26 : vector<1x128xf32> to vector<1x1x1x128xf32>
    %28 = vector.broadcast %27 : vector<1x1x1x128xf32> to vector<4x8x8x128xf32>
    %29 = arith.mulf %25, %28 : vector<4x8x8x128xf32>
    %30 = vector.shape_cast %29 : vector<4x8x8x128xf32> to vector<256x128xf32>
    %31 = arith.truncf %30 : vector<256x128xf32> to vector<256x128xbf16>
    %c0_17 = arith.constant 0 : index
    %c0_18 = arith.constant 0 : index
    %32 = vector.load %arg8[%c0_17, %c0_18] : memref<128x128xbf16, #tpu.memory_space<vmem>>, vector<128x128xbf16>
    %cst_19 = arith.constant dense<0.000000e+00> : vector<256x128xf32>
    %33 = tpu.matmul %31, %32, %cst_19 {dimension_numbers = #tpu.dot_dimension_numbers<[1], [0], [0], [1], [0, 0, 1, 1], [], []>} : vector<256x128xbf16>, vector<128x128xbf16>, vector<256x128xf32> -> vector<256x128xf32>
    %34 = vector.shape_cast %33 : vector<256x128xf32> to vector<4x8x8x128xf32>
    %35 = arith.addf %34, %3 : vector<4x8x8x128xf32>
    %cst_20 = arith.constant dense<0xFF800000> : vector<4x8x128xf32>
    %36 = vector.multi_reduction <maximumf>, %35, %cst_20 [2] : vector<4x8x8x128xf32> to vector<4x8x128xf32>
    %37 = vector.shape_cast %36 : vector<4x8x128xf32> to vector<4x8x1x128xf32>
    %38 = vector.broadcast %37 : vector<4x8x1x128xf32> to vector<4x8x8x128xf32>
    %39 = arith.subf %35, %38 : vector<4x8x8x128xf32>
    %40 = math.exp %39 : vector<4x8x8x128xf32>
    %cst_21 = arith.constant 0.000000e+00 : f32
    %41 = vector.broadcast %cst_21 : f32 to vector<4x8x8x128xf32>
    %42 = arith.select %5, %41, %40 : vector<4x8x8x128xi1>, vector<4x8x8x128xf32>
    %cst_22 = arith.constant dense<0.000000e+00> : vector<4x8x128xf32>
    %43 = vector.multi_reduction <add>, %42, %cst_22 [2] : vector<4x8x8x128xf32> to vector<4x8x128xf32>
    %44 = vector.shape_cast %43 : vector<4x8x128xf32> to vector<4x8x1x128xf32>
    %cst_23 = arith.constant 0.000000e+00 : f32
    %45 = vector.broadcast %cst_23 : f32 to vector<4x8x1x128xf32>
    %46 = arith.cmpf ogt, %44, %45 : vector<4x8x1x128xf32>
    %cst_24 = arith.constant 1.000000e+00 : f32
    %47 = vector.broadcast %cst_24 : f32 to vector<4x8x1x128xf32>
    %48 = arith.select %46, %44, %47 : vector<4x8x1x128xi1>, vector<4x8x1x128xf32>
    %49 = tpu.reciprocal %48 {approx = true} : vector<4x8x1x128xf32> -> vector<4x8x1x128xf32>
    %50 = vector.broadcast %49 : vector<4x8x1x128xf32> to vector<4x8x8x128xf32>
    %51 = arith.mulf %42, %50 : vector<4x8x8x128xf32>
    %52 = vector.shape_cast %13 : vector<4x8x128xf32> to vector<4x1x8x128xf32>
    %53 = vector.broadcast %52 : vector<4x1x8x128xf32> to vector<4x8x8x128xf32>
    %54 = arith.mulf %51, %53 : vector<4x8x8x128xf32>
    %cst_25 = arith.constant dense<0.000000e+00> : vector<4x8x128xf32>
    %55 = vector.multi_reduction <add>, %54, %cst_25 [2] : vector<4x8x8x128xf32> to vector<4x8x128xf32>
    %56 = vector.shape_cast %55 : vector<4x8x128xf32> to vector<32x128xf32>
    %c0_26 = arith.constant 0 : index
    %c0_27 = arith.constant 0 : index
    %57 = vector.load %arg9[%c0_26, %c0_27] : memref<128x256xf32, #tpu.memory_space<vmem>>, vector<128x256xf32>
    %cst_28 = arith.constant dense<0.000000e+00> : vector<32x256xf32>
    %58 = tpu.matmul %56, %57, %cst_28 {dimension_numbers = #tpu.dot_dimension_numbers<[1], [0], [0], [1], [0, 0, 1, 1], [], []>} : vector<32x128xf32>, vector<128x256xf32>, vector<32x256xf32> -> vector<32x256xf32>
    %c0_29 = arith.constant 0 : index
    %c0_30 = arith.constant 0 : index
    %59 = vector.load %arg10[%c0_29, %c0_30] : memref<1x256xf32, #tpu.memory_space<vmem>>, vector<1x256xf32>
    %60 = vector.broadcast %59 : vector<1x256xf32> to vector<32x256xf32>
    %61 = arith.addf %58, %60 : vector<32x256xf32>
    %62 = vector.extract_strided_slice %61 {offsets = [0, 0], sizes = [32, 128], strides = [1, 1]} : vector<32x256xf32> to vector<32x128xf32>
    %63 = vector.shape_cast %62 : vector<32x128xf32> to vector<4x8x128xf32>
    %64 = vector.extract_strided_slice %61 {offsets = [0, 128], sizes = [32, 128], strides = [1, 1]} : vector<32x256xf32> to vector<32x128xf32>
    %65 = vector.shape_cast %64 : vector<32x128xf32> to vector<4x8x128xf32>
    %66 = vector.shape_cast %65 : vector<4x8x128xf32> to vector<4x8x1x128xf32>
    %67 = vector.shape_cast %63 : vector<4x8x128xf32> to vector<4x1x8x128xf32>
    %68 = vector.broadcast %66 : vector<4x8x1x128xf32> to vector<4x8x8x128xf32>
    %69 = vector.broadcast %67 : vector<4x1x8x128xf32> to vector<4x8x8x128xf32>
    %70 = arith.addf %68, %69 : vector<4x8x8x128xf32>
    %cst_31 = arith.constant 0.000000e+00 : f32
    %71 = vector.broadcast %cst_31 : f32 to vector<4x8x8x128xf32>
    %72 = arith.cmpf oge, %70, %71 : vector<4x8x8x128xf32>
    %cst_32 = arith.constant 2.000000e-01 : f32
    %73 = vector.broadcast %cst_32 : f32 to vector<4x8x8x128xf32>
    %74 = arith.mulf %73, %70 : vector<4x8x8x128xf32>
    %75 = arith.select %72, %70, %74 : vector<4x8x8x128xi1>, vector<4x8x8x128xf32>
    %c0_33 = arith.constant 0 : index
    %c0_34 = arith.constant 0 : index
    %76 = vector.load %arg11[%c0_33, %c0_34] : memref<1x128xf32, #tpu.memory_space<vmem>>, vector<1x128xf32>
    %77 = vector.shape_cast %76 : vector<1x128xf32> to vector<1x1x1x128xf32>
    %78 = vector.broadcast %77 : vector<1x1x1x128xf32> to vector<4x8x8x128xf32>
    %79 = arith.mulf %75, %78 : vector<4x8x8x128xf32>
    %80 = vector.shape_cast %79 : vector<4x8x8x128xf32> to vector<256x128xf32>
    %81 = arith.truncf %80 : vector<256x128xf32> to vector<256x128xbf16>
    %c0_35 = arith.constant 0 : index
    %c0_36 = arith.constant 0 : index
    %82 = vector.load %arg12[%c0_35, %c0_36] : memref<128x128xbf16, #tpu.memory_space<vmem>>, vector<128x128xbf16>
    %cst_37 = arith.constant dense<0.000000e+00> : vector<256x128xf32>
    %83 = tpu.matmul %81, %82, %cst_37 {dimension_numbers = #tpu.dot_dimension_numbers<[1], [0], [0], [1], [0, 0, 1, 1], [], []>} : vector<256x128xbf16>, vector<128x128xbf16>, vector<256x128xf32> -> vector<256x128xf32>
    %84 = vector.shape_cast %83 : vector<256x128xf32> to vector<4x8x8x128xf32>
    %85 = arith.addf %84, %3 : vector<4x8x8x128xf32>
    %cst_38 = arith.constant dense<0xFF800000> : vector<4x8x128xf32>
    %86 = vector.multi_reduction <maximumf>, %85, %cst_38 [2] : vector<4x8x8x128xf32> to vector<4x8x128xf32>
    %87 = vector.shape_cast %86 : vector<4x8x128xf32> to vector<4x8x1x128xf32>
    %88 = vector.broadcast %87 : vector<4x8x1x128xf32> to vector<4x8x8x128xf32>
    %89 = arith.subf %85, %88 : vector<4x8x8x128xf32>
    %90 = math.exp %89 : vector<4x8x8x128xf32>
    %cst_39 = arith.constant 0.000000e+00 : f32
    %91 = vector.broadcast %cst_39 : f32 to vector<4x8x8x128xf32>
    %92 = arith.select %5, %91, %90 : vector<4x8x8x128xi1>, vector<4x8x8x128xf32>
    %cst_40 = arith.constant dense<0.000000e+00> : vector<4x8x128xf32>
    %93 = vector.multi_reduction <add>, %92, %cst_40 [2] : vector<4x8x8x128xf32> to vector<4x8x128xf32>
    %94 = vector.shape_cast %93 : vector<4x8x128xf32> to vector<4x8x1x128xf32>
    %cst_41 = arith.constant 0.000000e+00 : f32
    %95 = vector.broadcast %cst_41 : f32 to vector<4x8x1x128xf32>
    %96 = arith.cmpf ogt, %94, %95 : vector<4x8x1x128xf32>
    %cst_42 = arith.constant 1.000000e+00 : f32
    %97 = vector.broadcast %cst_42 : f32 to vector<4x8x1x128xf32>
    %98 = arith.select %96, %94, %97 : vector<4x8x1x128xi1>, vector<4x8x1x128xf32>
    %99 = tpu.reciprocal %98 {approx = true} : vector<4x8x1x128xf32> -> vector<4x8x1x128xf32>
    %100 = vector.broadcast %99 : vector<4x8x1x128xf32> to vector<4x8x8x128xf32>
    %101 = arith.mulf %92, %100 : vector<4x8x8x128xf32>
    %102 = vector.shape_cast %63 : vector<4x8x128xf32> to vector<4x1x8x128xf32>
    %103 = vector.broadcast %102 : vector<4x1x8x128xf32> to vector<4x8x8x128xf32>
    %104 = arith.mulf %101, %103 : vector<4x8x8x128xf32>
    %cst_43 = arith.constant dense<0.000000e+00> : vector<4x8x128xf32>
    %105 = vector.multi_reduction <add>, %104, %cst_43 [2] : vector<4x8x8x128xf32> to vector<4x8x128xf32>
    %106 = vector.shape_cast %105 : vector<4x8x128xf32> to vector<32x128xf32>
    %c0_44 = arith.constant 0 : index
    %c0_45 = arith.constant 0 : index
    %107 = vector.load %arg13[%c0_44, %c0_45] : memref<128x256xf32, #tpu.memory_space<vmem>>, vector<128x256xf32>
    %cst_46 = arith.constant dense<0.000000e+00> : vector<32x256xf32>
    %108 = tpu.matmul %106, %107, %cst_46 {dimension_numbers = #tpu.dot_dimension_numbers<[1], [0], [0], [1], [0, 0, 1, 1], [], []>} : vector<32x128xf32>, vector<128x256xf32>, vector<32x256xf32> -> vector<32x256xf32>
    %c0_47 = arith.constant 0 : index
    %c0_48 = arith.constant 0 : index
    %109 = vector.load %arg14[%c0_47, %c0_48] : memref<1x256xf32, #tpu.memory_space<vmem>>, vector<1x256xf32>
    %110 = vector.broadcast %109 : vector<1x256xf32> to vector<32x256xf32>
    %111 = arith.addf %108, %110 : vector<32x256xf32>
    %112 = vector.extract_strided_slice %111 {offsets = [0, 0], sizes = [32, 128], strides = [1, 1]} : vector<32x256xf32> to vector<32x128xf32>
    %113 = vector.shape_cast %112 : vector<32x128xf32> to vector<4x8x128xf32>
    %114 = vector.extract_strided_slice %111 {offsets = [0, 128], sizes = [32, 128], strides = [1, 1]} : vector<32x256xf32> to vector<32x128xf32>
    %115 = vector.shape_cast %114 : vector<32x128xf32> to vector<4x8x128xf32>
    %116 = vector.shape_cast %115 : vector<4x8x128xf32> to vector<4x8x1x128xf32>
    %117 = vector.shape_cast %113 : vector<4x8x128xf32> to vector<4x1x8x128xf32>
    %118 = vector.broadcast %116 : vector<4x8x1x128xf32> to vector<4x8x8x128xf32>
    %119 = vector.broadcast %117 : vector<4x1x8x128xf32> to vector<4x8x8x128xf32>
    %120 = arith.addf %118, %119 : vector<4x8x8x128xf32>
    %cst_49 = arith.constant 0.000000e+00 : f32
    %121 = vector.broadcast %cst_49 : f32 to vector<4x8x8x128xf32>
    %122 = arith.cmpf oge, %120, %121 : vector<4x8x8x128xf32>
    %cst_50 = arith.constant 2.000000e-01 : f32
    %123 = vector.broadcast %cst_50 : f32 to vector<4x8x8x128xf32>
    %124 = arith.mulf %123, %120 : vector<4x8x8x128xf32>
    %125 = arith.select %122, %120, %124 : vector<4x8x8x128xi1>, vector<4x8x8x128xf32>
    %c0_51 = arith.constant 0 : index
    %c0_52 = arith.constant 0 : index
    %126 = vector.load %arg15[%c0_51, %c0_52] : memref<1x128xf32, #tpu.memory_space<vmem>>, vector<1x128xf32>
    %127 = vector.shape_cast %126 : vector<1x128xf32> to vector<1x1x1x128xf32>
    %128 = vector.broadcast %127 : vector<1x1x1x128xf32> to vector<4x8x8x128xf32>
    %129 = arith.mulf %125, %128 : vector<4x8x8x128xf32>
    %130 = vector.shape_cast %129 : vector<4x8x8x128xf32> to vector<256x128xf32>
    %131 = arith.truncf %130 : vector<256x128xf32> to vector<256x128xbf16>
    %c0_53 = arith.constant 0 : index
    %c0_54 = arith.constant 0 : index
    %132 = vector.load %arg16[%c0_53, %c0_54] : memref<128x128xbf16, #tpu.memory_space<vmem>>, vector<128x128xbf16>
    %cst_55 = arith.constant dense<0.000000e+00> : vector<256x128xf32>
    %133 = tpu.matmul %131, %132, %cst_55 {dimension_numbers = #tpu.dot_dimension_numbers<[1], [0], [0], [1], [0, 0, 1, 1], [], []>} : vector<256x128xbf16>, vector<128x128xbf16>, vector<256x128xf32> -> vector<256x128xf32>
    %134 = vector.shape_cast %133 : vector<256x128xf32> to vector<4x8x8x128xf32>
    %135 = arith.addf %134, %3 : vector<4x8x8x128xf32>
    %cst_56 = arith.constant dense<0xFF800000> : vector<4x8x128xf32>
    %136 = vector.multi_reduction <maximumf>, %135, %cst_56 [2] : vector<4x8x8x128xf32> to vector<4x8x128xf32>
    %137 = vector.shape_cast %136 : vector<4x8x128xf32> to vector<4x8x1x128xf32>
    %138 = vector.broadcast %137 : vector<4x8x1x128xf32> to vector<4x8x8x128xf32>
    %139 = arith.subf %135, %138 : vector<4x8x8x128xf32>
    %140 = math.exp %139 : vector<4x8x8x128xf32>
    %cst_57 = arith.constant 0.000000e+00 : f32
    %141 = vector.broadcast %cst_57 : f32 to vector<4x8x8x128xf32>
    %142 = arith.select %5, %141, %140 : vector<4x8x8x128xi1>, vector<4x8x8x128xf32>
    %cst_58 = arith.constant dense<0.000000e+00> : vector<4x8x128xf32>
    %143 = vector.multi_reduction <add>, %142, %cst_58 [2] : vector<4x8x8x128xf32> to vector<4x8x128xf32>
    %144 = vector.shape_cast %143 : vector<4x8x128xf32> to vector<4x8x1x128xf32>
    %cst_59 = arith.constant 0.000000e+00 : f32
    %145 = vector.broadcast %cst_59 : f32 to vector<4x8x1x128xf32>
    %146 = arith.cmpf ogt, %144, %145 : vector<4x8x1x128xf32>
    %cst_60 = arith.constant 1.000000e+00 : f32
    %147 = vector.broadcast %cst_60 : f32 to vector<4x8x1x128xf32>
    %148 = arith.select %146, %144, %147 : vector<4x8x1x128xi1>, vector<4x8x1x128xf32>
    %149 = tpu.reciprocal %148 {approx = true} : vector<4x8x1x128xf32> -> vector<4x8x1x128xf32>
    %150 = vector.broadcast %149 : vector<4x8x1x128xf32> to vector<4x8x8x128xf32>
    %151 = arith.mulf %142, %150 : vector<4x8x8x128xf32>
    %152 = vector.shape_cast %113 : vector<4x8x128xf32> to vector<4x1x8x128xf32>
    %153 = vector.broadcast %152 : vector<4x1x8x128xf32> to vector<4x8x8x128xf32>
    %154 = arith.mulf %151, %153 : vector<4x8x8x128xf32>
    %cst_61 = arith.constant dense<0.000000e+00> : vector<4x8x128xf32>
    %155 = vector.multi_reduction <add>, %154, %cst_61 [2] : vector<4x8x8x128xf32> to vector<4x8x128xf32>
    %c0_62 = arith.constant 0 : index
    %c0_63 = arith.constant 0 : index
    %c0_64 = arith.constant 0 : index
    %c0_65 = arith.constant 0 : index
    %156 = vector.load %arg3[%c0_62, %c0_63, %c0_64, %c0_65] : memref<1x4x8x128xf32, #tpu.memory_space<vmem>>, vector<1x4x8x128xf32>
    %157 = vector.shape_cast %156 : vector<1x4x8x128xf32> to vector<4x8x128xf32>
    %158 = arith.mulf %157, %155 : vector<4x8x128xf32>
    %cst_66 = arith.constant dense<0.000000e+00> : vector<4x128xf32>
    %159 = vector.multi_reduction <add>, %158, %cst_66 [1] : vector<4x8x128xf32> to vector<4x128xf32>
    %c0_67 = arith.constant 0 : index
    %c0_68 = arith.constant 0 : index
    %160 = vector.load %arg17[%c0_67, %c0_68] : memref<128x128xf32, #tpu.memory_space<vmem>>, vector<128x128xf32>
    %cst_69 = arith.constant dense<0.000000e+00> : vector<4x128xf32>
    %161 = tpu.matmul %159, %160, %cst_69 {dimension_numbers = #tpu.dot_dimension_numbers<[1], [0], [0], [1], [0, 0, 1, 1], [], []>} : vector<4x128xf32>, vector<128x128xf32>, vector<4x128xf32> -> vector<4x128xf32>
    %c0_70 = arith.constant 0 : index
    %c0_71 = arith.constant 0 : index
    %c0_72 = arith.constant 0 : index
    %162 = vector.load %arg4[%c0_70, %c0_71, %c0_72] : memref<1x4x128xf32, #tpu.memory_space<vmem>>, vector<1x4x128xf32>
    %163 = vector.shape_cast %162 : vector<1x4x128xf32> to vector<4x128xf32>
    %c0_73 = arith.constant 0 : index
    %c0_74 = arith.constant 0 : index
    %164 = vector.load %arg18[%c0_73, %c0_74] : memref<128x128xf32, #tpu.memory_space<vmem>>, vector<128x128xf32>
    %cst_75 = arith.constant dense<0.000000e+00> : vector<4x128xf32>
    %165 = tpu.matmul %163, %164, %cst_75 {dimension_numbers = #tpu.dot_dimension_numbers<[1], [0], [0], [1], [0, 0, 1, 1], [], []>} : vector<4x128xf32>, vector<128x128xf32>, vector<4x128xf32> -> vector<4x128xf32>
    %166 = arith.addf %161, %165 : vector<4x128xf32>
    %c0_76 = arith.constant 0 : index
    %c0_77 = arith.constant 0 : index
    %167 = vector.load %arg19[%c0_76, %c0_77] : memref<1x128xf32, #tpu.memory_space<vmem>>, vector<1x128xf32>
    %168 = vector.broadcast %167 : vector<1x128xf32> to vector<4x128xf32>
    %169 = arith.addf %166, %168 : vector<4x128xf32>
    %c0_78 = arith.constant 0 : index
    %c0_79 = arith.constant 0 : index
    %170 = vector.load %arg20[%c0_78, %c0_79] : memref<128x128xf32, #tpu.memory_space<vmem>>, vector<128x128xf32>
    %cst_80 = arith.constant dense<0.000000e+00> : vector<4x128xf32>
    %171 = tpu.matmul %169, %170, %cst_80 {dimension_numbers = #tpu.dot_dimension_numbers<[1], [0], [0], [1], [0, 0, 1, 1], [], []>} : vector<4x128xf32>, vector<128x128xf32>, vector<4x128xf32> -> vector<4x128xf32>
    %c0_81 = arith.constant 0 : index
    %c0_82 = arith.constant 0 : index
    %172 = vector.load %arg21[%c0_81, %c0_82] : memref<1x128xf32, #tpu.memory_space<vmem>>, vector<1x128xf32>
    %173 = vector.broadcast %172 : vector<1x128xf32> to vector<4x128xf32>
    %174 = arith.addf %171, %173 : vector<4x128xf32>
    %cst_83 = arith.constant 0.000000e+00 : f32
    %175 = vector.broadcast %cst_83 : f32 to vector<4x128xf32>
    %176 = arith.maximumf %174, %175 : vector<4x128xf32>
    %c0_84 = arith.constant 0 : index
    %c0_85 = arith.constant 0 : index
    %177 = vector.load %arg22[%c0_84, %c0_85] : memref<128x128xf32, #tpu.memory_space<vmem>>, vector<128x128xf32>
    %cst_86 = arith.constant dense<0.000000e+00> : vector<4x128xf32>
    %178 = tpu.matmul %176, %177, %cst_86 {dimension_numbers = #tpu.dot_dimension_numbers<[1], [0], [0], [1], [0, 0, 1, 1], [], []>} : vector<4x128xf32>, vector<128x128xf32>, vector<4x128xf32> -> vector<4x128xf32>
    %c0_87 = arith.constant 0 : index
    %c0_88 = arith.constant 0 : index
    %179 = vector.load %arg23[%c0_87, %c0_88] : memref<1x128xf32, #tpu.memory_space<vmem>>, vector<1x128xf32>
    %180 = vector.broadcast %179 : vector<1x128xf32> to vector<4x128xf32>
    %181 = arith.addf %178, %180 : vector<4x128xf32>
    %c0_89 = arith.constant 0 : index
    %c0_90 = arith.constant 0 : index
    %c0_91 = arith.constant 0 : index
    %182 = vector.load %arg24[%c0_89, %c0_90, %c0_91] : memref<1x4x128xf32, #tpu.memory_space<vmem>>, vector<1x4x128xf32>
    %183 = vector.shape_cast %182 : vector<1x4x128xf32> to vector<4x128xf32>
    %184 = vector.shape_cast %181 : vector<4x128xf32> to vector<1x4x128xf32>
    tpu.vector_store %arg24[%c0_89, %c0_90, %c0_91], %184 {strides = array<i32>} : memref<1x4x128xf32, #tpu.memory_space<vmem>>, vector<1x4x128xf32>,
    return
  }
  func.func @transform_0(%arg0: i32) -> (i32, i32, i32, i32) {
    %c0_i32 = arith.constant 0 : i32
    %c0_i32_0 = arith.constant 0 : i32
    %c0_i32_1 = arith.constant 0 : i32
    %c0_i32_2 = arith.constant 0 : i32
    return %arg0, %c0_i32, %c0_i32_0, %c0_i32_1 : i32, i32, i32, i32
  }
  func.func @transform_1(%arg0: i32) -> (i32, i32, i32, i32, i32) {
    %c0_i32 = arith.constant 0 : i32
    %c0_i32_0 = arith.constant 0 : i32
    %c0_i32_1 = arith.constant 0 : i32
    %c0_i32_2 = arith.constant 0 : i32
    %c0_i32_3 = arith.constant 0 : i32
    return %arg0, %c0_i32, %c0_i32_0, %c0_i32_1, %c0_i32_2 : i32, i32, i32, i32, i32
  }
  func.func @transform_2(%arg0: i32) -> (i32, i32, i32, i32) {
    %c0_i32 = arith.constant 0 : i32
    %c0_i32_0 = arith.constant 0 : i32
    %c0_i32_1 = arith.constant 0 : i32
    %c0_i32_2 = arith.constant 0 : i32
    return %arg0, %c0_i32, %c0_i32_0, %c0_i32_1 : i32, i32, i32, i32
  }
  func.func @transform_3(%arg0: i32) -> (i32, i32, i32) {
    %c0_i32 = arith.constant 0 : i32
    %c0_i32_0 = arith.constant 0 : i32
    %c0_i32_1 = arith.constant 0 : i32
    return %arg0, %c0_i32, %c0_i32_0 : i32, i32, i32
  }
  func.func @transform_4(%arg0: i32) -> (i32, i32) {
    %c0_i32 = arith.constant 0 : i32
    %c0_i32_0 = arith.constant 0 : i32
    %c0_i32_1 = arith.constant 0 : i32
    return %c0_i32, %c0_i32_0 : i32, i32
  }
  func.func @transform_5(%arg0: i32) -> (i32, i32) {
    %c0_i32 = arith.constant 0 : i32
    %c0_i32_0 = arith.constant 0 : i32
    %c0_i32_1 = arith.constant 0 : i32
    return %c0_i32, %c0_i32_0 : i32, i32
  }
  func.func @transform_6(%arg0: i32) -> (i32, i32) {
    %c0_i32 = arith.constant 0 : i32
    %c0_i32_0 = arith.constant 0 : i32
    %c0_i32_1 = arith.constant 0 : i32
    return %c0_i32, %c0_i32_0 : i32, i32
  }
  func.func @transform_7(%arg0: i32) -> (i32, i32) {
    %c0_i32 = arith.constant 0 : i32
    %c0_i32_0 = arith.constant 0 : i32
    %c0_i32_1 = arith.constant 0 : i32
    return %c0_i32, %c0_i32_0 : i32, i32
  }
  func.func @transform_8(%arg0: i32) -> (i32, i32) {
    %c0_i32 = arith.constant 0 : i32
    %c0_i32_0 = arith.constant 0 : i32
    %c0_i32_1 = arith.constant 0 : i32
    return %c0_i32, %c0_i32_0 : i32, i32
  }
  func.func @transform_9(%arg0: i32) -> (i32, i32) {
    %c0_i32 = arith.constant 0 : i32
    %c0_i32_0 = arith.constant 0 : i32
    %c0_i32_1 = arith.constant 0 : i32
    return %c0_i32, %c0_i32_0 : i32, i32
  }
  func.func @transform_10(%arg0: i32) -> (i32, i32) {
    %c0_i32 = arith.constant 0 : i32
    %c0_i32_0 = arith.constant 0 : i32
    %c0_i32_1 = arith.constant 0 : i32
    return %c0_i32, %c0_i32_0 : i32, i32
  }
  func.func @transform_11(%arg0: i32) -> (i32, i32) {
    %c0_i32 = arith.constant 0 : i32
    %c0_i32_0 = arith.constant 0 : i32
    %c0_i32_1 = arith.constant 0 : i32
    return %c0_i32, %c0_i32_0 : i32, i32
  }
  func.func @transform_12(%arg0: i32) -> (i32, i32) {
    %c0_i32 = arith.constant 0 : i32
    %c0_i32_0 = arith.constant 0 : i32
    %c0_i32_1 = arith.constant 0 : i32
    return %c0_i32, %c0_i32_0 : i32, i32
  }
  func.func @transform_13(%arg0: i32) -> (i32, i32) {
    %c0_i32 = arith.constant 0 : i32
    %c0_i32_0 = arith.constant 0 : i32
    %c0_i32_1 = arith.constant 0 : i32
    return %c0_i32, %c0_i32_0 : i32, i32
  }
  func.func @transform_14(%arg0: i32) -> (i32, i32) {
    %c0_i32 = arith.constant 0 : i32
    %c0_i32_0 = arith.constant 0 : i32
    %c0_i32_1 = arith.constant 0 : i32
    return %c0_i32, %c0_i32_0 : i32, i32
  }
  func.func @transform_15(%arg0: i32) -> (i32, i32) {
    %c0_i32 = arith.constant 0 : i32
    %c0_i32_0 = arith.constant 0 : i32
    %c0_i32_1 = arith.constant 0 : i32
    return %c0_i32, %c0_i32_0 : i32, i32
  }
  func.func @transform_16(%arg0: i32) -> (i32, i32) {
    %c0_i32 = arith.constant 0 : i32
    %c0_i32_0 = arith.constant 0 : i32
    %c0_i32_1 = arith.constant 0 : i32
    return %c0_i32, %c0_i32_0 : i32, i32
  }
  func.func @transform_17(%arg0: i32) -> (i32, i32) {
    %c0_i32 = arith.constant 0 : i32
    %c0_i32_0 = arith.constant 0 : i32
    %c0_i32_1 = arith.constant 0 : i32
    return %c0_i32, %c0_i32_0 : i32, i32
  }
  func.func @transform_18(%arg0: i32) -> (i32, i32) {
    %c0_i32 = arith.constant 0 : i32
    %c0_i32_0 = arith.constant 0 : i32
    %c0_i32_1 = arith.constant 0 : i32
    return %c0_i32, %c0_i32_0 : i32, i32
  }
  func.func @transform_19(%arg0: i32) -> (i32, i32) {
    %c0_i32 = arith.constant 0 : i32
    %c0_i32_0 = arith.constant 0 : i32
    %c0_i32_1 = arith.constant 0 : i32
    return %c0_i32, %c0_i32_0 : i32, i32
  }
  func.func @transform_20(%arg0: i32) -> (i32, i32) {
    %c0_i32 = arith.constant 0 : i32
    %c0_i32_0 = arith.constant 0 : i32
    %c0_i32_1 = arith.constant 0 : i32
    return %c0_i32, %c0_i32_0 : i32, i32
  }
  func.func @transform_21(%arg0: i32) -> (i32, i32) {
    %c0_i32 = arith.constant 0 : i32
    %c0_i32_0 = arith.constant 0 : i32
    %c0_i32_1 = arith.constant 0 : i32
    return %c0_i32, %c0_i32_0 : i32, i32
  }
  func.func @transform_22(%arg0: i32) -> (i32, i32) {
    %c0_i32 = arith.constant 0 : i32
    %c0_i32_0 = arith.constant 0 : i32
    %c0_i32_1 = arith.constant 0 : i32
    return %c0_i32, %c0_i32_0 : i32, i32
  }
  func.func @transform_23(%arg0: i32) -> (i32, i32, i32) {
    %c0_i32 = arith.constant 0 : i32
    %c0_i32_0 = arith.constant 0 : i32
    %c0_i32_1 = arith.constant 0 : i32
    return %arg0, %c0_i32, %c0_i32_0 : i32, i32, i32
  }
}

</mosaic_0001>

<bundles_post_ra>
// kernel: tpu_custom_call.1
= control target key start
LH: loop header
LB: loop body
LE: loop exit
PB: predicated region body
PF: predicated region fallthrough
CT: control target
= control target key end

     0   :  { %s12587_s0 = inlined_call_operand.hbm [shape: f32[2,4,8,128], index: 0, kind: input, shape index: {}]   ;;  %s12588_s1 = inlined_call_operand.hbm [shape: f32[2,4,8,8,128], index: 1, kind: input, shape index: {}]   ;;  %s12589_s2 = inlined_call_operand.hbm [shape: f32[2,4,8,128], index: 2, kind: input, shape index: {}]   ;;  %s12590_s3 = inlined_call_operand.vmem [shape: f32[2,4,128], index: 3, kind: input, shape index: {}]   ;;  %s12591_s4 = inlined_call_operand.hbm [shape: f32[128,256], index: 4, kind: input, shape index: {}]   ;;  %s12592_s5 = inlined_call_operand.vmem [shape: f32[1,256], index: 5, kind: input, shape index: {}]   ;;  %s12593_s6 = inlined_call_operand.vmem [shape: f32[1,128], index: 6, kind: input, shape index: {}]   ;;  %s12594_s7 = inlined_call_operand.hbm [shape: bf16[128,128], index: 7, kind: input, shape index: {}]   ;;  %s12595_s8 = inlined_call_operand.hbm [shape: f32[128,256], index: 8, kind: input, shape index: {}]   ;;  %s12596_s9 = inlined_call_operand.vmem [shape: f32[1,256], index: 9, kind: input, shape index: {}]   ;;  %s12597_s10 = inlined_call_operand.vmem [shape: f32[1,128], index: 10, kind: input, shape index: {}]   ;;  %s12598_s11 = inlined_call_operand.hbm [shape: bf16[128,128], index: 11, kind: input, shape index: {}]   ;;  %s12599_s12 = inlined_call_operand.hbm [shape: f32[128,256], index: 12, kind: input, shape index: {}]   ;;  %s12600_s13 = inlined_call_operand.vmem [shape: f32[1,256], index: 13, kind: input, shape index: {}]   ;;  %s12601_s14 = inlined_call_operand.vmem [shape: f32[1,128], index: 14, kind: input, shape index: {}]   ;;  %s12602_s15 = inlined_call_operand.hbm [shape: bf16[128,128], index: 15, kind: input, shape index: {}]   ;;  %s12603_s16 = inlined_call_operand.hbm [shape: f32[128,128], index: 16, kind: input, shape index: {}]   ;;  %s12604_s17 = inlined_call_operand.hbm [shape: f32[128,128], index: 17, kind: input, shape index: {}]   ;;  %s12605_s18 = inlined_call_operand.vmem [shape: f32[1,128], index: 18, kind: input, shape index: {}]   ;;  %s12606_s19 = inlined_call_operand.hbm [shape: f32[128,128], index: 19, kind: input, shape index: {}]   ;;  %s12607_s20 = inlined_call_operand.vmem [shape: f32[1,128], index: 20, kind: input, shape index: {}]   ;;  %s12608_s21 = inlined_call_operand.hbm [shape: f32[128,128], index: 21, kind: input, shape index: {}]   ;;  %s12609_s22 = inlined_call_operand.vmem [shape: f32[1,128], index: 22, kind: input, shape index: {}]   ;;  %s12610_s23 = inlined_call_operand.hbm [shape: f32[2,4,128], index: 23, kind: output, shape index: {}]  }
   0x1   :  { %12752 = sst [smem:[#allocation75_spill]] %s12587_s0 }
   0x2   :  { %12753 = sst [smem:[#allocation76_spill]] %s12588_s1 }
   0x3   :  { %12754 = sst [smem:[#allocation77_spill]] %s12589_s2 }
   0x4   :  { %12755 = sst [smem:[#allocation78_spill]] %s12590_s3 }
   0x5   :  { %12756 = sst [smem:[#allocation79_spill]] %s12591_s4 }
   0x6   :  { %12757 = sst [smem:[#allocation80_spill]] %s12592_s5 }
   0x7   :  { %12758 = sst [smem:[#allocation81_spill]] %s12593_s6 }
   0x8   :  { %12759 = sst [smem:[#allocation82_spill]] %s12594_s7 }
   0x9   :  { %12760 = sst [smem:[#allocation83_spill]] %s12595_s8 }
   0xa   :  { %12761 = sst [smem:[#allocation84_spill]] %s12596_s9 }
   0xb   :  { %12762 = sst [smem:[#allocation85_spill]] %s12597_s10 }
   0xc   :  { %12763 = sst [smem:[#allocation86_spill]] %s12599_s12 }
   0xd   :  { %12764 = sst [smem:[#allocation87_spill]] %s12600_s13 }
   0xe   :  { %12765 = sst [smem:[#allocation88_spill]] %s12601_s14 }
   0xf   :  { %12766 = sst [smem:[#allocation89_spill]] %s12603_s16 }
  0x10   :  { %12767 = sst [smem:[#allocation90_spill]] %s12605_s18 }
  0x11   :  { %12768 = sst [smem:[#allocation91_spill]] %s12606_s19 }
  0x12   :  { %12769 = sst [smem:[#allocation92_spill]] %s12607_s20 }
  0x13   :  { %12770 = sst [smem:[#allocation93_spill]] %s12609_s22 }
  0x14   :  { %12771 = sst [smem:[#allocation94_spill]] %s12610_s23 }
  0x15   :  { %28 = vsyncpa [#allocation3], 0 }
  0x16   :  { %30 = vsyncpa [#allocation3 + $0x1], 0 }
  0x17   :  { %31 = vsyncpa [#allocation6], 0 }
  0x18   :  { %33 = vsyncpa [#allocation6 + $0x1], 0 }
  0x19   :  { %34 = vsyncpa [#allocation9], 0 }
  0x1a   :  { %35 = vsyncpa [#allocation12], 0 }
  0x1b   :  { %36 = vsyncpa [#allocation15], 0 }
  0x1c   :  { %37 = vsyncpa [#allocation18], 0 }
  0x1d   :  { %38 = vsyncpa [#allocation21], 0 }
  0x1e   :  { %39 = vsyncpa [#allocation4], 0 }
  0x1f   :  { %41 = vsyncpa [#allocation4 + $0x1], 0  ;;  %s9206_s4 = smov 0   ;;  %s9208_s30 = smov 0  }
  0x20   :  { %s9210_s24 = smov 0   ;;  %s9212_s25 = smov 0  }
  0x21 LB: > { %12772 = sst [smem:[#allocation32_spill]] %s9048_s4  ;;  %s9062_s5 = smov [#allocation8]   ;;  %s9060_s25 = sphi %s9212_s25, %s13058_s25   ;;  %s9056_s24 = sphi %s9210_s24, %s13060_s24   ;;  %s9052_s30 = sphi %s9208_s30, %s13062_s30   ;;  %s9048_s4 = sphi %s9206_s4, %s13061_s4  }
  0x22   : > { %12773 = sst [smem:[#allocation33_spill]] %s9056_s24  ;;  %s593_s1 = sshll.u32 %s9062_s5, 4  ;;  %s9232_s1 = int_to_ptr.vmem [resolvable:$true] %s593_s1 }
  0x23   : > { %s9227_s26 = sadd.s32 4294967295, %s9060_s25   ;;  %p7271_p0 = scmp.ge.s32.totalorder %s9060_s25, 1 }
  0x24   : > { %12774 = sst [smem:[#allocation34_spill]] %s9227_s26  ;;  %p12617_p1 = scmp.eq.s32.totalorder %s9227_s26, 0 }
  0x25   : > { %p581_p2 = scmp.lt.s32.totalorder %s9060_s25, 3  ;;  %s9063_s6 = smov [#allocation11]  }
  0x26   : > { %s625_s27 = sshll.u32 %s9063_s6, 4  ;;  %s9064_s28 = smov [#allocation14]   ;;  %s9247_s27 = int_to_ptr.vmem [resolvable:$true] %s625_s27 }
  0x27   : > { %p9234_p3 = pnand %p7271_p0, %p581_p2  ;;  %s657_s29 = sshll.u32 %s9064_s28, 4  ;;  %s9249_s29 = int_to_ptr.vmem [resolvable:$true] %s657_s29 }
  0x28   : > { %s12777_s5 = sld [smem:[#allocation79_spill]] }
  0x29   : > { %s12775_s2 = scalar_select %p9234_p3, 1, 0 }
  0x2a   : > { %p8009_p5 = pneg %p9234_p3 }
  0x2c   : > { %p9243_p6 = pnand %p8009_p5, %p12617_p1 }
  0x2e   : > { %s12776_s7 = scalar_select %p9243_p6, 1, 0 }
  0x2f   : > { %s8600_s23 = scalar_lea.hbm %s12777_s5, 4096  ;;  %p9259_p8 = pneg %p9243_p6 }
  0x30   : > { %p8601_p7 = scmp.ne.s32.totalorder %s12777_s5, %s8600_s23  ;;  %p8607_p11 = scmp.lt.u32.totalorder %s8600_s23, %s12777_s5 }
  0x31   : > { %s12778_s6 = scalar_select %p9259_p8, 1, 0 }
  0x32   : > { %p8603_p9 = pnand %p9259_p8, %p8601_p7 }
  0x34   : > { %p8604_p10 = pneg %p8603_p9 }
  0x36   : > { %p8609_p12 = pnand %p8607_p11, %p8604_p10 }
  0x38   : > { %8612 = shalt.err (!%p8609_p12)
}
  0x39   : > { %s8613_s20 = scalar_lea.vmem %s9232_s1, 4096  ;;  %p8621_p5 = scmp.lt.s32.totalorder %s9232_s1, %s9232_s1 }
  0x3a   : > { %p8614_p13 = scmp.ne.s32.totalorder %s9232_s1, %s8613_s20  ;;  %p8622_p4 = scmp.lt.s32.totalorder %s8613_s20, %s8613_s20 }
  0x3c   : > { %p8616_p0 = pnand %p8614_p13, %p9259_p8  ;;  %p8623_p7 = por %p8622_p4, %p8621_p5 }
  0x3e   : > { %p8617_p2 = pneg %p8616_p0 }
  0x40   : > { %p8624_p9 = pnand %p8623_p7, %p8617_p2 }
  0x42   : > { %8627 = shalt.err (!%p8624_p9)
}
  0x43   : > { %s9065_s22 = smov 256   ;;  %s9066_s18 = smov 16  }
  0x44   : > { %8012 = dma.hbm_to_vmem [thread:$0]  (!%p9243_p6), %s12777_s5, 4096, %s9232_s1, [#allocation9], %s9065_s22, %s9065_s22, %s9066_s18  }
  0x45   : > { %s12779_s8 = sld [smem:[#allocation83_spill]] }
  0x4b   : > { %s8628_s20 = scalar_lea.hbm %s12779_s8, 4096 }
  0x4c   : > { %p8629_p4 = scmp.ne.s32.totalorder %s12779_s8, %s8628_s20  ;;  %p8635_p12 = scmp.lt.u32.totalorder %s8628_s20, %s12779_s8 }
  0x4e   : > { %p8631_p10 = pnand %p8629_p4, %p9259_p8 }
  0x50   : > { %p8632_p11 = pneg %p8631_p10 }
  0x52   : > { %p8637_p13 = pnand %p8635_p12, %p8632_p11 }
  0x54   : > { %8640 = shalt.err (!%p8637_p13)
}
  0x55   : > { %s8641_s1 = scalar_lea.vmem %s9247_s27, 4096  ;;  %p8649_p7 = scmp.lt.s32.totalorder %s9247_s27, %s9247_s27 }
  0x56   : > { %p8642_p0 = scmp.ne.s32.totalorder %s9247_s27, %s8641_s1  ;;  %p8650_p9 = scmp.lt.s32.totalorder %s8641_s1, %s8641_s1 }
  0x58   : > { %p8644_p2 = pnand %p8642_p0, %p9259_p8  ;;  %p8651_p4 = por %p8650_p9, %p8649_p7 }
  0x5a   : > { %p8645_p5 = pneg %p8644_p2 }
  0x5c   : > { %p8652_p10 = pnand %p8651_p4, %p8645_p5 }
  0x5e   : > { %8655 = shalt.err (!%p8652_p10)
}
  0x5f   : > { %8018 = dma.hbm_to_vmem [thread:$0]  (!%p9243_p6), %s12779_s8, 4096, %s9247_s27, [#allocation12], %s9065_s22, %s9065_s22, %s9066_s18  }
  0x60   : > { %s12780_s12 = sld [smem:[#allocation86_spill]] }
  0x66   : > { %s8656_s23 = scalar_lea.hbm %s12780_s12, 4096 }
  0x67   : > { %p8657_p11 = scmp.ne.s32.totalorder %s12780_s12, %s8656_s23  ;;  %p8663_p0 = scmp.lt.u32.totalorder %s8656_s23, %s12780_s12 }
  0x69   : > { %p8659_p12 = pnand %p8657_p11, %p9259_p8 }
  0x6b   : > { %p8660_p13 = pneg %p8659_p12 }
  0x6d   : > { %p8665_p2 = pnand %p8663_p0, %p8660_p13 }
  0x6f   : > { %8668 = shalt.err (!%p8665_p2)
}
  0x70   : > { %s8669_s27 = scalar_lea.vmem %s9249_s29, 4096  ;;  %p8677_p4 = scmp.lt.s32.totalorder %s9249_s29, %s9249_s29 }
  0x71   : > { %p8670_p5 = scmp.ne.s32.totalorder %s9249_s29, %s8669_s27  ;;  %p8678_p10 = scmp.lt.s32.totalorder %s8669_s27, %s8669_s27 }
  0x73   : > { %p8672_p7 = pnand %p8670_p5, %p9259_p8  ;;  %p8679_p11 = por %p8678_p10, %p8677_p4 }
  0x75   : > { %p8673_p9 = pneg %p8672_p7 }
  0x77   : > { %p8680_p12 = pnand %p8679_p11, %p8673_p9 }
  0x79   : > { %8683 = shalt.err (!%p8680_p12)
}
  0x7a   : > { %8024 = dma.hbm_to_vmem [thread:$0]  (!%p9243_p6), %s12780_s12, 4096, %s9249_s29, [#allocation15], %s9065_s22, %s9065_s22, %s9066_s18  }
  0x7b   : > { %s9067_s10 = smov [#allocation17]   ;;  %s12781_s16 = sld [smem:[#allocation89_spill]] }
  0x7c   : > { %s689_s13 = sshll.u32 %s9067_s10, 4  ;;  %s690_s13 = int_to_ptr.vmem [resolvable:$true] %s689_s13 }
  0x81   : > { %s8684_s3 = scalar_lea.hbm %s12781_s16, 2048 }
  0x82   : > { %p8685_p13 = scmp.ne.s32.totalorder %s12781_s16, %s8684_s3  ;;  %p8691_p5 = scmp.lt.u32.totalorder %s8684_s3, %s12781_s16 }
  0x84   : > { %p8687_p0 = pnand %p8685_p13, %p9259_p8 }
  0x86   : > { %p8688_p2 = pneg %p8687_p0 }
  0x88   : > { %p8693_p7 = pnand %p8691_p5, %p8688_p2 }
  0x8a   : > { %8696 = shalt.err (!%p8693_p7)
}
  0x8b   : > { %s8697_s29 = scalar_lea.vmem %s690_s13, 2048  ;;  %p8705_p11 = scmp.lt.s32.totalorder %s690_s13, %s690_s13 }
  0x8c   : > { %p8698_p9 = scmp.ne.s32.totalorder %s690_s13, %s8697_s29  ;;  %p8706_p12 = scmp.lt.s32.totalorder %s8697_s29, %s8697_s29 }
  0x8e   : > { %p8700_p4 = pnand %p8698_p9, %p9259_p8  ;;  %p8707_p1 = por %p8706_p12, %p8705_p11 }
  0x90   : > { %p8701_p10 = pneg %p8700_p4 }
  0x92   : > { %p8708_p3 = pnand %p8707_p1, %p8701_p10 }
  0x94   : > { %8711 = shalt.err (!%p8708_p3)
}
  0x95   : > { %s12619_s22 = smov 128   ;;  %s12621_s18 = smov 8  }
  0x96   : > { %8030 = dma.hbm_to_vmem [thread:$0]  (!%p9243_p6), %s12781_s16, 2048, %s690_s13, [#allocation18], %s12619_s22, %s12619_s22, %s12621_s18  }
  0x97   : > { %s9070_s10 = smov [#allocation20]   ;;  %s12782_s19 = sld [smem:[#allocation91_spill]] }
  0x98   : > { %s718_s14 = sshll.u32 %s9070_s10, 4  ;;  %s719_s14 = int_to_ptr.vmem [resolvable:$true] %s718_s14 }
  0x9d   : > { %s8712_s0 = scalar_lea.hbm %s12782_s19, 2048 }
  0x9e   : > { %p8713_p1 = scmp.ne.s32.totalorder %s12782_s19, %s8712_s0  ;;  %p8719_p0 = scmp.lt.u32.totalorder %s8712_s0, %s12782_s19 }
  0xa0   : > { %p8715_p3 = pnand %p8713_p1, %p9259_p8 }
  0xa2   : > { %p8716_p13 = pneg %p8715_p3 }
  0xa4   : > { %p8721_p2 = pnand %p8719_p0, %p8716_p13 }
  0xa6   : > { %8724 = shalt.err (!%p8721_p2)
}
  0xa7   : > { %s8725_s13 = scalar_lea.vmem %s719_s14, 2048  ;;  %p8733_p4 = scmp.lt.s32.totalorder %s719_s14, %s719_s14 }
  0xa8   : > { %p8726_p5 = scmp.ne.s32.totalorder %s719_s14, %s8725_s13  ;;  %p8734_p10 = scmp.lt.s32.totalorder %s8725_s13, %s8725_s13 }
  0xaa   : > { %p8728_p7 = pnand %p8726_p5, %p9259_p8  ;;  %p8735_p11 = por %p8734_p10, %p8733_p4 }
  0xac   : > { %p8729_p9 = pneg %p8728_p7 }
  0xae   : > { %p8736_p12 = pnand %p8735_p11, %p8729_p9 }
  0xb0   : > { %8739 = shalt.err (!%p8736_p12)
}
  0xb1   : > { %8036 = dma.hbm_to_vmem [thread:$0]  (!%p9243_p6), %s12782_s19, 2048, %s719_s14, [#allocation21], %s12619_s22, %s12619_s22, %s12621_s18  }
  0xb2   : > { %s7270_s10 = sadd.s32 4294967294, %s9060_s25   ;;  %s9379_s23 = sadd.s32 1, %s9060_s25  }
  0xb3   : > { %12783 = sst [smem:[#allocation35_spill]] %s9379_s23  ;;  %s54_s3 = sadd.s32 1, %s9056_s24 }
  0xb4   : > { %s51_s0 = ssub.s32 %s9060_s25, %s9379_s23  ;;  %p61_p1 = scmp.ne.s32.totalorder %s9056_s24, %s9052_s30 }
  0xb5   : > { %p52_p3 = scmp.eq.s32.totalorder %s51_s0, 0  ;;  %p62_p13 = scmp.eq.s32.totalorder %s9060_s25, 0 }
  0xb6   : > { %p67_p0 = scmp.ne.s32.totalorder %s9052_s30, %s9048_s4  ;;  %p568_p2 = scmp.eq.s32.totalorder %s9227_s26, 1 }
  0xb7   : > { %s9391_s28 = scalar_select %p52_p3, %s9056_s24, %s54_s3  }
  0xb8   : > { %p63_p5 = por %p62_p13, %p61_p1  ;;  %p12785_p7 = scmp.eq.s32.totalorder %s9227_s26, 0 }
  0xb9   : > { %12784 = sst [smem:[#allocation36_spill]] %s9391_s28  ;;  %p9399_p4 = por %p568_p2, %p61_p1 }
  0xba   : > { %p9395_p9 = por %p12785_p7, %p67_p0  ;;  %p574_p10 = scmp.eq.s32.totalorder %s7270_s10, 1 }
  0xbb   : > { %s12787_s20 = scalar_select %p9399_p4, 1, 0 }
  0xbc   : > { %s12786_s14 = scalar_select %p9395_p9, 1, 0 }
  0xbd   : > { %12788 = sst [smem:[#allocation37_spill]] %s12787_s20  ;;  %p8064_p11 = scmp.lt.s32.totalorder %s9060_s25, 2 }
  0xbe   : > { %s9405_s27 = sand.u32 1, %s9056_s24   ;;  %p9407_p12 = por %p574_p10, %p67_p0 }
  0xbf   : > { %s772_s13 = sand.u32 1, %s9060_s25   ;;  %p9412_p3 = pnand %p8064_p11, %p63_p5 }
  0xc0   : > { %s12789_s29 = scalar_select %p9407_p12, 1, 0 }
  0xc1   : > { %s12791_s1 = scalar_select %p9412_p3, 1, 0 }
  0xc2   : > { %12790 = sst [smem:[#allocation38_spill]] %s12789_s29  ;;  %s7286_s9 = sshll.u32 %s9405_s27, 8 }
  0xc3   : > { %s7343_s3 = sshll.u32 %s9060_s25, 12  ;;  %s12792_s18 = sld [smem:[#allocation76_spill]] }
  0xc4   : > { %s776_s5 = scalar_lea.vmem [#allocation5], %s7286_s9  ;;  %s9425_s12 = scalar_lea.sflag [#allocation6], %s772_s13 }
  0xc5   : > { %s783_s8 = sshll.u32 %s776_s5, 4  ;;  %p9431_p13 = pneg %p9412_p3  ;;  %s9423_s8 = int_to_ptr.vmem [resolvable:$true] %s783_s8 }
  0xc7   : > { %s12793_s19 = scalar_select %p9431_p13, 1, 0 }
  0xc9   : > { %s9421_s10 = scalar_lea.hbm %s12792_s18, %s7343_s3  ;;  %s8745_s9 = scalar_lea.hbm %s12792_s18, 8192 }
  0xca   : > { %s8740_s16 = scalar_lea.hbm %s9421_s10, 4096  ;;  %p8746_p5 = scmp.lt.u32.totalorder %s9421_s10, %s12792_s18 }
  0xcb   : > { %p8741_p1 = scmp.ne.s32.totalorder %s9421_s10, %s8740_s16  ;;  %p8747_p7 = scmp.lt.u32.totalorder %s8745_s9, %s8740_s16 }
  0xcc   : > { %p8749_p11 = scmp.lt.u32.totalorder %s8740_s16, %s9421_s10 }
  0xcd   : > { %p8743_p0 = pnand %p9431_p13, %p8741_p1  ;;  %p8748_p10 = por %p8747_p7, %p8746_p5 }
  0xcf   : > { %p8744_p2 = pneg %p8743_p0  ;;  %p8750_p12 = por %p8749_p11, %p8748_p10 }
  0xd1   : > { %p8751_p4 = pnand %p8750_p12, %p8744_p2 }
  0xd3   : > { %8754 = shalt.err (!%p8751_p4)
}
  0xd4   : > { %s8755_s13 = scalar_lea.vmem %s9423_s8, 4096  ;;  %s9071_s22 = smov [#allocation5]  }
  0xd5   : > { %p8756_p1 = scmp.ne.s32.totalorder %s9423_s8, %s8755_s13  ;;  %s8760_s3 = sshll.u32 %s9071_s22, 4  ;;  %s8761_s3 = int_to_ptr.vmem [resolvable:$false] %s8760_s3 }
  0xd6   : > { %s8762_s5 = scalar_lea.vmem %s8761_s3, 8192  ;;  %p8763_p6 = scmp.lt.s32.totalorder %s9423_s8, %s8761_s3 }
  0xd7   : > { %p8758_p0 = pnand %p8756_p1, %p9431_p13  ;;  %p8764_p8 = scmp.lt.s32.totalorder %s8762_s5, %s8755_s13 }
  0xd9   : > { %p8759_p9 = pneg %p8758_p0  ;;  %p8765_p5 = por %p8764_p8, %p8763_p6 }
  0xdb   : > { %p8766_p7 = pnand %p8765_p5, %p8759_p9 }
  0xdd   : > { %8769 = shalt.err (!%p8766_p7)
}
  0xde   : > { %s12794_s16 = smov 8   ;;  %s12795_s9 = smov 128  }
  0xdf   : > { %8046 = dma.hbm_to_vmem [thread:$0]  (!%p9412_p3), %s9421_s10, 4096, %s9423_s8, %s9425_s12, %s12795_s9, %s12795_s9, %s12794_s16  }
  0xe0   : > { %s9072_s0 = smov [#allocation10]   ;;  %s12796_s3 = sld [smem:[#allocation82_spill]] }
  0xe1   : > { %s612_s18 = sshll.u32 %s9072_s0, 4  ;;  %p12797_p8 = scmp.ne.s32.totalorder %s12778_s6, 0  ;;  %s613_s18 = int_to_ptr.vmem [resolvable:$true] %s612_s18 }
  0xe6   : > { %s8770_s13 = scalar_lea.hbm %s12796_s3, 1024 }
  0xe7   : > { %p8771_p6 = scmp.ne.s32.totalorder %s12796_s3, %s8770_s13  ;;  %p8777_p12 = scmp.lt.u32.totalorder %s8770_s13, %s12796_s3 }
  0xe9   : > { %p8773_p9 = pnand %p8771_p6, %p12797_p8 }
  0xeb   : > { %p8774_p4 = pneg %p8773_p9 }
  0xed   : > { %p8779_p2 = pnand %p8777_p12, %p8774_p4 }
  0xef   : > { %8782 = shalt.err (!%p8779_p2)
}
  0xf0   : > { %s8783_s8 = scalar_lea.vmem %s613_s18, 1024  ;;  %p8791_p0 = scmp.lt.s32.totalorder %s613_s18, %s613_s18 }
  0xf1   : > { %p8784_p10 = scmp.ne.s32.totalorder %s613_s18, %s8783_s8  ;;  %p8792_p5 = scmp.lt.s32.totalorder %s8783_s8, %s8783_s8 }
  0xf3   : > { %p8786_p11 = pnand %p8784_p10, %p12797_p8  ;;  %p8793_p7 = por %p8792_p5, %p8791_p0 }
  0xf5   : > { %p8787_p1 = pneg %p8786_p11 }
  0xf7   : > { %p8794_p3 = pnand %p8793_p7, %p8787_p1 }
  0xf9   : > { %8797 = shalt.err (!%p8794_p3)
}
  0xfa   : > { %s9073_s24 = smov 64   ;;  %s9074_s28 = smov 4  }
  0xfb   : > { %p12798_p6 = scmp.ne.s32.totalorder %s12776_s7, 0  ;;  %s9075_s10 = smov [#allocation13]  }
  0xfc   : > { %s644_s0 = sshll.u32 %s9075_s10, 4  ;;  %s9076_s22 = smov [#allocation16]   ;;  %s645_s0 = int_to_ptr.vmem [resolvable:$true] %s644_s0 }
  0xfd   : > { %8015 = dma.hbm_to_vmem [thread:$0]  (!%p12798_p6), %s12796_s3, 1024, %s613_s18, [#allocation9], %s9073_s24, %s9073_s24, %s9074_s28  }
  0xfe   : > { %s676_s13 = sshll.u32 %s9076_s22, 4  ;;  %s8798_s4 = scalar_lea.hbm %s12598_s11, 1024  ;;  %s9479_s13 = int_to_ptr.vmem [resolvable:$true] %s676_s13 }
  0xff   : > { %p8799_p3 = scmp.ne.s32.totalorder %s12598_s11, %s8798_s4  ;;  %p8805_p12 = scmp.lt.u32.totalorder %s8798_s4, %s12598_s11 }
 0x101   : > { %p8801_p9 = pnand %p8799_p3, %p12797_p8 }
 0x103   : > { %p8802_p4 = pneg %p8801_p9 }
 0x105   : > { %p8807_p2 = pnand %p8805_p12, %p8802_p4 }
 0x107   : > { %8810 = shalt.err (!%p8807_p2)
}
 0x108   : > { %s8811_s29 = scalar_lea.vmem %s645_s0, 1024  ;;  %p8819_p0 = scmp.lt.s32.totalorder %s645_s0, %s645_s0 }
 0x109   : > { %p8812_p10 = scmp.ne.s32.totalorder %s645_s0, %s8811_s29  ;;  %p8820_p5 = scmp.lt.s32.totalorder %s8811_s29, %s8811_s29 }
 0x10b   : > { %p8814_p11 = pnand %p8812_p10, %p12797_p8  ;;  %p8821_p7 = por %p8820_p5, %p8819_p0 }
 0x10d   : > { %p8815_p1 = pneg %p8814_p11 }
 0x10f   : > { %p8822_p13 = pnand %p8821_p7, %p8815_p1 }
 0x111   : > { %8825 = shalt.err (!%p8822_p13)
}
 0x112   : > { %8021 = dma.hbm_to_vmem [thread:$0]  (!%p12798_p6), %s12598_s11, 1024, %s645_s0, [#allocation12], %s9073_s24, %s9073_s24, %s9074_s28  }
 0x113   : > { %s8826_s22 = scalar_lea.hbm %s12602_s15, 1024 }
 0x114   : > { %p8827_p3 = scmp.ne.s32.totalorder %s12602_s15, %s8826_s22  ;;  %p8833_p4 = scmp.lt.u32.totalorder %s8826_s22, %s12602_s15 }
 0x116   : > { %p8829_p13 = pnand %p8827_p3, %p12797_p8 }
 0x118   : > { %p8830_p9 = pneg %p8829_p13 }
 0x11a   : > { %p8835_p12 = pnand %p8833_p4, %p8830_p9 }
 0x11c   : > { %8838 = shalt.err (!%p8835_p12)
}
 0x11d   : > { %s8839_s0 = scalar_lea.vmem %s9479_s13, 1024  ;;  %p8847_p1 = scmp.lt.s32.totalorder %s9479_s13, %s9479_s13 }
 0x11e   : > { %p8840_p2 = scmp.ne.s32.totalorder %s9479_s13, %s8839_s0  ;;  %p8848_p0 = scmp.lt.s32.totalorder %s8839_s0, %s8839_s0 }
 0x120   : > { %p8842_p10 = pnand %p8840_p2, %p12797_p8  ;;  %p8849_p5 = por %p8848_p0, %p8847_p1 }
 0x122   : > { %p8843_p11 = pneg %p8842_p10 }
 0x124   : > { %p8850_p7 = pnand %p8849_p5, %p8843_p11 }
 0x126   : > { %8853 = shalt.err (!%p8850_p7)
}
 0x127   : > { %8027 = dma.hbm_to_vmem [thread:$0]  (!%p12798_p6), %s12602_s15, 1024, %s9479_s13, [#allocation15], %s9073_s24, %s9073_s24, %s9074_s28  }
 0x128   : > { %s9077_s4 = smov [#allocation19]   ;;  %s9078_s10 = smov [#allocation22]  }
 0x129   : > { %s702_s20 = sshll.u32 %s9077_s4, 4  ;;  %s734_s22 = sshll.u32 %s9078_s10, 4  ;;  %s703_s20 = int_to_ptr.vmem [resolvable:$true] %s702_s20  ;;  %s9528_s22 = int_to_ptr.vmem [resolvable:$true] %s734_s22 }
 0x12a   : > { %s8854_s23 = scalar_lea.hbm %s12604_s17, 2048 }
 0x12b   : > { %p8855_p3 = scmp.ne.s32.totalorder %s12604_s17, %s8854_s23  ;;  %p8861_p4 = scmp.lt.u32.totalorder %s8854_s23, %s12604_s17 }
 0x12d   : > { %p8857_p13 = pnand %p8855_p3, %p12797_p8 }
 0x12f   : > { %p8858_p9 = pneg %p8857_p13 }
 0x131   : > { %p8863_p12 = pnand %p8861_p4, %p8858_p9 }
 0x133   : > { %8866 = shalt.err (!%p8863_p12)
}
 0x134   : > { %s8867_s28 = scalar_lea.vmem %s703_s20, 2048  ;;  %p8875_p1 = scmp.lt.s32.totalorder %s703_s20, %s703_s20 }
 0x135   : > { %p8868_p2 = scmp.ne.s32.totalorder %s703_s20, %s8867_s28  ;;  %p8876_p0 = scmp.lt.s32.totalorder %s8867_s28, %s8867_s28 }
 0x137   : > { %p8870_p10 = pnand %p8868_p2, %p12797_p8  ;;  %p8877_p5 = por %p8876_p0, %p8875_p1 }
 0x139   : > { %p8871_p11 = pneg %p8870_p10 }
 0x13b   : > { %p8878_p7 = pnand %p8877_p5, %p8871_p11 }
 0x13d   : > { %8881 = shalt.err (!%p8878_p7)
}
 0x13e   : > { %8033 = dma.hbm_to_vmem [thread:$0]  (!%p12798_p6), %s12604_s17, 2048, %s703_s20, [#allocation18], %s12795_s9, %s12795_s9, %s12794_s16  }
 0x13f   : > { %s8882_s5 = scalar_lea.hbm %s12608_s21, 2048 }
 0x140   : > { %p8883_p3 = scmp.ne.s32.totalorder %s12608_s21, %s8882_s5  ;;  %p8889_p4 = scmp.lt.u32.totalorder %s8882_s5, %s12608_s21 }
 0x142   : > { %p8885_p13 = pnand %p8883_p3, %p12797_p8 }
 0x144   : > { %p8886_p9 = pneg %p8885_p13 }
 0x146   : > { %p8891_p12 = pnand %p8889_p4, %p8886_p9 }
 0x148   : > { %8894 = shalt.err (!%p8891_p12)
}
 0x149   : > { %s8895_s20 = scalar_lea.vmem %s9528_s22, 2048  ;;  %p8903_p1 = scmp.lt.s32.totalorder %s9528_s22, %s9528_s22 }
 0x14a   : > { %p8896_p2 = scmp.ne.s32.totalorder %s9528_s22, %s8895_s20  ;;  %p8904_p0 = scmp.lt.s32.totalorder %s8895_s20, %s8895_s20 }
 0x14c   : > { %p8898_p10 = pnand %p8896_p2, %p12797_p8  ;;  %p8905_p5 = por %p8904_p0, %p8903_p1 }
 0x14e   : > { %p8899_p11 = pneg %p8898_p10 }
 0x150   : > { %p8906_p7 = pnand %p8905_p5, %p8899_p11 }
 0x152   : > { %8909 = shalt.err (!%p8906_p7)
}
 0x153   : > { %8039 = dma.hbm_to_vmem [thread:$0]  (!%p12798_p6), %s12608_s21, 2048, %s9528_s22, [#allocation21], %s12795_s9, %s12795_s9, %s12794_s16  }
 0x154   : > { %s7283_s6 = sshll.u32 %s9405_s27, 5  ;;  %s7342_s28 = sshll.u32 %s9060_s25, 9 }
 0x155   : > { %s12799_s7 = sld [smem:[#allocation75_spill]]  ;;  %s755_s10 = scalar_lea.vmem [#allocation2], %s7283_s6 }
 0x156   : > { %s762_s5 = sshll.u32 %s755_s10, 4  ;;  %s752_s8 = scalar_lea.sflag [#allocation3], %s9405_s27  ;;  %s9588_s5 = int_to_ptr.vmem [resolvable:$true] %s762_s5 }
 0x157   : > { %p12800_p6 = scmp.ne.s32.totalorder %s12793_s19, 0 }
 0x15b   : > { %s9584_s4 = scalar_lea.hbm %s12799_s7, %s7342_s28  ;;  %s8915_s0 = scalar_lea.hbm %s12799_s7, 1024 }
 0x15c   : > { %s8910_s23 = scalar_lea.hbm %s9584_s4, 512  ;;  %p8916_p9 = scmp.lt.u32.totalorder %s9584_s4, %s12799_s7 }
 0x15d   : > { %p8911_p8 = scmp.ne.s32.totalorder %s9584_s4, %s8910_s23  ;;  %p8917_p4 = scmp.lt.u32.totalorder %s8915_s0, %s8910_s23 }
 0x15e   : > { %p8919_p2 = scmp.lt.u32.totalorder %s8910_s23, %s9584_s4 }
 0x15f   : > { %p8913_p3 = pnand %p8911_p8, %p12800_p6  ;;  %p8918_p12 = por %p8917_p4, %p8916_p9 }
 0x161   : > { %p8914_p13 = pneg %p8913_p3  ;;  %p8920_p10 = por %p8919_p2, %p8918_p12 }
 0x163   : > { %p8921_p11 = pnand %p8920_p10, %p8914_p13 }
 0x165   : > { %8924 = shalt.err (!%p8921_p11)
}
 0x166   : > { %s8925_s24 = scalar_lea.vmem %s9588_s5, 512  ;;  %s9079_s13 = smov [#allocation2]  }
 0x167   : > { %p8926_p1 = scmp.ne.s32.totalorder %s9588_s5, %s8925_s24  ;;  %s8930_s26 = sshll.u32 %s9079_s13, 4  ;;  %s8931_s26 = int_to_ptr.vmem [resolvable:$false] %s8930_s26 }
 0x168   : > { %s8932_s10 = scalar_lea.vmem %s8931_s26, 1024  ;;  %p8933_p7 = scmp.lt.s32.totalorder %s9588_s5, %s8931_s26 }
 0x169   : > { %p8928_p0 = pnand %p8926_p1, %p12800_p6  ;;  %p8934_p8 = scmp.lt.s32.totalorder %s8932_s10, %s8925_s24 }
 0x16b   : > { %p8929_p5 = pneg %p8928_p0  ;;  %p8935_p3 = por %p8934_p8, %p8933_p7 }
 0x16d   : > { %p8936_p9 = pnand %p8935_p3, %p8929_p5 }
 0x16f   : > { %8939 = shalt.err (!%p8936_p9)
}
 0x170   : > { %p12801_p13 = scmp.ne.s32.totalorder %s12791_s1, 0  ;;  %s12802_s18 = sld [smem:[#allocation77_spill]] }
 0x171   : > { %s797_s20 = scalar_lea.vmem [#allocation7], %s7283_s6 }
 0x172   : > { %8043 = dma.hbm_to_vmem [thread:$0]  (!%p12801_p13), %s9584_s4, 512, %s9588_s5, %s752_s8, %s12795_s9, %s12795_s9, %s12794_s16  }
 0x173   : > { %s804_s29 = sshll.u32 %s797_s20, 4  ;;  %s9626_s29 = int_to_ptr.vmem [resolvable:$true] %s804_s29 }
 0x176   : > { %s9622_s0 = scalar_lea.hbm %s12802_s18, %s7342_s28  ;;  %s8945_s8 = scalar_lea.hbm %s12802_s18, 1024 }
 0x177   : > { %s8940_s24 = scalar_lea.hbm %s9622_s0, 512  ;;  %p8946_p10 = scmp.lt.u32.totalorder %s9622_s0, %s12802_s18 }
 0x178   : > { %p8941_p4 = scmp.ne.s32.totalorder %s9622_s0, %s8940_s24  ;;  %p8947_p11 = scmp.lt.u32.totalorder %s8945_s8, %s8940_s24 }
 0x179   : > { %p8949_p0 = scmp.lt.u32.totalorder %s8940_s24, %s9622_s0 }
 0x17a   : > { %p8943_p12 = pnand %p8941_p4, %p12800_p6  ;;  %p8948_p1 = por %p8947_p11, %p8946_p10 }
 0x17c   : > { %p8944_p2 = pneg %p8943_p12  ;;  %p8950_p5 = por %p8949_p0, %p8948_p1 }
 0x17e   : > { %p8951_p7 = pnand %p8950_p5, %p8944_p2 }
 0x180   : > { %8954 = shalt.err (!%p8951_p7)
}
 0x181   : > { %s8955_s27 = scalar_lea.vmem %s9626_s29, 512  ;;  %s9080_s6 = smov [#allocation7]  }
 0x182   : > { %p8956_p8 = scmp.ne.s32.totalorder %s9626_s29, %s8955_s27  ;;  %s8960_s26 = sshll.u32 %s9080_s6, 4  ;;  %s8961_s26 = int_to_ptr.vmem [resolvable:$false] %s8960_s26 }
 0x183   : > { %s8962_s10 = scalar_lea.vmem %s8961_s26, 1024  ;;  %p8963_p4 = scmp.lt.s32.totalorder %s9626_s29, %s8961_s26 }
 0x184   : > { %p8958_p3 = pnand %p8956_p8, %p12800_p6  ;;  %p8964_p12 = scmp.lt.s32.totalorder %s8962_s10, %s8955_s27 }
 0x186   : > { %p8959_p9 = pneg %p8958_p3  ;;  %p8965_p10 = por %p8964_p12, %p8963_p4 }
 0x188   : > { %p8966_p11 = pnand %p8965_p10, %p8959_p9 }
 0x18a   : > { %8969 = shalt.err (!%p8966_p11)
}
 0x18b   : > { %8049 = dma.hbm_to_vmem [thread:$0]  (!%p12801_p13), %s9622_s0, 512, %s9626_s29, %s9425_s12, %s12795_s9, %s12795_s9, %s12794_s16  }
 0x18c   : > { %p12803_p6 = scmp.ne.s32.totalorder %s12775_s2, 0 }
 0x18e   : > { %823 = sbr.rel (%p12803_p6) target bundleno = 3178 (0xc6a), region = 112 }
 0x195   : > { %s9656_s19 = sand.u32 1, %s9052_s30   ;;  %p12804_p2 = scmp.ne.s32.totalorder %s12786_s14, 0 }
 0x196   : > { %s7293_s23 = sshll.u32 %s9656_s19, 5  ;;  %s826_s22 = scalar_lea.sflag [#allocation3], %s9656_s19 }
 0x197   : > { %s9660_s20 = scalar_lea.vmem [#allocation2], %s7293_s23 }
 0x198   : > { %9015 = dma.done.wait (%p12804_p2), %s826_s22, 512  }
 0x199   : > { %9017 = vsyncadd (%p12804_p2), %s826_s22, 4294966784  ;;  %s12805_s1 = sld [smem:[#allocation34_spill]]  ;;  %s7294_s2 = sshll.u32 %s9656_s19, 8 }
 0x19a   : > { %s9668_s9 = scalar_lea.vmem [#allocation5], %s7294_s2 }
 0x19f   : > { %s834_s12 = sand.u32 1, %s12805_s1  }
 0x1a0   : > { %s835_s16 = scalar_lea.sflag [#allocation6], %s834_s12 }
 0x1a1   : > { %9019 = dma.done.wait (%p12804_p2), %s835_s16, 4608  }
 0x1a2   : > { %9021 = vsyncadd (%p12804_p2), %s835_s16, 4294962688  ;;  %s9674_s0 = scalar_lea.vmem [#allocation7], %s7293_s23  ;;  %p12806_p13 = scmp.eq.s32.totalorder %s12805_s1, 0 }
 0x1a4   : > { %9023 = dma.done.wait (%p12806_p13), [#allocation9], 5120   ;;  %p12807_p1 = pmov %p12806_p13 }
 0x1a6   : > { %9025 = vsyncadd (%p12807_p1), [#allocation9], 4294962176  ;;  %p12808_p0 = pmov %p12807_p1 }
 0x1a8   : > { %9027 = dma.done.wait (%p12808_p0), [#allocation12], 5120   ;;  %p12809_p5 = pmov %p12808_p0 }
 0x1a9   : > { %p12810_p7 = pmov %p12808_p0 }
 0x1aa   : > { %9029 = vsyncadd (%p12809_p5), [#allocation12], 4294962176 }
 0x1ab   : > { %9031 = dma.done.wait (%p12810_p7), [#allocation15], 5120   ;;  %p12811_p8 = pmov %p12808_p0 }
 0x1ac   : > { %p12812_p3 = pmov %p12808_p0 }
 0x1ad   : > { %9033 = vsyncadd (%p12811_p8), [#allocation15], 4294962176 }
 0x1ae   : > { %9035 = dma.done.wait (%p12812_p3), [#allocation18], 4096   ;;  %p12813_p9 = pmov %p12808_p0 }
 0x1af   : > { %p12814_p4 = pmov %p12808_p0 }
 0x1b0   : > { %9037 = vsyncadd (%p12813_p9), [#allocation18], 4294963200 }
 0x1b1   : > { %9039 = dma.done.wait (%p12814_p4), [#allocation21], 4096   ;;  %p12815_p12 = pmov %p12808_p0 }
 0x1b2   : > { %v12644_v0 = vmov 0.0   ;;  %v1038_v1 = vld [vmem:[#allocation8 + $0x8] sm:$0xff]  ;;  %v1040_v2 = vld [vmem:[#allocation8 + $0x18] sm:$0xff]  ;;  %v1037_v3 = vld [vmem:[#allocation8] sm:$0xff]  ;;  %v1071_v61 = vlaneseq  ;;  %v9082_v63 = vmov 1966171168  }
 0x1b3   : > { %9041 = vsyncadd (%p12815_p12), [#allocation21], 4294963200  ;;  %1145 = vmatprep.mubr.f32.mxu0 %v12644_v0  ;;  %v7769_v4 = vpack.c.bf16 %v1040_v2, %v1038_v1  ;;  %v1039_v5 = vld [vmem:[#allocation8 + $0x10] sm:$0xff]  ;;  %v1042_v6 = vld [vmem:[#allocation8 + $0x28] sm:$0xff]  ;;  %v1176_v1 = vunpack.c.l.s4 %v9082_v63  ;;  %s12817_s24 = sld [smem:[#allocation80_spill]]  ;;  %s12820_s8 = sld [smem:[#allocation81_spill]] }
 0x1b4   : > { %v1044_v7 = vld [vmem:[#allocation8 + $0x38] sm:$0xff]  ;;  %v7771_v8 = vpack.c.bf16 %v1039_v5, %v1037_v3  ;;  %v1041_v10 = vld [vmem:[#allocation8 + $0x20] sm:$0xff]  ;;  %v1043_v11 = vld [vmem:[#allocation8 + $0x30] sm:$0xff]  ;;  %v1072_v62 = vshrl.u32 %v1071_v61, 7  ;;  %s12868_s27 = sld [smem:[#allocation84_spill]]  ;;  %s12872_s10 = sld [smem:[#allocation85_spill]] }
 0x1b5   : > { %v7773_v9 = vpack.c.bf16 %v1044_v7, %v1042_v6  ;;  %v1046_v12 = vld [vmem:[#allocation8 + $0x48] sm:$0xff]  ;;  %7770 = vmatprep.subr.bf16.mxu0 %v7769_v4  ;;  %v1048_v13 = vld [vmem:[#allocation8 + $0x58] sm:$0xff]  ;;  %v7775_v14 = vpack.c.bf16 %v1043_v11, %v1041_v10  ;;  %v1045_v16 = vld [vmem:[#allocation8 + $0x40] sm:$0xff]  ;;  %v1177_v4 = vunpack.c.0.s8 %v1176_v1  ;;  %s12961_s16 = sld [smem:[#allocation88_spill]]  ;;  %p964_p10 = scmp.lt.s32.totalorder %s12805_s1, 1 }
 0x1b6   : > { %7772 = vmatpush1.bf16.msra.mxu0 %v7771_v8  ;;  %v7777_v15 = vpack.c.bf16 %v1048_v13, %v1046_v12  ;;  %v1047_v17 = vld [vmem:[#allocation8 + $0x50] sm:$0xff]  ;;  %v1050_v18 = vld [vmem:[#allocation8 + $0x68] sm:$0xff]  ;;  %v1052_v19 = vld [vmem:[#allocation8 + $0x78] sm:$0xff]  ;;  %v9705_v2 = vsub.s32 1, %v1072_v62  ;;  %s13014_s4 = sld [smem:[#allocation78_spill]]  ;;  %s13048_s28 = sld [smem:[#allocation90_spill]] }
 0x1b7   : > { %7774 = vmatprep.subr.bf16.mxu0 %v7773_v9  ;;  %v7779_v20 = vpack.c.bf16 %v1047_v17, %v1045_v16  ;;  %v7781_v21 = vpack.c.bf16 %v1052_v19, %v1050_v18  ;;  %v1049_v22 = vld [vmem:[#allocation8 + $0x60] sm:$0xff]  ;;  %v1051_v23 = vld [vmem:[#allocation8 + $0x70] sm:$0xff]  ;;  %v1054_v24 = vld [vmem:[#allocation8 + $0x88] sm:$0xff]  ;;  %v9713_v7 = vsub.s32 %v1177_v4, %v1072_v62  ;;  %s13049_s6 = sld [smem:[#allocation92_spill]]  ;;  %s7339_s12 = sshll.u32 %s12805_s1, 6 }
 0x1b8   : > { %v1056_v25 = vld [vmem:[#allocation8 + $0x98] sm:$0xff]  ;;  %v1053_v26 = vld [vmem:[#allocation8 + $0x80] sm:$0xff]  ;;  %v1055_v27 = vld [vmem:[#allocation8 + $0x90] sm:$0xff]  ;;  %v7783_v28 = vpack.c.bf16 %v1051_v23, %v1049_v22  ;;  %12816 = vst [vmem:[#allocation39_spill] sm:$0xff] %v9705_v2  ;;  %s13050_s26 = sld [smem:[#allocation37_spill]]  ;;  %s13052_s29 = sld [smem:[#allocation94_spill]] }
 0x1b9   : > { %v1058_v29 = vld [vmem:[#allocation8 + $0xa8] sm:$0xff]  ;;  %v8128_v30 = vld [vmem:[#allocation10] sm:$0xff]   ;;  %v7785_v31 = vpack.c.bf16 %v1056_v25, %v1054_v24  ;;  %v1060_v33 = vld [vmem:[#allocation8 + $0xb8] sm:$0xff]  ;;  %v7787_v37 = vpack.c.bf16 %v1055_v27, %v1053_v26  ;;  %12818 = vst [vmem:[#allocation40_spill] sm:$0xff] %v9713_v7 }
 0x1ba   : > { %7776 = vmatpush1.bf16.msra.mxu0 %v7775_v14  ;;  %v8129_v32 = vld [vmem:[#allocation10 + $0x8] sm:$0xff]   ;;  %7485 = vmatprep.subr.bf16.mxu1 %v8128_v30  ;;  %v1057_v34 = vld [vmem:[#allocation8 + $0xa0] sm:$0xff]  ;;  %v1059_v35 = vld [vmem:[#allocation8 + $0xb0] sm:$0xff]  ;;  %v7789_v40 = vpack.c.bf16 %v1060_v33, %v1058_v29  ;;  %v9717_v14 = vsub.s32 0, %v1072_v62 }
 0x1bb   : > { %7778 = vmatprep.subr.bf16.mxu0 %v7777_v15  ;;  %7486 = vmatpush3.bf16.msra.mxu1 %v8128_v30  ;;  %v8130_v36 = vld [vmem:[#allocation10 + $0x10] sm:$0xff]   ;;  %v1062_v38 = vld [vmem:[#allocation8 + $0xc8] sm:$0xff]  ;;  %v1064_v39 = vld [vmem:[#allocation8 + $0xd8] sm:$0xff]  ;;  %v7791_v43 = vpack.c.bf16 %v1059_v35, %v1057_v34 }
 0x1bc   : > { %7487 = vmatprep.subr.bf16.mxu1 %v8129_v32  ;;  %v1061_v41 = vld [vmem:[#allocation8 + $0xc0] sm:$0xff]  ;;  %v1063_v42 = vld [vmem:[#allocation8 + $0xd0] sm:$0xff]  ;;  %v1066_v44 = vld [vmem:[#allocation8 + $0xe8] sm:$0xff]  ;;  %v7793_v46 = vpack.c.bf16 %v1064_v39, %v1062_v38  ;;  %12819 = vst [vmem:[#allocation41_spill] sm:$0xff] %v9717_v14 }
 0x1bd   : > { %v1068_v45 = vld [vmem:[#allocation8 + $0xf8] sm:$0xff]  ;;  %v1065_v47 = vld [vmem:[#allocation8 + $0xe0] sm:$0xff]  ;;  %v1067_v48 = vld [vmem:[#allocation8 + $0xf0] sm:$0xff]  ;;  %v7795_v49 = vpack.c.bf16 %v1063_v42, %v1061_v41 }
 0x1be   : > { %7780 = vmatpush1.bf16.msra.mxu0 %v7779_v20  ;;  %v7797_v50 = vpack.c.bf16 %v1068_v45, %v1066_v44  ;;  %v7799_v51 = vpack.c.bf16 %v1067_v48, %v1065_v47  ;;  %v969_v52 = vld [vmem:[%s9660_s20] sm:$0xff]  ;;  %v970_v53 = vld [vmem:[%s9660_s20 + $0x8] sm:$0xff]  ;;  %v971_v54 = vld [vmem:[%s9660_s20 + $0x10] sm:$0xff]  ;;  %p13053_p6 = scmp.ne.s32.totalorder %s13050_s26, 0 }
 0x1bf   : > { %7782 = vmatprep.subr.bf16.mxu0 %v7781_v21  ;;  %7488 = vmatpush3.bf16.msra.mxu1 %v8129_v32  ;;  %v972_v55 = vld [vmem:[%s9660_s20 + $0x18] sm:$0xff]  ;;  %v8132_v57 = vld [vmem:[#allocation10 + $0x20] sm:$0xff]   ;;  %v8133_v58 = vld [vmem:[#allocation10 + $0x28] sm:$0xff]   ;;  %s12957_s20 = sld [smem:[#allocation87_spill]] }
 0x1c0   : > { %7489 = vmatprep.subr.bf16.mxu1 %v8130_v36  ;;  %v8131_v56 = vld [vmem:[#allocation10 + $0x18] sm:$0xff]   ;;  %v8134_v59 = vld [vmem:[#allocation10 + $0x30] sm:$0xff]   ;;  %v1069_v3 = vld [vmem:[%s12817_s24] sm:$0x3]  ;;  %s12543_s24 = scalar_lea.hbm %s13052_s29, %s7339_s12 }
 0x1c1   : > { %v8135_v60 = vld [vmem:[#allocation10 + $0x38] sm:$0xff]   ;;  %v9711_v5 = vrot.slane %v1069_v3, %v9705_v2  ;;  %v9724_v24 = vrot.slane %v1069_v3, %v9717_v14 }
 0x1c2   : > { %7784 = vmatpush1.bf16.msra.mxu0 %v7783_v28 }
 0x1c3   : > { %7786 = vmatprep.subr.bf16.mxu0 %v7785_v31  ;;  %7490 = vmatpush3.bf16.msra.mxu1 %v8130_v36 }
 0x1c4   : > { %7491 = vmatprep.subr.bf16.mxu1 %v8131_v56 }
 0x1c6   : > { %7788 = vmatpush1.bf16.msra.mxu0 %v7787_v37 }
 0x1c7   : > { %7790 = vmatprep.subr.bf16.mxu0 %v7789_v40  ;;  %7492 = vmatpush3.bf16.msra.mxu1 %v8131_v56 }
 0x1c8   : > { %7493 = vmatprep.subr.bf16.mxu1 %v8132_v57 }
 0x1ca   : > { %7792 = vmatpush1.bf16.msra.mxu0 %v7791_v43 }
 0x1cb   : > { %7794 = vmatprep.subr.bf16.mxu0 %v7793_v46  ;;  %7494 = vmatpush3.bf16.msra.mxu1 %v8132_v57 }
 0x1cc   : > { %7495 = vmatprep.subr.bf16.mxu1 %v8133_v58 }
 0x1ce   : > { %7796 = vmatpush1.bf16.msra.mxu0 %v7795_v49 }
 0x1cf   : > { %7798 = vmatprep.subr.bf16.mxu0 %v7797_v50  ;;  %7496 = vmatpush3.bf16.msra.mxu1 %v8133_v58 }
 0x1d0   : > { %7497 = vmatprep.subr.bf16.mxu1 %v8134_v59 }
 0x1d2   : > { %7800 = vmatpush1.bf16.msra.mxu0 %v7799_v51 }
 0x1d3   : > { %7498 = vmatpush3.bf16.msra.mxu1 %v8134_v59 }
 0x1d4   : > { %7499 = vmatprep.subr.bf16.mxu1 %v8135_v60 }
 0x1d5   : > { %1146 = vmatmul.mubr.f32.vlgmr.msra.gmra.mrb[0].mxu0 %v969_v52 }
 0x1d6   : > { %1151 = vmatprep.mubr.f32.mxu0 %v12644_v0 }
 0x1d7   : > { %7500 = vmatpush3.bf16.msra.mxu1 %v8135_v60 }
 0x1d9   : > { %1152 = vmatmul.mubr.f32.gmra.mrb[2].mxu0 %v970_v53 }
 0x1da   : > { %1157 = vmatprep.mubr.f32.mxu0 %v12644_v0 }
 0x1dd   : > { %1158 = vmatmul.mubr.f32.gmra.mrb[4].mxu0 %v971_v54 }
 0x1de   : > { %1163 = vmatprep.mubr.f32.mxu0 %v12644_v0 }
 0x1e1   : > { %1164 = vmatmul.mubr.f32.gmra.mrb[6].mxu0 %v972_v55 }
 0x1e2   : > { %3013 = vmatprep.mubr.f32.mxu0 %v12644_v0 }
 0x2a8   : > { %v1147_v6 = vpop.f32.mrb[0].mxu0 }
 0x2a9   : > { %v1149_v8 = vpop.f32.mrb[1].mxu0  ;;  %v9738_v34 = vadd.f32 %v1147_v6, %v9724_v24 }
 0x2aa   : > { %v1150_v9 = vadd.f32 %v1149_v8, %v9711_v5 }
 0x2ac   : > { %v1174_v10 = vcombine.high %v1150_v9, %v1150_v9  ;;  %v1181_v11 = vrot.slane %v1150_v9, %v9713_v7  ;;  %v1153_v12 = vpop.f32.mrb[2].mxu0 }
 0x2ad   : > { %v1155_v13 = vpop.f32.mrb[3].mxu0  ;;  %v9749_v45 = vadd.f32 %v1153_v12, %v9724_v24 }
 0x2ae   : > { %v1188_v15 = vrot.slane %v1174_v10, %v9713_v7  ;;  %v1189_v16 = vcombine.high %v1181_v11, %v1181_v11  ;;  %v1156_v17 = vadd.f32 %v1155_v13, %v9711_v5  ;;  %v1197_v18 = vrot.slane %v1181_v11, %v9713_v7  ;;  %v9777_v10 = vld [vmem:[%s12820_s8] ss:$0 sm:$0xff] }
 0x2b0   : > { %v1159_v19 = vpop.f32.mrb[4].mxu0  ;;  %v1190_v20 = vcombine.high %v1188_v15, %v1188_v15  ;;  %v1223_v21 = vcombine.high %v1156_v17, %v1156_v17  ;;  %v1230_v22 = vrot.slane %v1156_v17, %v9713_v7  ;;  %v1204_v25 = vrot.slane %v1188_v15, %v9713_v7 }
 0x2b1   : > { %v1161_v23 = vpop.f32.mrb[5].mxu0  ;;  %v1211_v26 = vrot.slane %v1189_v16, %v9713_v7  ;;  %v1219_v27 = vcombine.high %v1197_v18, %v1197_v18  ;;  %v1373_v29 = vrot.slane %v1197_v18, %v9717_v14  ;;  %v9758_v51 = vadd.f32 %v1159_v19, %v9724_v24 }
 0x2b2   : > { %v1237_v28 = vrot.slane %v1223_v21, %v9713_v7  ;;  %v9733_v31 = vrot.slane %v1190_v20, %v9713_v7  ;;  %v1238_v32 = vcombine.high %v1230_v22, %v1230_v22  ;;  %v1220_v35 = vcombine.high %v1204_v25, %v1204_v25 }
 0x2b3   : > { %v1221_v36 = vcombine.high %v1211_v26, %v1211_v26  ;;  %v1381_v37 = vrot.slane %v1219_v27, %v9717_v14  ;;  %v1389_v38 = vrot.slane %v1204_v25, %v9717_v14  ;;  %v1246_v40 = vrot.slane %v1230_v22, %v9713_v7 }
 0x2b4   : > { %v9730_v30 = vpop.f32.mrb[6].mxu0  ;;  %v1239_v39 = vcombine.high %v1237_v28, %v1237_v28  ;;  %v1377_v41 = vrot.slane %v1211_v26, %v9717_v14  ;;  %v1162_v42 = vadd.f32 %v1161_v23, %v9711_v5  ;;  %v1530_v43 = vadd.f32 %v1373_v29, %v9738_v34 }
 0x2b5   : > { %v9735_v33 = vpop.f32.mrb[7].mxu0  ;;  %v1222_v44 = vcombine.high %v9733_v31, %v9733_v31  ;;  %v1253_v46 = vrot.slane %v1237_v28, %v9713_v7  ;;  %v1260_v47 = vrot.slane %v1238_v32, %v9713_v7  ;;  %v1385_v48 = vrot.slane %v1221_v36, %v9717_v14 }
 0x2b6   : > { %v1393_v49 = vrot.slane %v9733_v31, %v9717_v14  ;;  %v1397_v50 = vrot.slane %v1220_v35, %v9717_v14  ;;  %v1532_v52 = vadd.f32 %v1381_v37, %v9738_v34  ;;  %v1534_v53 = vadd.f32 %v1389_v38, %v9738_v34 }
 0x2b7   : > { %v9763_v54 = vrot.slane %v1239_v39, %v9713_v7  ;;  %v1268_v55 = vcombine.high %v1246_v40, %v1246_v40  ;;  %v1272_v56 = vcombine.high %v1162_v42, %v1162_v42  ;;  %v1531_v57 = vadd.f32 %v1377_v41, %v9738_v34 }
 0x2b8   : > { %vm1562_vm0 = vcmp.ge.f32.partialorder %v1530_v43, 0.0  ;;  %v1594_v58 = vmul.f32 0.2, %v1530_v43  ;;  %v1401_v59 = vrot.slane %v1222_v44, %v9717_v14  ;;  %v1269_v60 = vcombine.high %v1253_v46, %v1253_v46 }
 0x2b9   : > { %v1270_v61 = vcombine.high %v1260_v47, %v1260_v47  ;;  %v1405_v62 = vrot.slane %v1246_v40, %v9717_v14  ;;  %v1409_v63 = vrot.slane %v1260_v47, %v9717_v14  ;;  %v1421_v1 = vrot.slane %v1253_v46, %v9717_v14 }
 0x2ba   : > { %vm1563_vm1 = vcmp.ge.f32.partialorder %v1531_v57, 0.0  ;;  %v1595_v3 = vmul.f32 0.2, %v1531_v57  ;;  %v1271_v4 = vcombine.high %v9763_v54, %v9763_v54  ;;  %v1413_v6 = vrot.slane %v1268_v55, %v9717_v14 }
 0x2bb   : > { %v1279_v8 = vrot.slane %v1162_v42, %v9713_v7  ;;  %v1626_v9 = vsel %vm1562_vm0, %v1530_v43, %v1594_v58  ;;  %v1425_v11 = vrot.slane %v9763_v54, %v9717_v14  ;;  %v1286_v12 = vrot.slane %v1272_v56, %v9713_v7 }
 0x2bc   : > { %v1627_v13 = vsel %vm1563_vm1, %v1531_v57, %v1595_v3  ;;  %v1533_v15 = vadd.f32 %v1385_v48, %v9738_v34  ;;  %v1417_v16 = vrot.slane %v1270_v61, %v9717_v14  ;;  %v9785_v17 = vrot.slane %v1269_v60, %v9717_v14 }
 0x2bd   : > { %v1538_v18 = vadd.f32 %v1405_v62, %v9749_v45  ;;  %v1596_v19 = vmul.f32 0.2, %v1532_v52  ;;  %v1539_v20 = vadd.f32 %v1409_v63, %v9749_v45  ;;  %v1665_v21 = vmul.f32 %v9777_v10, %v1626_v9 }
 0x2be   : > { %v1666_v22 = vmul.f32 %v9777_v10, %v1627_v13  ;;  %vm1564_vm2 = vcmp.ge.f32.partialorder %v1532_v52, 0.0  ;;  %v9792_v23 = vrot.slane %v1271_v4, %v9717_v14  ;;  %v9795_v25 = vadd.f32 %v1413_v6, %v9749_v45 }
 0x2bf   : > { %v9798_v26 = vadd.f32 %v1421_v1, %v9749_v45  ;;  %v1287_v27 = vcombine.high %v1279_v8, %v1279_v8  ;;  %v1288_v28 = vcombine.high %v1286_v12, %v1286_v12  ;;  %v9801_v29 = vrot.slane %v1279_v8, %v9713_v7 }
 0x2c0   : > { %v1697_v31 = vpack.c.bf16 %v1666_v22, %v1665_v21  ;;  %vm1565_vm3 = vcmp.ge.f32.partialorder %v1533_v15, 0.0  ;;  %v9804_v32 = vrot.slane %v1286_v12, %v9713_v7  ;;  %v1597_v35 = vmul.f32 0.2, %v1533_v15 }
 0x2c1   : > { %v1628_v36 = vsel %vm1564_vm2, %v1532_v52, %v1596_v19  ;;  %v1535_v37 = vadd.f32 %v1393_v49, %v9738_v34  ;;  %vm1566_vm4 = vcmp.ge.f32.partialorder %v1534_v53, 0.0  ;;  %v1598_v39 = vmul.f32 0.2, %v1534_v53 }
 0x2c2   : > { %7501 = vmatprep.mubr.bf16.mxu1 %v1697_v31  ;;  %v1667_v38 = vmul.f32 %v9777_v10, %v1628_v36  ;;  %v1536_v40 = vadd.f32 %v1397_v50, %v9738_v34  ;;  %v1629_v41 = vsel %vm1565_vm3, %v1533_v15, %v1597_v35  ;;  %v1537_v43 = vadd.f32 %v1401_v59, %v9738_v34 }
 0x2c3   : > { %vm1567_vm5 = vcmp.ge.f32.partialorder %v1535_v37, 0.0  ;;  %v1599_v42 = vmul.f32 0.2, %v1535_v37  ;;  %v1668_v44 = vmul.f32 %v9777_v10, %v1629_v41  ;;  %v1630_v46 = vsel %vm1566_vm4, %v1534_v53, %v1598_v39 }
 0x2c4   : > { %vm1568_vm6 = vcmp.ge.f32.partialorder %v1536_v40, 0.0  ;;  %v1600_v47 = vmul.f32 0.2, %v1536_v40  ;;  %v1309_v48 = vrot.slane %v1287_v27, %v9713_v7  ;;  %vm1569_vm7 = vcmp.ge.f32.partialorder %v1537_v43, 0.0 }
 0x2c5   : > { %v1631_v49 = vsel %vm1567_vm5, %v1535_v37, %v1599_v42  ;;  %v1601_v52 = vmul.f32 0.2, %v1537_v43  ;;  %v1698_v55 = vpack.c.bf16 %v1668_v44, %v1667_v38  ;;  %v1669_v56 = vmul.f32 %v9777_v10, %v1630_v46 }
 0x2c6   : > { %v1670_v50 = vmul.f32 %v9777_v10, %v1631_v49  ;;  %vm1570_vm8 = vcmp.ge.f32.partialorder %v1538_v18, 0.0  ;;  %v1632_v57 = vsel %vm1568_vm6, %v1536_v40, %v1600_v47  ;;  %vm1571_vm9 = vcmp.ge.f32.partialorder %v1539_v20, 0.0 }
 0x2c7   : > { %v1633_v58 = vsel %vm1569_vm7, %v1537_v43, %v1601_v52  ;;  %v1602_v59 = vmul.f32 0.2, %v1538_v18  ;;  %v1317_v53 = vcombine.high %v9801_v29, %v9801_v29  ;;  %v1437_v60 = vrot.slane %v9801_v29, %v9717_v14  ;;  %7502 = vmatmul.mubr.bf16.vlgmr.msra.gmra.mrb[0].mxu1 %v1698_v55 }
 0x2c8   : > { %v1699_v61 = vpack.c.bf16 %v1670_v50, %v1669_v56  ;;  %v1603_v62 = vmul.f32 0.2, %v1539_v20  ;;  %v9819_v63 = vrot.slane %v1288_v28, %v9713_v7  ;;  %v1168_v3 = vadd.f32 %v9735_v33, %v9711_v5 }
 0x2c9   : > { %v1634_v1 = vsel %vm1570_vm8, %v1538_v18, %v1602_v59  ;;  %v1541_v4 = vadd.f32 %v1417_v16, %v9749_v45  ;;  %v1671_v6 = vmul.f32 %v9777_v10, %v1632_v57  ;;  %v1672_v8 = vmul.f32 %v9777_v10, %v1633_v58 }
 0x2ca   : > { %7505 = vmatprep.mubr.bf16.mxu1 %v1699_v61  ;;  %v1635_v9 = vsel %vm1571_vm9, %v1539_v20, %v1603_v62  ;;  %v1604_v12 = vmul.f32 0.2, %v9795_v25  ;;  %v1673_v13 = vmul.f32 %v9777_v10, %v1634_v1  ;;  %vm1572_vm10 = vcmp.ge.f32.partialorder %v9795_v25, 0.0 }
 0x2cb   : > { %v1674_v15 = vmul.f32 %v9777_v10, %v1635_v9  ;;  %vm1573_vm11 = vcmp.ge.f32.partialorder %v1541_v4, 0.0  ;;  %v1321_v18 = vcombine.high %v1168_v3, %v1168_v3  ;;  %v1328_v5 = vrot.slane %v1168_v3, %v9713_v7 }
 0x2cc   : > { %v1605_v33 = vmul.f32 0.2, %v1541_v4  ;;  %v1543_v16 = vadd.f32 %v1425_v11, %v9749_v45  ;;  %v1318_v19 = vcombine.high %v9804_v32, %v9804_v32  ;;  %v1319_v20 = vcombine.high %v1309_v48, %v1309_v48 }
 0x2cd   : > { %v1441_v21 = vrot.slane %v1309_v48, %v9717_v14  ;;  %v1445_v22 = vrot.slane %v1317_v53, %v9717_v14  ;;  %v1700_v27 = vpack.c.bf16 %v1672_v8, %v1671_v6  ;;  %v1636_v28 = vsel %vm1572_vm10, %v9795_v25, %v1604_v12 }
 0x2ce   : > { %v1637_v29 = vsel %vm1573_vm11, %v1541_v4, %v1605_v33  ;;  %v1606_v31 = vmul.f32 0.2, %v9798_v26  ;;  %v1320_v35 = vcombine.high %v9819_v63, %v9819_v63  ;;  %v1453_v54 = vrot.slane %v9804_v32, %v9717_v14 }
 0x2cf   : > { %v1701_v11 = vpack.c.bf16 %v1674_v15, %v1673_v13  ;;  %vm1574_vm12 = vcmp.ge.f32.partialorder %v9798_v26, 0.0  ;;  %v1546_v36 = vadd.f32 %v1437_v60, %v9758_v51  ;;  %7506 = vmatmul.mubr.bf16.gmra.mrb[4].mxu1 %v1700_v27  ;;  %v1335_v37 = vrot.slane %v1321_v18, %v9713_v7 }
 0x2d0   : > { %v1336_v38 = vcombine.high %v1328_v5, %v1328_v5  ;;  %v1607_v39 = vmul.f32 0.2, %v1543_v16  ;;  %v1449_v25 = vrot.slane %v1319_v20, %v9717_v14  ;;  %v1675_v40 = vmul.f32 %v9777_v10, %v1636_v28 }
 0x2d1   : > { %7509 = vmatprep.mubr.bf16.mxu1 %v1701_v11  ;;  %v1676_v41 = vmul.f32 %v9777_v10, %v1637_v29  ;;  %vm1575_vm13 = vcmp.ge.f32.partialorder %v1543_v16, 0.0  ;;  %v1457_v32 = vrot.slane %v9819_v63, %v9717_v14  ;;  %v1461_v42 = vrot.slane %v1318_v19, %v9717_v14 }
 0x2d2   : > { %v1547_v43 = vadd.f32 %v1441_v21, %v9758_v51  ;;  %v1638_v44 = vsel %vm1574_vm12, %v9798_v26, %v1606_v31  ;;  %v1465_v46 = vrot.slane %v1320_v35, %v9717_v14  ;;  %v1548_v47 = vadd.f32 %v1445_v22, %v9758_v51 }
 0x2d3   : > { %v1550_v48 = vadd.f32 %v1453_v54, %v9758_v51  ;;  %v9861_v49 = vadd.f32 %v9730_v30, %v9724_v24  ;;  %v1337_v52 = vcombine.high %v1335_v37, %v1335_v37  ;;  %v1344_v55 = vrot.slane %v1328_v5, %v9713_v7 }
 0x2d4   : > { %v1358_v56 = vrot.slane %v1336_v38, %v9713_v7  ;;  %v1639_v50 = vsel %vm1575_vm13, %v1543_v16, %v1607_v39  ;;  %v1702_v57 = vpack.c.bf16 %v1676_v41, %v1675_v40  ;;  %v1677_v58 = vmul.f32 %v9777_v10, %v1638_v44 }
 0x2d5   : > { %v1678_v26 = vmul.f32 %v9777_v10, %v1639_v50  ;;  %v1544_v59 = vadd.f32 %v9785_v17, %v9749_v45  ;;  %v1545_v53 = vadd.f32 %v9792_v23, %v9749_v45  ;;  %vm1578_vm14 = vcmp.ge.f32.partialorder %v1546_v36, 0.0 }
 0x2d6   : > { %vm1579_vm15 = vcmp.ge.f32.partialorder %v1547_v43, 0.0  ;;  %v1610_v24 = vmul.f32 0.2, %v1546_v36  ;;  %v1611_v61 = vmul.f32 0.2, %v1547_v43  ;;  %v1549_v1 = vadd.f32 %v1449_v25, %v9758_v51 }
 0x2d7   : > { %v1703_v30 = vpack.c.bf16 %v1678_v26, %v1677_v58  ;;  %vm1576_vm0 = vcmp.ge.f32.partialorder %v1544_v59, 0.0  ;;  %v1608_v60 = vmul.f32 0.2, %v1544_v59  ;;  %7510 = vmatmul.mubr.bf16.gmra.mrb[8].mxu1 %v1702_v57  ;;  %vm1577_vm1 = vcmp.ge.f32.partialorder %v1545_v53, 0.0 }
 0x2d8   : > { %v1609_v62 = vmul.f32 0.2, %v1545_v53  ;;  %v1642_v63 = vsel %vm1578_vm14, %v1546_v36, %v1610_v24  ;;  %v9873_v3 = vrot.slane %v1335_v37, %v9713_v7  ;;  %v1469_v17 = vrot.slane %v1344_v55, %v9717_v14 }
 0x2d9   : > { %7513 = vmatprep.mubr.bf16.mxu1 %v1703_v30  ;;  %v1640_v23 = vsel %vm1576_vm0, %v1544_v59, %v1608_v60  ;;  %v1643_v4 = vsel %vm1579_vm15, %v1547_v43, %v1611_v61  ;;  %v1473_v6 = vrot.slane %v1358_v56, %v9717_v14  ;;  %v1681_v9 = vmul.f32 %v9777_v10, %v1642_v63 }
 0x2da   : > { %v1641_v8 = vsel %vm1577_vm1, %v1545_v53, %v1609_v62  ;;  %v1682_v12 = vmul.f32 %v9777_v10, %v1643_v4  ;;  %v1612_v15 = vmul.f32 0.2, %v1548_v47  ;;  %v1613_v18 = vmul.f32 0.2, %v1549_v1 }
 0x2db   : > { %v1680_v13 = vmul.f32 %v9777_v10, %v1641_v8  ;;  %v1551_v5 = vadd.f32 %v1457_v32, %v9758_v51  ;;  %v1679_v33 = vmul.f32 %v9777_v10, %v1640_v23  ;;  %vm1580_vm2 = vcmp.ge.f32.partialorder %v1548_v47, 0.0 }
 0x2dc   : > { %vm1581_vm3 = vcmp.ge.f32.partialorder %v1549_v1, 0.0  ;;  %v1614_v16 = vmul.f32 0.2, %v1550_v48  ;;  %v1365_v19 = vrot.slane %v1337_v52, %v9713_v7  ;;  %v1366_v20 = vcombine.high %v1344_v55, %v1344_v55 }
 0x2dd   : > { %vm1582_vm4 = vcmp.ge.f32.partialorder %v1550_v48, 0.0  ;;  %vm1583_vm5 = vcmp.ge.f32.partialorder %v1551_v5, 0.0  ;;  %v1368_v21 = vcombine.high %v1358_v56, %v1358_v56  ;;  %v1704_v22 = vpack.c.bf16 %v1680_v13, %v1679_v33 }
 0x2de   : > { %v1705_v27 = vpack.c.bf16 %v1682_v12, %v1681_v9  ;;  %v1615_v28 = vmul.f32 0.2, %v1551_v5  ;;  %v1644_v29 = vsel %vm1580_vm2, %v1548_v47, %v1612_v15  ;;  %v1645_v31 = vsel %vm1581_vm3, %v1549_v1, %v1613_v18 }
 0x2df   : > { %v1552_v35 = vadd.f32 %v1461_v42, %v9758_v51  ;;  %v1553_v54 = vadd.f32 %v1465_v46, %v9758_v51  ;;  %v1554_v11 = vadd.f32 %v1469_v17, %v9861_v49  ;;  %v1555_v36 = vadd.f32 %v1473_v6, %v9861_v49  ;;  %7514 = vmatmul.mubr.bf16.gmra.mrb[12].mxu1 %v1704_v22 }
 0x2e0   : > { %v1646_v37 = vsel %vm1582_vm4, %v1550_v48, %v1614_v16  ;;  %v1647_v38 = vsel %vm1583_vm5, %v1551_v5, %v1615_v28  ;;  %v1477_v39 = vrot.slane %v1366_v20, %v9717_v14  ;;  %v1485_v25 = vrot.slane %v9873_v3, %v9717_v14  ;;  %7517 = vmatprep.mubr.bf16.mxu1 %v1705_v27 }
 0x2e1   : > { %v1481_v40 = vrot.slane %v1368_v21, %v9717_v14  ;;  %v1489_v41 = vrot.slane %v1365_v19, %v9717_v14  ;;  %v1683_v32 = vmul.f32 %v9777_v10, %v1644_v29  ;;  %v1684_v42 = vmul.f32 %v9777_v10, %v1645_v31 }
 0x2e2   : > { %v1685_v43 = vmul.f32 %v9777_v10, %v1646_v37  ;;  %v1686_v44 = vmul.f32 %v9777_v10, %v1647_v38  ;;  %v1616_v46 = vmul.f32 0.2, %v1552_v35  ;;  %v1617_v47 = vmul.f32 0.2, %v1553_v54 }
 0x2e3   : > { %vm1584_vm6 = vcmp.ge.f32.partialorder %v1552_v35, 0.0  ;;  %vm1585_vm7 = vcmp.ge.f32.partialorder %v1553_v54, 0.0  ;;  %v1618_v48 = vmul.f32 0.2, %v1554_v11  ;;  %v1619_v52 = vmul.f32 0.2, %v1555_v36 }
 0x2e4   : > { %v1367_v55 = vcombine.high %v9873_v3, %v9873_v3  ;;  %vm1586_vm8 = vcmp.ge.f32.partialorder %v1554_v11, 0.0  ;;  %vm1587_vm9 = vcmp.ge.f32.partialorder %v1555_v36, 0.0  ;;  %v1369_v56 = vcombine.high %v1365_v19, %v1365_v19 }
 0x2e5   : > { %v1556_v50 = vadd.f32 %v1477_v39, %v9861_v49  ;;  %v1706_v57 = vpack.c.bf16 %v1684_v42, %v1683_v32  ;;  %v1707_v58 = vpack.c.bf16 %v1686_v44, %v1685_v43  ;;  %v1648_v26 = vsel %vm1584_vm6, %v1552_v35, %v1616_v46  ;;  %v9918_v39 = vld [vmem:[%s9668_s9 + $0x10] sm:$0xff]  ;;  %v9928_v43 = vld [vmem:[%s9668_s9 + $0x8] sm:$0xff] }
 0x2e6   : > { %v1649_v59 = vsel %vm1585_vm7, %v1553_v54, %v1617_v47  ;;  %v1557_v53 = vadd.f32 %v1481_v40, %v9861_v49  ;;  %v1558_v24 = vadd.f32 %v1485_v25, %v9861_v49  ;;  %v1650_v30 = vsel %vm1586_vm8, %v1554_v11, %v1618_v48  ;;  %12821 = vst [vmem:[#allocation42_spill] sm:$0xff] %v9918_v39  ;;  %v9921_v25 = vld [vmem:[%s9668_s9] sm:$0xff] }
 0x2e7   : > { %7518 = vmatmul.mubr.bf16.gmra.mrb[16].mxu1 %v1706_v57  ;;  %v1651_v60 = vsel %vm1587_vm9, %v1555_v36, %v1619_v52  ;;  %v1559_v61 = vadd.f32 %v1489_v41, %v9861_v49  ;;  %v1493_v62 = vrot.slane %v1367_v55, %v9717_v14  ;;  %v1497_v63 = vrot.slane %v1369_v56, %v9717_v14  ;;  %v9924_v41 = vld [vmem:[%s9668_s9 + $0x18] sm:$0xff] }
 0x2e8   : > { %7521 = vmatprep.mubr.bf16.mxu1 %v1707_v58  ;;  %v1687_v1 = vmul.f32 %v9777_v10, %v1648_v26  ;;  %v1688_v3 = vmul.f32 %v9777_v10, %v1649_v59  ;;  %v1620_v17 = vmul.f32 0.2, %v1556_v50  ;;  %v1689_v23 = vmul.f32 %v9777_v10, %v1650_v30  ;;  %12822 = vst [vmem:[#allocation43_spill] sm:$0xff] %v9921_v25  ;;  %v9940_v26 = vld [vmem:[%s9668_s9 + $0x30] sm:$0xff] }
 0x2e9   : > { %v1690_v4 = vmul.f32 %v9777_v10, %v1651_v60  ;;  %vm1588_vm10 = vcmp.ge.f32.partialorder %v1556_v50, 0.0  ;;  %v1621_v6 = vmul.f32 0.2, %v1557_v53  ;;  %vm1589_vm11 = vcmp.ge.f32.partialorder %v1557_v53, 0.0  ;;  %12823 = vst [vmem:[#allocation44_spill] sm:$0xff] %v9924_v41  ;;  %12824 = vst [vmem:[#allocation45_spill] sm:$0xff] %v9928_v43 }
 0x2ea   : > { %v1622_v8 = vmul.f32 0.2, %v1558_v24  ;;  %v1623_v9 = vmul.f32 0.2, %v1559_v61  ;;  %vm1590_vm12 = vcmp.ge.f32.partialorder %v1558_v24, 0.0  ;;  %vm1591_vm13 = vcmp.ge.f32.partialorder %v1559_v61, 0.0 }
 0x2eb   : > { %v1708_v12 = vpack.c.bf16 %v1688_v3, %v1687_v1  ;;  %v1652_v13 = vsel %vm1588_vm10, %v1556_v50, %v1620_v17  ;;  %v1709_v15 = vpack.c.bf16 %v1690_v4, %v1689_v23  ;;  %v1653_v18 = vsel %vm1589_vm11, %v1557_v53, %v1621_v6  ;;  %12825 = vst [vmem:[#allocation46_spill] sm:$0xff] %v9940_v26  ;;  %v9954_v23 = vld [vmem:[%s9668_s9 + $0x28] sm:$0xff] }
 0x2ec   : > { %v1560_v5 = vadd.f32 %v1493_v62, %v9861_v49  ;;  %v1561_v33 = vadd.f32 %v1497_v63, %v9861_v49  ;;  %v1654_v16 = vsel %vm1590_vm12, %v1558_v24, %v1622_v8  ;;  %v1655_v19 = vsel %vm1591_vm13, %v1559_v61, %v1623_v9  ;;  %v9944_v24 = vld [vmem:[%s9668_s9 + $0x20] sm:$0xff]  ;;  %v9948_v62 = vld [vmem:[%s9668_s9 + $0x38] sm:$0xff]  ;;  %12828 = vst [vmem:[#allocation49_spill] sm:$0xff] %v9954_v23 }
 0x2ed   : > { %v1691_v20 = vmul.f32 %v9777_v10, %v1652_v13  ;;  %v1692_v21 = vmul.f32 %v9777_v10, %v1653_v18  ;;  %v1693_v22 = vmul.f32 %v9777_v10, %v1654_v16  ;;  %v1694_v27 = vmul.f32 %v9777_v10, %v1655_v19  ;;  %12826 = vst [vmem:[#allocation47_spill] sm:$0xff] %v9944_v24 }
 0x2ee   : > { %v1624_v28 = vmul.f32 0.2, %v1560_v5  ;;  %v1625_v29 = vmul.f32 0.2, %v1561_v33  ;;  %vm1592_vm14 = vcmp.ge.f32.partialorder %v1560_v5, 0.0  ;;  %vm1593_vm15 = vcmp.ge.f32.partialorder %v1561_v33, 0.0 }
 0x2ef   : > { %7522 = vmatmul.mubr.bf16.gmra.mrb[20].mxu1 %v1708_v12  ;;  %v1710_v31 = vpack.c.bf16 %v1692_v21, %v1691_v20  ;;  %v1711_v35 = vpack.c.bf16 %v1694_v27, %v1693_v22  ;;  %12827 = vst [vmem:[#allocation48_spill] sm:$0xff] %v9948_v62  ;;  %vm1007_vm0 = vcmp.lt.f32.partialorder %v9918_v39, 0.0  ;;  %vm1005_vm1 = vcmp.lt.f32.partialorder %v9921_v25, 0.0 }
 0x2f0   : > { %7525 = vmatprep.mubr.bf16.mxu1 %v1709_v15  ;;  %v1656_v54 = vsel %vm1592_vm14, %v1560_v5, %v1624_v28  ;;  %v1657_v11 = vsel %vm1593_vm15, %v1561_v33, %v1625_v29  ;;  %vm1008_vm2 = vcmp.lt.f32.partialorder %v9924_v41, 0.0  ;;  %vm1006_vm3 = vcmp.lt.f32.partialorder %v9928_v43, 0.0 }
 0x2f1   : > { %v1695_v36 = vmul.f32 %v9777_v10, %v1656_v54  ;;  %v1696_v37 = vmul.f32 %v9777_v10, %v1657_v11  ;;  %vm1011_vm4 = vcmp.lt.f32.partialorder %v9940_v26, 0.0  ;;  %vm1009_vm5 = vcmp.lt.f32.partialorder %v9944_v24, 0.0 }
 0x2f2   : > { %vm1012_vm6 = vcmp.lt.f32.partialorder %v9948_v62, 0.0  ;;  %vm1010_vm7 = vcmp.lt.f32.partialorder %v9954_v23, 0.0 }
 0x2f3   : > { %v1712_v38 = vpack.c.bf16 %v1696_v37, %v1695_v36 }
 0x2f7   : > { %7526 = vmatmul.mubr.bf16.gmra.mrb[24].mxu1 %v1710_v31 }
 0x2f8   : > { %7529 = vmatprep.mubr.bf16.mxu1 %v1711_v35 }
 0x2ff   : > { %7530 = vmatmul.mubr.bf16.gmra.mrb[28].mxu1 %v1712_v38 }
 0x300   : > { %4874 = vmatprep.mubr.f32.mxu1 %v12644_v0 }
 0x39a   : > { %v7503_v40 = vpop.f32.mrb[0].mxu1 }
 0x39b   : > { %v1940_v32 = vadd.f32 %v7503_v40, %v9918_v39  ;;  %v1811_v42 = vpop.f32.mrb[1].mxu1 }
 0x39c   : > { %v1938_v10 = vadd.f32 %v1811_v42, %v9921_v25  ;;  %v7504_v44 = vpop.f32.mrb[2].mxu1 }
 0x39d   : > { %v1982_v46 = vrot.slane %v1940_v32, 4  ;;  %v9932_v47 = vadd.f32 %v7504_v44, %v9924_v41  ;;  %v1814_v48 = vpop.f32.mrb[3].mxu1 }
 0x39e   : > { %v1970_v52 = vrot.slane %v1938_v10, 4  ;;  %v9935_v55 = vadd.f32 %v1814_v48, %v9928_v43 }
 0x39f   : > { %v1983_v56 = vmax.f32 %v1940_v32, %v1982_v46  ;;  %v1988_v50 = vrot.slane %v9932_v47, 4 }
 0x3a0   : > { %v1971_v57 = vmax.f32 %v1938_v10, %v1970_v52  ;;  %v1976_v58 = vrot.slane %v9935_v55, 4 }
 0x3a1   : > { %v1984_v59 = vrot.slane %v1983_v56, 2  ;;  %v1989_v53 = vmax.f32 %v9932_v47, %v1988_v50 }
 0x3a2   : > { %v1972_v30 = vrot.slane %v1971_v57, 2  ;;  %v1977_v60 = vmax.f32 %v9935_v55, %v1976_v58  ;;  %v7507_v61 = vpop.f32.mrb[4].mxu1 }
 0x3a3   : > { %v1985_v63 = vmax.f32 %v1983_v56, %v1984_v59  ;;  %v1990_v1 = vrot.slane %v1989_v53, 2  ;;  %v9951_v3 = vadd.f32 %v7507_v61, %v9940_v26  ;;  %v1827_v17 = vpop.f32.mrb[5].mxu1 }
 0x3a4   : > { %v1973_v4 = vmax.f32 %v1971_v57, %v1972_v30  ;;  %v1978_v6 = vrot.slane %v1977_v60, 2  ;;  %v9957_v8 = vadd.f32 %v1827_v17, %v9944_v24  ;;  %v7508_v9 = vpop.f32.mrb[6].mxu1 }
 0x3a5   : > { %v1986_v12 = vrot.slane %v1985_v63, 1  ;;  %v1991_v13 = vmax.f32 %v1989_v53, %v1990_v1  ;;  %v2006_v15 = vrot.slane %v9951_v3, 4  ;;  %v9961_v18 = vadd.f32 %v7508_v9, %v9948_v62  ;;  %v1830_v5 = vpop.f32.mrb[7].mxu1  ;;  %v9984_v9 = vld [vmem:[%s9668_s9 + $0x58] sm:$0xff] }
 0x3a6   : > { %v1974_v33 = vrot.slane %v1973_v4, 1  ;;  %v1979_v16 = vmax.f32 %v1977_v60, %v1978_v6  ;;  %v1994_v19 = vrot.slane %v9957_v8, 4  ;;  %v9965_v20 = vadd.f32 %v1830_v5, %v9954_v23  ;;  %v9976_v60 = vld [vmem:[%s9668_s9 + $0x50] sm:$0xff]  ;;  %12831 = vst [vmem:[#allocation52_spill] sm:$0xff] %v9984_v9  ;;  %v9991_v5 = vld [vmem:[%s9668_s9 + $0x48] sm:$0xff] }
 0x3a7   : > { %v1987_v21 = vmax.f32 %v1985_v63, %v1986_v12  ;;  %v1992_v22 = vrot.slane %v1991_v13, 1  ;;  %v2007_v27 = vmax.f32 %v9951_v3, %v2006_v15  ;;  %v2012_v28 = vrot.slane %v9961_v18, 4  ;;  %12829 = vst [vmem:[#allocation50_spill] sm:$0xff] %v9976_v60  ;;  %12832 = vst [vmem:[#allocation53_spill] sm:$0xff] %v9991_v5 }
 0x3a8   : > { %v1975_v29 = vmax.f32 %v1973_v4, %v1974_v33  ;;  %v1980_v31 = vrot.slane %v1979_v16, 1  ;;  %v1995_v35 = vmax.f32 %v9957_v8, %v1994_v19  ;;  %v2000_v54 = vrot.slane %v9965_v20, 4 }
 0x3a9   : > { %v2164_v11 = vsub.f32 %v1940_v32, %v1987_v21  ;;  %v1993_v36 = vmax.f32 %v1991_v13, %v1992_v22  ;;  %v2008_v37 = vrot.slane %v2007_v27, 2  ;;  %v2013_v38 = vmax.f32 %v9961_v18, %v2012_v28 }
 0x3aa   : > { %v2162_v40 = vsub.f32 %v1938_v10, %v1975_v29  ;;  %v1981_v42 = vmax.f32 %v1979_v16, %v1980_v31  ;;  %v1996_v44 = vrot.slane %v1995_v35, 2  ;;  %v2001_v46 = vmax.f32 %v9965_v20, %v2000_v54  ;;  %v7511_v48 = vpop.f32.mrb[8].mxu1 }
 0x3ab   : > { %v2198_v52 = vmul.f32 1.442695, %v2164_v11  ;;  %v2165_v56 = vsub.f32 %v9932_v47, %v1993_v36  ;;  %v2009_v50 = vmax.f32 %v2007_v27, %v2008_v37  ;;  %v2014_v57 = vrot.slane %v2013_v38, 2  ;;  %v1843_v58 = vpop.f32.mrb[9].mxu1  ;;  %v9980_v47 = vld [vmem:[%s9668_s9 + $0x40] sm:$0xff] }
 0x3ac   : > { %v2194_v59 = vmul.f32 1.442695, %v2162_v40  ;;  %v2163_v32 = vsub.f32 %v9935_v55, %v1981_v42  ;;  %v1997_v53 = vmax.f32 %v1995_v35, %v1996_v44  ;;  %v2002_v30 = vrot.slane %v2001_v46, 2  ;;  %v7512_v10 = vpop.f32.mrb[10].mxu1  ;;  %12830 = vst [vmem:[#allocation51_spill] sm:$0xff] %v9980_v47 }
 0x3ad   : > { %8152 = vpow2.f32 %v2198_v52  ;;  %v2200_v61 = vmul.f32 1.442695, %v2165_v56  ;;  %v2010_v63 = vrot.slane %v2009_v50, 1  ;;  %v2015_v1 = vmax.f32 %v2013_v38, %v2014_v57  ;;  %v1846_v17 = vpop.f32.mrb[11].mxu1 }
 0x3ae   : > { %8154 = vpow2.f32 %v2194_v59  ;;  %v2196_v55 = vmul.f32 1.442695, %v2163_v32  ;;  %v1998_v4 = vrot.slane %v1997_v53, 1  ;;  %v2003_v6 = vmax.f32 %v2001_v46, %v2002_v30 }
 0x3af   : > { %8156 = vpow2.f32 %v2200_v61  ;;  %v2011_v12 = vmax.f32 %v2009_v50, %v2010_v63  ;;  %v2016_v13 = vrot.slane %v2015_v1, 1  ;;  %v9988_v15 = vadd.f32 %v7511_v48, %v9976_v60  ;;  %v10016_v48 = vld [vmem:[%s9668_s9 + $0x70] sm:$0xff] }
 0x3b0   : > { %8158 = vpow2.f32 %v2196_v55  ;;  %v1999_v33 = vmax.f32 %v1997_v53, %v1998_v4  ;;  %v2004_v16 = vrot.slane %v2003_v6, 1  ;;  %v9995_v19 = vadd.f32 %v1843_v58, %v9980_v47  ;;  %12833 = vst [vmem:[#allocation54_spill] sm:$0xff] %v10016_v48 }
 0x3b1   : > { %v2168_v21 = vsub.f32 %v9951_v3, %v2011_v12  ;;  %v2017_v22 = vmax.f32 %v2015_v1, %v2016_v13  ;;  %v2030_v27 = vrot.slane %v9988_v15, 4  ;;  %v10000_v28 = vadd.f32 %v7512_v10, %v9984_v9 }
 0x3b2   : > { %v2166_v29 = vsub.f32 %v9957_v8, %v1999_v33  ;;  %v2005_v31 = vmax.f32 %v2003_v6, %v2004_v16  ;;  %v2018_v35 = vrot.slane %v9995_v19, 4  ;;  %v10005_v54 = vadd.f32 %v1846_v17, %v9991_v5  ;;  %v7515_v11 = vpop.f32.mrb[12].mxu1 }
 0x3b3   : > { %v2206_v36 = vmul.f32 1.442695, %v2168_v21  ;;  %v2169_v37 = vsub.f32 %v9961_v18, %v2017_v22  ;;  %v2031_v3 = vmax.f32 %v9988_v15, %v2030_v27  ;;  %v2036_v38 = vrot.slane %v10000_v28, 4  ;;  %v10010_v40 = vpop.f32.mrb[13].mxu1 }
 0x3b4   : > { %v2202_v42 = vmul.f32 1.442695, %v2166_v29  ;;  %v2167_v44 = vsub.f32 %v9965_v20, %v2005_v31  ;;  %v2019_v8 = vmax.f32 %v9995_v19, %v2018_v35  ;;  %v2024_v46 = vrot.slane %v10005_v54, 4  ;;  %v10018_v52 = vpop.f32.mrb[14].mxu1 }
 0x3b5   : > { %8160 = vpow2.f32 %v2206_v36  ;;  %v2208_v18 = vmul.f32 1.442695, %v2169_v37  ;;  %v2032_v56 = vrot.slane %v2031_v3, 2  ;;  %v2037_v50 = vmax.f32 %v10000_v28, %v2036_v38  ;;  %v10022_v57 = vpop.f32.mrb[15].mxu1 }
 0x3b6   : > { %8162 = vpow2.f32 %v2202_v42  ;;  %v2204_v20 = vmul.f32 1.442695, %v2167_v44  ;;  %v2020_v58 = vrot.slane %v2019_v8, 2  ;;  %v2025_v59 = vmax.f32 %v10005_v54, %v2024_v46 }
 0x3b7   : > { %v8153_v32 = vpop.eup %8152  ;;  %8164 = vpow2.f32 %v2208_v18  ;;  %v2033_v53 = vmax.f32 %v2031_v3, %v2032_v56  ;;  %v2038_v30 = vrot.slane %v2037_v50, 2  ;;  %v10028_v10 = vadd.f32 %v7515_v11, %v10016_v48 }
 0x3b8   : > { %v8155_v61 = vpop.eup %8154  ;;  %v10032_v63 = vsel %vm1007_vm0, 0.0, %v8153_v32  ;;  %8166 = vpow2.f32 %v2204_v20  ;;  %v2021_v1 = vmax.f32 %v2019_v8, %v2020_v58  ;;  %v2026_v17 = vrot.slane %v2025_v59, 2 }
 0x3b9   : > { %v8157_v55 = vpop.eup %8156  ;;  %v2302_v4 = vrot.slane %v10032_v63, 4  ;;  %v10037_v6 = vsel %vm1005_vm1, 0.0, %v8155_v61  ;;  %v2034_v12 = vrot.slane %v2033_v53, 1  ;;  %v2039_v13 = vmax.f32 %v2037_v50, %v2038_v30 }
 0x3ba   : > { %v8159_v33 = vpop.eup %8158  ;;  %v2290_v16 = vrot.slane %v10037_v6, 4  ;;  %v10043_v21 = vsel %vm1008_vm2, 0.0, %v8157_v55  ;;  %v2022_v22 = vrot.slane %v2021_v1, 1  ;;  %v2027_v27 = vmax.f32 %v2025_v59, %v2026_v17  ;;  %v10045_v29 = vpop.f32.mrb[16].mxu1 }
 0x3bb   : > { %v2303_v31 = vadd.f32 %v2302_v4, %v10032_v63  ;;  %v2308_v35 = vrot.slane %v10043_v21, 4  ;;  %v10051_v11 = vsel %vm1006_vm3, 0.0, %v8159_v33  ;;  %v2035_v36 = vmax.f32 %v2033_v53, %v2034_v12  ;;  %v10053_v37 = vpop.f32.mrb[17].mxu1 }
 0x3bc   : > { %v2291_v3 = vadd.f32 %v2290_v16, %v10037_v6  ;;  %v2296_v38 = vrot.slane %v10051_v11, 4  ;;  %v2023_v42 = vmax.f32 %v2021_v1, %v2022_v22  ;;  %v2040_v44 = vrot.slane %v2039_v13, 1  ;;  %v10057_v8 = vpop.f32.mrb[18].mxu1 }
 0x3bd   : > { %v2304_v46 = vrot.slane %v2303_v31, 2  ;;  %v2309_v18 = vadd.f32 %v2308_v35, %v10043_v21  ;;  %v2172_v56 = vsub.f32 %v9988_v15, %v2035_v36  ;;  %v2028_v50 = vrot.slane %v2027_v27, 1  ;;  %v10061_v20 = vpop.f32.mrb[19].mxu1 }
 0x3be   : > { %v2292_v58 = vrot.slane %v2291_v3, 2  ;;  %v2297_v59 = vadd.f32 %v2296_v38, %v10051_v11  ;;  %v2170_v32 = vsub.f32 %v9995_v19, %v2023_v42  ;;  %v10065_v53 = vmax.f32 %v2039_v13, %v2040_v44 }
 0x3bf   : > { %v8161_v30 = vpop.eup %8160  ;;  %v2305_v61 = vadd.f32 %v2304_v46, %v2303_v31  ;;  %v2310_v1 = vrot.slane %v2309_v18, 2  ;;  %v2214_v17 = vmul.f32 1.442695, %v2172_v56  ;;  %v10067_v55 = vmax.f32 %v2027_v27, %v2028_v50 }
 0x3c0   : > { %v8163_v4 = vpop.eup %8162  ;;  %v2293_v12 = vadd.f32 %v2292_v58, %v2291_v3  ;;  %v2298_v33 = vrot.slane %v2297_v59, 2  ;;  %v10071_v15 = vsel %vm1011_vm4, 0.0, %v8161_v30  ;;  %v2210_v16 = vmul.f32 1.442695, %v2170_v32 }
 0x3c1   : > { %v8165_v22 = vpop.eup %8164  ;;  %v2306_v35 = vrot.slane %v2305_v61, 1  ;;  %v2311_v36 = vadd.f32 %v2310_v1, %v2309_v18  ;;  %v2326_v19 = vrot.slane %v10071_v15, 4  ;;  %v10076_v13 = vsel %vm1009_vm5, 0.0, %v8163_v4 }
 0x3c2   : > { %v8167_v31 = vpop.eup %8166  ;;  %v2294_v27 = vrot.slane %v2293_v12, 1  ;;  %v2299_v38 = vadd.f32 %v2298_v33, %v2297_v59  ;;  %v2314_v3 = vrot.slane %v10076_v13, 4  ;;  %v10081_v42 = vsel %vm1012_vm6, 0.0, %v8165_v22  ;;  %v10083_v44 = vpop.f32.mrb[20].mxu1 }
 0x3c3   : > { %v2307_v46 = vadd.f32 %v2306_v35, %v2305_v61  ;;  %v2312_v56 = vrot.slane %v2311_v36, 1  ;;  %v2327_v18 = vadd.f32 %v2326_v19, %v10071_v15  ;;  %v2332_v50 = vrot.slane %v10081_v42, 4  ;;  %v10087_v58 = vpop.f32.mrb[21].mxu1 }
 0x3c4   : > { %v2295_v32 = vadd.f32 %v2294_v27, %v2293_v12  ;;  %v2300_v30 = vrot.slane %v2299_v38, 1  ;;  %v2315_v59 = vadd.f32 %v2314_v3, %v10076_v13  ;;  %v10092_v1 = vsel %vm1010_vm7, 0.0, %v8167_v31  ;;  %v10094_v4 = vpop.f32.mrb[22].mxu1 }
 0x3c5   : > { %vm2484_vm8 = vcmp.gt.f32.partialorder %v2307_v46, 0.0  ;;  %v2313_v33 = vadd.f32 %v2312_v56, %v2311_v36  ;;  %v2328_v61 = vrot.slane %v2327_v18, 2  ;;  %v2333_v22 = vadd.f32 %v2332_v50, %v10081_v42  ;;  %v10097_v35 = vpop.f32.mrb[23].mxu1 }
 0x3c6   : > { %v2516_v19 = vsel %vm2484_vm8, %v2307_v46, 1.0  ;;  %vm2482_vm9 = vcmp.gt.f32.partialorder %v2295_v32, 0.0  ;;  %v2301_v0 = vadd.f32 %v2300_v30, %v2299_v38  ;;  %v2316_v12 = vrot.slane %v2315_v59, 2 }
 0x3c7   : > { %8168 = vrcp.f32 %v2516_v19  ;;  %v2514_v27 = vsel %vm2482_vm9, %v2295_v32, 1.0  ;;  %vm2485_vm10 = vcmp.gt.f32.partialorder %v2313_v33, 0.0  ;;  %v2329_v3 = vadd.f32 %v2328_v61, %v2327_v18 }
 0x3c8   : > { %8170 = vrcp.f32 %v2514_v27  ;;  %v2517_v31 = vsel %vm2485_vm10, %v2313_v33, 1.0  ;;  %vm2483_vm11 = vcmp.gt.f32.partialorder %v2301_v0, 0.0  ;;  %v2317_v23 = vadd.f32 %v2316_v12, %v2315_v59  ;;  %v10115_v12 = vld [vmem:[%s9668_s9 + $0x60] sm:$0xff] }
 0x3c9   : > { %8172 = vrcp.f32 %v2517_v31  ;;  %v2515_v62 = vsel %vm2483_vm11, %v2301_v0, 1.0  ;;  %v2330_v36 = vrot.slane %v2329_v3, 1  ;;  %v2334_v56 = vrot.slane %v2333_v22, 2  ;;  %12834 = vst [vmem:[#allocation55_spill] sm:$0xff] %v10115_v12 }
 0x3ca   : > { %8174 = vrcp.f32 %v2515_v62  ;;  %v2318_v50 = vrot.slane %v2317_v23, 1  ;;  %v2320_v24 = vrot.slane %v10092_v1, 4  ;;  %v2173_v38 = vsub.f32 %v10000_v28, %v10065_v53  ;;  %v10102_v46 = vpop.f32.mrb[24].mxu1 }
 0x3cb   : > { %v2331_v32 = vadd.f32 %v2330_v36, %v2329_v3  ;;  %v2335_v30 = vadd.f32 %v2334_v56, %v2333_v22  ;;  %8176 = vpow2.f32 %v2214_v17  ;;  %v10104_v18 = vpop.f32.mrb[25].mxu1  ;;  %v2171_v61 = vsub.f32 %v10005_v54, %v10067_v55  ;;  %v10119_v55 = vld [vmem:[%s9668_s9 + $0x78] sm:$0xff] }
 0x3cc   : > { %v2319_v33 = vadd.f32 %v2318_v50, %v2317_v23  ;;  %v2321_v59 = vadd.f32 %v2320_v24, %v10092_v1  ;;  %8178 = vpow2.f32 %v2210_v16  ;;  %v10107_v0 = vpop.f32.mrb[26].mxu1  ;;  %v2054_v28 = vrot.slane %v10028_v10, 4  ;;  %12835 = vst [vmem:[#allocation56_spill] sm:$0xff] %v10119_v55 }
 0x3cd   : > { %vm2488_vm12 = vcmp.gt.f32.partialorder %v2331_v32, 0.0  ;;  %v2336_v62 = vrot.slane %v2335_v30, 1  ;;  %v10112_v53 = vpop.f32.mrb[27].mxu1  ;;  %v2216_v23 = vmul.f32 1.442695, %v2173_v38  ;;  %vm12734_vm15 = vcmp.lt.f32.partialorder %v9976_v60, 0.0 }
 0x3ce   : > { %v2520_v17 = vsel %vm2488_vm12, %v2331_v32, 1.0  ;;  %vm2486_vm13 = vcmp.gt.f32.partialorder %v2319_v33, 0.0  ;;  %v2322_v22 = vrot.slane %v2321_v59, 2  ;;  %v2212_v3 = vmul.f32 1.442695, %v2171_v61 }
 0x3cf   : > { %8180 = vrcp.f32 %v2520_v17  ;;  %v2518_v24 = vsel %vm2486_vm13, %v2319_v33, 1.0  ;;  %v2337_v16 = vadd.f32 %v2336_v62, %v2335_v30  ;;  %v2055_v54 = vmax.f32 %v10028_v10, %v2054_v28 }
 0x3d0   : > { %8182 = vrcp.f32 %v2518_v24  ;;  %v2323_v19 = vadd.f32 %v2322_v22, %v2321_v59  ;;  %vm12733_vm8 = vcmp.lt.f32.partialorder %v9980_v47, 0.0  ;;  %v10129_v33 = vadd.f32 %v10010_v40, %v10115_v12 }
 0x3d1   : > { %v8169_v27 = vpop.eup %8168  ;;  %vm2489_vm14 = vcmp.gt.f32.partialorder %v2337_v16, 0.0  ;;  %8184 = vpow2.f32 %v2216_v23  ;;  %v10137_v17 = vadd.f32 %v10018_v52, %v10119_v55  ;;  %v2056_v24 = vrot.slane %v2055_v54, 2 }
 0x3d2   : > { %v8171_v31 = vpop.eup %8170  ;;  %v2580_v36 = vmul.f32 %v8169_v27, %v10032_v63  ;;  %v2324_v56 = vrot.slane %v2323_v19, 1  ;;  %v10123_v50 = vpop.f32.mrb[28].mxu1  ;;  %v2521_v30 = vsel %vm2489_vm14, %v2337_v16, 1.0  ;;  %8186 = vpow2.f32 %v2212_v3 }
 0x3d3   : > { %v8173_v38 = vpop.eup %8172  ;;  %v2578_v32 = vmul.f32 %v8171_v31, %v10037_v6  ;;  %v10131_v59 = vpop.f32.mrb[29].mxu1  ;;  %8188 = vrcp.f32 %v2521_v30  ;;  %vm12681_vm10 = vcmp.lt.f32.partialorder %v9984_v9, 0.0  ;;  %v2060_v14 = vrot.slane %v10137_v17, 4 }
 0x3d4   : > { %v8175_v62 = vpop.eup %8174  ;;  %v2612_v63 = vmul.f32 %v2580_v36, %v9738_v34  ;;  %v2581_v61 = vmul.f32 %v8173_v38, %v10043_v21  ;;  %v2325_v28 = vadd.f32 %v2324_v56, %v2323_v19  ;;  %v10139_v6 = vpop.f32.mrb[30].mxu1  ;;  %vm12680_vm11 = vcmp.lt.f32.partialorder %v9991_v5, 0.0 }
 0x3d5   : > { %v8177_v22 = vpop.eup %8176  ;;  %v2610_v23 = vmul.f32 %v2578_v32, %v9738_v34  ;;  %v2579_v40 = vmul.f32 %v8175_v62, %v10051_v11  ;;  %v10143_v16 = vpop.f32.mrb[31].mxu1  ;;  %v2042_v11 = vrot.slane %v10129_v33, 4  ;;  %vm12677_vm14 = vcmp.lt.f32.partialorder %v10016_v48, 0.0 }
 0x3d6   : > { %v8179_v27 = vpop.eup %8178  ;;  %v2654_v31 = vrot.slane %v2612_v63, 4  ;;  %v2613_v21 = vmul.f32 %v2581_v61, %v9738_v34  ;;  %v10148_v52 = vsel %vm12734_vm15, 0.0, %v8177_v22  ;;  %vm2487_vm9 = vcmp.gt.f32.partialorder %v2325_v28, 0.0 }
 0x3d7   : > { %v2642_v19 = vrot.slane %v2610_v23, 4  ;;  %v2611_v36 = vmul.f32 %v2579_v40, %v9738_v34  ;;  %v2350_v56 = vrot.slane %v10148_v52, 4  ;;  %v10155_v32 = vsel %vm12733_vm8, 0.0, %v8179_v27  ;;  %v10162_v27 = vld [vmem:[%s9668_s9 + $0x68] sm:$0xff] }
 0x3d8   : > { %v2655_v3 = vadd.f32 %v2654_v31, %v2612_v63  ;;  %v2660_v38 = vrot.slane %v2613_v21, 4  ;;  %v2338_v60 = vrot.slane %v10155_v32, 4  ;;  %v2057_v63 = vmax.f32 %v2055_v54, %v2056_v24  ;;  %12836 = vst [vmem:[#allocation57_spill] sm:$0xff] %v10162_v27 }
 0x3d9   : > { %v8181_v30 = vpop.eup %8180  ;;  %v2643_v62 = vadd.f32 %v2642_v19, %v2610_v23  ;;  %v2648_v61 = vrot.slane %v2611_v36, 4  ;;  %v2351_v22 = vadd.f32 %v2350_v56, %v10148_v52  ;;  %v2519_v19 = vsel %vm2487_vm9, %v2325_v28, 1.0 }
 0x3da   : > { %v8183_v40 = vpop.eup %8182  ;;  %v2656_v26 = vrot.slane %v2655_v3, 2  ;;  %v2661_v43 = vadd.f32 %v2660_v38, %v2613_v21  ;;  %v2584_v41 = vmul.f32 %v8181_v30, %v10071_v15  ;;  %v2339_v56 = vadd.f32 %v2338_v60, %v10155_v32 }
 0x3db   : > { %v2644_v31 = vrot.slane %v2643_v62, 2  ;;  %v2649_v25 = vadd.f32 %v2648_v61, %v2611_v36  ;;  %v2352_v39 = vrot.slane %v2351_v22, 2  ;;  %v8185_v47 = vpop.eup %8184  ;;  %v2582_v23 = vmul.f32 %v8183_v40, %v10076_v13 }
 0x3dc   : > { %v2657_v21 = vadd.f32 %v2656_v26, %v2655_v3  ;;  %v2662_v38 = vrot.slane %v2661_v43, 2  ;;  %v10169_v15 = vmul.f32 %v2584_v41, %v9738_v34  ;;  %v2058_v24 = vrot.slane %v2057_v63, 1  ;;  %v8187_v28 = vpop.eup %8186 }
 0x3dd   : > { %v2353_v54 = vadd.f32 %v2352_v39, %v2351_v22  ;;  %v2043_v36 = vmax.f32 %v10129_v33, %v2042_v11  ;;  %v10175_v13 = vadd.f32 %v10022_v57, %v10162_v27  ;;  %v10177_v30 = vadd.f32 %v2644_v31, %v2643_v62  ;;  %v8189_v41 = vpop.eup %8188 }
 0x3de   : > { %v2650_v60 = vrot.slane %v2649_v25, 2  ;;  %v10181_v26 = vsel %vm12681_vm10, 0.0, %v8185_v47  ;;  %v10184_v39 = vmul.f32 %v2582_v23, %v9738_v34  ;;  %8190 = vrcp.f32 %v2519_v19  ;;  %v10210_v23 = vld [vmem:[%s9668_s9 + $0x90] sm:$0xff] }
 0x3df   : > { %v2354_v61 = vrot.slane %v2353_v54, 1  ;;  %v2340_v3 = vrot.slane %v2339_v56, 2  ;;  %v2061_v11 = vmax.f32 %v10137_v17, %v2060_v14  ;;  %v2658_v22 = vrot.slane %v2657_v21, 1  ;;  %12837 = vst [vmem:[#allocation58_spill] sm:$0xff] %v10210_v23 }
 0x3e0   : > { %v10187_v57 = vadd.f32 %v2662_v38, %v2661_v43  ;;  %v2356_v7 = vrot.slane %v10181_v26, 4  ;;  %v10193_v47 = vsel %vm12680_vm11, 0.0, %v8187_v28  ;;  %v2059_v9 = vmax.f32 %v2057_v63, %v2058_v24 }
 0x3e1   : > { %v2355_v40 = vadd.f32 %v2354_v61, %v2353_v54  ;;  %v2341_v31 = vadd.f32 %v2340_v3, %v2339_v56  ;;  %v10196_v19 = vadd.f32 %v2650_v60, %v2649_v25  ;;  %v10199_v14 = vmul.f32 %v8189_v41, %v10081_v42 }
 0x3e2   : > { %v2357_v54 = vadd.f32 %v2356_v7, %v10181_v26  ;;  %v2344_v56 = vrot.slane %v10193_v47, 4  ;;  %v2176_v63 = vsub.f32 %v10028_v10, %v2059_v9  ;;  %v2044_v24 = vrot.slane %v2043_v36, 2  ;;  %v10213_v9 = vld [vmem:[%s9668_s9 + $0x80] sm:$0xff]  ;;  %v10241_v10 = vld [vmem:[%s9668_s9 + $0x88] sm:$0xff] }
 0x3e3   : > { %vm2492_vm12 = vcmp.gt.f32.partialorder %v2355_v40, 0.0  ;;  %v2342_v38 = vrot.slane %v2341_v31, 1  ;;  %v2062_v60 = vrot.slane %v2061_v11, 2  ;;  %v10206_v41 = vadd.f32 %v2658_v22, %v2657_v21  ;;  %12838 = vst [vmem:[#allocation59_spill] sm:$0xff] %v10213_v9  ;;  %v10218_v22 = vld [vmem:[%s9668_s9 + $0x98] sm:$0xff]  ;;  %12840 = vst [vmem:[#allocation61_spill] sm:$0xff] %v10241_v10 }
 0x3e4   : > { %v2524_v43 = vsel %vm2492_vm12, %v2355_v40, 1.0  ;;  %v2358_v28 = vrot.slane %v2357_v54, 2  ;;  %v2345_v42 = vadd.f32 %v2344_v56, %v10193_v47  ;;  %v2222_v3 = vmul.f32 1.442695, %v2176_v63  ;;  %12839 = vst [vmem:[#allocation60_spill] sm:$0xff] %v10218_v22 }
 0x3e5   : > { %8192 = vrcp.f32 %v2524_v43  ;;  %v2343_v25 = vadd.f32 %v2342_v38, %v2341_v31  ;;  %v2045_v7 = vmax.f32 %v2043_v36, %v2044_v24  ;;  %v2048_v40 = vrot.slane %v10175_v13, 4 }
 0x3e6   : > { %v2359_v62 = vadd.f32 %v2358_v28, %v2357_v54  ;;  %v2346_v61 = vrot.slane %v2345_v42, 2  ;;  %v2063_v43 = vmax.f32 %v2061_v11, %v2062_v60  ;;  %8194 = vpow2.f32 %v2222_v3 }
 0x3e7   : > { %vm2490_vm13 = vcmp.gt.f32.partialorder %v2343_v25, 0.0  ;;  %v2046_v21 = vrot.slane %v2045_v7, 1  ;;  %v2049_v11 = vmax.f32 %v10175_v13, %v2048_v40  ;;  %v10223_v24 = vadd.f32 %v10045_v29, %v10210_v23 }
 0x3e8   : > { %v2522_v31 = vsel %vm2490_vm13, %v2343_v25, 1.0  ;;  %v8191_v36 = vpop.eup %8190  ;;  %v2360_v38 = vrot.slane %v2359_v62, 1  ;;  %v2347_v56 = vadd.f32 %v2346_v61, %v2345_v42  ;;  %v2064_v54 = vrot.slane %v2063_v43, 1 }
 0x3e9   : > { %8196 = vrcp.f32 %v2522_v31  ;;  %v2047_v63 = vmax.f32 %v2045_v7, %v2046_v21  ;;  %v10227_v25 = vadd.f32 %v10053_v37, %v10213_v9  ;;  %v10231_v31 = vadd.f32 %v10057_v8, %v10218_v22 }
 0x3ea   : > { %v2361_v28 = vadd.f32 %v2360_v38, %v2359_v62  ;;  %v2348_v60 = vrot.slane %v2347_v56, 1  ;;  %v2065_v3 = vmax.f32 %v2063_v43, %v2064_v54  ;;  %v2050_v42 = vrot.slane %v2049_v11, 2 }
 0x3eb   : > { %v2174_v61 = vsub.f32 %v10129_v33, %v2047_v63  ;;  %v2078_v7 = vrot.slane %v10223_v24, 4  ;;  %v2066_v29 = vrot.slane %v10227_v25, 4  ;;  %v2084_v62 = vrot.slane %v10231_v31, 4 }
 0x3ec   : > { %vm2493_vm9 = vcmp.gt.f32.partialorder %v2361_v28, 0.0  ;;  %v2349_v40 = vadd.f32 %v2348_v60, %v2347_v56  ;;  %v2177_v37 = vsub.f32 %v10137_v17, %v2065_v3  ;;  %v2051_v54 = vmax.f32 %v2049_v11, %v2050_v42 }
 0x3ed   : > { %v2525_v43 = vsel %vm2493_vm9, %v2361_v28, 1.0  ;;  %v2218_v38 = vmul.f32 1.442695, %v2174_v61  ;;  %v2079_v8 = vmax.f32 %v10223_v24, %v2078_v7  ;;  %vm12676_vm13 = vcmp.lt.f32.partialorder %v10115_v12, 0.0 }
 0x3ee   : > { %8198 = vrcp.f32 %v2525_v43  ;;  %vm2491_vm12 = vcmp.gt.f32.partialorder %v2349_v40, 0.0  ;;  %v2224_v63 = vmul.f32 1.442695, %v2177_v37  ;;  %v2052_v17 = vrot.slane %v2051_v54, 1 }
 0x3ef   : > { %v8193_v21 = vpop.eup %8192  ;;  %v2523_v5 = vsel %vm2491_vm12, %v2349_v40, 1.0  ;;  %8200 = vpow2.f32 %v2218_v38  ;;  %v2080_v56 = vrot.slane %v2079_v8, 2  ;;  %v2583_v60 = vmul.f32 %v8191_v36, %v10092_v1 }
 0x3f0   : > { %v2588_v33 = vmul.f32 %v8193_v21, %v10148_v52  ;;  %8202 = vrcp.f32 %v2523_v5  ;;  %v2067_v11 = vmax.f32 %v10227_v25, %v2066_v29  ;;  %v2085_v28 = vmax.f32 %v10231_v31, %v2084_v62  ;;  %v8195_v3 = vpop.eup %8194 }
 0x3f1   : > { %vm12678_vm9 = vcmp.lt.f32.partialorder %v10119_v55, 0.0  ;;  %8204 = vpow2.f32 %v2224_v63  ;;  %v2053_v52 = vmax.f32 %v2051_v54, %v2052_v17  ;;  %v2081_v61 = vmax.f32 %v2079_v8, %v2080_v56 }
 0x3f2   : > { %v10250_v42 = vadd.f32 %v10061_v20, %v10241_v10  ;;  %v2620_v40 = vmul.f32 %v2588_v33, %v9749_v45  ;;  %v10255_v5 = vsel %vm12677_vm14, 0.0, %v8195_v3  ;;  %v2068_v1 = vrot.slane %v2067_v11, 2 }
 0x3f3   : > { %v8197_v7 = vpop.eup %8196  ;;  %v2086_v36 = vrot.slane %v2085_v28, 2  ;;  %v2374_v37 = vrot.slane %v10255_v5, 4  ;;  %v2175_v62 = vsub.f32 %v10175_v13, %v2053_v52  ;;  %v2082_v21 = vrot.slane %v2081_v61, 1 }
 0x3f4   : > { %v2586_v29 = vmul.f32 %v8197_v7, %v10155_v32  ;;  %v2615_v43 = vmul.f32 %v2583_v60, %v9738_v34  ;;  %v2069_v20 = vmax.f32 %v2067_v11, %v2068_v1  ;;  %v2072_v54 = vrot.slane %v10250_v42, 4 }
 0x3f5   : > { %v2087_v38 = vmax.f32 %v2085_v28, %v2086_v36  ;;  %v2375_v33 = vadd.f32 %v2374_v37, %v10255_v5  ;;  %v2220_v63 = vmul.f32 1.442695, %v2175_v62  ;;  %v2083_v17 = vmax.f32 %v2081_v61, %v2082_v21 }
 0x3f6   : > { %v2618_v8 = vmul.f32 %v2586_v29, %v9749_v45  ;;  %v2702_v56 = vrot.slane %v2620_v40, 4  ;;  %v2070_v3 = vrot.slane %v2069_v20, 1  ;;  %v2073_v7 = vmax.f32 %v10250_v42, %v2072_v54 }
 0x3f7   : > { %v2088_v32 = vrot.slane %v2087_v38, 1  ;;  %v2376_v13 = vrot.slane %v2375_v33, 2  ;;  %vm12679_vm12 = vcmp.lt.f32.partialorder %v10162_v27, 0.0  ;;  %8206 = vpow2.f32 %v2220_v63 }
 0x3f8   : > { %v2690_v48 = vrot.slane %v2618_v8, 4  ;;  %v2180_v60 = vsub.f32 %v10223_v24, %v2083_v17  ;;  %v8199_v11 = vpop.eup %8198  ;;  %v12841_v28 = vrot.slane %v10177_v30, 1  ;;  %v10274_v61 = vmul.f32 %v10199_v14, %v9738_v34 }
 0x3f9   : > { %v2071_v1 = vmax.f32 %v2069_v20, %v2070_v3  ;;  %v2089_v36 = vmax.f32 %v2087_v38, %v2088_v32  ;;  %v8201_v29 = vpop.eup %8200  ;;  %v2377_v62 = vadd.f32 %v2376_v13, %v2375_v33  ;;  %v2074_v54 = vrot.slane %v2073_v7, 2 }
 0x3fa   : > { %v10270_v52 = vadd.f32 %v12841_v28, %v10177_v30  ;;  %v2691_v37 = vadd.f32 %v2690_v48, %v2618_v8  ;;  %v2230_v21 = vmul.f32 1.442695, %v2180_v60  ;;  %v8203_v63 = vpop.eup %8202  ;;  %v2652_v24 = vrot.slane %v10196_v19, 1 }
 0x3fb   : > { %v10279_v17 = vsel %vm12676_vm13, 0.0, %v8201_v29  ;;  %v2178_v30 = vsub.f32 %v10227_v25, %v2071_v1  ;;  %v2181_v28 = vsub.f32 %v10231_v31, %v2089_v36  ;;  %v8205_v34 = vpop.eup %8204  ;;  %v12842_v14 = vrot.slane %v10184_v39, 4 }
 0x3fc   : > { %v2672_v48 = vrot.slane %v2615_v43, 4  ;;  %v2703_v38 = vadd.f32 %v2702_v56, %v2620_v40  ;;  %v2589_v8 = vmul.f32 %v8199_v11, %v10181_v26  ;;  %v2362_v33 = vrot.slane %v10279_v17, 4 }
 0x3fd   : > { %v10286_v20 = vadd.f32 %v12842_v14, %v10184_v39  ;;  %v10292_v3 = vsel %vm12678_vm9, 0.0, %v8205_v34  ;;  %vm12731_vm13 = vcmp.lt.f32.partialorder %v10210_v23, 0.0  ;;  %8208 = vpow2.f32 %v2230_v21 }
 0x3fe   : > { %v2226_v25 = vmul.f32 1.442695, %v2178_v30  ;;  %v2692_v31 = vrot.slane %v2691_v37, 2  ;;  %v2587_v32 = vmul.f32 %v8203_v63, %v10193_v47  ;;  %v2378_v39 = vrot.slane %v2377_v62, 1  ;;  %v10305_v47 = vld [vmem:[%s9668_s9 + $0xb0] sm:$0xff] }
 0x3ff   : > { %v2075_v13 = vmax.f32 %v2073_v7, %v2074_v54  ;;  %v2363_v40 = vadd.f32 %v2362_v33, %v10279_v17  ;;  %v2380_v26 = vrot.slane %v10292_v3, 4  ;;  %vm12710_vm14 = vcmp.lt.f32.partialorder %v10213_v9, 0.0  ;;  %12843 = vst [vmem:[#allocation62_spill] sm:$0xff] %v10305_v47  ;;  %v10370_v9 = vld [vmem:[%s9668_s9 + $0xa8] sm:$0xff] }
 0x400   : > { %8210 = vpow2.f32 %v2226_v25  ;;  %v2232_v56 = vmul.f32 1.442695, %v2181_v28  ;;  %v10300_v60 = vadd.f32 %v2652_v24, %v10196_v19  ;;  %v2704_v1 = vrot.slane %v2703_v38, 2  ;;  %v10315_v28 = vld [vmem:[%s9668_s9 + $0xa0] sm:$0xff]  ;;  %12846 = vst [vmem:[#allocation65_spill] sm:$0xff] %v10370_v9 }
 0x401   : > { %v2621_v36 = vmul.f32 %v2589_v8, %v9749_v45  ;;  %v10307_v7 = vadd.f32 %v2672_v48, %v2615_v43  ;;  %v2364_v29 = vrot.slane %v2363_v40, 2  ;;  %v2381_v21 = vadd.f32 %v2380_v26, %v10292_v3  ;;  %v8207_v54 = vpop.eup %8206  ;;  %12844 = vst [vmem:[#allocation63_spill] sm:$0xff] %v10315_v28 }
 0x402   : > { %vm12695_vm9 = vcmp.lt.f32.partialorder %v10218_v22, 0.0  ;;  %8212 = vpow2.f32 %v2232_v56  ;;  %v10311_v63 = vadd.f32 %v2692_v31, %v2691_v37  ;;  %v2619_v19 = vmul.f32 %v2587_v32, %v9749_v45 }
 0x403   : > { %v2379_v24 = vadd.f32 %v2378_v39, %v2377_v62  ;;  %v2076_v30 = vrot.slane %v2075_v13, 1  ;;  %v2365_v34 = vadd.f32 %v2364_v29, %v2363_v40  ;;  %v2382_v14 = vrot.slane %v2381_v21, 2 }
 0x404   : > { %v10319_v43 = vsel %vm12679_vm12, 0.0, %v8207_v54  ;;  %v10323_v48 = vadd.f32 %v10083_v44, %v10305_v47  ;;  %v10325_v8 = vadd.f32 %v2704_v1, %v2703_v38  ;;  %v2708_v37 = vrot.slane %v2621_v36, 4 }
 0x405   : > { %v2368_v33 = vrot.slane %v10319_v43, 4  ;;  %v2077_v25 = vmax.f32 %v2075_v13, %v2076_v30  ;;  %v2366_v62 = vrot.slane %v2365_v34, 1  ;;  %v2383_v31 = vadd.f32 %v2382_v14, %v2381_v21 }
 0x406   : > { %v2102_v32 = vrot.slane %v10323_v48, 4  ;;  %v10331_v39 = vadd.f32 %v10087_v58, %v10315_v28  ;;  %v2696_v26 = vrot.slane %v2619_v19, 4  ;;  %vm2496_vm12 = vcmp.gt.f32.partialorder %v2379_v24, 0.0 }
 0x407   : > { %v2369_v44 = vadd.f32 %v2368_v33, %v10319_v43  ;;  %v2179_v38 = vsub.f32 %v10250_v42, %v2077_v25  ;;  %v8209_v56 = vpop.eup %8208  ;;  %v2367_v1 = vadd.f32 %v2366_v62, %v2365_v34  ;;  %v2384_v29 = vrot.slane %v2383_v31, 1 }
 0x408   : > { %v2103_v13 = vmax.f32 %v10323_v48, %v2102_v32  ;;  %v10339_v54 = vsel %vm12731_vm13, 0.0, %v8209_v56  ;;  %v2090_v30 = vrot.slane %v10331_v39, 4  ;;  %vm12694_vm10 = vcmp.lt.f32.partialorder %v10241_v10, 0.0 }
 0x409   : > { %v2370_v21 = vrot.slane %v2369_v44, 2  ;;  %v2228_v58 = vmul.f32 1.442695, %v2179_v38  ;;  %vm2494_vm11 = vcmp.gt.f32.partialorder %v2367_v1, 0.0  ;;  %v2385_v40 = vadd.f32 %v2384_v29, %v2383_v31 }
 0x40a   : > { %v8211_v14 = vpop.eup %8210  ;;  %v2398_v33 = vrot.slane %v10339_v54, 4  ;;  %v2104_v42 = vrot.slane %v2103_v13, 2  ;;  %v2526_v25 = vsel %vm2494_vm11, %v2367_v1, 1.0  ;;  %v10348_v38 = vadd.f32 %v2708_v37, %v2621_v36 }
 0x40b   : > { %v2371_v34 = vadd.f32 %v2370_v21, %v2369_v44  ;;  %v10345_v62 = vsel %vm12710_vm14, 0.0, %v8211_v14  ;;  %8214 = vpow2.f32 %v2228_v58  ;;  %v2528_v56 = vsel %vm2496_vm12, %v2379_v24, 1.0  ;;  %v10358_v21 = vld [vmem:[%s9668_s9 + $0xb8] sm:$0xff] }
 0x40c   : > { %v8213_v32 = vpop.eup %8212  ;;  %v2399_v31 = vadd.f32 %v2398_v33, %v10339_v54  ;;  %v2386_v29 = vrot.slane %v10345_v62, 4  ;;  %v2697_v11 = vadd.f32 %v2696_v26, %v2619_v19  ;;  %v2105_v1 = vmax.f32 %v2103_v13, %v2104_v42  ;;  %12845 = vst [vmem:[#allocation64_spill] sm:$0xff] %v10358_v21 }
 0x40d   : > { %v2372_v55 = vrot.slane %v2371_v34, 1  ;;  %v10355_v44 = vsel %vm12695_vm9, 0.0, %v8213_v32  ;;  %8216 = vrcp.f32 %v2526_v25  ;;  %vm2497_vm11 = vcmp.gt.f32.partialorder %v2385_v40, 0.0 }
 0x40e   : > { %v2400_v58 = vrot.slane %v2399_v31, 2  ;;  %v2387_v36 = vadd.f32 %v2386_v29, %v10345_v62  ;;  %v2404_v24 = vrot.slane %v10355_v44, 4  ;;  %v2106_v14 = vrot.slane %v2105_v1, 1 }
 0x40f   : > { %v2373_v37 = vadd.f32 %v2372_v55, %v2371_v34  ;;  %v2091_v19 = vmax.f32 %v10331_v39, %v2090_v30  ;;  %8218 = vrcp.f32 %v2528_v56  ;;  %v10365_v13 = vadd.f32 %v10094_v4, %v10358_v21 }
 0x410   : > { %v2401_v26 = vadd.f32 %v2400_v58, %v2399_v31  ;;  %v2388_v33 = vrot.slane %v2387_v36, 2  ;;  %v2529_v42 = vsel %vm2497_vm11, %v2385_v40, 1.0  ;;  %v2405_v25 = vadd.f32 %v2404_v24, %v10355_v44 }
 0x411   : > { %v2107_v32 = vmax.f32 %v2105_v1, %v2106_v14  ;;  %v2092_v22 = vrot.slane %v2091_v19, 2  ;;  %vm2495_vm12 = vcmp.gt.f32.partialorder %v2373_v37, 0.0  ;;  %v2108_v29 = vrot.slane %v10365_v13, 4 }
 0x412   : > { %v2402_v55 = vrot.slane %v2401_v26, 1  ;;  %v2389_v34 = vadd.f32 %v2388_v33, %v2387_v36  ;;  %v2698_v30 = vrot.slane %v2697_v11, 2  ;;  %v2406_v56 = vrot.slane %v2405_v25, 2 }
 0x413   : > { %v2184_v31 = vsub.f32 %v10323_v48, %v2107_v32  ;;  %v2093_v58 = vmax.f32 %v2091_v19, %v2092_v22  ;;  %8220 = vrcp.f32 %v2529_v42  ;;  %v2109_v40 = vmax.f32 %v10365_v13, %v2108_v29 }
 0x414   : > { %v2403_v4 = vadd.f32 %v2402_v55, %v2401_v26  ;;  %v2390_v23 = vrot.slane %v2389_v34, 1  ;;  %v2527_v1 = vsel %vm2495_vm12, %v2373_v37, 1.0  ;;  %v2407_v14 = vadd.f32 %v2406_v56, %v2405_v25 }
 0x415   : > { %v8215_v24 = vpop.eup %8214  ;;  %v2094_v27 = vrot.slane %v2093_v58, 1  ;;  %v10376_v36 = vadd.f32 %v10097_v35, %v10370_v9  ;;  %v2110_v22 = vrot.slane %v2109_v40, 2  ;;  %v2238_v42 = vmul.f32 1.442695, %v2184_v31  ;;  %v10388_v31 = vld [vmem:[%s9668_s9 + $0xd0] sm:$0xff] }
 0x416   : > { %vm2500_vm11 = vcmp.gt.f32.partialorder %v2403_v4, 0.0  ;;  %v2391_v33 = vadd.f32 %v2390_v23, %v2389_v34  ;;  %v10380_v12 = vsel %vm12694_vm10, 0.0, %v8215_v24  ;;  %v2408_v19 = vrot.slane %v2407_v14, 1  ;;  %12847 = vst [vmem:[#allocation66_spill] sm:$0xff] %v10388_v31 }
 0x417   : > { %v2532_v48 = vsel %vm2500_vm11, %v2403_v4, 1.0  ;;  %v2392_v26 = vrot.slane %v10380_v12, 4  ;;  %v8217_v37 = vpop.eup %8216  ;;  %v2095_v25 = vmax.f32 %v2093_v58, %v2094_v27  ;;  %v2111_v32 = vmax.f32 %v2109_v40, %v2110_v22 }
 0x418   : > { %8222 = vrcp.f32 %v2532_v48  ;;  %vm2498_vm12 = vcmp.gt.f32.partialorder %v2391_v33, 0.0  ;;  %v10383_v35 = vadd.f32 %v2698_v30, %v2697_v11  ;;  %v2409_v55 = vadd.f32 %v2408_v19, %v2407_v14 }
 0x419   : > { %8224 = vrcp.f32 %v2527_v1  ;;  %v2530_v23 = vsel %vm2498_vm12, %v2391_v33, 1.0  ;;  %v8219_v34 = vpop.eup %8218  ;;  %v2393_v29 = vadd.f32 %v2392_v26, %v10380_v12  ;;  %v2182_v56 = vsub.f32 %v10331_v39, %v2095_v25  ;;  %v10394_v1 = vld [vmem:[%s9668_s9 + $0xc0] sm:$0xff]  ;;  %v10403_v33 = vld [vmem:[%s9668_s9 + $0xd8] sm:$0xff] }
 0x41a   : > { %8226 = vrcp.f32 %v2530_v23  ;;  %v2112_v4 = vrot.slane %v2111_v32, 1  ;;  %v2590_v24 = vmul.f32 %v8217_v37, %v10279_v17  ;;  %vm2501_vm11 = vcmp.gt.f32.partialorder %v2409_v55, 0.0  ;;  %12848 = vst [vmem:[#allocation67_spill] sm:$0xff] %v10394_v1  ;;  %12849 = vst [vmem:[#allocation68_spill] sm:$0xff] %v10403_v33 }
 0x41b   : > { %vm12709_vm10 = vcmp.lt.f32.partialorder %v10305_v47, 0.0  ;;  %8228 = vpow2.f32 %v2238_v42  ;;  %v2096_v27 = vrot.slane %v10376_v36, 4  ;;  %v2533_v11 = vsel %vm2501_vm11, %v2409_v55, 1.0 }
 0x41c   : > { %v2394_v30 = vrot.slane %v2393_v29, 2  ;;  %v2234_v58 = vmul.f32 1.442695, %v2182_v56  ;;  %v2113_v40 = vmax.f32 %v2111_v32, %v2112_v4  ;;  %8230 = vrcp.f32 %v2533_v11 }
 0x41d   : > { %v2097_v14 = vmax.f32 %v10376_v36, %v2096_v27  ;;  %v10400_v17 = vadd.f32 %v10102_v46, %v10388_v31  ;;  %v8221_v22 = vpop.eup %8220  ;;  %vm12702_vm12 = vcmp.lt.f32.partialorder %v10315_v28, 0.0  ;;  %v10411_v25 = vadd.f32 %v10104_v18, %v10394_v1  ;;  %v2835_v27 = vld [vmem:[#allocation11 + $0x8] sm:$0xff]  ;;  %v2837_v18 = vld [vmem:[#allocation11 + $0x18] sm:$0xff] }
 0x41e   : > { %v2395_v48 = vadd.f32 %v2394_v30, %v2393_v29  ;;  %8232 = vpow2.f32 %v2234_v58  ;;  %v2185_v19 = vsub.f32 %v10365_v13, %v2113_v40  ;;  %v10414_v46 = vmul.f32 %v2590_v24, %v9749_v45 }
 0x41f   : > { %v2098_v42 = vrot.slane %v2097_v14, 2  ;;  %v2126_v37 = vrot.slane %v10400_v17, 4  ;;  %v10418_v55 = vadd.f32 %v10107_v0, %v10403_v33  ;;  %v10421_v13 = vmul.f32 %v8219_v34, %v10255_v5 }
 0x420   : > { %v2396_v32 = vrot.slane %v2395_v48, 1  ;;  %v2240_v23 = vmul.f32 1.442695, %v2185_v19  ;;  %v2114_v4 = vrot.slane %v10411_v25, 4  ;;  %v10426_v24 = vmul.f32 %v8221_v22, %v10292_v3 }
 0x421   : > { %v2099_v29 = vmax.f32 %v2097_v14, %v2098_v42  ;;  %v2127_v56 = vmax.f32 %v10400_v17, %v2126_v37  ;;  %vm12707_vm11 = vcmp.lt.f32.partialorder %v10358_v21, 0.0  ;;  %v2132_v0 = vrot.slane %v10418_v55, 4 }
 0x422   : > { %v8223_v11 = vpop.eup %8222  ;;  %v2397_v30 = vadd.f32 %v2396_v32, %v2395_v48  ;;  %8234 = vpow2.f32 %v2240_v23  ;;  %v2115_v14 = vmax.f32 %v10411_v25, %v2114_v4  ;;  %v7801_v22 = vpack.c.bf16 %v2837_v18, %v2835_v27 }
 0x423   : > { %v8225_v58 = vpop.eup %8224  ;;  %v2596_v5 = vmul.f32 %v8223_v11, %v10339_v54  ;;  %v2100_v34 = vrot.slane %v2099_v29, 1  ;;  %v2128_v40 = vrot.slane %v2127_v56, 2  ;;  %v2133_v3 = vmax.f32 %v10418_v55, %v2132_v0 }
 0x424   : > { %v8227_v19 = vpop.eup %8226  ;;  %vm2499_vm9 = vcmp.gt.f32.partialorder %v2397_v30, 0.0  ;;  %v2116_v11 = vrot.slane %v2115_v14, 2  ;;  %7802 = vmatprep.subr.bf16.mxu0 %v7801_v22  ;;  %vm12711_vm14 = vcmp.lt.f32.partialorder %v10394_v1, 0.0  ;;  %vm12735_vm8 = vcmask 1047559  }
 0x425   : > { %v8229_v48 = vpop.eup %8228  ;;  %v2628_v37 = vmul.f32 %v2596_v5, %v9758_v51  ;;  %v2594_v32 = vmul.f32 %v8227_v19, %v10345_v62  ;;  %v2531_v23 = vsel %vm2499_vm9, %v2397_v30, 1.0  ;;  %v2101_v39 = vmax.f32 %v2099_v29, %v2100_v34  ;;  %v10444_v5 = vld [vmem:[%s9668_s9 + $0xc8] sm:$0xff] }
 0x426   : > { %8236 = vrcp.f32 %v2531_v23  ;;  %v10438_v54 = vsel %vm12709_vm10, 0.0, %v8229_v48  ;;  %v2129_v4 = vmax.f32 %v2127_v56, %v2128_v40  ;;  %v8231_v42 = vpop.eup %8230  ;;  %12850 = vst [vmem:[#allocation69_spill] sm:$0xff] %v10444_v5  ;;  %v2591_v29 = vmul.f32 %v8225_v58, %v10319_v43 }
 0x427   : > { %v2750_v26 = vrot.slane %v2628_v37, 4  ;;  %v2626_v27 = vmul.f32 %v2594_v32, %v9758_v51  ;;  %v2422_v18 = vrot.slane %v10438_v54, 4  ;;  %v2183_v0 = vsub.f32 %v10376_v36, %v2101_v39 }
 0x428   : > { %v8233_v62 = vpop.eup %8232  ;;  %v2597_v30 = vmul.f32 %v8231_v42, %v10355_v44  ;;  %v2130_v34 = vrot.slane %v2129_v4, 1  ;;  %v2117_v19 = vmax.f32 %v2115_v14, %v2116_v11  ;;  %v10456_v23 = vadd.f32 %v10112_v53, %v10444_v5 }
 0x429   : > { %v2751_v56 = vadd.f32 %v2750_v26, %v2628_v37  ;;  %v2738_v40 = vrot.slane %v2626_v27, 4  ;;  %v2423_v22 = vadd.f32 %v2422_v18, %v10438_v54  ;;  %v10451_v48 = vsel %vm12702_vm12, 0.0, %v8233_v62 }
 0x42a   : > { %v2410_v32 = vrot.slane %v10451_v48, 4  ;;  %v2236_v36 = vmul.f32 1.442695, %v2183_v0  ;;  %v2131_v39 = vmax.f32 %v2129_v4, %v2130_v34  ;;  %v2629_v43 = vmul.f32 %v2597_v30, %v9758_v51 }
 0x42b   : > { %v2424_v44 = vrot.slane %v2423_v22, 2  ;;  %v2118_v58 = vrot.slane %v2117_v19, 1  ;;  %v2134_v26 = vrot.slane %v2133_v3, 2  ;;  %v2752_v42 = vrot.slane %v2751_v56, 2 }
 0x42c   : > { %v8235_v14 = vpop.eup %8234  ;;  %v2411_v37 = vadd.f32 %v2410_v32, %v10451_v48  ;;  %vm12730_vm9 = vcmp.lt.f32.partialorder %v10370_v9, 0.0  ;;  %8238 = vpow2.f32 %v2236_v36  ;;  %v2188_v11 = vsub.f32 %v10400_v17, %v2131_v39 }
 0x42d   : > { %v10463_v4 = vmul.f32 %v2591_v29, %v9749_v45  ;;  %v2739_v18 = vadd.f32 %v2738_v40, %v2626_v27  ;;  %v2425_v53 = vadd.f32 %v2424_v44, %v2423_v22  ;;  %v10467_v0 = vsel %vm12707_vm11, 0.0, %v8235_v14  ;;  %v2834_v40 = vld [vmem:[#allocation11] sm:$0xff]  ;;  %v2836_v22 = vld [vmem:[#allocation11 + $0x10] sm:$0xff] }
 0x42e   : > { %v2412_v62 = vrot.slane %v2411_v37, 2  ;;  %v2428_v30 = vrot.slane %v10467_v0, 4  ;;  %v2246_v34 = vmul.f32 1.442695, %v2188_v11  ;;  %v2120_v32 = vrot.slane %v10456_v23, 4 }
 0x42f   : > { %v2756_v28 = vrot.slane %v2629_v43, 4  ;;  %v2426_v47 = vrot.slane %v2425_v53, 1  ;;  %v2119_v36 = vmax.f32 %v2117_v19, %v2118_v58  ;;  %v2135_v10 = vmax.f32 %v2133_v3, %v2134_v26 }
 0x430   : > { %v8237_v17 = vpop.eup %8236  ;;  %v10471_v39 = vadd.f32 %v2752_v42, %v2751_v56  ;;  %v2413_v29 = vadd.f32 %v2412_v62, %v2411_v37  ;;  %v2429_v27 = vadd.f32 %v2428_v30, %v10467_v0  ;;  %vm12712_vm12 = vcmp.lt.f32.partialorder %v10388_v31, 0.0 }
 0x431   : > { %8240 = vpow2.f32 %v2246_v34  ;;  %v2740_v44 = vrot.slane %v2739_v18, 2  ;;  %v2595_v14 = vmul.f32 %v8237_v17, %v10380_v12  ;;  %v2427_v11 = vadd.f32 %v2426_v47, %v2425_v53 }
 0x432   : > { %12851 = vst [vmem:[#allocation70_spill] sm:$0xff] %v10471_v39  ;;  %v2186_v21 = vsub.f32 %v10411_v25, %v2119_v36  ;;  %v2414_v2 = vrot.slane %v2413_v29, 1  ;;  %v2430_v19 = vrot.slane %v2429_v27, 2  ;;  %v2136_v3 = vrot.slane %v2135_v10, 1 }
 0x433   : > { %v2121_v56 = vmax.f32 %v10456_v23, %v2120_v32  ;;  %v2627_v58 = vmul.f32 %v2595_v14, %v9758_v51  ;;  %vm2504_vm11 = vcmp.gt.f32.partialorder %v2427_v11, 0.0  ;;  %v7803_v42 = vpack.c.bf16 %v2836_v22, %v2834_v40  ;;  %v10484_v32 = vld [vmem:[%s9668_s9 + $0xf0] sm:$0xff] }
 0x434   : > { %v2242_v26 = vmul.f32 1.442695, %v2186_v21  ;;  %v2536_v37 = vsel %vm2504_vm11, %v2427_v11, 1.0  ;;  %v2415_v62 = vadd.f32 %v2414_v2, %v2413_v29  ;;  %v2431_v30 = vadd.f32 %v2430_v19, %v2429_v27 }
 0x435   : > { %v2137_v34 = vmax.f32 %v2135_v10, %v2136_v3  ;;  %v10479_v39 = vadd.f32 %v2756_v28, %v2629_v43  ;;  %v2744_v12 = vrot.slane %v2627_v58, 4  ;;  %8242 = vrcp.f32 %v2536_v37  ;;  %7804 = vmatpush1.bf16.msra.mxu0 %v7803_v42  ;;  %v10491_v43 = vld [vmem:[%s9668_s9 + $0xe0] sm:$0xff] }
 0x436   : > { %v2122_v47 = vrot.slane %v2121_v56, 2  ;;  %v8239_v25 = vpop.eup %8238  ;;  %vm2502_vm10 = vcmp.gt.f32.partialorder %v2415_v62, 0.0  ;;  %v2432_v53 = vrot.slane %v2431_v30, 1  ;;  %8244 = vpow2.f32 %v2242_v26 }
 0x437   : > { %v2189_v21 = vsub.f32 %v10418_v55, %v2137_v34  ;;  %v2745_v2 = vadd.f32 %v2744_v12, %v2627_v58  ;;  %v2534_v36 = vsel %vm2502_vm10, %v2415_v62, 1.0  ;;  %v10488_v10 = vsel %vm12730_vm9, 0.0, %v8239_v25  ;;  %v10513_v58 = vld [vmem:[%s9668_s9 + $0xf8] sm:$0xff]  ;;  %v2839_v62 = vld [vmem:[#allocation11 + $0x28] sm:$0xff] }
 0x438   : > { %v2123_v28 = vmax.f32 %v2121_v56, %v2122_v47  ;;  %8246 = vrcp.f32 %v2534_v36  ;;  %v2433_v17 = vadd.f32 %v2432_v53, %v2431_v30  ;;  %v2416_v29 = vrot.slane %v10488_v10, 4  ;;  %12852 = vst [vmem:[#allocation71_spill] sm:$0xff] %v10513_v58  ;;  %v2841_v30 = vld [vmem:[#allocation11 + $0x38] sm:$0xff] }
 0x439   : > { %v2248_v27 = vmul.f32 1.442695, %v2189_v21  ;;  %v10494_v40 = vadd.f32 %v2740_v44, %v2739_v18  ;;  %v2746_v55 = vrot.slane %v2745_v2, 2  ;;  %v10498_v14 = vadd.f32 %v10123_v50, %v10484_v32 }
 0x43a   : > { %v2124_v22 = vrot.slane %v2123_v28, 1  ;;  %vm2505_vm10 = vcmp.gt.f32.partialorder %v2433_v17, 0.0  ;;  %v2417_v19 = vadd.f32 %v2416_v29, %v10488_v10  ;;  %vm12717_vm11 = vcmp.lt.f32.partialorder %v10403_v33, 0.0 }
 0x43b   : > { %v8241_v11 = vpop.eup %8240  ;;  %8248 = vpow2.f32 %v2248_v27  ;;  %v10504_v3 = vadd.f32 %v10131_v59, %v10491_v43  ;;  %v10506_v56 = vadd.f32 %v2746_v55, %v2745_v2  ;;  %v2537_v18 = vsel %vm2505_vm10, %v2433_v17, 1.0  ;;  %v2840_v59 = vld [vmem:[#allocation11 + $0x30] sm:$0xff] }
 0x43c   : > { %v10510_v44 = vsel %vm12712_vm12, 0.0, %v8241_v11  ;;  %v2125_v50 = vmax.f32 %v2123_v28, %v2124_v22  ;;  %8250 = vrcp.f32 %v2537_v18  ;;  %v2418_v26 = vrot.slane %v2417_v19, 2  ;;  %v10533_v18 = vld [vmem:[%s9668_s9 + $0xe8] sm:$0xff] }
 0x43d   : > { %v2446_v42 = vrot.slane %v10510_v44, 4  ;;  %v2150_v37 = vrot.slane %v10498_v14, 4  ;;  %v2138_v47 = vrot.slane %v10504_v3, 4  ;;  %v10525_v2 = vadd.f32 %v10139_v6, %v10513_v58 }
 0x43e   : > { %v2187_v12 = vsub.f32 %v10456_v23, %v2125_v50  ;;  %v2419_v25 = vadd.f32 %v2418_v26, %v2417_v19  ;;  %v7805_v27 = vpack.c.bf16 %v2841_v30, %v2839_v62  ;;  %vm12726_vm10 = vcmp.lt.f32.partialorder %v10444_v5, 0.0  ;;  %v2853_v5 = vld [vmem:[#allocation11 + $0x98] sm:$0xff] }
 0x43f   : > { %v2447_v53 = vadd.f32 %v2446_v42, %v10510_v44  ;;  %v2151_v21 = vmax.f32 %v10498_v14, %v2150_v37  ;;  %v8243_v36 = vpop.eup %8242  ;;  %v2139_v29 = vmax.f32 %v10504_v3, %v2138_v47  ;;  %v2156_v26 = vrot.slane %v10525_v2, 4 }
 0x440   : > { %v2244_v17 = vmul.f32 1.442695, %v2187_v12  ;;  %v8245_v23 = vpop.eup %8244  ;;  %v10530_v55 = vmul.f32 %v8243_v36, %v10438_v54  ;;  %v2420_v22 = vrot.slane %v2419_v25, 1  ;;  %7806 = vmatprep.subr.bf16.mxu0 %v7805_v27 }
 0x441   : > { %v2448_v11 = vrot.slane %v2447_v53, 2  ;;  %v2152_v19 = vrot.slane %v2151_v21, 2  ;;  %v10537_v6 = vsel %vm12711_vm14, 0.0, %v8245_v23  ;;  %v2140_v50 = vrot.slane %v2139_v29, 2 }
 0x442   : > { %8252 = vpow2.f32 %v2244_v17  ;;  %v8247_v42 = vpop.eup %8246  ;;  %v2421_v37 = vadd.f32 %v2420_v22, %v2419_v25  ;;  %v2434_v62 = vrot.slane %v10537_v6, 4  ;;  %v2157_v36 = vmax.f32 %v10525_v2, %v2156_v26 }
 0x443   : > { %v2449_v54 = vadd.f32 %v2448_v11, %v2447_v53  ;;  %v2153_v30 = vmax.f32 %v2151_v21, %v2152_v19  ;;  %v2598_v12 = vmul.f32 %v8247_v42, %v10451_v48  ;;  %v2141_v47 = vmax.f32 %v2139_v29, %v2140_v50 }
 0x444   : > { %v10546_v23 = vadd.f32 %v10143_v16, %v10533_v18  ;;  %vm2503_vm14 = vcmp.gt.f32.partialorder %v2421_v37, 0.0  ;;  %v2435_v27 = vadd.f32 %v2434_v62, %v10537_v6 }
 0x445   : > { %v8249_v17 = vpop.eup %8248  ;;  %v2450_v34 = vrot.slane %v2449_v54, 1  ;;  %v2154_v28 = vrot.slane %v2153_v30, 1  ;;  %v10550_v25 = vmul.f32 %v2598_v12, %v9758_v51  ;;  %v2535_v53 = vsel %vm2503_vm14, %v2421_v37, 1.0 }
 0x446   : > { %v10554_v48 = vsel %vm12717_vm11, 0.0, %v8249_v17  ;;  %v2142_v21 = vrot.slane %v2141_v47, 1  ;;  %v8251_v29 = vpop.eup %8250  ;;  %8254 = vrcp.f32 %v2535_v53  ;;  %v2436_v16 = vrot.slane %v2435_v27, 2  ;;  %v2838_v17 = vld [vmem:[#allocation11 + $0x20] sm:$0xff] }
 0x447   : > { %12853 = vst [vmem:[#allocation72_spill] sm:$0xff] %v10550_v25  ;;  %v2451_v22 = vadd.f32 %v2450_v34, %v2449_v54  ;;  %v2452_v11 = vrot.slane %v10554_v48, 4  ;;  %v10559_v50 = vmul.f32 %v8251_v29, %v10467_v0  ;;  %v2155_v26 = vmax.f32 %v2153_v30, %v2154_v28  ;;  %v2843_v28 = vld [vmem:[#allocation11 + $0x48] sm:$0xff]  ;;  %v2845_v30 = vld [vmem:[#allocation11 + $0x58] sm:$0xff]  ;;  %v10577_v25 = vld [vmem:[#allocation11 + $0xa0] sm:$0xff] }
 0x448   : > { %v2143_v42 = vmax.f32 %v2141_v47, %v2142_v21  ;;  %v2437_v37 = vadd.f32 %v2436_v16, %v2435_v27  ;;  %v2158_v12 = vrot.slane %v2157_v36, 2  ;;  %v2144_v53 = vrot.slane %v10546_v23, 4 }
 0x449   : > { %vm2508_vm12 = vcmp.gt.f32.partialorder %v2451_v22, 0.0  ;;  %v2453_v62 = vadd.f32 %v2452_v11, %v10554_v48  ;;  %v2192_v34 = vsub.f32 %v10498_v14, %v2155_v26  ;;  %v7807_v11 = vpack.c.bf16 %v2840_v59, %v2838_v17  ;;  %v2842_v26 = vld [vmem:[#allocation11 + $0x40] sm:$0xff]  ;;  %v2851_v17 = vld [vmem:[#allocation11 + $0x88] sm:$0xff] }
 0x44a   : > { %v2540_v33 = vsel %vm2508_vm12, %v2451_v22, 1.0  ;;  %v2190_v54 = vsub.f32 %v10504_v3, %v2143_v42  ;;  %v2438_v19 = vrot.slane %v2437_v37, 1  ;;  %v2159_v29 = vmax.f32 %v2157_v36, %v2158_v12 }
 0x44b   : > { %8256 = vrcp.f32 %v2540_v33  ;;  %v2454_v0 = vrot.slane %v2453_v62, 2  ;;  %v2254_v27 = vmul.f32 1.442695, %v2192_v34  ;;  %v2145_v16 = vmax.f32 %v10546_v23, %v2144_v53  ;;  %v2844_v33 = vld [vmem:[#allocation11 + $0x50] sm:$0xff]  ;;  %7808 = vmatpush1.bf16.msra.mxu0 %v7807_v11  ;;  %v2847_v34 = vld [vmem:[#allocation11 + $0x68] sm:$0xff]  ;;  %v10574_v11 = vld [vmem:[#allocation11 + $0x80] sm:$0xff] }
 0x44c   : > { %v8253_v47 = vpop.eup %8252  ;;  %v2250_v21 = vmul.f32 1.442695, %v2190_v54  ;;  %v2439_v1 = vadd.f32 %v2438_v19, %v2437_v37  ;;  %v2160_v3 = vrot.slane %v2159_v29, 1  ;;  %vm12727_vm14 = vcmp.lt.f32.partialorder %v10484_v32, 0.0  ;;  %v2849_v54 = vld [vmem:[#allocation11 + $0x78] sm:$0xff]  ;;  %v2846_v37 = vld [vmem:[#allocation11 + $0x60] sm:$0xff] }
 0x44d   : > { %v2455_v22 = vadd.f32 %v2454_v0, %v2453_v62  ;;  %v10568_v14 = vsel %vm12726_vm10, 0.0, %v8253_v47  ;;  %8258 = vpow2.f32 %v2254_v27  ;;  %v2146_v36 = vrot.slane %v2145_v16, 2  ;;  %v2848_v62 = vld [vmem:[#allocation11 + $0x70] sm:$0xff] }
 0x44e   : > { %v2440_v42 = vrot.slane %v10568_v14, 4  ;;  %v7809_v12 = vpack.c.bf16 %v2845_v30, %v2843_v28  ;;  %vm2506_vm12 = vcmp.gt.f32.partialorder %v2439_v1, 0.0  ;;  %vm12729_vm11 = vcmp.lt.f32.partialorder %v10491_v43, 0.0  ;;  %v2852_v28 = vld [vmem:[#allocation11 + $0x90] sm:$0xff] }
 0x44f   : > { %v2456_v59 = vrot.slane %v2455_v22, 1  ;;  %8260 = vpow2.f32 %v2250_v21  ;;  %v2161_v19 = vmax.f32 %v2159_v29, %v2160_v3  ;;  %v2538_v53 = vsel %vm2506_vm12, %v2439_v1, 1.0  ;;  %v2855_v29 = vld [vmem:[#allocation11 + $0xa8] sm:$0xff]  ;;  %v2857_v3 = vld [vmem:[#allocation11 + $0xb8] sm:$0xff] }
 0x450   : > { %v2441_v0 = vadd.f32 %v2440_v42, %v10568_v14  ;;  %v2147_v47 = vmax.f32 %v2145_v16, %v2146_v36  ;;  %7810 = vmatprep.subr.bf16.mxu0 %v7809_v12  ;;  %v7811_v27 = vpack.c.bf16 %v2844_v33, %v2842_v26  ;;  %v8255_v30 = vpop.eup %8254  ;;  %8262 = vrcp.f32 %v2538_v53  ;;  %v10580_v33 = vld [vmem:[#allocation11 + $0xb0] sm:$0xff]  ;;  %v10582_v36 = vld [vmem:[#allocation11 + $0xc8] sm:$0xff]  ;;  %v10584_v12 = vld [vmem:[#allocation11 + $0xd8] sm:$0xff] }
 0x451   : > { %v2457_v31 = vadd.f32 %v2456_v59, %v2455_v22  ;;  %v2193_v9 = vsub.f32 %v10525_v2, %v2161_v19  ;;  %v7813_v21 = vpack.c.bf16 %v2849_v54, %v2847_v34  ;;  %v2599_v1 = vmul.f32 %v8255_v30, %v10488_v10  ;;  %v10587_v54 = vld [vmem:[#allocation11 + $0xc0] sm:$0xff]  ;;  %v10589_v59 = vld [vmem:[#allocation11 + $0xd0] sm:$0xff]  ;;  %v10591_v10 = vld [vmem:[#allocation11 + $0xe8] sm:$0xff] }
 0x452   : > { %v2442_v42 = vrot.slane %v2441_v0, 2  ;;  %v2148_v16 = vrot.slane %v2147_v47, 1  ;;  %7812 = vmatpush1.bf16.msra.mxu0 %v7811_v27  ;;  %v7815_v26 = vpack.c.bf16 %v2848_v62, %v2846_v37  ;;  %v7817_v2 = vpack.c.bf16 %v2853_v5, %v2851_v17  ;;  %v10596_v27 = vld [vmem:[#allocation11 + $0xf8] sm:$0xff]  ;;  %v10598_v30 = vld [vmem:[#allocation11 + $0xe0] sm:$0xff] }
 0x453   : > { %vm2509_vm12 = vcmp.gt.f32.partialorder %v2457_v31, 0.0  ;;  %v2256_v22 = vmul.f32 1.442695, %v2193_v9  ;;  %7814 = vmatprep.subr.bf16.mxu0 %v7813_v21  ;;  %v7819_v34 = vpack.c.bf16 %v2852_v28, %v10574_v11  ;;  %v10594_v19 = vmul.f32 %v2599_v1, %v9758_v51  ;;  %v10600_v9 = vld [vmem:[#allocation11 + $0xf0] sm:$0xff] }
 0x454   : > { %v2541_v37 = vsel %vm2509_vm12, %v2457_v31, 1.0  ;;  %v2443_v62 = vadd.f32 %v2442_v42, %v2441_v0  ;;  %v2149_v53 = vmax.f32 %v2147_v47, %v2148_v16  ;;  %v7821_v17 = vpack.c.bf16 %v2857_v3, %v2855_v29 }
 0x455   : > { %v8257_v5 = vpop.eup %8256  ;;  %8264 = vrcp.f32 %v2541_v37  ;;  %v7823_v11 = vpack.c.bf16 %v10580_v33, %v10577_v25  ;;  %v7825_v28 = vpack.c.bf16 %v10584_v12, %v10582_v36  ;;  %vm12728_vm12 = vcmp.lt.f32.partialorder %v10513_v58, 0.0 }
 0x456   : > { %v2604_v21 = vmul.f32 %v8257_v5, %v10510_v44  ;;  %v2444_v31 = vrot.slane %v2443_v62, 1  ;;  %8266 = vpow2.f32 %v2256_v22  ;;  %v2191_v0 = vsub.f32 %v10546_v23, %v2149_v53  ;;  %7816 = vmatpush1.bf16.msra.mxu0 %v7815_v26 }
 0x457   : > { %7818 = vmatprep.subr.bf16.mxu0 %v7817_v2  ;;  %v7827_v47 = vpack.c.bf16 %v10589_v59, %v10587_v54  ;;  %v7829_v29 = vpack.c.bf16 %v10596_v27, %v10591_v10  ;;  %v7831_v25 = vpack.c.bf16 %v10600_v9, %v10598_v30  ;;  %v12854_v44 = vrot.slane %v10187_v57, 1  ;;  %v8259_v1 = vpop.eup %8258 }
 0x458   : > { %v2636_v42 = vmul.f32 %v2604_v21, %v9861_v49  ;;  %v2445_v23 = vadd.f32 %v2444_v31, %v2443_v62  ;;  %v2252_v16 = vmul.f32 1.442695, %v2191_v0  ;;  %v12855_v26 = vrot.slane %v10286_v20, 2 }
 0x459   : > { %v10618_v3 = vadd.f32 %v12854_v44, %v10187_v57  ;;  %v8261_v36 = vpop.eup %8260  ;;  %v10626_v12 = vsel %vm12727_vm14, 0.0, %v8259_v1  ;;  %v2674_v22 = vrot.slane %v10307_v7, 2  ;;  %v12856_v57 = vrot.slane %v10169_v15, 4 }
 0x45a   : > { %v2669_v33 = vadd.f32 %v12855_v26, %v10286_v20  ;;  %v2684_v54 = vrot.slane %v10274_v61, 4  ;;  %v2798_v59 = vrot.slane %v2636_v42, 4  ;;  %vm2507_vm10 = vcmp.gt.f32.partialorder %v2445_v23, 0.0  ;;  %7820 = vmatpush1.bf16.msra.mxu0 %v7819_v34  ;;  %v8263_v37 = vpop.eup %8262 }
 0x45b   : > { %v2679_v2 = vadd.f32 %v12856_v57, %v10169_v15  ;;  %v2470_v10 = vrot.slane %v10626_v12, 4  ;;  %v10636_v20 = vsel %vm12729_vm11, 0.0, %v8261_v36  ;;  %v2539_v62 = vsel %vm2507_vm10, %v2445_v23, 1.0  ;;  %7822 = vmatprep.subr.bf16.mxu0 %v7821_v17 }
 0x45c   : > { %v2458_v53 = vrot.slane %v10636_v20, 4  ;;  %8268 = vpow2.f32 %v2252_v16  ;;  %v2670_v27 = vrot.slane %v2669_v33, 1  ;;  %v2799_v5 = vadd.f32 %v2798_v59, %v2636_v42 }
 0x45d   : > { %v2602_v15 = vmul.f32 %v8263_v37, %v10537_v6  ;;  %8270 = vrcp.f32 %v2539_v62  ;;  %v2471_v21 = vadd.f32 %v2470_v10, %v10626_v12  ;;  %vm12732_vm14 = vcmp.lt.f32.partialorder %v10533_v18, 0.0 }
 0x45e   : > { %v2459_v31 = vadd.f32 %v2458_v53, %v10636_v20  ;;  %v10643_v0 = vadd.f32 %v2670_v27, %v2669_v33  ;;  %v2675_v34 = vadd.f32 %v2674_v22, %v10307_v7  ;;  %v2680_v44 = vrot.slane %v2679_v2, 2  ;;  %7824 = vmatpush1.bf16.msra.mxu0 %v7823_v11 }
 0x45f   : > { %v2800_v1 = vrot.slane %v2799_v5, 2  ;;  %v2634_v23 = vmul.f32 %v2602_v15, %v9861_v49  ;;  %v2472_v17 = vrot.slane %v2471_v21, 2  ;;  %v2685_v42 = vadd.f32 %v2684_v54, %v10274_v61  ;;  %v8265_v6 = vpop.eup %8264  ;;  %7826 = vmatprep.subr.bf16.mxu0 %v7825_v28  ;;  %v10660_v15 = vld [vmem:[#allocation13] sm:$0xff]  }
 0x460   : > { %v2460_v16 = vrot.slane %v2459_v31, 2  ;;  %v2676_v26 = vrot.slane %v2675_v34, 1  ;;  %v2681_v36 = vadd.f32 %v2680_v44, %v2679_v2  ;;  %vm2910_vm10 = vcmask 1041409   ;;  %v8267_v57 = vpop.eup %8266 }
 0x461   : > { %v10648_v59 = vadd.f32 %v2800_v1, %v2799_v5  ;;  %v2786_v33 = vrot.slane %v2634_v23, 4  ;;  %v2605_v7 = vmul.f32 %v8265_v6, %v10554_v48  ;;  %v2473_v22 = vadd.f32 %v2472_v17, %v2471_v21 }
 0x462   : > { %v2461_v10 = vadd.f32 %v2460_v16, %v2459_v31  ;;  %v10653_v37 = vsel %vm12728_vm12, 0.0, %v8267_v57  ;;  %v2677_v11 = vadd.f32 %v2676_v26, %v2675_v34  ;;  %v2682_v61 = vrot.slane %v2681_v36, 1  ;;  %7828 = vmatpush1.bf16.msra.mxu0 %v7827_v47 }
 0x463   : > { %v2787_v54 = vadd.f32 %v2786_v33, %v2634_v23  ;;  %v2637_v28 = vmul.f32 %v2605_v7, %v9861_v49  ;;  %v2474_v62 = vrot.slane %v2473_v22, 1  ;;  %v2476_v2 = vrot.slane %v10653_v37, 4  ;;  %7830 = vmatprep.subr.bf16.mxu0 %v7829_v29 }
 0x464   : > { %v2462_v53 = vrot.slane %v2461_v10, 1  ;;  %v2683_v27 = vadd.f32 %v2682_v61, %v2681_v36  ;;  %v2686_v5 = vrot.slane %v2685_v42, 2  ;;  %v2911_v48 = vsel %vm2910_vm10, %v10300_v60, %v10270_v52 }
 0x465   : > { %v2788_v21 = vrot.slane %v2787_v54, 2  ;;  %v2804_v31 = vrot.slane %v2637_v28, 4  ;;  %v2475_v34 = vadd.f32 %v2474_v62, %v2473_v22  ;;  %v2477_v44 = vadd.f32 %v2476_v2, %v10653_v37 }
 0x466   : > { %v8269_v1 = vpop.eup %8268  ;;  %v2463_v23 = vadd.f32 %v2462_v53, %v2461_v10  ;;  %v2687_v17 = vadd.f32 %v2686_v5, %v2685_v42  ;;  %vm12740_vm12 = vcmask 1042434   ;;  %vm12739_vm11 = vcmask 1043459   ;;  %7832 = vmatpush1.bf16.msra.mxu0 %v7831_v25 }
 0x467   : > { %v8271_v47 = vpop.eup %8270  ;;  %v10663_v29 = vadd.f32 %v2788_v21, %v2787_v54  ;;  %v10665_v6 = vadd.f32 %v2804_v31, %v2637_v28  ;;  %vm2512_vm9 = vcmp.gt.f32.partialorder %v2475_v34, 0.0  ;;  %v2478_v16 = vrot.slane %v2477_v44, 2  ;;  %7533 = vmatprep.subr.bf16.mxu0 %v10660_v15 }
 0x468   : > { %v2603_v52 = vmul.f32 %v8271_v47, %v10568_v14  ;;  %v2544_v60 = vsel %vm2512_vm9, %v2475_v34, 1.0  ;;  %vm2510_vm13 = vcmp.gt.f32.partialorder %v2463_v23, 0.0  ;;  %v10673_v42 = vsel %vm12732_vm14, 0.0, %v8269_v1 }
 0x469   : > { %v2790_v26 = vrot.slane %v10663_v29, 1  ;;  %v2806_v36 = vrot.slane %v10665_v6, 2  ;;  %8272 = vrcp.f32 %v2544_v60  ;;  %v2542_v57 = vsel %vm2510_vm13, %v2463_v23, 1.0 }
 0x46a   : > { %v2635_v33 = vmul.f32 %v2603_v52, %v9861_v49  ;;  %8274 = vrcp.f32 %v2542_v57  ;;  %v2479_v30 = vadd.f32 %v2478_v16, %v2477_v44  ;;  %v2464_v14 = vrot.slane %v10673_v42, 4 }
 0x46b   : > { %v2688_v9 = vrot.slane %v2687_v17, 1  ;;  %v2913_v25 = vsel %vm12740_vm12, %v10206_v41, %v2911_v48  ;;  %vm12738_vm9 = vcmask 1044484   ;;  %vm12737_vm14 = vcmask 1045509  }
 0x46c   : > { %v2792_v7 = vrot.slane %v2635_v33, 4  ;;  %v2480_v22 = vrot.slane %v2479_v30, 1  ;;  %v2465_v10 = vadd.f32 %v2464_v14, %v10673_v42  ;;  %v2915_v61 = vsel %vm12739_vm11, %v10618_v3, %v2913_v25 }
 0x46d   : > { %v2689_v54 = vadd.f32 %v2688_v9, %v2687_v17  ;;  %v2917_v28 = vsel %vm12738_vm9, %v10643_v0, %v2915_v61  ;;  %vm12736_vm13 = vcmask 1046534   ;;  %v2624_v48 = vmul.f32 %v10421_v13, %v9749_v45  ;;  %v8137_v0 = vld [vmem:[#allocation13 + $0x8] sm:$0xff]  }
 0x46e   : > { %v2793_v62 = vadd.f32 %v2792_v7, %v2635_v33  ;;  %v2481_v2 = vadd.f32 %v2480_v22, %v2479_v30  ;;  %v2466_v53 = vrot.slane %v2465_v10, 2  ;;  %v2919_v41 = vsel %vm12737_vm14, %v2677_v11, %v2917_v28 }
 0x46f   : > { %v2921_v5 = vsel %vm12736_vm13, %v2683_v27, %v2919_v41  ;;  %v2625_v21 = vmul.f32 %v10426_v24, %v9749_v45  ;;  %v12857_v3 = vrot.slane %v10311_v63, 1  ;;  %v12858_v11 = vrot.slane %v10383_v35, 1 }
 0x470   : > { %v2794_v34 = vrot.slane %v2793_v62, 2  ;;  %vm2513_vm15 = vcmp.gt.f32.partialorder %v2481_v2, 0.0  ;;  %v2467_v44 = vadd.f32 %v2466_v53, %v2465_v10  ;;  %v2923_v1 = vsel %vm12735_vm8, %v2689_v54, %v2921_v5 }
 0x471   : > { %v2695_v31 = vadd.f32 %v12857_v3, %v10311_v63  ;;  %v2545_v23 = vsel %vm2513_vm15, %v2481_v2, 1.0  ;;  %3014 = vmatmul.mubr.f32.vlgmr.msra.gmra.mrb[8].mxu0 %v2923_v1  ;;  %v2701_v27 = vadd.f32 %v12858_v11, %v10383_v35  ;;  %v2706_v13 = vrot.slane %v10325_v8, 1 }
 0x472   : > { %v12859_v45 = vrot.slane %v10348_v38, 2  ;;  %v10704_v17 = vadd.f32 %v2794_v34, %v2793_v62  ;;  %8276 = vrcp.f32 %v2545_v23  ;;  %v2468_v63 = vrot.slane %v2467_v44, 1  ;;  %7534 = vmatpush3.bf16.msra.mxu0 %v10660_v15 }
 0x473   : > { %v12860_v47 = vmov 0.0   ;;  %v12861_v16 = vrot.slane %v10414_v46, 4  ;;  %v8273_v60 = vpop.eup %8272  ;;  %v2707_v35 = vadd.f32 %v2706_v13, %v10325_v8  ;;  %v2720_v33 = vrot.slane %v10463_v4, 4  ;;  %7535 = vmatprep.subr.bf16.mxu0 %v8137_v0 }
 0x474   : > { %v2711_v24 = vadd.f32 %v12859_v45, %v10348_v38  ;;  %3019 = vmatprep.mubr.f32.mxu0 %v12860_v47  ;;  %v2726_v30 = vrot.slane %v2624_v48, 4  ;;  %v8138_v38 = vld [vmem:[#allocation13 + $0x10] sm:$0xff]   ;;  %v8275_v14 = vpop.eup %8274  ;;  %v2796_v9 = vrot.slane %v10704_v17, 1  ;;  %v10715_v25 = vmul.f32 %v8273_v60, %v10626_v12 }
 0x475   : > { %v2715_v52 = vadd.f32 %v12861_v16, %v10414_v46  ;;  %v2469_v7 = vadd.f32 %v2468_v63, %v2467_v44  ;;  %v2606_v46 = vmul.f32 %v8275_v14, %v10636_v20  ;;  %v2721_v10 = vadd.f32 %v2720_v33, %v10463_v4  ;;  %v12866_v33 = vld [vmem:[#allocation72_spill] sm:$0xff] }
 0x476   : > { %v2712_v57 = vrot.slane %v2711_v24, 1  ;;  %v2727_v8 = vadd.f32 %v2726_v30, %v2624_v48  ;;  %v2732_v54 = vrot.slane %v2625_v21, 4  ;;  %v2924_v28 = vsel %vm2910_vm10, %v2701_v27, %v2695_v31  ;;  %7536 = vmatpush3.bf16.msra.mxu0 %v8137_v0 }
 0x477   : > { %v2716_v22 = vrot.slane %v2715_v52, 2  ;;  %vm2511_vm15 = vcmp.gt.f32.partialorder %v2469_v7, 0.0  ;;  %v10721_v62 = vmul.f32 %v2606_v46, %v9861_v49  ;;  %v2722_v12 = vrot.slane %v2721_v10, 2  ;;  %7537 = vmatprep.subr.bf16.mxu0 %v8138_v38 }
 0x478   : > { %v2713_v15 = vadd.f32 %v2712_v57, %v2711_v24  ;;  %v2543_v2 = vsel %vm2511_vm15, %v2469_v7, 1.0  ;;  %v2728_v53 = vrot.slane %v2727_v8, 2  ;;  %v2733_v20 = vadd.f32 %v2732_v54, %v2625_v21 }
 0x479   : > { %v2717_v61 = vadd.f32 %v2716_v22, %v2715_v52  ;;  %8278 = vrcp.f32 %v2543_v2  ;;  %v2925_v5 = vsel %vm12740_vm12, %v2707_v35, %v2924_v28  ;;  %v2810_v4 = vrot.slane %v10721_v62, 4  ;;  %v12864_v52 = vld [vmem:[#allocation70_spill] sm:$0xff] }
 0x47a   : > { %v2723_v48 = vadd.f32 %v2722_v12, %v2721_v10  ;;  %v2729_v3 = vadd.f32 %v2728_v53, %v2727_v8  ;;  %v2926_v34 = vsel %vm12739_vm11, %v2713_v15, %v2925_v5  ;;  %v2734_v0 = vrot.slane %v2733_v20, 2  ;;  %7538 = vmatpush3.bf16.msra.mxu0 %v8138_v38 }
 0x47b   : > { %v2718_v41 = vrot.slane %v2717_v61, 1  ;;  %v2632_v44 = vmul.f32 %v10530_v55, %v9758_v51  ;;  %v2633_v1 = vmul.f32 %v10559_v50, %v9758_v51  ;;  %v12862_v21 = vrot.slane %v10494_v40, 1 }
 0x47c   : > { %v2724_v23 = vrot.slane %v2723_v48, 1  ;;  %v2730_v11 = vrot.slane %v2729_v3, 1  ;;  %v12863_v13 = vrot.slane %v10506_v56, 1  ;;  %v8277_v24 = vpop.eup %8276  ;;  %v2735_v63 = vadd.f32 %v2734_v0, %v2733_v20 }
 0x47d   : > { %v2719_v31 = vadd.f32 %v2718_v41, %v2717_v61  ;;  %v2743_v27 = vadd.f32 %v12862_v21, %v10494_v40  ;;  %v2754_v55 = vrot.slane %v12864_v52, 1  ;;  %v12865_v51 = vrot.slane %v10479_v39, 2 }
 0x47e   : > { %v2749_v45 = vadd.f32 %v12863_v13, %v10506_v56  ;;  %v2609_v60 = vmul.f32 %v8277_v24, %v10653_v37  ;;  %v2725_v35 = vadd.f32 %v2724_v23, %v2723_v48  ;;  %v2731_v57 = vadd.f32 %v2730_v11, %v2729_v3 }
 0x47f   : > { %v2927_v16 = vsel %vm12738_vm9, %v2719_v31, %v2926_v34  ;;  %v2759_v50 = vadd.f32 %v12865_v51, %v10479_v39  ;;  %v12867_v40 = vrot.slane %v12866_v33, 4  ;;  %v2736_v38 = vrot.slane %v2735_v63, 1 }
 0x480   : > { %v2755_v56 = vadd.f32 %v2754_v55, %v12864_v52  ;;  %v2768_v7 = vrot.slane %v10594_v19, 4  ;;  %v2928_v22 = vsel %vm12737_vm14, %v2725_v35, %v2927_v16  ;;  %v2774_v15 = vrot.slane %v2632_v44, 4 }
 0x481   : > { %v2763_v30 = vadd.f32 %v12867_v40, %v12866_v33  ;;  %v2760_v14 = vrot.slane %v2759_v50, 1  ;;  %v2780_v10 = vrot.slane %v2633_v1, 4  ;;  %v2737_v39 = vadd.f32 %v2736_v38, %v2735_v63 }
 0x482   : > { %v2929_v37 = vsel %vm12736_vm13, %v2731_v57, %v2928_v22  ;;  %v2769_v61 = vadd.f32 %v2768_v7, %v10594_v19  ;;  %v2775_v28 = vadd.f32 %v2774_v15, %v2632_v44  ;;  %v2931_v12 = vsel %vm2910_vm10, %v2749_v45, %v2743_v27 }
 0x483   : > { %v2764_v46 = vrot.slane %v2763_v30, 2  ;;  %v2761_v8 = vadd.f32 %v2760_v14, %v2759_v50  ;;  %v2781_v2 = vadd.f32 %v2780_v10, %v2633_v1  ;;  %v8279_v53 = vpop.eup %8278  ;;  %v2930_v41 = vsel %vm12735_vm8, %v2737_v39, %v2929_v37 }
 0x484   : > { %v2770_v20 = vrot.slane %v2769_v61, 2  ;;  %v2932_v5 = vsel %vm12740_vm12, %v2755_v56, %v2931_v12  ;;  %v2640_v48 = vmul.f32 %v10715_v25, %v9861_v49  ;;  %v2607_v3 = vmul.f32 %v8279_v53, %v10673_v42  ;;  %3020 = vmatmul.mubr.f32.gmra.mrb[10].mxu0 %v2930_v41 }
 0x485   : > { %v2765_v54 = vadd.f32 %v2764_v46, %v2763_v30  ;;  %v2776_v31 = vrot.slane %v2775_v28, 2  ;;  %v2782_v19 = vrot.slane %v2781_v2, 2  ;;  %3025 = vmatprep.mubr.f32.mxu0 %v12860_v47  ;;  %v2933_v44 = vsel %vm12739_vm11, %v2761_v8, %v2932_v5 }
 0x486   : > { %v2771_v0 = vadd.f32 %v2770_v20, %v2769_v61  ;;  %v2641_v1 = vmul.f32 %v2609_v60, %v9861_v49  ;;  %v2791_v23 = vadd.f32 %v2790_v26, %v10663_v29  ;;  %v2639_v11 = vmul.f32 %v2607_v3, %v9861_v49  ;;  %v8140_v3 = vld [vmem:[#allocation13 + $0x20] sm:$0xff]  }
 0x487   : > { %v2766_v34 = vrot.slane %v2765_v54, 1  ;;  %v2777_v21 = vadd.f32 %v2776_v31, %v2775_v28  ;;  %v2783_v42 = vadd.f32 %v2782_v19, %v2781_v2  ;;  %v2797_v13 = vadd.f32 %v2796_v9, %v10704_v17  ;;  %v8142_v31 = vld [vmem:[#allocation13 + $0x30] sm:$0xff]   ;;  %v8143_v19 = vld [vmem:[#allocation13 + $0x38] sm:$0xff]  }
 0x488   : > { %v2772_v27 = vrot.slane %v2771_v0, 1  ;;  %v2802_v45 = vrot.slane %v10648_v59, 1  ;;  %v2807_v24 = vadd.f32 %v2806_v36, %v10665_v6  ;;  %v2811_v49 = vadd.f32 %v2810_v4, %v10721_v62 }
 0x489   : > { %v2767_v25 = vadd.f32 %v2766_v34, %v2765_v54  ;;  %v2778_v63 = vrot.slane %v2777_v21, 1  ;;  %v2784_v16 = vrot.slane %v2783_v42, 1  ;;  %v2816_v51 = vrot.slane %v2639_v11, 4  ;;  %v8141_v34 = vld [vmem:[#allocation13 + $0x28] sm:$0xff]  }
 0x48a   : > { %v2773_v26 = vadd.f32 %v2772_v27, %v2771_v0  ;;  %v2803_v52 = vadd.f32 %v2802_v45, %v10648_v59  ;;  %v2808_v55 = vrot.slane %v2807_v24, 1  ;;  %v2812_v50 = vrot.slane %v2811_v49, 2  ;;  %v2866_v0 = vld [vmem:[%s12868_s27] sm:$0x3] }
 0x48b   : > { %v2934_v29 = vsel %vm12738_vm9, %v2767_v25, %v2933_v44  ;;  %v2779_v17 = vadd.f32 %v2778_v63, %v2777_v21  ;;  %v2785_v9 = vadd.f32 %v2784_v16, %v2783_v42  ;;  %v2822_v60 = vrot.slane %v2640_v48, 4  ;;  %v12869_v44 = vld [vmem:[#allocation39_spill] sm:$0xff]  ;;  %v12870_v42 = vld [vmem:[#allocation40_spill] sm:$0xff] }
 0x48c   : > { %v2935_v35 = vsel %vm12737_vm14, %v2773_v26, %v2934_v29  ;;  %v2809_v6 = vadd.f32 %v2808_v55, %v2807_v24  ;;  %v2817_v36 = vadd.f32 %v2816_v51, %v2639_v11  ;;  %v2828_v57 = vrot.slane %v2641_v1, 4 }
 0x48d   : > { %v2936_v33 = vsel %vm12736_vm13, %v2779_v17, %v2935_v35  ;;  %v2813_v40 = vadd.f32 %v2812_v50, %v2811_v49  ;;  %v2823_v30 = vadd.f32 %v2822_v60, %v2640_v48  ;;  %v2938_v62 = vsel %vm2910_vm10, %v2797_v13, %v2791_v23  ;;  %v8139_v48 = vld [vmem:[#allocation13 + $0x18] sm:$0xff]  }
 0x48e   : > { %v2937_v4 = vsel %vm12735_vm8, %v2785_v9, %v2936_v33  ;;  %v2818_v59 = vrot.slane %v2817_v36, 2  ;;  %v2829_v38 = vadd.f32 %v2828_v57, %v2641_v1  ;;  %v2939_v56 = vsel %vm12740_vm12, %v2803_v52, %v2938_v62  ;;  %7539 = vmatprep.subr.bf16.mxu0 %v8139_v48  ;;  %v12871_v13 = vld [vmem:[#allocation41_spill] sm:$0xff] }
 0x48f   : > { %3026 = vmatmul.mubr.f32.gmra.mrb[12].mxu0 %v2937_v4  ;;  %v2814_v14 = vrot.slane %v2813_v40, 1  ;;  %v2824_v7 = vrot.slane %v2823_v30, 2  ;;  %v2940_v22 = vsel %vm12739_vm11, %v2809_v6, %v2939_v56  ;;  %v10790_v1 = vrot.slane %v2866_v0, %v12869_v44 }
 0x490   : > { %3031 = vmatprep.mubr.f32.mxu0 %v12860_v47  ;;  %v2819_v46 = vadd.f32 %v2818_v59, %v2817_v36  ;;  %v2830_v15 = vrot.slane %v2829_v38, 2  ;;  %7540 = vmatpush3.bf16.msra.mxu0 %v8139_v48  ;;  %v10795_v45 = vrot.slane %v2866_v0, %v12871_v13 }
 0x491   : > { %v2815_v10 = vadd.f32 %v2814_v14, %v2813_v40  ;;  %v2825_v39 = vadd.f32 %v2824_v7, %v2823_v30  ;;  %7541 = vmatprep.subr.bf16.mxu0 %v8140_v3  ;;  %v10820_v14 = vld [vmem:[%s12872_s10] ss:$0 sm:$0xff]  ;;  %s7306_s10 = sshll.u32 %s9656_s19, 2 }
 0x492   : > { %v2820_v37 = vrot.slane %v2819_v46, 1  ;;  %v2831_v8 = vadd.f32 %v2830_v15, %v2829_v38  ;;  %s963_s2 = scalar_lea.vmem [#allocation23], %s7306_s10 }
 0x493   : > { %v2826_v61 = vrot.slane %v2825_v39, 1  ;;  %v2941_v54 = vsel %vm12738_vm9, %v2815_v10, %v2940_v22 }
 0x494   : > { %v2821_v28 = vadd.f32 %v2820_v37, %v2819_v46  ;;  %v2832_v2 = vrot.slane %v2831_v8, 1  ;;  %7542 = vmatpush3.bf16.msra.mxu0 %v8140_v3 }
 0x495   : > { %v2827_v12 = vadd.f32 %v2826_v61, %v2825_v39  ;;  %7543 = vmatprep.subr.bf16.mxu0 %v8141_v34 }
 0x496   : > { %v2833_v53 = vadd.f32 %v2832_v2, %v2831_v8  ;;  %v2942_v41 = vsel %vm12737_vm14, %v2821_v28, %v2941_v54 }
 0x497   : > { %v2943_v20 = vsel %vm12736_vm13, %v2827_v12, %v2942_v41 }
 0x498   : > { %v2944_v5 = vsel %vm12735_vm8, %v2833_v53, %v2943_v20  ;;  %7544 = vmatpush3.bf16.msra.mxu0 %v8141_v34 }
 0x499   : > { %3032 = vmatmul.mubr.f32.gmra.mrb[14].mxu0 %v2944_v5  ;;  %7545 = vmatprep.subr.bf16.mxu0 %v8142_v31 }
 0x49c   : > { %7546 = vmatpush3.bf16.msra.mxu0 %v8142_v31 }
 0x49d   : > { %7547 = vmatprep.subr.bf16.mxu0 %v8143_v19 }
 0x4a0   : > { %7548 = vmatpush3.bf16.msra.mxu0 %v8143_v19 }
 0x544   : > { %v3015_v23 = vpop.f32.mrb[8].mxu0 }
 0x545   : > { %v3017_v11 = vpop.f32.mrb[9].mxu0  ;;  %v10802_v55 = vadd.f32 %v3015_v23, %v10795_v45 }
 0x546   : > { %v3018_v25 = vadd.f32 %v3017_v11, %v10790_v1 }
 0x548   : > { %v3042_v21 = vcombine.high %v3018_v25, %v3018_v25  ;;  %v3049_v27 = vrot.slane %v3018_v25, %v12870_v42 }
 0x54a   : > { %v3056_v24 = vrot.slane %v3042_v21, %v12870_v42  ;;  %v3057_v63 = vcombine.high %v3049_v27, %v3049_v27  ;;  %v3065_v16 = vrot.slane %v3049_v27, %v12870_v42 }
 0x54c   : > { %v3058_v29 = vcombine.high %v3056_v24, %v3056_v24  ;;  %v3072_v49 = vrot.slane %v3056_v24, %v12870_v42  ;;  %v3079_v26 = vrot.slane %v3057_v63, %v12870_v42  ;;  %v3087_v52 = vcombine.high %v3065_v16, %v3065_v16 }
 0x54d   : > { %v3241_v51 = vrot.slane %v3065_v16, %v12871_v13 }
 0x54e   : > { %v3086_v17 = vrot.slane %v3058_v29, %v12870_v42  ;;  %v3088_v9 = vcombine.high %v3072_v49, %v3072_v49  ;;  %v3089_v50 = vcombine.high %v3079_v26, %v3079_v26  ;;  %v3245_v60 = vrot.slane %v3079_v26, %v12871_v13 }
 0x54f   : > { %v3249_v35 = vrot.slane %v3087_v52, %v12871_v13  ;;  %v3257_v6 = vrot.slane %v3072_v49, %v12871_v13  ;;  %v3398_v36 = vadd.f32 %v3241_v51, %v10802_v55 }
 0x550   : > { %v3090_v57 = vcombine.high %v3086_v17, %v3086_v17  ;;  %v3253_v33 = vrot.slane %v3089_v50, %v12871_v13  ;;  %v3261_v40 = vrot.slane %v3086_v17, %v12871_v13  ;;  %v3399_v30 = vadd.f32 %v3245_v60, %v10802_v55 }
 0x551   : > { %v3400_v62 = vadd.f32 %v3249_v35, %v10802_v55  ;;  %v3402_v4 = vadd.f32 %v3257_v6, %v10802_v55  ;;  %vm3430_vm15 = vcmp.ge.f32.partialorder %v3398_v36, 0.0  ;;  %v3265_v59 = vrot.slane %v3088_v9, %v12871_v13 }
 0x552   : > { %v3401_v38 = vadd.f32 %v3253_v33, %v10802_v55  ;;  %v3462_v56 = vmul.f32 0.2, %v3398_v36  ;;  %v3403_v7 = vadd.f32 %v3261_v40, %v10802_v55  ;;  %vm3431_vm13 = vcmp.ge.f32.partialorder %v3399_v30, 0.0 }
 0x553   : > { %vm3432_vm8 = vcmp.ge.f32.partialorder %v3400_v62, 0.0  ;;  %v3464_v22 = vmul.f32 0.2, %v3400_v62  ;;  %v3463_v46 = vmul.f32 0.2, %v3399_v30  ;;  %v3269_v15 = vrot.slane %v3090_v57, %v12871_v13 }
 0x554   : > { %vm3433_vm14 = vcmp.ge.f32.partialorder %v3401_v38, 0.0  ;;  %v3465_v10 = vmul.f32 0.2, %v3401_v38  ;;  %v3494_v39 = vsel %vm3430_vm15, %v3398_v36, %v3462_v56  ;;  %vm3434_vm9 = vcmp.ge.f32.partialorder %v3402_v4, 0.0 }
 0x555   : > { %v3495_v37 = vsel %vm3431_vm13, %v3399_v30, %v3463_v46  ;;  %v3533_v8 = vmul.f32 %v10820_v14, %v3494_v39  ;;  %v3496_v61 = vsel %vm3432_vm8, %v3400_v62, %v3464_v22  ;;  %vm3435_vm11 = vcmp.ge.f32.partialorder %v3403_v7, 0.0 }
 0x556   : > { %v3534_v28 = vmul.f32 %v10820_v14, %v3495_v37  ;;  %v3497_v2 = vsel %vm3433_vm14, %v3401_v38, %v3465_v10  ;;  %v3466_v12 = vmul.f32 0.2, %v3402_v4  ;;  %v3535_v41 = vmul.f32 %v10820_v14, %v3496_v61 }
 0x557   : > { %v3021_v54 = vpop.f32.mrb[10].mxu0  ;;  %v3536_v20 = vmul.f32 %v10820_v14, %v3497_v2  ;;  %v3467_v5 = vmul.f32 0.2, %v3403_v7  ;;  %v3404_v48 = vadd.f32 %v3265_v59, %v10802_v55  ;;  %v3405_v19 = vadd.f32 %v3269_v15, %v10802_v55 }
 0x558   : > { %v3023_v53 = vpop.f32.mrb[11].mxu0  ;;  %v3565_v34 = vpack.c.bf16 %v3534_v28, %v3533_v8  ;;  %v3498_v31 = vsel %vm3434_vm9, %v3402_v4, %v3466_v12  ;;  %v10839_v35 = vadd.f32 %v3021_v54, %v10795_v45 }
 0x559   : > { %v3024_v3 = vadd.f32 %v3023_v53, %v10790_v1  ;;  %v3566_v0 = vpack.c.bf16 %v3536_v20, %v3535_v41  ;;  %v3499_v23 = vsel %vm3435_vm11, %v3403_v7, %v3467_v5  ;;  %v3537_v11 = vmul.f32 %v10820_v14, %v3498_v31 }
 0x55a   : > { %vm3436_vm8 = vcmp.ge.f32.partialorder %v3404_v48, 0.0  ;;  %7549 = vmatprep.mubr.bf16.mxu0 %v3565_v34  ;;  %v3538_v27 = vmul.f32 %v10820_v14, %v3499_v23  ;;  %vm3437_vm14 = vcmp.ge.f32.partialorder %v3405_v19, 0.0  ;;  %v3468_v24 = vmul.f32 0.2, %v3404_v48 }
 0x55b   : > { %v3091_v25 = vcombine.high %v3024_v3, %v3024_v3  ;;  %v3098_v21 = vrot.slane %v3024_v3, %v12870_v42  ;;  %7550 = vmatmul.mubr.bf16.vlgmr.msra.gmra.mrb[16].mxu0 %v3566_v0  ;;  %v3469_v63 = vmul.f32 0.2, %v3405_v19 }
 0x55c   : > { %v3567_v26 = vpack.c.bf16 %v3538_v27, %v3537_v11  ;;  %v3500_v52 = vsel %vm3436_vm8, %v3404_v48, %v3468_v24 }
 0x55d   : > { %v3105_v16 = vrot.slane %v3091_v25, %v12870_v42  ;;  %v3106_v29 = vcombine.high %v3098_v21, %v3098_v21  ;;  %v3114_v49 = vrot.slane %v3098_v21, %v12870_v42  ;;  %v3501_v51 = vsel %vm3437_vm14, %v3405_v19, %v3469_v63 }
 0x55e   : > { %7553 = vmatprep.mubr.bf16.mxu0 %v3567_v26  ;;  %v3539_v36 = vmul.f32 %v10820_v14, %v3500_v52  ;;  %v3540_v57 = vmul.f32 %v10820_v14, %v3501_v51 }
 0x55f   : > { %v3107_v17 = vcombine.high %v3105_v16, %v3105_v16  ;;  %v3121_v9 = vrot.slane %v3105_v16, %v12870_v42  ;;  %v3128_v50 = vrot.slane %v3106_v29, %v12870_v42  ;;  %v3136_v60 = vcombine.high %v3114_v49, %v3114_v49 }
 0x560   : > { %v3273_v6 = vrot.slane %v3114_v49, %v12871_v13  ;;  %v3568_v7 = vpack.c.bf16 %v3540_v57, %v3539_v36 }
 0x561   : > { %v3135_v33 = vrot.slane %v3107_v17, %v12870_v42  ;;  %v3137_v40 = vcombine.high %v3121_v9, %v3121_v9  ;;  %v3138_v30 = vcombine.high %v3128_v50, %v3128_v50  ;;  %v3277_v62 = vrot.slane %v3128_v50, %v12871_v13 }
 0x562   : > { %v3027_v4 = vpop.f32.mrb[12].mxu0  ;;  %v3281_v59 = vrot.slane %v3136_v60, %v12871_v13  ;;  %v3289_v38 = vrot.slane %v3121_v9, %v12871_v13  ;;  %v3406_v56 = vadd.f32 %v3273_v6, %v10839_v35 }
 0x563   : > { %v3029_v22 = vpop.f32.mrb[13].mxu0  ;;  %v3139_v46 = vcombine.high %v3135_v33, %v3135_v33  ;;  %v3285_v15 = vrot.slane %v3138_v30, %v12871_v13  ;;  %v3293_v10 = vrot.slane %v3135_v33, %v12871_v13  ;;  %v3297_v39 = vrot.slane %v3137_v40, %v12871_v13  ;;  %7554 = vmatmul.mubr.bf16.gmra.mrb[20].mxu0 %v3568_v7 }
 0x564   : > { %v3407_v37 = vadd.f32 %v3277_v62, %v10839_v35  ;;  %v3408_v8 = vadd.f32 %v3281_v59, %v10839_v35  ;;  %v3410_v61 = vadd.f32 %v3289_v38, %v10839_v35  ;;  %v3030_v54 = vadd.f32 %v3029_v22, %v10790_v1 }
 0x565   : > { %vm3438_vm11 = vcmp.ge.f32.partialorder %v3406_v56, 0.0  ;;  %v3470_v28 = vmul.f32 0.2, %v3406_v56  ;;  %v3409_v12 = vadd.f32 %v3285_v15, %v10839_v35  ;;  %v10859_v48 = vadd.f32 %v3027_v4, %v10795_v45 }
 0x566   : > { %vm3439_vm9 = vcmp.ge.f32.partialorder %v3407_v37, 0.0  ;;  %v3471_v2 = vmul.f32 0.2, %v3407_v37  ;;  %vm3440_vm13 = vcmp.ge.f32.partialorder %v3408_v8, 0.0  ;;  %v3140_v53 = vcombine.high %v3030_v54, %v3030_v54 }
 0x567   : > { %v3147_v41 = vrot.slane %v3030_v54, %v12870_v42  ;;  %v3502_v20 = vsel %vm3438_vm11, %v3406_v56, %v3470_v28  ;;  %v3472_v5 = vmul.f32 0.2, %v3408_v8  ;;  %vm3441_vm15 = vcmp.ge.f32.partialorder %v3409_v12, 0.0 }
 0x568   : > { %v3503_v3 = vsel %vm3439_vm9, %v3407_v37, %v3471_v2  ;;  %v3473_v34 = vmul.f32 0.2, %v3409_v12  ;;  %v3154_v31 = vrot.slane %v3140_v53, %v12870_v42  ;;  %v3541_v11 = vmul.f32 %v10820_v14, %v3502_v20 }
 0x569   : > { %v3155_v19 = vcombine.high %v3147_v41, %v3147_v41  ;;  %v3163_v0 = vrot.slane %v3147_v41, %v12870_v42  ;;  %v3542_v23 = vmul.f32 %v10820_v14, %v3503_v3  ;;  %v3504_v25 = vsel %vm3440_vm13, %v3408_v8, %v3472_v5 }
 0x56a   : > { %v3505_v21 = vsel %vm3441_vm15, %v3409_v12, %v3473_v34  ;;  %v3411_v27 = vadd.f32 %v3293_v10, %v10839_v35  ;;  %v3156_v24 = vcombine.high %v3154_v31, %v3154_v31  ;;  %v3170_v63 = vrot.slane %v3154_v31, %v12870_v42 }
 0x56b   : > { %v3177_v16 = vrot.slane %v3155_v19, %v12870_v42  ;;  %v3185_v29 = vcombine.high %v3163_v0, %v3163_v0  ;;  %v3305_v26 = vrot.slane %v3163_v0, %v12871_v13  ;;  %v3569_v52 = vpack.c.bf16 %v3542_v23, %v3541_v11 }
 0x56c   : > { %v3033_v49 = vpop.f32.mrb[14].mxu0  ;;  %v3543_v51 = vmul.f32 %v10820_v14, %v3504_v25  ;;  %v3544_v17 = vmul.f32 %v10820_v14, %v3505_v21  ;;  %v10872_v50 = vrot.slane %v3156_v24, %v12870_v42  ;;  %v3186_v60 = vcombine.high %v3170_v63, %v3170_v63 }
 0x56d   : > { %v3035_v9 = vpop.f32.mrb[15].mxu0  ;;  %v3187_v6 = vcombine.high %v3177_v16, %v3177_v16  ;;  %v3309_v36 = vrot.slane %v3177_v16, %v12871_v13  ;;  %v3301_v57 = vrot.slane %v3139_v46, %v12871_v13  ;;  %v3313_v33 = vrot.slane %v3185_v29, %v12871_v13  ;;  %7557 = vmatprep.mubr.bf16.mxu0 %v3569_v52 }
 0x56e   : > { %v3414_v40 = vadd.f32 %v3305_v26, %v10859_v48  ;;  %v3570_v30 = vpack.c.bf16 %v3544_v17, %v3543_v51  ;;  %v3188_v62 = vcombine.high %v10872_v50, %v10872_v50  ;;  %v3321_v4 = vrot.slane %v3170_v63, %v12871_v13 }
 0x56f   : > { %vm3442_vm8 = vcmp.ge.f32.partialorder %v3410_v61, 0.0  ;;  %v3317_v59 = vrot.slane %v3187_v6, %v12871_v13  ;;  %v3325_v38 = vrot.slane %v10872_v50, %v12871_v13  ;;  %v10885_v56 = vrot.slane %v3186_v60, %v12871_v13 }
 0x570   : > { %7558 = vmatmul.mubr.bf16.gmra.mrb[24].mxu0 %v3570_v30  ;;  %vm3443_vm14 = vcmp.ge.f32.partialorder %v3411_v27, 0.0  ;;  %v3415_v7 = vadd.f32 %v3309_v36, %v10859_v48  ;;  %v3474_v22 = vmul.f32 0.2, %v3410_v61  ;;  %v3475_v46 = vmul.f32 0.2, %v3411_v27 }
 0x571   : > { %v3412_v15 = vadd.f32 %v3297_v39, %v10839_v35  ;;  %v10890_v10 = vadd.f32 %v3313_v33, %v10859_v48  ;;  %v3413_v37 = vadd.f32 %v3301_v57, %v10839_v35  ;;  %v3036_v8 = vadd.f32 %v3035_v9, %v10790_v1 }
 0x572   : > { %vm3446_vm11 = vcmp.ge.f32.partialorder %v3414_v40, 0.0  ;;  %v3506_v54 = vsel %vm3442_vm8, %v3410_v61, %v3474_v22  ;;  %v3507_v28 = vsel %vm3443_vm14, %v3411_v27, %v3475_v46  ;;  %vm3447_vm15 = vcmp.ge.f32.partialorder %v3415_v7, 0.0 }
 0x573   : > { %vm3444_vm9 = vcmp.ge.f32.partialorder %v3412_v15, 0.0  ;;  %v3476_v2 = vmul.f32 0.2, %v3412_v15  ;;  %v3545_v12 = vmul.f32 %v10820_v14, %v3506_v54  ;;  %v3546_v53 = vmul.f32 %v10820_v14, %v3507_v28 }
 0x574   : > { %vm3445_vm13 = vcmp.ge.f32.partialorder %v3413_v37, 0.0  ;;  %v3477_v41 = vmul.f32 0.2, %v3413_v37  ;;  %v3189_v39 = vcombine.high %v3036_v8, %v3036_v8  ;;  %v3196_v5 = vrot.slane %v3036_v8, %v12870_v42 }
 0x575   : > { %v3508_v20 = vsel %vm3444_vm9, %v3412_v15, %v3476_v2  ;;  %v3571_v3 = vpack.c.bf16 %v3546_v53, %v3545_v12  ;;  %v3478_v31 = vmul.f32 0.2, %v3414_v40  ;;  %v3418_v11 = vadd.f32 %v3321_v4, %v10859_v48 }
 0x576   : > { %v3509_v34 = vsel %vm3445_vm13, %v3413_v37, %v3477_v41  ;;  %v3547_v1 = vmul.f32 %v10820_v14, %v3508_v20  ;;  %v3203_v19 = vrot.slane %v3189_v39, %v12870_v42  ;;  %v3204_v0 = vcombine.high %v3196_v5, %v3196_v5 }
 0x577   : > { %v3548_v61 = vmul.f32 %v10820_v14, %v3509_v34  ;;  %v3212_v23 = vrot.slane %v3196_v5, %v12870_v42  ;;  %7561 = vmatprep.mubr.bf16.mxu0 %v3571_v3  ;;  %v10903_v25 = vadd.f32 %v3033_v49, %v10795_v45  ;;  %v3479_v21 = vmul.f32 0.2, %v3415_v7 }
 0x578   : > { %v3510_v27 = vsel %vm3446_vm11, %v3414_v40, %v3478_v31  ;;  %v3205_v63 = vcombine.high %v3203_v19, %v3203_v19  ;;  %v3219_v16 = vrot.slane %v3203_v19, %v12870_v42  ;;  %v3226_v29 = vrot.slane %v3204_v0, %v12870_v42 }
 0x579   : > { %v3572_v24 = vpack.c.bf16 %v3548_v61, %v3547_v1  ;;  %v3234_v26 = vcombine.high %v3212_v23, %v3212_v23  ;;  %v3337_v52 = vrot.slane %v3212_v23, %v12871_v13  ;;  %v3511_v51 = vsel %vm3447_vm15, %v3415_v7, %v3479_v21 }
 0x57a   : > { %v3417_v17 = vadd.f32 %v3317_v59, %v10859_v48  ;;  %v10912_v45 = vrot.slane %v3205_v63, %v12870_v42  ;;  %v3235_v49 = vcombine.high %v3219_v16, %v3219_v16  ;;  %v3236_v9 = vcombine.high %v3226_v29, %v3226_v29 }
 0x57b   : > { %7562 = vmatmul.mubr.bf16.gmra.mrb[28].mxu0 %v3572_v24  ;;  %v3341_v60 = vrot.slane %v3226_v29, %v12871_v13  ;;  %v3333_v6 = vrot.slane %v3188_v62, %v12871_v13  ;;  %v3549_v36 = vmul.f32 %v10820_v14, %v3510_v27  ;;  %v3550_v57 = vmul.f32 %v10820_v14, %v3511_v51 }
 0x57c   : > { %vm3448_vm8 = vcmp.ge.f32.partialorder %v10890_v10, 0.0  ;;  %v3237_v33 = vcombine.high %v10912_v45, %v10912_v45  ;;  %v3345_v40 = vrot.slane %v3234_v26, %v12871_v13  ;;  %v3353_v30 = vrot.slane %v3219_v16, %v12871_v13 }
 0x57d   : > { %v3422_v4 = vadd.f32 %v3337_v52, %v10903_v25  ;;  %v3349_v59 = vrot.slane %v3236_v9, %v12871_v13  ;;  %v3357_v62 = vrot.slane %v10912_v45, %v12871_v13  ;;  %v3361_v7 = vrot.slane %v3235_v49, %v12871_v13 }
 0x57e   : > { %v3573_v22 = vpack.c.bf16 %v3550_v57, %v3549_v36  ;;  %v3423_v46 = vadd.f32 %v3341_v60, %v10903_v25  ;;  %vm3449_vm14 = vcmp.ge.f32.partialorder %v3417_v17, 0.0  ;;  %v3480_v15 = vmul.f32 0.2, %v10890_v10 }
 0x57f   : > { %v3481_v37 = vmul.f32 0.2, %v3417_v17  ;;  %v3419_v8 = vadd.f32 %v3325_v38, %v10859_v48  ;;  %vm3450_vm11 = vcmp.ge.f32.partialorder %v3418_v11, 0.0  ;;  %v3482_v54 = vmul.f32 0.2, %v3418_v11 }
 0x580   : > { %7565 = vmatprep.mubr.bf16.mxu0 %v3573_v22  ;;  %v3420_v28 = vadd.f32 %v10885_v56, %v10859_v48  ;;  %v3424_v2 = vadd.f32 %v3345_v40, %v10903_v25  ;;  %v3512_v12 = vsel %vm3448_vm8, %v10890_v10, %v3480_v15  ;;  %v3421_v41 = vadd.f32 %v3333_v6, %v10859_v48 }
 0x581   : > { %v3513_v53 = vsel %vm3449_vm14, %v3417_v17, %v3481_v37  ;;  %v3551_v20 = vmul.f32 %v10820_v14, %v3512_v12  ;;  %vm3451_vm9 = vcmp.ge.f32.partialorder %v3419_v8, 0.0  ;;  %v3483_v50 = vmul.f32 0.2, %v3419_v8 }
 0x582   : > { %v3552_v39 = vmul.f32 %v10820_v14, %v3513_v53  ;;  %v3514_v38 = vsel %vm3450_vm11, %v3418_v11, %v3482_v54  ;;  %vm3453_vm13 = vcmp.ge.f32.partialorder %v3421_v41, 0.0  ;;  %v3484_v5 = vmul.f32 0.2, %v3420_v28 }
 0x583   : > { %vm3454_vm15 = vcmp.ge.f32.partialorder %v3422_v4, 0.0  ;;  %v3515_v3 = vsel %vm3451_vm9, %v3419_v8, %v3483_v50  ;;  %vm3452_vm12 = vcmp.ge.f32.partialorder %v3420_v28, 0.0  ;;  %v3485_v34 = vmul.f32 0.2, %v3421_v41  ;;  %v4702_v50 = vld [vmem:[#allocation14] sm:$0xff] }
 0x584   : > { %v3574_v56 = vpack.c.bf16 %v3552_v39, %v3551_v20  ;;  %v3553_v1 = vmul.f32 %v10820_v14, %v3514_v38  ;;  %v3554_v10 = vmul.f32 %v10820_v14, %v3515_v3  ;;  %vm3455_vm8 = vcmp.ge.f32.partialorder %v3423_v46, 0.0  ;;  %v4705_v20 = vld [vmem:[#allocation14 + $0x18] sm:$0xff]  ;;  %v4704_v38 = vld [vmem:[#allocation14 + $0x10] sm:$0xff] }
 0x585   : > { %v3486_v31 = vmul.f32 0.2, %v3422_v4  ;;  %v3426_v61 = vadd.f32 %v3353_v30, %v10903_v25  ;;  %v3517_v19 = vsel %vm3453_vm13, %v3421_v41, %v3485_v34  ;;  %v3487_v0 = vmul.f32 0.2, %v3423_v46  ;;  %v4703_v41 = vld [vmem:[#allocation14 + $0x8] sm:$0xff]  ;;  %v4709_v3 = vld [vmem:[#allocation14 + $0x38] sm:$0xff] }
 0x586   : > { %7566 = vmatmul.mubr.bf16.gmra.mrb[32].mxu0 %v3574_v56  ;;  %v3425_v23 = vadd.f32 %v3349_v59, %v10903_v25  ;;  %v3365_v11 = vrot.slane %v3237_v33, %v12871_v13  ;;  %v3575_v21 = vpack.c.bf16 %v3554_v10, %v3553_v1  ;;  %v3516_v27 = vsel %vm3452_vm12, %v3420_v28, %v3484_v5  ;;  %v4707_v56 = vld [vmem:[#allocation14 + $0x28] sm:$0xff]  ;;  %v4706_v1 = vld [vmem:[#allocation14 + $0x20] sm:$0xff]  ;;  %v4708_v10 = vld [vmem:[#allocation14 + $0x30] sm:$0xff] }
 0x587   : > { %v3518_v24 = vsel %vm3454_vm15, %v3422_v4, %v3486_v31  ;;  %v3556_v63 = vmul.f32 %v10820_v14, %v3517_v19  ;;  %v3519_v16 = vsel %vm3455_vm8, %v3423_v46, %v3487_v0  ;;  %v3488_v52 = vmul.f32 0.2, %v3424_v2  ;;  %v4711_v31 = vld [vmem:[#allocation14 + $0x48] sm:$0xff]  ;;  %v4710_v0 = vld [vmem:[#allocation14 + $0x40] sm:$0xff] }
 0x588   : > { %v3557_v29 = vmul.f32 %v10820_v14, %v3518_v24  ;;  %vm3457_vm14 = vcmp.ge.f32.partialorder %v3425_v23, 0.0  ;;  %7569 = vmatprep.mubr.bf16.mxu0 %v3575_v21  ;;  %v3558_v26 = vmul.f32 %v10820_v14, %v3519_v16  ;;  %v3489_v51 = vmul.f32 0.2, %v3425_v23  ;;  %v4715_v21 = vld [vmem:[#allocation14 + $0x68] sm:$0xff]  ;;  %v4716_v16 = vld [vmem:[#allocation14 + $0x70] sm:$0xff] }
 0x589   : > { %v3427_v17 = vadd.f32 %v3357_v62, %v10903_v25  ;;  %v3555_v45 = vmul.f32 %v10820_v14, %v3516_v27  ;;  %vm3456_vm11 = vcmp.ge.f32.partialorder %v3424_v2, 0.0  ;;  %v3490_v49 = vmul.f32 0.2, %v3426_v61  ;;  %v4717_v27 = vld [vmem:[#allocation14 + $0x78] sm:$0xff] }
 0x58a   : > { %v3428_v9 = vadd.f32 %v3361_v7, %v10903_v25  ;;  %v3577_v60 = vpack.c.bf16 %v3558_v26, %v3557_v29  ;;  %v3521_v6 = vsel %vm3457_vm14, %v3425_v23, %v3489_v51  ;;  %vm3458_vm12 = vcmp.ge.f32.partialorder %v3426_v61, 0.0  ;;  %v4712_v23 = vld [vmem:[#allocation14 + $0x50] sm:$0xff] }
 0x58b   : > { %vm3459_vm9 = vcmp.ge.f32.partialorder %v3427_v17, 0.0  ;;  %v3576_v36 = vpack.c.bf16 %v3556_v63, %v3555_v45  ;;  %v3491_v57 = vmul.f32 0.2, %v3427_v17  ;;  %v3429_v33 = vadd.f32 %v3365_v11, %v10903_v25  ;;  %v4714_v63 = vld [vmem:[#allocation14 + $0x60] sm:$0xff] }
 0x58c   : > { %v3520_v40 = vsel %vm3456_vm11, %v3424_v2, %v3488_v52  ;;  %v3560_v30 = vmul.f32 %v10820_v14, %v3521_v6  ;;  %vm3460_vm13 = vcmp.ge.f32.partialorder %v3428_v9, 0.0  ;;  %v3492_v4 = vmul.f32 0.2, %v3428_v9  ;;  %v8536_v52 = vld [vmem:[%s9668_s9 + $0x10] sm:$0xff]  ;;  %v8537_v45 = vld [vmem:[%s9668_s9] sm:$0xff]  ;;  %v8538_v6 = vld [vmem:[%s9668_s9 + $0x18] sm:$0xff] }
 0x58d   : > { %v3522_v59 = vsel %vm3458_vm12, %v3426_v61, %v3490_v49  ;;  %v3523_v62 = vsel %vm3459_vm9, %v3427_v17, %v3491_v57  ;;  %vm3461_vm15 = vcmp.ge.f32.partialorder %v3429_v33, 0.0  ;;  %v3493_v22 = vmul.f32 0.2, %v3429_v33  ;;  %v4713_v61 = vld [vmem:[#allocation14 + $0x58] sm:$0xff] }
 0x58e   : > { %7570 = vmatmul.mubr.bf16.gmra.mrb[36].mxu0 %v3576_v36  ;;  %v3562_v7 = vmul.f32 %v10820_v14, %v3523_v62  ;;  %v3524_v46 = vsel %vm3460_vm13, %v3428_v9, %v3492_v4  ;;  %v3559_v15 = vmul.f32 %v10820_v14, %v3520_v40  ;;  %v3561_v54 = vmul.f32 %v10820_v14, %v3522_v59  ;;  %v8539_v40 = vld [vmem:[%s9668_s9 + $0x8] sm:$0xff] }
 0x58f   : > { %7573 = vmatprep.mubr.bf16.mxu0 %v3577_v60  ;;  %v3525_v37 = vsel %vm3461_vm15, %v3429_v33, %v3493_v22  ;;  %v3563_v8 = vmul.f32 %v10820_v14, %v3524_v46  ;;  %v7833_v39 = vpack.c.bf16 %v4705_v20, %v4703_v41  ;;  %v7835_v5 = vpack.c.bf16 %v4704_v38, %v4702_v50 }
 0x590   : > { %v3564_v28 = vmul.f32 %v10820_v14, %v3525_v37  ;;  %v3578_v2 = vpack.c.bf16 %v3560_v30, %v3559_v15  ;;  %v3579_v12 = vpack.c.bf16 %v3562_v7, %v3561_v54  ;;  %v7837_v34 = vpack.c.bf16 %v4709_v3, %v4707_v56 }
 0x591   : > { %7834 = vmatprep.subr.bf16.mxu1 %v7833_v39  ;;  %v7839_v14 = vpack.c.bf16 %v4708_v10, %v4706_v1  ;;  %v7841_v19 = vpack.c.bf16 %v4713_v61, %v4711_v31  ;;  %v7843_v11 = vpack.c.bf16 %v4712_v23, %v4710_v0  ;;  %v7845_v24 = vpack.c.bf16 %v4717_v27, %v4715_v21  ;;  %v8541_v39 = vld [vmem:[%s9668_s9 + $0x20] sm:$0xff] }
 0x592   : > { %v3580_v53 = vpack.c.bf16 %v3564_v28, %v3563_v8  ;;  %7836 = vmatpush1.bf16.msra.mxu1 %v7835_v5  ;;  %v7847_v29 = vpack.c.bf16 %v4716_v16, %v4714_v63 }
 0x593   : > { %7838 = vmatprep.subr.bf16.mxu1 %v7837_v34  ;;  %v8542_v34 = vld [vmem:[%s9668_s9 + $0x38] sm:$0xff] }
 0x596   : > { %7574 = vmatmul.mubr.bf16.gmra.mrb[40].mxu0 %v3578_v2  ;;  %7840 = vmatpush1.bf16.msra.mxu1 %v7839_v14  ;;  %v8540_v2 = vld [vmem:[%s9668_s9 + $0x30] sm:$0xff] }
 0x597   : > { %7577 = vmatprep.mubr.bf16.mxu0 %v3579_v12  ;;  %7842 = vmatprep.subr.bf16.mxu1 %v7841_v19  ;;  %v8543_v19 = vld [vmem:[%s9668_s9 + $0x28] sm:$0xff] }
 0x59a   : > { %7844 = vmatpush1.bf16.msra.mxu1 %v7843_v11 }
 0x59b   : > { %7846 = vmatprep.subr.bf16.mxu1 %v7845_v24 }
 0x59e   : > { %7578 = vmatmul.mubr.bf16.gmra.mrb[44].mxu0 %v3580_v53  ;;  %7848 = vmatpush1.bf16.msra.mxu1 %v7847_v29 }
 0x62e   : > { %v7551_v26 = vpop.f32.mrb[16].mxu0 }
 0x62f   : > { %v3808_v51 = vadd.f32 %v8536_v52, %v7551_v26  ;;  %v3679_v17 = vpop.f32.mrb[17].mxu0 }
 0x630   : > { %v3806_v49 = vadd.f32 %v8537_v45, %v3679_v17  ;;  %v7552_v9 = vpop.f32.mrb[18].mxu0 }
 0x631   : > { %v3850_v60 = vrot.slane %v3808_v51, 4  ;;  %v3809_v36 = vadd.f32 %v8538_v6, %v7552_v9  ;;  %v3682_v57 = vpop.f32.mrb[19].mxu0 }
 0x632   : > { %v3838_v33 = vrot.slane %v3806_v49, 4  ;;  %v3807_v30 = vadd.f32 %v8539_v40, %v3682_v57 }
 0x633   : > { %v3851_v4 = vmax.f32 %v3808_v51, %v3850_v60  ;;  %v3856_v59 = vrot.slane %v3809_v36, 4 }
 0x634   : > { %v3839_v62 = vmax.f32 %v3806_v49, %v3838_v33  ;;  %v3844_v22 = vrot.slane %v3807_v30, 4 }
 0x635   : > { %v3852_v7 = vrot.slane %v3851_v4, 2  ;;  %v3857_v46 = vmax.f32 %v3809_v36, %v3856_v59 }
 0x636   : > { %v3840_v15 = vrot.slane %v3839_v62, 2  ;;  %v3845_v37 = vmax.f32 %v3807_v30, %v3844_v22  ;;  %v7555_v8 = vpop.f32.mrb[20].mxu0 }
 0x637   : > { %v3853_v54 = vmax.f32 %v3851_v4, %v3852_v7  ;;  %v3858_v28 = vrot.slane %v3857_v46, 2  ;;  %v10967_v12 = vadd.f32 %v8540_v2, %v7555_v8  ;;  %v3695_v53 = vpop.f32.mrb[21].mxu0 }
 0x638   : > { %v3841_v41 = vmax.f32 %v3839_v62, %v3840_v15  ;;  %v3846_v20 = vrot.slane %v3845_v37, 2  ;;  %v10970_v50 = vadd.f32 %v8541_v39, %v3695_v53  ;;  %v7556_v38 = vpop.f32.mrb[22].mxu0  ;;  %v8544_v53 = vld [vmem:[%s9668_s9 + $0x50] sm:$0xff] }
 0x639   : > { %v3854_v5 = vrot.slane %v3853_v54, 1  ;;  %v3859_v56 = vmax.f32 %v3857_v46, %v3858_v28  ;;  %v3874_v3 = vrot.slane %v10967_v12, 4  ;;  %v10974_v1 = vadd.f32 %v8542_v34, %v7556_v38  ;;  %v3698_v10 = vpop.f32.mrb[23].mxu0  ;;  %v8545_v38 = vld [vmem:[%s9668_s9 + $0x40] sm:$0xff] }
 0x63a   : > { %v3842_v14 = vrot.slane %v3841_v41, 1  ;;  %v3847_v31 = vmax.f32 %v3845_v37, %v3846_v20  ;;  %v3862_v61 = vrot.slane %v10970_v50, 4  ;;  %v10978_v0 = vadd.f32 %v8543_v19, %v3698_v10 }
 0x63b   : > { %v3855_v23 = vmax.f32 %v3853_v54, %v3854_v5  ;;  %v3860_v11 = vrot.slane %v3859_v56, 1  ;;  %v3875_v21 = vmax.f32 %v10967_v12, %v3874_v3  ;;  %v3880_v27 = vrot.slane %v10974_v1, 4 }
 0x63c   : > { %v3843_v24 = vmax.f32 %v3841_v41, %v3842_v14  ;;  %v3848_v63 = vrot.slane %v3847_v31, 1  ;;  %v3863_v16 = vmax.f32 %v10970_v50, %v3862_v61  ;;  %v3868_v29 = vrot.slane %v10978_v0, 4  ;;  %v8546_v14 = vld [vmem:[%s9668_s9 + $0x58] sm:$0xff] }
 0x63d   : > { %v4032_v26 = vsub.f32 %v3808_v51, %v3855_v23  ;;  %v3861_v52 = vmax.f32 %v3859_v56, %v3860_v11  ;;  %v3876_v17 = vrot.slane %v3875_v21, 2  ;;  %v3881_v45 = vmax.f32 %v10974_v1, %v3880_v27 }
 0x63e   : > { %v4030_v9 = vsub.f32 %v3806_v49, %v3843_v24  ;;  %v3849_v60 = vmax.f32 %v3847_v31, %v3848_v63  ;;  %v3864_v6 = vrot.slane %v3863_v16, 2  ;;  %v3869_v57 = vmax.f32 %v10978_v0, %v3868_v29 }
 0x63f   : > { %v4066_v33 = vmul.f32 1.442695, %v4032_v26  ;;  %v4033_v40 = vsub.f32 %v3809_v36, %v3861_v52  ;;  %v3877_v4 = vmax.f32 %v3875_v21, %v3876_v17  ;;  %v3882_v59 = vrot.slane %v3881_v45, 2  ;;  %v8547_v21 = vld [vmem:[%s9668_s9 + $0x48] sm:$0xff] }
 0x640   : > { %v4062_v62 = vmul.f32 1.442695, %v4030_v9  ;;  %v4031_v22 = vsub.f32 %v3807_v30, %v3849_v60  ;;  %v3865_v7 = vmax.f32 %v3863_v16, %v3864_v6  ;;  %v3870_v46 = vrot.slane %v3869_v57, 2  ;;  %v4719_v17 = vld [vmem:[#allocation14 + $0x88] sm:$0xff] }
 0x641   : > { %8280 = vpow2.f32 %v4066_v33  ;;  %v4068_v51 = vmul.f32 1.442695, %v4033_v40  ;;  %v3878_v15 = vrot.slane %v3877_v4, 1  ;;  %v3883_v37 = vmax.f32 %v3881_v45, %v3882_v59  ;;  %v4721_v45 = vld [vmem:[#allocation14 + $0x98] sm:$0xff] }
 0x642   : > { %8282 = vpow2.f32 %v4062_v62  ;;  %v4064_v49 = vmul.f32 1.442695, %v4031_v22  ;;  %v3866_v8 = vrot.slane %v3865_v7, 1  ;;  %v3871_v54 = vmax.f32 %v3869_v57, %v3870_v46 }
 0x643   : > { %v7559_v28 = vpop.f32.mrb[24].mxu0  ;;  %8284 = vpow2.f32 %v4068_v51  ;;  %v3879_v36 = vmax.f32 %v3877_v4, %v3878_v15  ;;  %v3884_v2 = vrot.slane %v3883_v37, 1  ;;  %v7849_v59 = vpack.c.bf16 %v4721_v45, %v4719_v17 }
 0x644   : > { %v10987_v41 = vadd.f32 %v8544_v53, %v7559_v28  ;;  %v3711_v30 = vpop.f32.mrb[25].mxu0  ;;  %8286 = vpow2.f32 %v4064_v49  ;;  %v3867_v20 = vmax.f32 %v3865_v7, %v3866_v8  ;;  %v3872_v39 = vrot.slane %v3871_v54, 1 }
 0x645   : > { %v10990_v5 = vadd.f32 %v8545_v38, %v3711_v30  ;;  %v7560_v56 = vpop.f32.mrb[26].mxu0  ;;  %v4036_v3 = vsub.f32 %v10967_v12, %v3879_v36  ;;  %v3885_v34 = vmax.f32 %v3883_v37, %v3884_v2  ;;  %7850 = vmatprep.subr.bf16.mxu1 %v7849_v59 }
 0x646   : > { %v3898_v10 = vrot.slane %v10987_v41, 4  ;;  %v10995_v31 = vadd.f32 %v8546_v14, %v7560_v56  ;;  %v3714_v61 = vpop.f32.mrb[27].mxu0  ;;  %v4034_v19 = vsub.f32 %v10970_v50, %v3867_v20  ;;  %v3873_v23 = vmax.f32 %v3871_v54, %v3872_v39 }
 0x647   : > { %v3886_v11 = vrot.slane %v10990_v5, 4  ;;  %v11000_v27 = vadd.f32 %v8547_v21, %v3714_v61  ;;  %v4074_v24 = vmul.f32 1.442695, %v4036_v3  ;;  %v4037_v63 = vsub.f32 %v10974_v1, %v3885_v34 }
 0x648   : > { %v3899_v12 = vmax.f32 %v10987_v41, %v3898_v10  ;;  %v3904_v16 = vrot.slane %v10995_v31, 4  ;;  %v4070_v29 = vmul.f32 1.442695, %v4034_v19  ;;  %v4035_v26 = vsub.f32 %v10978_v0, %v3873_v23 }
 0x649   : > { %v3887_v52 = vmax.f32 %v10990_v5, %v3886_v11  ;;  %v3892_v50 = vrot.slane %v11000_v27, 4  ;;  %8288 = vpow2.f32 %v4074_v24  ;;  %v4076_v9 = vmul.f32 1.442695, %v4037_v63 }
 0x64a   : > { %v3900_v60 = vrot.slane %v3899_v12, 2  ;;  %v3905_v6 = vmax.f32 %v10995_v31, %v3904_v16  ;;  %8290 = vpow2.f32 %v4070_v29  ;;  %v4072_v1 = vmul.f32 1.442695, %v4035_v26 }
 0x64b   : > { %v3888_v57 = vrot.slane %v3887_v52, 2  ;;  %v3893_v33 = vmax.f32 %v11000_v27, %v3892_v50  ;;  %v8281_v40 = vpop.eup %8280  ;;  %8292 = vpow2.f32 %v4076_v9 }
 0x64c   : > { %v3901_v4 = vmax.f32 %v3899_v12, %v3900_v60  ;;  %v3906_v0 = vrot.slane %v3905_v6, 2  ;;  %v8283_v62 = vpop.eup %8282  ;;  %v11012_v7 = vsel %vm1007_vm0, 0.0, %v8281_v40  ;;  %8294 = vpow2.f32 %v4072_v1 }
 0x64d   : > { %v3889_v46 = vmax.f32 %v3887_v52, %v3888_v57  ;;  %v3894_v51 = vrot.slane %v3893_v33, 2  ;;  %v8285_v15 = vpop.eup %8284  ;;  %v4170_v37 = vrot.slane %v11012_v7, 4  ;;  %v11017_v8 = vsel %vm1005_vm1, 0.0, %v8283_v62 }
 0x64e   : > { %v3902_v54 = vrot.slane %v3901_v4, 1  ;;  %v3907_v28 = vmax.f32 %v3905_v6, %v3906_v0  ;;  %v11019_v36 = vpop.f32.mrb[28].mxu0  ;;  %v8287_v2 = vpop.eup %8286  ;;  %v4158_v53 = vrot.slane %v11017_v8, 4  ;;  %v11024_v20 = vsel %vm1008_vm2, 0.0, %v8285_v15  ;;  %v12887_v0 = vld [vmem:[#allocation53_spill] sm:$0xff] }
 0x64f   : > { %v3890_v39 = vrot.slane %v3889_v46, 1  ;;  %v3895_v38 = vmax.f32 %v3893_v33, %v3894_v51  ;;  %v11026_v56 = vpop.f32.mrb[29].mxu0  ;;  %v4171_v3 = vadd.f32 %v4170_v37, %v11012_v7  ;;  %v4176_v34 = vrot.slane %v11024_v20, 4 }
 0x650   : > { %v11032_v14 = vsel %vm1006_vm3, 0.0, %v8287_v2  ;;  %v3903_v61 = vmax.f32 %v3901_v4, %v3902_v54  ;;  %v11034_v19 = vpop.f32.mrb[30].mxu0  ;;  %v4159_v23 = vadd.f32 %v4158_v53, %v11017_v8  ;;  %v3908_v24 = vrot.slane %v3907_v28, 1 }
 0x651   : > { %v4164_v11 = vrot.slane %v11032_v14, 4  ;;  %v3891_v21 = vmax.f32 %v3889_v46, %v3890_v39  ;;  %v11038_v63 = vpop.f32.mrb[31].mxu0  ;;  %v4172_v12 = vrot.slane %v4171_v3, 2  ;;  %v4177_v16 = vadd.f32 %v4176_v34, %v11024_v20 }
 0x652   : > { %v4040_v29 = vsub.f32 %v10987_v41, %v3903_v61  ;;  %v3896_v26 = vrot.slane %v3895_v38, 1  ;;  %v4160_v52 = vrot.slane %v4159_v23, 2  ;;  %v11044_v45 = vmax.f32 %v3907_v28, %v3908_v24 }
 0x653   : > { %v4165_v50 = vadd.f32 %v4164_v11, %v11032_v14  ;;  %v4038_v17 = vsub.f32 %v10990_v5, %v3891_v21  ;;  %v8289_v9 = vpop.eup %8288  ;;  %v4173_v60 = vadd.f32 %v4172_v12, %v4171_v3  ;;  %v4178_v6 = vrot.slane %v4177_v16, 2 }
 0x654   : > { %v4082_v1 = vmul.f32 1.442695, %v4040_v29  ;;  %v11046_v57 = vmax.f32 %v3895_v38, %v3896_v26  ;;  %v8291_v33 = vpop.eup %8290  ;;  %v4161_v40 = vadd.f32 %v4160_v52, %v4159_v23  ;;  %v11050_v41 = vsel %vm1011_vm4, 0.0, %v8289_v9 }
 0x655   : > { %v4166_v4 = vrot.slane %v4165_v50, 2  ;;  %v4078_v59 = vmul.f32 1.442695, %v4038_v17  ;;  %v8293_v62 = vpop.eup %8292  ;;  %v4174_v46 = vrot.slane %v4173_v60, 1  ;;  %v4179_v51 = vadd.f32 %v4178_v6, %v4177_v16 }
 0x656   : > { %v4194_v5 = vrot.slane %v11050_v41, 4  ;;  %v11055_v37 = vsel %vm1009_vm5, 0.0, %v8291_v33  ;;  %v8295_v54 = vpop.eup %8294  ;;  %v4162_v28 = vrot.slane %v4161_v40, 1  ;;  %v11060_v38 = vsel %vm1012_vm6, 0.0, %v8293_v62 }
 0x657   : > { %v4167_v2 = vadd.f32 %v4166_v4, %v4165_v50  ;;  %v4182_v53 = vrot.slane %v11055_v37, 4  ;;  %v4175_v3 = vadd.f32 %v4174_v46, %v4173_v60  ;;  %v4180_v34 = vrot.slane %v4179_v51, 1 }
 0x658   : > { %v4195_v61 = vadd.f32 %v4194_v5, %v11050_v41  ;;  %v4200_v23 = vrot.slane %v11060_v38, 4  ;;  %v4163_v11 = vadd.f32 %v4162_v28, %v4161_v40  ;;  %v11067_v16 = vsel %vm1010_vm7, 0.0, %v8295_v54 }
 0x659   : > { %v4168_v21 = vrot.slane %v4167_v2, 1  ;;  %v4183_v24 = vadd.f32 %v4182_v53, %v11055_v37  ;;  %v11069_v29 = vpop.f32.mrb[32].mxu0  ;;  %vm4352_vm8 = vcmp.gt.f32.partialorder %v4175_v3, 0.0  ;;  %v4181_v26 = vadd.f32 %v4180_v34, %v4179_v51 }
 0x65a   : > { %v4196_v52 = vrot.slane %v4195_v61, 2  ;;  %v4201_v50 = vadd.f32 %v4200_v23, %v11060_v38  ;;  %v11072_v17 = vpop.f32.mrb[33].mxu0  ;;  %v4384_v9 = vsel %vm4352_vm8, %v4175_v3, 1.0  ;;  %vm4350_vm14 = vcmp.gt.f32.partialorder %v4163_v11, 0.0 }
 0x65b   : > { %v4169_v60 = vadd.f32 %v4168_v21, %v4167_v2  ;;  %v4184_v6 = vrot.slane %v4183_v24, 2  ;;  %v11074_v33 = vpop.f32.mrb[34].mxu0  ;;  %8296 = vrcp.f32 %v4384_v9  ;;  %v4382_v40 = vsel %vm4350_vm14, %v4163_v11, 1.0 }
 0x65c   : > { %vm4353_vm11 = vcmp.gt.f32.partialorder %v4181_v26, 0.0  ;;  %v4197_v4 = vadd.f32 %v4196_v52, %v4195_v61  ;;  %v11076_v62 = vpop.f32.mrb[35].mxu0  ;;  %8298 = vrcp.f32 %v4382_v40  ;;  %v4202_v28 = vrot.slane %v4201_v50, 2 }
 0x65d   : > { %v4385_v46 = vsel %vm4353_vm11, %v4181_v26, 1.0  ;;  %vm4351_vm12 = vcmp.gt.f32.partialorder %v4169_v60, 0.0  ;;  %v4185_v51 = vadd.f32 %v4184_v6, %v4183_v24  ;;  %v4188_v53 = vrot.slane %v11067_v16, 4 }
 0x65e   : > { %8300 = vrcp.f32 %v4385_v46  ;;  %v4383_v5 = vsel %vm4351_vm12, %v4169_v60, 1.0  ;;  %v4198_v54 = vrot.slane %v4197_v4, 1  ;;  %v4041_v3 = vsub.f32 %v10995_v31, %v11044_v45  ;;  %v8548_v60 = vld [vmem:[%s9668_s9 + $0x70] sm:$0xff] }
 0x65f   : > { %8302 = vrcp.f32 %v4383_v5  ;;  %v4186_v2 = vrot.slane %v4185_v51, 1  ;;  %v4203_v61 = vadd.f32 %v4202_v28, %v4201_v50  ;;  %v4039_v23 = vsub.f32 %v11000_v27, %v11046_v57 }
 0x660   : > { %v4199_v34 = vadd.f32 %v4198_v54, %v4197_v4  ;;  %8304 = vpow2.f32 %v4082_v1  ;;  %v4189_v21 = vadd.f32 %v4188_v53, %v11067_v16  ;;  %v4084_v24 = vmul.f32 1.442695, %v4041_v3  ;;  %v8549_v4 = vld [vmem:[%s9668_s9 + $0x60] sm:$0xff] }
 0x661   : > { %v4187_v11 = vadd.f32 %v4186_v2, %v4185_v51  ;;  %8306 = vpow2.f32 %v4078_v59  ;;  %v11084_v26 = vpop.f32.mrb[36].mxu0  ;;  %v4204_v52 = vrot.slane %v4203_v61, 1  ;;  %v4080_v9 = vmul.f32 1.442695, %v4039_v23  ;;  %v8550_v51 = vld [vmem:[%s9668_s9 + $0x78] sm:$0xff]  ;;  %v8551_v2 = vld [vmem:[%s9668_s9 + $0x68] sm:$0xff] }
 0x662   : > { %vm4356_vm9 = vcmp.gt.f32.partialorder %v4199_v34, 0.0  ;;  %v11088_v31 = vadd.f32 %v8548_v60, %v11019_v36  ;;  %v11090_v45 = vpop.f32.mrb[37].mxu0  ;;  %v4190_v27 = vrot.slane %v4189_v21, 2  ;;  %8308 = vpow2.f32 %v4084_v24 }
 0x663   : > { %v4388_v1 = vsel %vm4356_vm9, %v4199_v34, 1.0  ;;  %vm4354_vm13 = vcmp.gt.f32.partialorder %v4187_v11, 0.0  ;;  %v11092_v57 = vpop.f32.mrb[38].mxu0  ;;  %v4205_v50 = vadd.f32 %v4204_v52, %v4203_v61  ;;  %v11099_v46 = vadd.f32 %v8549_v4, %v11026_v56 }
 0x664   : > { %8310 = vrcp.f32 %v4388_v1  ;;  %v4386_v59 = vsel %vm4354_vm13, %v4187_v11, 1.0  ;;  %v3922_v6 = vrot.slane %v11088_v31, 4  ;;  %v11095_v40 = vpop.f32.mrb[39].mxu0  ;;  %v4191_v36 = vadd.f32 %v4190_v27, %v4189_v21 }
 0x665   : > { %8312 = vrcp.f32 %v4386_v59  ;;  %v11103_v5 = vadd.f32 %v8550_v51, %v11034_v19  ;;  %v8297_v54 = vpop.eup %8296  ;;  %vm4357_vm15 = vcmp.gt.f32.partialorder %v4205_v50, 0.0  ;;  %v11108_v53 = vadd.f32 %v8551_v2, %v11038_v63 }
 0x666   : > { %8314 = vpow2.f32 %v4080_v9  ;;  %v3923_v28 = vmax.f32 %v11088_v31, %v3922_v6  ;;  %v8299_v3 = vpop.eup %8298  ;;  %v4448_v34 = vmul.f32 %v8297_v54, %v11012_v7  ;;  %v4389_v61 = vsel %vm4357_vm15, %v4205_v50, 1.0 }
 0x667   : > { %v4192_v23 = vrot.slane %v4191_v36, 1  ;;  %v3910_v56 = vrot.slane %v11099_v46, 4  ;;  %v4446_v19 = vmul.f32 %v8299_v3, %v11017_v8  ;;  %8316 = vrcp.f32 %v4389_v61 }
 0x668   : > { %v8301_v11 = vpop.eup %8300  ;;  %v3924_v21 = vrot.slane %v3923_v28, 2  ;;  %v3928_v24 = vrot.slane %v11103_v5, 4  ;;  %v4480_v9 = vmul.f32 %v4448_v34, %v10802_v55  ;;  %vm12888_vm9 = vcmp.lt.f32.partialorder %v12887_v0, 0.0 }
 0x669   : > { %v8303_v52 = vpop.eup %8302  ;;  %v4449_v63 = vmul.f32 %v8301_v11, %v11024_v20  ;;  %v4193_v60 = vadd.f32 %v4192_v23, %v4191_v36  ;;  %v11117_v1 = vmax.f32 %v11099_v46, %v3910_v56  ;;  %v11119_v7 = vpop.f32.mrb[40].mxu0  ;;  %v4478_v59 = vmul.f32 %v4446_v19, %v10802_v55  ;;  %v12881_v36 = vld [vmem:[#allocation50_spill] sm:$0xff] }
 0x66a   : > { %v8305_v27 = vpop.eup %8304  ;;  %v4447_v8 = vmul.f32 %v8303_v52, %v11032_v14  ;;  %v3925_v50 = vmax.f32 %v3923_v28, %v3924_v21  ;;  %v3929_v6 = vmax.f32 %v11103_v5, %v3928_v24  ;;  %v11124_v4 = vpop.f32.mrb[41].mxu0  ;;  %v4522_v54 = vrot.slane %v4480_v9, 4  ;;  %v12883_v21 = vld [vmem:[#allocation51_spill] sm:$0xff] }
 0x66b   : > { %v8307_v51 = vpop.eup %8306  ;;  %v11127_v20 = vmul.f32 %v4449_v63, %v10802_v55  ;;  %vm4355_vm8 = vcmp.gt.f32.partialorder %v4193_v60, 0.0  ;;  %vm12882_vm14 = vcmp.lt.f32.partialorder %v12881_v36, 0.0  ;;  %v11133_v3 = vpop.f32.mrb[42].mxu0  ;;  %v4510_v34 = vrot.slane %v4478_v59, 4 }
 0x66c   : > { %v11131_v2 = vsel %vm12882_vm14, 0.0, %v8305_v27  ;;  %v4479_v14 = vmul.f32 %v4447_v8, %v10802_v55  ;;  %v4387_v28 = vsel %vm4355_vm8, %v4193_v60, 1.0  ;;  %v11137_v23 = vpop.f32.mrb[43].mxu0  ;;  %v8309_v56 = vpop.eup %8308  ;;  %v11139_v11 = vadd.f32 %v4522_v54, %v4480_v9  ;;  %v12885_v54 = vld [vmem:[#allocation52_spill] sm:$0xff] }
 0x66d   : > { %v4218_v61 = vrot.slane %v11131_v2, 4  ;;  %8318 = vrcp.f32 %v4387_v28  ;;  %vm12884_vm11 = vcmp.lt.f32.partialorder %v12883_v21, 0.0  ;;  %v4511_v63 = vadd.f32 %v4510_v34, %v4478_v59 }
 0x66e   : > { %v11144_v24 = vsel %vm12884_vm11, 0.0, %v8307_v51  ;;  %v8311_v52 = vpop.eup %8310  ;;  %v4516_v27 = vrot.slane %v4479_v14, 4  ;;  %vm12886_vm12 = vcmp.lt.f32.partialorder %v12885_v54, 0.0  ;;  %v3926_v19 = vrot.slane %v3925_v50, 1 }
 0x66f   : > { %v4219_v8 = vadd.f32 %v4218_v61, %v11131_v2  ;;  %v4206_v60 = vrot.slane %v11144_v24, 4  ;;  %v8313_v36 = vpop.eup %8312  ;;  %v11150_v9 = vmul.f32 %v8311_v52, %v11050_v41  ;;  %v11154_v28 = vsel %vm12886_vm12, 0.0, %v8309_v56 }
 0x670   : > { %v8315_v51 = vpop.eup %8314  ;;  %v4512_v21 = vrot.slane %v4511_v63, 2  ;;  %v4517_v39 = vadd.f32 %v4516_v27, %v4479_v14  ;;  %v4450_v59 = vmul.f32 %v8313_v36, %v11055_v37  ;;  %v4224_v15 = vrot.slane %v11154_v28, 4 }
 0x671   : > { %v4220_v34 = vrot.slane %v4219_v8, 2  ;;  %v4207_v61 = vadd.f32 %v4206_v60, %v11144_v24  ;;  %v11161_v12 = vsel %vm12888_vm9, 0.0, %v8315_v51  ;;  %v3927_v41 = vmax.f32 %v3925_v50, %v3926_v19  ;;  %v11163_v52 = vpop.f32.mrb[44].mxu0  ;;  %v11165_v56 = vpop.eup %8316 }
 0x672   : > { %v11167_v54 = vadd.f32 %v4512_v21, %v4511_v63  ;;  %v4518_v10 = vrot.slane %v4517_v39, 2  ;;  %v11170_v14 = vmul.f32 %v4450_v59, %v10802_v55  ;;  %v11172_v36 = vpop.f32.mrb[45].mxu0  ;;  %v4225_v60 = vadd.f32 %v4224_v15, %v11154_v28 }
 0x673   : > { %v4221_v37 = vadd.f32 %v4220_v34, %v4219_v8  ;;  %v4208_v27 = vrot.slane %v4207_v61, 2  ;;  %v4212_v51 = vrot.slane %v11161_v12, 4  ;;  %v4044_v50 = vsub.f32 %v11088_v31, %v3927_v41  ;;  %v11177_v19 = vpop.f32.mrb[46].mxu0 }
 0x674   : > { %v11179_v0 = vadd.f32 %v4518_v10, %v4517_v39  ;;  %v3912_v63 = vrot.slane %v11117_v1, 2  ;;  %v3930_v30 = vrot.slane %v3929_v6, 2  ;;  %v11182_v59 = vpop.f32.mrb[47].mxu0  ;;  %v4226_v34 = vrot.slane %v4225_v60, 2 }
 0x675   : > { %v4222_v21 = vrot.slane %v4221_v37, 1  ;;  %v4209_v8 = vadd.f32 %v4208_v27, %v4207_v61  ;;  %v4213_v49 = vadd.f32 %v4212_v51, %v11161_v12  ;;  %v4090_v22 = vmul.f32 1.442695, %v4044_v50 }
 0x676   : > { %v3913_v13 = vmax.f32 %v11117_v1, %v3912_v63  ;;  %v3931_v42 = vmax.f32 %v3929_v6, %v3930_v30  ;;  %v3916_v31 = vrot.slane %v11108_v53, 4  ;;  %v4227_v39 = vadd.f32 %v4226_v34, %v4225_v60 }
 0x677   : > { %v4223_v15 = vadd.f32 %v4222_v21, %v4221_v37  ;;  %v8319_v41 = vpop.eup %8318  ;;  %v4210_v10 = vrot.slane %v4209_v8, 1  ;;  %v4214_v44 = vrot.slane %v4213_v49, 2  ;;  %8320 = vpow2.f32 %v4090_v22  ;;  %v8552_v22 = vld [vmem:[%s9668_s9 + $0x90] sm:$0xff] }
 0x678   : > { %v11188_v58 = vmul.f32 %v8319_v41, %v11067_v16  ;;  %v3914_v61 = vrot.slane %v3913_v13, 1  ;;  %v3932_v27 = vrot.slane %v3931_v42, 1  ;;  %v4228_v37 = vrot.slane %v4227_v39, 1 }
 0x679   : > { %vm4360_vm13 = vcmp.gt.f32.partialorder %v4223_v15, 0.0  ;;  %v4211_v50 = vadd.f32 %v4210_v10, %v4209_v8  ;;  %v4215_v21 = vadd.f32 %v4214_v44, %v4213_v49  ;;  %v3917_v6 = vmax.f32 %v11108_v53, %v3916_v31 }
 0x67a   : > { %v4392_v51 = vsel %vm4360_vm13, %v4223_v15, 1.0  ;;  %v3915_v30 = vmax.f32 %v3913_v13, %v3914_v61  ;;  %v3933_v1 = vmax.f32 %v3931_v42, %v3932_v27  ;;  %v4229_v60 = vadd.f32 %v4228_v37, %v4227_v39  ;;  %v8553_v39 = vld [vmem:[%s9668_s9 + $0x80] sm:$0xff]  ;;  %v8554_v27 = vld [vmem:[%s9668_s9 + $0x98] sm:$0xff] }
 0x67b   : > { %8322 = vrcp.f32 %v4392_v51  ;;  %vm4358_vm15 = vcmp.gt.f32.partialorder %v4211_v50, 0.0  ;;  %v4216_v63 = vrot.slane %v4215_v21, 1  ;;  %v11193_v34 = vadd.f32 %v8552_v22, %v11069_v29 }
 0x67c   : > { %v4390_v16 = vsel %vm4358_vm15, %v4211_v50, 1.0  ;;  %v4042_v41 = vsub.f32 %v11099_v46, %v3915_v30  ;;  %v4045_v8 = vsub.f32 %v11103_v5, %v3933_v1  ;;  %v3918_v15 = vrot.slane %v3917_v6, 2  ;;  %v8555_v30 = vld [vmem:[%s9668_s9 + $0x88] sm:$0xff] }
 0x67d   : > { %8324 = vrcp.f32 %v4390_v16  ;;  %vm4361_vm8 = vcmp.gt.f32.partialorder %v4229_v60, 0.0  ;;  %v4217_v44 = vadd.f32 %v4216_v63, %v4215_v21  ;;  %v3946_v42 = vrot.slane %v11193_v34, 4 }
 0x67e   : > { %v4393_v13 = vsel %vm4361_vm8, %v4229_v60, 1.0  ;;  %v4086_v49 = vmul.f32 1.442695, %v4042_v41  ;;  %v4092_v31 = vmul.f32 1.442695, %v4045_v8  ;;  %v3919_v10 = vmax.f32 %v3917_v6, %v3918_v15 }
 0x67f   : > { %8326 = vrcp.f32 %v4393_v13  ;;  %vm4359_vm14 = vcmp.gt.f32.partialorder %v4217_v44, 0.0  ;;  %v3947_v29 = vmax.f32 %v11193_v34, %v3946_v42  ;;  %v11201_v46 = vadd.f32 %v8553_v39, %v11072_v17  ;;  %v12889_v17 = vld [vmem:[#allocation54_spill] sm:$0xff] }
 0x680   : > { %v4391_v5 = vsel %vm4359_vm14, %v4217_v44, 1.0  ;;  %8328 = vpow2.f32 %v4086_v49  ;;  %v3920_v61 = vrot.slane %v3919_v10, 1  ;;  %v11205_v51 = vadd.f32 %v8554_v27, %v11074_v33  ;;  %v8556_v44 = vld [vmem:[%s9668_s9 + $0xb0] sm:$0xff]  ;;  %v8557_v13 = vld [vmem:[%s9668_s9 + $0xa0] sm:$0xff] }
 0x681   : > { %v8321_v50 = vpop.eup %8320  ;;  %8330 = vrcp.f32 %v4391_v5  ;;  %v3948_v37 = vrot.slane %v3947_v29, 2  ;;  %v3934_v21 = vrot.slane %v11201_v46, 4  ;;  %v11210_v1 = vadd.f32 %v8555_v30, %v11076_v62 }
 0x682   : > { %vm12890_vm11 = vcmp.lt.f32.partialorder %v12889_v17, 0.0  ;;  %8332 = vpow2.f32 %v4092_v31  ;;  %v3921_v60 = vmax.f32 %v3919_v10, %v3920_v61  ;;  %v3952_v33 = vrot.slane %v11205_v51, 4 }
 0x683   : > { %v11214_v6 = vsel %vm12890_vm11, 0.0, %v8321_v50  ;;  %v3949_v22 = vmax.f32 %v3947_v29, %v3948_v37  ;;  %v3935_v16 = vmax.f32 %v11201_v46, %v3934_v21  ;;  %v3940_v41 = vrot.slane %v11210_v1, 4 }
 0x684   : > { %v4242_v63 = vrot.slane %v11214_v6, 4  ;;  %v4043_v15 = vsub.f32 %v11108_v53, %v3921_v60  ;;  %v3953_v62 = vmax.f32 %v11205_v51, %v3952_v33  ;;  %v11224_v42 = vadd.f32 %v8556_v44, %v11084_v26 }
 0x685   : > { %v8323_v8 = vpop.eup %8322  ;;  %v11228_v49 = vadd.f32 %v8557_v13, %v11090_v45  ;;  %v3950_v29 = vrot.slane %v3949_v22, 1  ;;  %v3936_v39 = vrot.slane %v3935_v16, 2  ;;  %v3941_v53 = vmax.f32 %v11210_v1, %v3940_v41 }
 0x686   : > { %v4456_v31 = vmul.f32 %v8323_v8, %v11131_v2  ;;  %v4243_v10 = vadd.f32 %v4242_v63, %v11214_v6  ;;  %v4088_v5 = vmul.f32 1.442695, %v4043_v15  ;;  %v3954_v61 = vrot.slane %v3953_v62, 2 }
 0x687   : > { %v3970_v27 = vrot.slane %v11224_v42, 4  ;;  %v8325_v50 = vpop.eup %8324  ;;  %v3951_v21 = vmax.f32 %v3949_v22, %v3950_v29  ;;  %v3937_v45 = vmax.f32 %v3935_v16, %v3936_v39  ;;  %v3942_v60 = vrot.slane %v3941_v53, 2  ;;  %v12892_v39 = vld [vmem:[#allocation55_spill] sm:$0xff] }
 0x688   : > { %v11235_v26 = vmul.f32 %v4456_v31, %v10839_v35  ;;  %v4244_v37 = vrot.slane %v4243_v10, 2  ;;  %v4454_v30 = vmul.f32 %v8325_v50, %v11144_v24  ;;  %8334 = vpow2.f32 %v4088_v5 }
 0x689   : > { %v3955_v2 = vmax.f32 %v3953_v62, %v3954_v61  ;;  %v8327_v33 = vpop.eup %8326  ;;  %v4048_v41 = vsub.f32 %v11193_v34, %v3951_v21  ;;  %v3938_v15 = vrot.slane %v3937_v45, 1  ;;  %v3943_v16 = vmax.f32 %v3941_v53, %v3942_v60 }
 0x68a   : > { %12891 = vst [vmem:[#allocation70_spill] sm:$0xff] %v11235_v26  ;;  %v4245_v8 = vadd.f32 %v4244_v37, %v4243_v10  ;;  %v8329_v44 = vpop.eup %8328  ;;  %v4486_v13 = vmul.f32 %v4454_v30, %v10839_v35  ;;  %v11242_v31 = vmul.f32 %v8327_v33, %v11154_v28  ;;  %vm12893_vm12 = vcmp.lt.f32.partialorder %v12892_v39, 0.0 }
 0x68b   : > { %v3956_v22 = vrot.slane %v3955_v2, 1  ;;  %v8331_v29 = vpop.eup %8330  ;;  %v11246_v62 = vsel %vm12893_vm12, 0.0, %v8329_v44  ;;  %v4098_v5 = vmul.f32 1.442695, %v4048_v41  ;;  %v3939_v61 = vmax.f32 %v3937_v45, %v3938_v15 }
 0x68c   : > { %v4246_v24 = vrot.slane %v4245_v8, 1  ;;  %v11248_v10 = vpop.eup %8332  ;;  %v4558_v34 = vrot.slane %v4486_v13, 4  ;;  %v4455_v50 = vmul.f32 %v8331_v29, %v11161_v12  ;;  %v4230_v37 = vrot.slane %v11246_v62, 4 }
 0x68d   : > { %v3957_v21 = vmax.f32 %v3955_v2, %v3956_v22  ;;  %8336 = vpow2.f32 %v4098_v5  ;;  %v4046_v53 = vsub.f32 %v11201_v46, %v3939_v61  ;;  %v3944_v30 = vrot.slane %v3943_v16, 1 }
 0x68e   : > { %v4247_v28 = vadd.f32 %v4246_v24, %v4245_v8  ;;  %v11253_v60 = vadd.f32 %v4558_v34, %v4486_v13  ;;  %v4487_v33 = vmul.f32 %v4455_v50, %v10839_v35  ;;  %v4231_v41 = vadd.f32 %v4230_v37, %v11246_v62  ;;  %v12894_v34 = vld [vmem:[#allocation57_spill] sm:$0xff] }
 0x68f   : > { %v4049_v45 = vsub.f32 %v11205_v51, %v3957_v21  ;;  %v4094_v15 = vmul.f32 1.442695, %v4046_v53  ;;  %v3945_v12 = vmax.f32 %v3943_v16, %v3944_v30  ;;  %v3971_v44 = vmax.f32 %v11224_v42, %v3970_v27  ;;  %v8558_v16 = vld [vmem:[%s9668_s9 + $0xb8] sm:$0xff] }
 0x690   : > { %vm4364_vm9 = vcmp.gt.f32.partialorder %v4247_v28, 0.0  ;;  %v4564_v2 = vrot.slane %v4487_v33, 4  ;;  %v4232_v22 = vrot.slane %v4231_v41, 2  ;;  %v3958_v24 = vrot.slane %v11228_v49, 4 }
 0x691   : > { %v4396_v8 = vsel %vm4364_vm9, %v4247_v28, 1.0  ;;  %v4100_v29 = vmul.f32 1.442695, %v4049_v45  ;;  %v4047_v46 = vsub.f32 %v11210_v1, %v3945_v12  ;;  %v3972_v13 = vrot.slane %v3971_v44, 2  ;;  %v8560_v45 = vld [vmem:[%s9668_s9 + $0xd0] sm:$0xff] }
 0x692   : > { %8338 = vrcp.f32 %v4396_v8  ;;  %v8335_v5 = vpop.eup %8334  ;;  %v11261_v61 = vadd.f32 %v4564_v2, %v4487_v33  ;;  %v4233_v51 = vadd.f32 %v4232_v22, %v4231_v41  ;;  %v11265_v27 = vadd.f32 %v8558_v16, %v11092_v57  ;;  %v8559_v41 = vld [vmem:[%s9668_s9 + $0xa8] sm:$0xff] }
 0x693   : > { %8340 = vpow2.f32 %v4094_v15  ;;  %vm12895_vm13 = vcmp.lt.f32.partialorder %v12894_v34, 0.0  ;;  %v4096_v1 = vmul.f32 1.442695, %v4047_v46  ;;  %v3973_v37 = vmax.f32 %v3971_v44, %v3972_v13 }
 0x694   : > { %v11269_v50 = vsel %vm12895_vm13, 0.0, %v8335_v5  ;;  %8342 = vpow2.f32 %v4100_v29  ;;  %v4234_v21 = vrot.slane %v4233_v51, 1  ;;  %v3959_v53 = vmax.f32 %v11228_v49, %v3958_v24  ;;  %v8561_v24 = vld [vmem:[%s9668_s9 + $0xc0] sm:$0xff] }
 0x695   : > { %v4236_v28 = vrot.slane %v11269_v50, 4  ;;  %v3976_v30 = vrot.slane %v11265_v27, 4  ;;  %8344 = vpow2.f32 %v4096_v1  ;;  %v3974_v33 = vrot.slane %v3973_v37, 1 }
 0x696   : > { %v11276_v57 = vadd.f32 %v8559_v41, %v11095_v40  ;;  %v11280_v15 = vadd.f32 %v8560_v45, %v11119_v7  ;;  %v4235_v12 = vadd.f32 %v4234_v21, %v4233_v51  ;;  %v3960_v2 = vrot.slane %v3959_v53, 2  ;;  %v12896_v7 = vld [vmem:[#allocation58_spill] sm:$0xff] }
 0x697   : > { %v4237_v44 = vadd.f32 %v4236_v28, %v11269_v50  ;;  %v3977_v8 = vmax.f32 %v11265_v27, %v3976_v30  ;;  %v8337_v22 = vpop.eup %8336  ;;  %v3975_v29 = vmax.f32 %v3973_v37, %v3974_v33  ;;  %v11288_v40 = vadd.f32 %v8561_v24, %v11124_v4 }
 0x698   : > { %v3964_v46 = vrot.slane %v11276_v57, 4  ;;  %v3994_v13 = vrot.slane %v11280_v15, 4  ;;  %vm4362_vm15 = vcmp.gt.f32.partialorder %v4235_v12, 0.0  ;;  %vm12897_vm8 = vcmp.lt.f32.partialorder %v12896_v7, 0.0 }
 0x699   : > { %v4238_v5 = vrot.slane %v4237_v44, 2  ;;  %v11292_v51 = vsel %vm12897_vm8, 0.0, %v8337_v22  ;;  %v3961_v16 = vmax.f32 %v3959_v53, %v3960_v2  ;;  %v4394_v1 = vsel %vm4362_vm15, %v4235_v12, 1.0 }
 0x69a   : > { %v4266_v21 = vrot.slane %v11292_v51, 4  ;;  %v4052_v37 = vsub.f32 %v11224_v42, %v3975_v29  ;;  %v3978_v28 = vrot.slane %v3977_v8, 2  ;;  %8346 = vrcp.f32 %v4394_v1 }
 0x69b   : > { %v4239_v30 = vadd.f32 %v4238_v5, %v4237_v44  ;;  %v3962_v33 = vrot.slane %v3961_v16, 1  ;;  %v3965_v41 = vmax.f32 %v11276_v57, %v3964_v46  ;;  %v3995_v22 = vmax.f32 %v11280_v15, %v3994_v13  ;;  %v12898_v44 = vld [vmem:[#allocation59_spill] sm:$0xff] }
 0x69c   : > { %v11297_v4 = vpop.eup %8338  ;;  %v4267_v45 = vadd.f32 %v4266_v21, %v11292_v51  ;;  %v4106_v24 = vmul.f32 1.442695, %v4052_v37  ;;  %v3979_v63 = vmax.f32 %v3977_v8, %v3978_v28  ;;  %v3982_v42 = vrot.slane %v11288_v40, 4  ;;  %v12900_v8 = vld [vmem:[#allocation60_spill] sm:$0xff] }
 0x69d   : > { %v8341_v53 = vpop.eup %8340  ;;  %v4240_v12 = vrot.slane %v4239_v30, 1  ;;  %v3963_v2 = vmax.f32 %v3961_v16, %v3962_v33  ;;  %v3966_v7 = vrot.slane %v3965_v41, 2  ;;  %vm12899_vm14 = vcmp.lt.f32.partialorder %v12898_v44, 0.0 }
 0x69e   : > { %v8343_v29 = vpop.eup %8342  ;;  %v4268_v1 = vrot.slane %v4267_v45, 2  ;;  %v11304_v5 = vsel %vm12899_vm14, 0.0, %v8341_v53  ;;  %8348 = vpow2.f32 %v4106_v24  ;;  %v3980_v46 = vrot.slane %v3979_v63, 1  ;;  %v12902_v24 = vld [vmem:[#allocation61_spill] sm:$0xff] }
 0x69f   : > { %v4241_v34 = vadd.f32 %v4240_v12, %v4239_v30  ;;  %v4254_v21 = vrot.slane %v11304_v5, 4  ;;  %vm12901_vm11 = vcmp.lt.f32.partialorder %v12900_v8, 0.0  ;;  %v4050_v16 = vsub.f32 %v11228_v49, %v3963_v2  ;;  %v8345_v37 = vpop.eup %8344 }
 0x6a0   : > { %v11309_v13 = vsel %vm12901_vm11, 0.0, %v8343_v29  ;;  %v4269_v28 = vadd.f32 %v4268_v1, %v4267_v45  ;;  %v3981_v39 = vmax.f32 %v3979_v63, %v3980_v46  ;;  %v3967_v17 = vmax.f32 %v3965_v41, %v3966_v7 }
 0x6a1   : > { %v4272_v33 = vrot.slane %v11309_v13, 4  ;;  %vm4363_vm12 = vcmp.gt.f32.partialorder %v4241_v34, 0.0  ;;  %v4255_v53 = vadd.f32 %v4254_v21, %v11304_v5  ;;  %vm12903_vm9 = vcmp.lt.f32.partialorder %v12902_v24, 0.0 }
 0x6a2   : > { %v11316_v30 = vsel %vm12903_vm9, 0.0, %v8345_v37  ;;  %v4102_v12 = vmul.f32 1.442695, %v4050_v16  ;;  %v4395_v44 = vsel %vm4363_vm12, %v4241_v34, 1.0  ;;  %v4270_v8 = vrot.slane %v4269_v28, 1 }
 0x6a3   : > { %v4273_v29 = vadd.f32 %v4272_v33, %v11309_v13  ;;  %v4260_v49 = vrot.slane %v11316_v30, 4  ;;  %8350 = vrcp.f32 %v4395_v44  ;;  %v4256_v45 = vrot.slane %v4255_v53, 2 }
 0x6a4   : > { %v4053_v2 = vsub.f32 %v11265_v27, %v3981_v39  ;;  %v3968_v63 = vrot.slane %v3967_v17, 1  ;;  %v4271_v7 = vadd.f32 %v4270_v8, %v4269_v28  ;;  %8352 = vpow2.f32 %v4102_v12  ;;  %v8347_v46 = vpop.eup %8346 }
 0x6a5   : > { %v4274_v41 = vrot.slane %v4273_v29, 2  ;;  %v4261_v1 = vadd.f32 %v4260_v49, %v11316_v30  ;;  %v4257_v21 = vadd.f32 %v4256_v45, %v4255_v53  ;;  %v3996_v34 = vrot.slane %v3995_v22, 2 }
 0x6a6   : > { %v4108_v37 = vmul.f32 1.442695, %v4053_v2  ;;  %v3969_v16 = vmax.f32 %v3967_v17, %v3968_v63  ;;  %v11323_v24 = vmul.f32 %v8347_v46, %v11246_v62  ;;  %vm4368_vm13 = vcmp.gt.f32.partialorder %v4271_v7, 0.0  ;;  %v12904_v17 = vld [vmem:[#allocation62_spill] sm:$0xff] }
 0x6a7   : > { %v4275_v33 = vadd.f32 %v4274_v41, %v4273_v29  ;;  %v4262_v44 = vrot.slane %v4261_v1, 2  ;;  %v4400_v47 = vsel %vm4368_vm13, %v4271_v7, 1.0  ;;  %v4258_v26 = vrot.slane %v4257_v21, 1 }
 0x6a8   : > { %8354 = vpow2.f32 %v4108_v37  ;;  %v4051_v39 = vsub.f32 %v11276_v57, %v3969_v16  ;;  %v8349_v27 = vpop.eup %8348  ;;  %v3997_v53 = vmax.f32 %v3995_v22, %v3996_v34  ;;  %vm12905_vm15 = vcmp.lt.f32.partialorder %v12904_v17, 0.0  ;;  %v4729_v17 = vld [vmem:[#allocation14 + $0xd8] sm:$0xff] }
 0x6a9   : > { %8356 = vrcp.f32 %v4400_v47  ;;  %v4276_v8 = vrot.slane %v4275_v33, 1  ;;  %v4263_v28 = vadd.f32 %v4262_v44, %v4261_v1  ;;  %v4259_v12 = vadd.f32 %v4258_v26, %v4257_v21  ;;  %v8562_v47 = vld [vmem:[%s9668_s9 + $0xd8] sm:$0xff]  ;;  %v4720_v44 = vld [vmem:[#allocation14 + $0x90] sm:$0xff] }
 0x6aa   : > { %v11328_v49 = vsel %vm12905_vm15, 0.0, %v8349_v27  ;;  %v4104_v62 = vmul.f32 1.442695, %v4051_v39  ;;  %v3983_v29 = vmax.f32 %v11288_v40, %v3982_v42  ;;  %v3998_v7 = vrot.slane %v3997_v53, 1  ;;  %v12906_v27 = vld [vmem:[#allocation63_spill] sm:$0xff] }
 0x6ab   : > { %v4277_v45 = vadd.f32 %v4276_v8, %v4275_v33  ;;  %v4264_v2 = vrot.slane %v4263_v28, 1  ;;  %v4290_v63 = vrot.slane %v11328_v49, 4  ;;  %vm4366_vm8 = vcmp.gt.f32.partialorder %v4259_v12, 0.0 }
 0x6ac   : > { %8358 = vpow2.f32 %v4104_v62  ;;  %v3984_v57 = vrot.slane %v3983_v29, 2  ;;  %v11334_v41 = vadd.f32 %v8562_v47, %v11133_v3  ;;  %v4398_v26 = vsel %vm4366_vm8, %v4259_v12, 1.0  ;;  %v4718_v3 = vld [vmem:[#allocation14 + $0x80] sm:$0xff] }
 0x6ad   : > { %vm4369_vm14 = vcmp.gt.f32.partialorder %v4277_v45, 0.0  ;;  %v4265_v22 = vadd.f32 %v4264_v2, %v4263_v28  ;;  %v4291_v1 = vadd.f32 %v4290_v63, %v11328_v49  ;;  %v11337_v46 = vpop.eup %8350  ;;  %8360 = vrcp.f32 %v4398_v26 }
 0x6ae   : > { %v4401_v42 = vsel %vm4369_vm14, %v4277_v45, 1.0  ;;  %v3999_v21 = vmax.f32 %v3997_v53, %v3998_v7  ;;  %v3985_v37 = vmax.f32 %v3983_v29, %v3984_v57  ;;  %v8353_v16 = vpop.eup %8352  ;;  %v4000_v33 = vrot.slane %v11334_v41, 4  ;;  %v8563_v7 = vld [vmem:[%s9668_s9 + $0xc8] sm:$0xff] }
 0x6af   : > { %8362 = vrcp.f32 %v4401_v42  ;;  %vm4367_vm11 = vcmp.gt.f32.partialorder %v4265_v22, 0.0  ;;  %v4292_v34 = vrot.slane %v4291_v1, 2  ;;  %vm12907_vm12 = vcmp.lt.f32.partialorder %v12906_v27, 0.0 }
 0x6b0   : > { %v4399_v39 = vsel %vm4367_vm11, %v4265_v22, 1.0  ;;  %v11342_v8 = vsel %vm12907_vm12, 0.0, %v8353_v16  ;;  %v4056_v28 = vsub.f32 %v11280_v15, %v3999_v21  ;;  %v3986_v12 = vrot.slane %v3985_v37, 1 }
 0x6b1   : > { %8364 = vrcp.f32 %v4399_v39  ;;  %v4293_v53 = vadd.f32 %v4292_v34, %v4291_v1  ;;  %v4278_v62 = vrot.slane %v11342_v8, 4  ;;  %v4001_v29 = vmax.f32 %v11334_v41, %v4000_v33  ;;  %v8564_v1 = vld [vmem:[%s9668_s9 + $0xf0] sm:$0xff] }
 0x6b2   : > { %v11347_v45 = vpop.eup %8354  ;;  %v4114_v2 = vmul.f32 1.442695, %v4056_v28  ;;  %v3987_v63 = vmax.f32 %v3985_v37, %v3986_v12  ;;  %v11351_v57 = vadd.f32 %v8563_v7, %v11137_v23  ;;  %v7851_v47 = vpack.c.bf16 %v4720_v44, %v4718_v3 }
 0x6b3   : > { %v8357_v26 = vpop.eup %8356  ;;  %v4294_v22 = vrot.slane %v4293_v53, 1  ;;  %v4279_v15 = vadd.f32 %v4278_v62, %v11342_v8  ;;  %v4002_v42 = vrot.slane %v4001_v29, 2  ;;  %v11356_v21 = vadd.f32 %v8564_v1, %v11163_v52  ;;  %v8565_v62 = vld [vmem:[%s9668_s9 + $0xe0] sm:$0xff] }
 0x6b4   : > { %v4464_v16 = vmul.f32 %v8357_v26, %v11292_v51  ;;  %8366 = vpow2.f32 %v4114_v2  ;;  %v4054_v37 = vsub.f32 %v11288_v40, %v3987_v63  ;;  %v3988_v34 = vrot.slane %v11351_v57, 4  ;;  %7852 = vmatpush1.bf16.msra.mxu1 %v7851_v47  ;;  %v12909_v2 = vld [vmem:[#allocation65_spill] sm:$0xff] }
 0x6b5   : > { %v4295_v23 = vadd.f32 %v4294_v22, %v4293_v53  ;;  %v4280_v33 = vrot.slane %v4279_v15, 2  ;;  %v4003_v3 = vmax.f32 %v4001_v29, %v4002_v42  ;;  %v4018_v44 = vrot.slane %v11356_v21, 4 }
 0x6b6   : > { %v8359_v39 = vpop.eup %8358  ;;  %v11363_v28 = vmul.f32 %v4464_v16, %v10859_v48  ;;  %v4110_v12 = vmul.f32 1.442695, %v4054_v37  ;;  %v3989_v52 = vmax.f32 %v11351_v57, %v3988_v34  ;;  %v11368_v51 = vadd.f32 %v8565_v62, %v11172_v36 }
 0x6b7   : > { %vm4372_vm9 = vcmp.gt.f32.partialorder %v4295_v23, 0.0  ;;  %v4281_v40 = vadd.f32 %v4280_v33, %v4279_v15  ;;  %vm12910_vm13 = vcmp.lt.f32.partialorder %v12909_v2, 0.0  ;;  %v4004_v29 = vrot.slane %v4003_v3, 1  ;;  %v8361_v63 = vpop.eup %8360  ;;  %v4725_v2 = vld [vmem:[#allocation14 + $0xb8] sm:$0xff] }
 0x6b8   : > { %12908 = vst [vmem:[#allocation72_spill] sm:$0xff] %v11363_v28  ;;  %v11372_v53 = vsel %vm12910_vm13, 0.0, %v8359_v39  ;;  %v4404_v47 = vsel %vm4372_vm9, %v4295_v23, 1.0  ;;  %8368 = vpow2.f32 %v4110_v12  ;;  %v4462_v42 = vmul.f32 %v8361_v63, %v11304_v5 }
 0x6b9   : > { %v4284_v26 = vrot.slane %v11372_v53, 4  ;;  %v8363_v22 = vpop.eup %8362  ;;  %8370 = vrcp.f32 %v4404_v47  ;;  %v4282_v36 = vrot.slane %v4281_v40, 1  ;;  %v4005_v1 = vmax.f32 %v4003_v3, %v4004_v29 }
 0x6ba   : > { %v11378_v15 = vmul.f32 %v8363_v22, %v11309_v13  ;;  %v3990_v37 = vrot.slane %v3989_v52, 2  ;;  %v4019_v34 = vmax.f32 %v11356_v21, %v4018_v44  ;;  %v4494_v23 = vmul.f32 %v4462_v42, %v10859_v48 }
 0x6bb   : > { %v4285_v16 = vadd.f32 %v4284_v26, %v11372_v53  ;;  %v8365_v33 = vpop.eup %8364  ;;  %v4283_v39 = vadd.f32 %v4282_v36, %v4281_v40  ;;  %v4057_v12 = vsub.f32 %v11334_v41, %v4005_v1  ;;  %v4006_v62 = vrot.slane %v11368_v51, 4  ;;  %v12912_v1 = vld [vmem:[#allocation66_spill] sm:$0xff] }
 0x6bc   : > { %v4463_v5 = vmul.f32 %v8365_v33, %v11316_v30  ;;  %v3991_v3 = vmax.f32 %v3989_v52, %v3990_v37  ;;  %v4020_v29 = vrot.slane %v4019_v34, 2  ;;  %v4606_v13 = vrot.slane %v4494_v23, 4 }
 0x6bd   : > { %v4286_v63 = vrot.slane %v4285_v16, 2  ;;  %vm4370_vm15 = vcmp.gt.f32.partialorder %v4283_v39, 0.0  ;;  %v4116_v47 = vmul.f32 1.442695, %v4057_v12  ;;  %v4007_v26 = vmax.f32 %v11368_v51, %v4006_v62 }
 0x6be   : > { %v8367_v22 = vpop.eup %8366  ;;  %v4495_v44 = vmul.f32 %v4463_v5, %v10859_v48  ;;  %v4402_v42 = vsel %vm4370_vm15, %v4283_v39, 1.0  ;;  %v3992_v36 = vrot.slane %v3991_v3, 1  ;;  %v11388_v41 = vadd.f32 %v4606_v13, %v4494_v23  ;;  %v8566_v39 = vld [vmem:[%s9668_s9 + $0xf8] sm:$0xff] }
 0x6bf   : > { %v4287_v40 = vadd.f32 %v4286_v63, %v4285_v16  ;;  %8372 = vrcp.f32 %v4402_v42  ;;  %vm12913_vm8 = vcmp.lt.f32.partialorder %v12912_v1, 0.0  ;;  %v4021_v52 = vmax.f32 %v4019_v34, %v4020_v29  ;;  %v8567_v42 = vld [vmem:[%s9668_s9 + $0xe8] sm:$0xff] }
 0x6c0   : > { %12911 = vst [vmem:[#allocation73_spill] sm:$0xff] %v11388_v41  ;;  %v11392_v30 = vsel %vm12913_vm8, 0.0, %v8367_v22  ;;  %v4612_v37 = vrot.slane %v4495_v44, 4  ;;  %8374 = vpow2.f32 %v4116_v47  ;;  %v3993_v62 = vmax.f32 %v3991_v3, %v3992_v36  ;;  %v12915_v47 = vld [vmem:[#allocation67_spill] sm:$0xff] }
 0x6c1   : > { %v4288_v33 = vrot.slane %v4287_v40, 1  ;;  %v4314_v12 = vrot.slane %v11392_v30, 4  ;;  %v4022_v7 = vrot.slane %v4021_v52, 1  ;;  %v4008_v5 = vrot.slane %v4007_v26, 2  ;;  %v4723_v1 = vld [vmem:[#allocation14 + $0xa8] sm:$0xff] }
 0x6c2   : > { %v11397_v16 = vadd.f32 %v8566_v39, %v11177_v19  ;;  %v8369_v23 = vpop.eup %8368  ;;  %v11399_v63 = vadd.f32 %v4612_v37, %v4495_v44  ;;  %v11404_v34 = vadd.f32 %v8567_v42, %v11182_v59  ;;  %vm12916_vm14 = vcmp.lt.f32.partialorder %v12915_v47, 0.0 }
 0x6c3   : > { %v4289_v13 = vadd.f32 %v4288_v33, %v4287_v40  ;;  %v4315_v22 = vadd.f32 %v4314_v12, %v11392_v30  ;;  %v11406_v29 = vpop.eup %8370  ;;  %v11410_v3 = vsel %vm12916_vm14, 0.0, %v8369_v23  ;;  %v4055_v36 = vsub.f32 %v11351_v57, %v3993_v62 }
 0x6c4   : > { %12914 = vst [vmem:[#allocation74_spill] sm:$0xff] %v11399_v63  ;;  %v4023_v19 = vmax.f32 %v4021_v52, %v4022_v7  ;;  %v4009_v39 = vmax.f32 %v4007_v26, %v4008_v5  ;;  %v4302_v40 = vrot.slane %v11410_v3, 4  ;;  %v4024_v37 = vrot.slane %v11397_v16, 4  ;;  %v4722_v7 = vld [vmem:[#allocation14 + $0xa0] sm:$0xff]  ;;  %v4724_v26 = vld [vmem:[#allocation14 + $0xb0] sm:$0xff] }
 0x6c5   : > { %vm4371_vm11 = vcmp.gt.f32.partialorder %v4289_v13, 0.0  ;;  %v4316_v44 = vrot.slane %v4315_v22, 2  ;;  %v4112_v12 = vmul.f32 1.442695, %v4055_v36  ;;  %v4012_v5 = vrot.slane %v11404_v34, 4  ;;  %v4728_v63 = vld [vmem:[#allocation14 + $0xd0] sm:$0xff] }
 0x6c6   : > { %v4403_v33 = vsel %vm4371_vm11, %v4289_v13, 1.0  ;;  %v4060_v59 = vsub.f32 %v11356_v21, %v4023_v19  ;;  %v4010_v42 = vrot.slane %v4009_v39, 1  ;;  %v4303_v47 = vadd.f32 %v4302_v40, %v11410_v3  ;;  %v4727_v19 = vld [vmem:[#allocation14 + $0xc8] sm:$0xff] }
 0x6c7   : > { %8376 = vrcp.f32 %v4403_v33  ;;  %v4317_v23 = vadd.f32 %v4316_v44, %v4315_v22  ;;  %v4025_v57 = vmax.f32 %v11397_v16, %v4024_v37  ;;  %v7853_v21 = vpack.c.bf16 %v4725_v2, %v4723_v1  ;;  %v12917_v2 = vld [vmem:[#allocation68_spill] sm:$0xff] }
 0x6c8   : > { %8378 = vpow2.f32 %v4112_v12  ;;  %v4122_v52 = vmul.f32 1.442695, %v4060_v59  ;;  %v4011_v62 = vmax.f32 %v4009_v39, %v4010_v42  ;;  %v4304_v36 = vrot.slane %v4303_v47, 2  ;;  %v4726_v42 = vld [vmem:[#allocation14 + $0xc0] sm:$0xff] }
 0x6c9   : > { %v4318_v13 = vrot.slane %v4317_v23, 1  ;;  %v4026_v27 = vrot.slane %v4025_v57, 2  ;;  %v8373_v28 = vpop.eup %8372  ;;  %v4013_v44 = vmax.f32 %v11404_v34, %v4012_v5  ;;  %v7855_v40 = vpack.c.bf16 %v4724_v26, %v4722_v7  ;;  %7854 = vmatprep.subr.bf16.mxu1 %v7853_v21  ;;  %v4733_v7 = vld [vmem:[#allocation14 + $0xf8] sm:$0xff] }
 0x6ca   : > { %8380 = vpow2.f32 %v4122_v52  ;;  %v4058_v22 = vsub.f32 %v11368_v51, %v4011_v62  ;;  %v8375_v37 = vpop.eup %8374  ;;  %v11422_v33 = vmul.f32 %v8373_v28, %v11342_v8  ;;  %v4305_v12 = vadd.f32 %v4304_v36, %v4303_v47  ;;  %v4731_v62 = vld [vmem:[#allocation14 + $0xe8] sm:$0xff]  ;;  %v4730_v47 = vld [vmem:[#allocation14 + $0xe0] sm:$0xff] }
 0x6cb   : > { %v4319_v39 = vadd.f32 %v4318_v13, %v4317_v23  ;;  %v4027_v59 = vmax.f32 %v4025_v57, %v4026_v27  ;;  %vm12918_vm12 = vcmp.lt.f32.partialorder %v12917_v2, 0.0  ;;  %v4014_v41 = vrot.slane %v4013_v44, 2  ;;  %7856 = vmatpush1.bf16.msra.mxu1 %v7855_v40  ;;  %v4732_v27 = vld [vmem:[#allocation14 + $0xf0] sm:$0xff] }
 0x6cc   : > { %v11426_v1 = vsel %vm12918_vm12, 0.0, %v8375_v37  ;;  %v4118_v52 = vmul.f32 1.442695, %v4058_v22  ;;  %v7857_v51 = vpack.c.bf16 %v4729_v17, %v4727_v19  ;;  %v4306_v26 = vrot.slane %v4305_v12, 1 }
 0x6cd   : > { %vm4376_vm9 = vcmp.gt.f32.partialorder %v4319_v39, 0.0  ;;  %v4320_v8 = vrot.slane %v11426_v1, 4  ;;  %v4028_v28 = vrot.slane %v4027_v59, 1  ;;  %v4015_v57 = vmax.f32 %v4013_v44, %v4014_v41  ;;  %v11439_v44 = vld [vmem:[#allocation16] sm:$0xff]  }
 0x6ce   : > { %v4408_v23 = vsel %vm4376_vm9, %v4319_v39, 1.0  ;;  %8382 = vpow2.f32 %v4118_v52  ;;  %7858 = vmatprep.subr.bf16.mxu1 %v7857_v51  ;;  %v7859_v5 = vpack.c.bf16 %v4728_v63, %v4726_v42  ;;  %v4307_v13 = vadd.f32 %v4306_v26, %v4305_v12 }
 0x6cf   : > { %8384 = vrcp.f32 %v4408_v23  ;;  %v4321_v36 = vadd.f32 %v4320_v8, %v11426_v1  ;;  %v4029_v21 = vmax.f32 %v4027_v59, %v4028_v28  ;;  %v4016_v17 = vrot.slane %v4015_v57, 1 }
 0x6d0   : > { %7860 = vmatpush1.bf16.msra.mxu1 %v7859_v5  ;;  %v7861_v19 = vpack.c.bf16 %v4733_v7, %v4731_v62  ;;  %v7863_v22 = vpack.c.bf16 %v4732_v27, %v4730_v47  ;;  %v4453_v40 = vmul.f32 %v11165_v56, %v11060_v38  ;;  %vm4374_vm13 = vcmp.gt.f32.partialorder %v4307_v13, 0.0 }
 0x6d1   : > { %v11432_v37 = vpop.eup %8376  ;;  %v4322_v39 = vrot.slane %v4321_v36, 2  ;;  %v4061_v41 = vsub.f32 %v11397_v16, %v4029_v21  ;;  %v11437_v63 = vmul.f32 %v11188_v58, %v10802_v55  ;;  %v4406_v59 = vsel %vm4374_vm13, %v4307_v13, 1.0  ;;  %v12919_v16 = vld [vmem:[#allocation69_spill] sm:$0xff] }
 0x6d2   : > { %v8379_v12 = vpop.eup %8378  ;;  %v4017_v42 = vmax.f32 %v4015_v57, %v4016_v17  ;;  %7862 = vmatprep.subr.bf16.mxu1 %v7861_v19  ;;  %v11443_v52 = vmul.f32 %v11150_v9, %v10802_v55  ;;  %v11446_v38 = vmul.f32 %v4453_v40, %v10802_v55  ;;  %8386 = vrcp.f32 %v4406_v59 }
 0x6d3   : > { %v4323_v56 = vadd.f32 %v4322_v39, %v4321_v36  ;;  %vm12920_vm15 = vcmp.lt.f32.partialorder %v12919_v16, 0.0  ;;  %v4124_v58 = vmul.f32 1.442695, %v4061_v41  ;;  %v4514_v8 = vrot.slane %v11167_v54, 1 }
 0x6d4   : > { %v11450_v51 = vsel %vm12920_vm15, 0.0, %v8379_v12  ;;  %v8381_v62 = vpop.eup %8380  ;;  %v4059_v26 = vsub.f32 %v11404_v34, %v4017_v42  ;;  %7864 = vmatpush1.bf16.msra.mxu1 %v7863_v22  ;;  %v4520_v9 = vrot.slane %v11179_v0, 1  ;;  %vm12921_vm8 = vcmp.lt.f32.partialorder %v10484_v32, 0.0 }
 0x6d5   : > { %v4308_v7 = vrot.slane %v11450_v51, 4  ;;  %v4324_v28 = vrot.slane %v4323_v56, 1  ;;  %v11458_v55 = vsel %vm12921_vm8, 0.0, %v8381_v62  ;;  %8388 = vpow2.f32 %v4124_v58  ;;  %7581 = vmatprep.subr.bf16.mxu1 %v11439_v44 }
 0x6d6   : > { %v12922_v47 = vrot.slane %v11139_v11, 2  ;;  %v4338_v34 = vrot.slane %v11458_v55, 4  ;;  %v4120_v57 = vmul.f32 1.442695, %v4059_v26  ;;  %v11467_v5 = vadd.f32 %v4514_v8, %v11167_v54 }
 0x6d7   : > { %v4309_v23 = vadd.f32 %v4308_v7, %v11450_v51  ;;  %v4325_v13 = vadd.f32 %v4324_v28, %v4323_v56  ;;  %v11470_v36 = vadd.f32 %v4520_v9, %v11179_v0  ;;  %v12923_v17 = vrot.slane %v11127_v20, 4 }
 0x6d8   : > { %v4525_v27 = vadd.f32 %v12922_v47, %v11139_v11  ;;  %v8383_v11 = vpop.eup %8382  ;;  %v4339_v40 = vadd.f32 %v4338_v34, %v11458_v55  ;;  %8390 = vpow2.f32 %v4120_v57  ;;  %v4534_v39 = vrot.slane %v11170_v14, 4 }
 0x6d9   : > { %v4529_v19 = vadd.f32 %v12923_v17, %v11127_v20  ;;  %v4310_v22 = vrot.slane %v4309_v23, 2  ;;  %v8385_v41 = vpop.eup %8384  ;;  %vm4377_vm14 = vcmp.gt.f32.partialorder %v4325_v13, 0.0  ;;  %vm12924_vm11 = vcmp.lt.f32.partialorder %v10491_v43, 0.0 }
 0x6da   : > { %v4526_v21 = vrot.slane %v4525_v27, 1  ;;  %v11479_v54 = vsel %vm12924_vm11, 0.0, %v8383_v11  ;;  %v4472_v59 = vmul.f32 %v8385_v41, %v11392_v30  ;;  %v4409_v42 = vsel %vm4377_vm14, %v4325_v13, 1.0 }
 0x6db   : > { %v4530_v12 = vrot.slane %v4529_v19, 2  ;;  %v4311_v56 = vadd.f32 %v4310_v22, %v4309_v23  ;;  %v4340_v20 = vrot.slane %v4339_v40, 2  ;;  %8392 = vrcp.f32 %v4409_v42 }
 0x6dc   : > { %v4527_v0 = vadd.f32 %v4526_v21, %v4525_v27  ;;  %v4326_v58 = vrot.slane %v11479_v54, 4  ;;  %v4535_v7 = vadd.f32 %v4534_v39, %v11170_v14  ;;  %v11485_v26 = vmul.f32 %v4472_v59, %v10903_v25  ;;  %v8387_v47 = vpop.eup %8386 }
 0x6dd   : > { %v4531_v62 = vadd.f32 %v4530_v12, %v4529_v19  ;;  %v4312_v8 = vrot.slane %v4311_v56, 1  ;;  %v4341_v9 = vadd.f32 %v4340_v20, %v4339_v40  ;;  %v4540_v28 = vrot.slane %v11437_v63, 4 }
 0x6de   : > { %v4327_v27 = vadd.f32 %v4326_v58, %v11479_v54  ;;  %v4536_v34 = vrot.slane %v4535_v7, 2  ;;  %v4546_v23 = vrot.slane %v11443_v52, 4  ;;  %v4666_v57 = vrot.slane %v11485_v26, 4 }
 0x6df   : > { %v4532_v30 = vrot.slane %v4531_v62, 1  ;;  %v4470_v13 = vmul.f32 %v8387_v47, %v11410_v3  ;;  %v4313_v21 = vadd.f32 %v4312_v8, %v4311_v56  ;;  %v4342_v14 = vrot.slane %v4341_v9, 1  ;;  %v11492_v17 = vpop.eup %8388 }
 0x6e0   : > { %v4328_v19 = vrot.slane %v4327_v27, 2  ;;  %v4537_v22 = vadd.f32 %v4536_v34, %v4535_v7  ;;  %v4541_v40 = vadd.f32 %v4540_v28, %v11437_v63  ;;  %v4547_v12 = vadd.f32 %v4546_v23, %v11443_v52 }
 0x6e1   : > { %v4533_v11 = vadd.f32 %v4532_v30, %v4531_v62  ;;  %v4502_v39 = vmul.f32 %v4470_v13, %v10903_v25  ;;  %vm4375_vm12 = vcmp.gt.f32.partialorder %v4313_v21, 0.0  ;;  %v4343_v41 = vadd.f32 %v4342_v14, %v4341_v9 }
 0x6e2   : > { %v4407_v59 = vsel %vm4375_vm12, %v4313_v21, 1.0  ;;  %v4329_v42 = vadd.f32 %v4328_v19, %v4327_v27  ;;  %v4538_v20 = vrot.slane %v4537_v22, 1  ;;  %v4542_v58 = vrot.slane %v4541_v40, 2  ;;  %v8391_v3 = vpop.eup %8390 }
 0x6e3   : > { %v4654_v56 = vrot.slane %v4502_v39, 4  ;;  %8394 = vrcp.f32 %v4407_v59  ;;  %vm4380_vm9 = vcmp.gt.f32.partialorder %v4343_v41, 0.0  ;;  %v4548_v8 = vrot.slane %v4547_v12, 2 }
 0x6e4   : > { %v4412_v47 = vsel %vm4380_vm9, %v4343_v41, 1.0  ;;  %v4330_v62 = vrot.slane %v4329_v42, 1  ;;  %vm12925_vm13 = vcmp.lt.f32.partialorder %v10533_v18, 0.0  ;;  %v4539_v7 = vadd.f32 %v4538_v20, %v4537_v22 }
 0x6e5   : > { %v11499_v63 = vsel %vm12925_vm13, 0.0, %v8391_v3  ;;  %v11501_v28 = vadd.f32 %v4654_v56, %v4502_v39  ;;  %8396 = vrcp.f32 %v4412_v47  ;;  %v4543_v9 = vadd.f32 %v4542_v58, %v4541_v40  ;;  %v8393_v27 = vpop.eup %8392 }
 0x6e6   : > { %v4332_v52 = vrot.slane %v11499_v63, 4  ;;  %v4331_v30 = vadd.f32 %v4330_v62, %v4329_v42  ;;  %v4549_v34 = vadd.f32 %v4548_v8, %v4547_v12  ;;  %v4552_v23 = vrot.slane %v11446_v38, 4 }
 0x6e7   : > { %v4778_v13 = vsel %vm2910_vm10, %v11470_v36, %v11467_v5  ;;  %v11509_v21 = vmul.f32 %v8393_v27, %v11426_v1  ;;  %v4544_v19 = vrot.slane %v4543_v9, 1  ;;  %vm12926_vm15 = vcmask 1042434   ;;  %v12929_v36 = vld [vmem:[#allocation56_spill] sm:$0xff] }
 0x6e8   : > { %v4333_v14 = vadd.f32 %v4332_v52, %v11499_v63  ;;  %v4779_v22 = vsel %vm12926_vm15, %v4527_v0, %v4778_v13  ;;  %vm4378_vm8 = vcmp.gt.f32.partialorder %v4331_v30, 0.0  ;;  %v4550_v39 = vrot.slane %v4549_v34, 1  ;;  %v12933_v13 = vld [vmem:[#allocation70_spill] sm:$0xff] }
 0x6e9   : > { %v4553_v40 = vadd.f32 %v4552_v23, %v11446_v38  ;;  %vm12927_vm14 = vcmask 1043459   ;;  %v4410_v12 = vsel %vm4378_vm8, %v4331_v30, 1.0  ;;  %v4545_v42 = vadd.f32 %v4544_v19, %v4543_v9 }
 0x6ea   : > { %v4780_v41 = vsel %vm12927_vm14, %v4533_v11, %v4779_v22  ;;  %v4334_v59 = vrot.slane %v4333_v14, 2  ;;  %vm12928_vm11 = vcmask 1044484   ;;  %8398 = vrcp.f32 %v4410_v12 }
 0x6eb   : > { %v4781_v20 = vsel %vm12928_vm11, %v4539_v7, %v4780_v41  ;;  %v4551_v5 = vadd.f32 %v4550_v39, %v4549_v34  ;;  %v4554_v1 = vrot.slane %v4553_v40, 2  ;;  %vm12930_vm12 = vcmp.lt.f32.partialorder %v12929_v36, 0.0 }
 0x6ec   : > { %v11519_v58 = vsel %vm12930_vm12, 0.0, %v11248_v10  ;;  %v4335_v0 = vadd.f32 %v4334_v59, %v4333_v14  ;;  %vm12931_vm9 = vcmask 1045509   ;;  %v4459_v11 = vmul.f32 %v11337_v46, %v11269_v50  ;;  %v8145_v59 = vld [vmem:[#allocation16 + $0x8] sm:$0xff]  }
 0x6ed   : > { %v4782_v3 = vsel %vm12931_vm9, %v4545_v42, %v4781_v20  ;;  %v4248_v38 = vrot.slane %v11519_v58, 4  ;;  %v4555_v56 = vadd.f32 %v4554_v1, %v4553_v40  ;;  %vm12932_vm13 = vcmask 1046534   ;;  %v8395_v7 = vpop.eup %8394 }
 0x6ee   : > { %v4783_v8 = vsel %vm12932_vm13, %v4551_v5, %v4782_v3  ;;  %v4460_v47 = vmul.f32 %v11297_v4, %v11214_v6  ;;  %v4489_v62 = vmul.f32 %v11242_v31, %v10839_v35  ;;  %v4336_v10 = vrot.slane %v4335_v0, 1 }
 0x6ef   : > { %v4249_v52 = vadd.f32 %v4248_v38, %v11519_v58  ;;  %v4490_v9 = vmul.f32 %v11323_v24, %v10839_v35  ;;  %v4491_v27 = vmul.f32 %v4459_v11, %v10839_v35  ;;  %v4471_v50 = vmul.f32 %v8395_v7, %v11450_v51  ;;  %v11537_v6 = vpop.eup %8396 }
 0x6f0   : > { %v4556_v46 = vrot.slane %v4555_v56, 1  ;;  %v4492_v30 = vmul.f32 %v4460_v47, %v10839_v35  ;;  %v4560_v34 = vrot.slane %v11253_v60, 2  ;;  %v4337_v4 = vadd.f32 %v4336_v10, %v4335_v0 }
 0x6f1   : > { %v4250_v31 = vrot.slane %v4249_v52, 2  ;;  %v4566_v23 = vrot.slane %v11261_v61, 2  ;;  %v12934_v14 = vrot.slane %v12933_v13, 4  ;;  %v4503_v24 = vmul.f32 %v4471_v50, %v10903_v25 }
 0x6f2   : > { %v4557_v22 = vadd.f32 %v4556_v46, %v4555_v56  ;;  %v4561_v51 = vadd.f32 %v4560_v34, %v11253_v60  ;;  %v4576_v39 = vrot.slane %v4489_v62, 4  ;;  %vm4379_vm15 = vcmp.gt.f32.partialorder %v4337_v4, 0.0  ;;  %v8146_v46 = vld [vmem:[#allocation16 + $0x10] sm:$0xff]  }
 0x6f3   : > { %v4571_v19 = vadd.f32 %v12934_v14, %v12933_v13  ;;  %v4251_v40 = vadd.f32 %v4250_v31, %v4249_v52  ;;  %v4567_v41 = vadd.f32 %v4566_v23, %v11261_v61  ;;  %v4660_v42 = vrot.slane %v4503_v24, 4 }
 0x6f4   : > { %v4411_v20 = vsel %vm4379_vm15, %v4337_v4, 1.0  ;;  %vm12935_vm8 = vcmask 1047559   ;;  %v4562_v1 = vrot.slane %v4561_v51, 1  ;;  %v8399_v11 = vpop.eup %8398  ;;  %v12936_v60 = vmov 0.0  }
 0x6f5   : > { %v4572_v12 = vrot.slane %v4571_v19, 2  ;;  %v4784_v5 = vsel %vm12935_vm8, %v4557_v22, %v4783_v8  ;;  %8400 = vrcp.f32 %v4411_v20  ;;  %v4252_v0 = vrot.slane %v4251_v40, 1 }
 0x6f6   : > { %4875 = vmatmul.mubr.f32.vlgmr.msra.gmra.mrb[32].mxu1 %v4784_v5  ;;  %v4568_v3 = vrot.slane %v4567_v41, 1  ;;  %v11547_v56 = vadd.f32 %v4660_v42, %v4503_v24  ;;  %v4563_v47 = vadd.f32 %v4562_v1, %v4561_v51  ;;  %v4577_v7 = vadd.f32 %v4576_v39, %v4489_v62  ;;  %v12937_v62 = vld [vmem:[#allocation64_spill] sm:$0xff] }
 0x6f7   : > { %v4573_v38 = vadd.f32 %v4572_v12, %v4571_v19  ;;  %4880 = vmatprep.mubr.f32.mxu1 %v12936_v60  ;;  %v4582_v61 = vrot.slane %v4490_v9, 4  ;;  %7582 = vmatpush3.bf16.msra.mxu1 %v11439_v44  ;;  %v11552_v10 = vmul.f32 %v8399_v11, %v11479_v54  ;;  %v4253_v8 = vadd.f32 %v4252_v0, %v4251_v40 }
 0x6f8   : > { %v4569_v52 = vadd.f32 %v4568_v3, %v4567_v41  ;;  %7583 = vmatprep.subr.bf16.mxu1 %v8145_v59  ;;  %v4578_v34 = vrot.slane %v4577_v7, 2  ;;  %v4588_v31 = vrot.slane %v4491_v27, 4  ;;  %v4594_v23 = vrot.slane %v4492_v30, 4 }
 0x6f9   : > { %v4574_v50 = vrot.slane %v4573_v38, 1  ;;  %v4583_v4 = vadd.f32 %v4582_v61, %v4490_v9  ;;  %vm4365_vm14 = vcmp.gt.f32.partialorder %v4253_v8, 0.0  ;;  %vm12938_vm11 = vcmp.lt.f32.partialorder %v12937_v62, 0.0 }
 0x6fa   : > { %v4785_v14 = vsel %vm2910_vm10, %v4569_v52, %v4563_v47  ;;  %v11558_v44 = vsel %vm12938_vm11, 0.0, %v11347_v45  ;;  %v4397_v54 = vsel %vm4365_vm14, %v4253_v8, 1.0  ;;  %v4579_v19 = vadd.f32 %v4578_v34, %v4577_v7  ;;  %v12942_v52 = vld [vmem:[#allocation74_spill] sm:$0xff]  ;;  %v12943_v34 = vld [vmem:[#allocation72_spill] sm:$0xff] }
 0x6fb   : > { %v4575_v13 = vadd.f32 %v4574_v50, %v4573_v38  ;;  %v4584_v24 = vrot.slane %v4583_v4, 2  ;;  %v4589_v22 = vadd.f32 %v4588_v31, %v4491_v27  ;;  %7584 = vmatpush3.bf16.msra.mxu1 %v8145_v59  ;;  %8402 = vrcp.f32 %v4397_v54 }
 0x6fc   : > { %v4595_v51 = vadd.f32 %v4594_v23, %v4492_v30  ;;  %vm12939_vm12 = vcmask 1042434   ;;  %v4296_v39 = vrot.slane %v11558_v44, 4  ;;  %7585 = vmatprep.subr.bf16.mxu1 %v8146_v46  ;;  %v4580_v40 = vrot.slane %v4579_v19, 1 }
 0x6fd   : > { %v4786_v9 = vsel %vm12939_vm12, %v4575_v13, %v4785_v14  ;;  %v4585_v41 = vadd.f32 %v4584_v24, %v4583_v4  ;;  %v4590_v12 = vrot.slane %v4589_v22, 2  ;;  %v4467_v42 = vmul.f32 %v11432_v37, %v11372_v53  ;;  %vm12948_vm11 = vmmov %vm12939_vm12 }
 0x6fe   : > { %v4596_v45 = vrot.slane %v4595_v51, 2  ;;  %v4297_v20 = vadd.f32 %v4296_v39, %v11558_v44  ;;  %v4468_v27 = vmul.f32 %v11406_v29, %v11328_v49  ;;  %v4497_v30 = vmul.f32 %v11378_v15, %v10859_v48  ;;  %v12941_v29 = vld [vmem:[#allocation73_spill] sm:$0xff] }
 0x6ff   : > { %v4581_v59 = vadd.f32 %v4580_v40, %v4579_v19  ;;  %v4586_v5 = vrot.slane %v4585_v41, 1  ;;  %v4591_v1 = vadd.f32 %v4590_v12, %v4589_v22  ;;  %v4498_v0 = vmul.f32 %v11422_v33, %v10859_v48  ;;  %7586 = vmatpush3.bf16.msra.mxu1 %v8146_v46  ;;  %v8401_v3 = vpop.eup %8400 }
 0x700   : > { %v4597_v38 = vadd.f32 %v4596_v45, %v4595_v51  ;;  %v4298_v11 = vrot.slane %v4297_v20, 2  ;;  %v4499_v53 = vmul.f32 %v4467_v42, %v10859_v48  ;;  %v4500_v37 = vmul.f32 %v4468_v27, %v10859_v48 }
 0x701   : > { %v4587_v47 = vadd.f32 %v4586_v5, %v4585_v41  ;;  %v4592_v7 = vrot.slane %v4591_v1, 1  ;;  %vm12940_vm9 = vcmask 1043459   ;;  %v4608_v15 = vrot.slane %v12941_v29, 2 }
 0x702   : > { %v4787_v49 = vsel %vm12940_vm9, %v4581_v59, %v4786_v9  ;;  %v4598_v61 = vrot.slane %v4597_v38, 1  ;;  %v4299_v8 = vadd.f32 %v4298_v11, %v4297_v20  ;;  %v4614_v50 = vrot.slane %v12942_v52, 2 }
 0x703   : > { %v12944_v33 = vrot.slane %v12943_v34, 4  ;;  %v4593_v4 = vadd.f32 %v4592_v7, %v4591_v1  ;;  %vm12945_vm13 = vcmask 1044484   ;;  %v4609_v23 = vadd.f32 %v4608_v15, %v12941_v29 }
 0x704   : > { %v4788_v31 = vsel %vm12945_vm13, %v4587_v47, %v4787_v49  ;;  %v4624_v13 = vrot.slane %v4497_v30, 4  ;;  %v4599_v14 = vadd.f32 %v4598_v61, %v4597_v38  ;;  %v4300_v54 = vrot.slane %v4299_v8, 1 }
 0x705   : > { %v4619_v46 = vadd.f32 %v12944_v33, %v12943_v34  ;;  %v4615_v19 = vadd.f32 %v4614_v50, %v12942_v52  ;;  %vm12946_vm15 = vcmask 1045509   ;;  %v4610_v51 = vrot.slane %v4609_v23, 1  ;;  %v8403_v40 = vpop.eup %8402 }
 0x706   : > { %v4789_v22 = vsel %vm12946_vm15, %v4593_v4, %v4788_v31  ;;  %v4625_v9 = vadd.f32 %v4624_v13, %v4497_v30  ;;  %v4630_v39 = vrot.slane %v4498_v0, 4  ;;  %vm12947_vm8 = vcmask 1046534  }
 0x707   : > { %v4620_v24 = vrot.slane %v4619_v46, 2  ;;  %v11584_v41 = vsel %vm12947_vm8, %v4599_v14, %v4789_v22  ;;  %v4301_v12 = vadd.f32 %v4300_v54, %v4299_v8  ;;  %v4616_v42 = vrot.slane %v4615_v19, 1 }
 0x708   : > { %v4461_v20 = vmul.f32 %v8403_v40, %v11519_v58  ;;  %v4611_v27 = vadd.f32 %v4610_v51, %v4609_v23  ;;  %v4626_v59 = vrot.slane %v4625_v9, 2  ;;  %v4631_v5 = vadd.f32 %v4630_v39, %v4498_v0 }
 0x709   : > { %v4621_v45 = vadd.f32 %v4620_v24, %v4619_v46  ;;  %vm4373_vm14 = vcmp.gt.f32.partialorder %v4301_v12, 0.0  ;;  %v4617_v1 = vadd.f32 %v4616_v42, %v4615_v19  ;;  %v4636_v11 = vrot.slane %v4499_v53, 4  ;;  %v12949_v46 = vld [vmem:[#allocation71_spill] sm:$0xff] }
 0x70a   : > { %v4493_v47 = vmul.f32 %v4461_v20, %v10839_v35  ;;  %v4405_v30 = vsel %vm4373_vm14, %v4301_v12, 1.0  ;;  %v4627_v7 = vadd.f32 %v4626_v59, %v4625_v9  ;;  %v4632_v49 = vrot.slane %v4631_v5, 2 }
 0x70b   : > { %v4622_v38 = vrot.slane %v4621_v45, 1  ;;  %8404 = vrcp.f32 %v4405_v30  ;;  %v4637_v15 = vadd.f32 %v4636_v11, %v4499_v53  ;;  %v4642_v61 = vrot.slane %v4500_v37, 4 }
 0x70c   : > { %v4600_v8 = vrot.slane %v4493_v47, 4  ;;  %v4628_v52 = vrot.slane %v4627_v7, 1  ;;  %v4633_v50 = vadd.f32 %v4632_v49, %v4631_v5  ;;  %v4792_v58 = vsel %vm2910_vm10, %v4617_v1, %v4611_v27 }
 0x70d   : > { %v4623_v29 = vadd.f32 %v4622_v38, %v4621_v45  ;;  %v4638_v34 = vrot.slane %v4637_v15, 2  ;;  %v4643_v0 = vadd.f32 %v4642_v61, %v4500_v37  ;;  %vm12950_vm12 = vcmp.lt.f32.partialorder %v12949_v46, 0.0 }
 0x70e   : > { %v11593_v35 = vsel %vm12950_vm12, 0.0, %v11492_v17  ;;  %v4601_v4 = vadd.f32 %v4600_v8, %v4493_v47  ;;  %v4629_v31 = vadd.f32 %v4628_v52, %v4627_v7  ;;  %v4634_v23 = vrot.slane %v4633_v50, 1 }
 0x70f   : > { %v4793_v33 = vsel %vm12948_vm11, %v4623_v29, %v4792_v58  ;;  %v4344_v53 = vrot.slane %v11593_v35, 4  ;;  %v4639_v13 = vadd.f32 %v4638_v34, %v4637_v15  ;;  %v4644_v14 = vrot.slane %v4643_v0, 2 }
 0x710   : > { %v4475_v54 = vmul.f32 %v8401_v3, %v11499_v63  ;;  %v4476_v19 = vmul.f32 %v11537_v6, %v11458_v55  ;;  %v4602_v37 = vrot.slane %v4601_v4, 2  ;;  %v4635_v24 = vadd.f32 %v4634_v23, %v4633_v50 }
 0x711   : > { %v4794_v22 = vsel %vm12940_vm9, %v4629_v31, %v4793_v33  ;;  %v4345_v51 = vadd.f32 %v4344_v53, %v11593_v35  ;;  %v4640_v17 = vrot.slane %v4639_v13, 1  ;;  %v4645_v9 = vadd.f32 %v4644_v14, %v4643_v0 }
 0x712   : > { %v4505_v39 = vmul.f32 %v11509_v21, %v10903_v25  ;;  %v4506_v40 = vmul.f32 %v11552_v10, %v10903_v25  ;;  %v4603_v12 = vadd.f32 %v4602_v37, %v4601_v4  ;;  %v4795_v63 = vsel %vm12945_vm13, %v4635_v24, %v4794_v22 }
 0x713   : > { %v4346_v3 = vrot.slane %v4345_v51, 2  ;;  %v4507_v55 = vmul.f32 %v4475_v54, %v10903_v25  ;;  %v4641_v6 = vadd.f32 %v4640_v17, %v4639_v13  ;;  %v4646_v42 = vrot.slane %v4645_v9, 1 }
 0x714   : > { %v4508_v45 = vmul.f32 %v4476_v19, %v10903_v25  ;;  %v4656_v20 = vrot.slane %v11501_v28, 2  ;;  %v4604_v27 = vrot.slane %v4603_v12, 1  ;;  %v4662_v5 = vrot.slane %v11547_v56, 2 }
 0x715   : > { %v4347_v59 = vadd.f32 %v4346_v3, %v4345_v51  ;;  %v4667_v21 = vadd.f32 %v4666_v57, %v11485_v26  ;;  %v8405_v10 = vpop.eup %8404  ;;  %v4647_v1 = vadd.f32 %v4646_v42, %v4645_v9  ;;  %v4796_v38 = vsel %vm12946_vm15, %v4641_v6, %v4795_v63 }
 0x716   : > { %v4657_v11 = vadd.f32 %v4656_v20, %v11501_v28  ;;  %v4672_v47 = vrot.slane %v4505_v39, 4  ;;  %v4605_v30 = vadd.f32 %v4604_v27, %v4603_v12  ;;  %v4469_v7 = vmul.f32 %v8405_v10, %v11558_v44 }
 0x717   : > { %v4348_v49 = vrot.slane %v4347_v59, 1  ;;  %v4663_v29 = vadd.f32 %v4662_v5, %v11547_v56  ;;  %v4797_v15 = vsel %vm12947_vm8, %v4647_v1, %v4796_v38  ;;  %v4668_v8 = vrot.slane %v4667_v21, 2 }
 0x718   : > { %v4658_v61 = vrot.slane %v4657_v11, 1  ;;  %v4673_v52 = vadd.f32 %v4672_v47, %v4505_v39  ;;  %vm12951_vm14 = vcmask 1047559   ;;  %v4501_v57 = vmul.f32 %v4469_v7, %v10859_v48 }
 0x719   : > { %v4791_v26 = vsel %vm12951_vm14, %v4605_v30, %v11584_v41  ;;  %v4349_v50 = vadd.f32 %v4348_v49, %v4347_v59  ;;  %v4664_v58 = vrot.slane %v4663_v29, 1  ;;  %v4669_v34 = vadd.f32 %v4668_v8, %v4667_v21  ;;  %vm12953_vm15 = vmmov %vm12951_vm14 }
 0x71a   : > { %4881 = vmatmul.mubr.f32.gmra.mrb[34].mxu1 %v4791_v26  ;;  %v4659_v28 = vadd.f32 %v4658_v61, %v4657_v11  ;;  %v4674_v0 = vrot.slane %v4673_v52, 2  ;;  %v4678_v44 = vrot.slane %v4506_v40, 4  ;;  %v4648_v56 = vrot.slane %v4501_v57, 4 }
 0x71b   : > { %4886 = vmatprep.mubr.f32.mxu1 %v12936_v60  ;;  %vm4381_vm11 = vcmp.gt.f32.partialorder %v4349_v50, 0.0  ;;  %v4665_v33 = vadd.f32 %v4664_v58, %v4663_v29  ;;  %v4684_v4 = vrot.slane %v4507_v55, 4  ;;  %v4670_v23 = vrot.slane %v4669_v34, 1  ;;  %v8148_v58 = vld [vmem:[#allocation16 + $0x20] sm:$0xff]  }
 0x71c   : > { %v4413_v31 = vsel %vm4381_vm11, %v4349_v50, 1.0  ;;  %v4675_v53 = vadd.f32 %v4674_v0, %v4673_v52  ;;  %v4679_v13 = vadd.f32 %v4678_v44, %v4506_v40  ;;  %v4649_v41 = vadd.f32 %v4648_v56, %v4501_v57  ;;  %vm12956_vm11 = vmmov %vm12953_vm15  ;;  %v8147_v50 = vld [vmem:[#allocation16 + $0x18] sm:$0xff]   ;;  %v12958_v0 = vld [vmem:[#allocation39_spill] sm:$0xff] }
 0x71d   : > { %8406 = vrcp.f32 %v4413_v31  ;;  %v4685_v48 = vadd.f32 %v4684_v4, %v4507_v55  ;;  %v4690_v14 = vrot.slane %v4508_v45, 4  ;;  %v4671_v54 = vadd.f32 %v4670_v23, %v4669_v34  ;;  %7587 = vmatprep.subr.bf16.mxu1 %v8147_v50  ;;  %v4734_v34 = vld [vmem:[%s12957_s20] sm:$0x3]  ;;  %v12959_v23 = vld [vmem:[#allocation40_spill] sm:$0xff]  ;;  %s13051_s20 = sld [smem:[#allocation93_spill]] }
 0x71e   : > { %v4676_v19 = vrot.slane %v4675_v53, 1  ;;  %v4680_v37 = vrot.slane %v4679_v13, 2  ;;  %v4799_v24 = vsel %vm2910_vm10, %v4665_v33, %v4659_v28  ;;  %v4650_v22 = vrot.slane %v4649_v41, 2  ;;  %7588 = vmatpush3.bf16.msra.mxu1 %v8147_v50  ;;  %v8150_v28 = vld [vmem:[#allocation16 + $0x30] sm:$0xff]  }
 0x71f   : > { %v4686_v51 = vrot.slane %v4685_v48, 2  ;;  %v4691_v17 = vadd.f32 %v4690_v14, %v4508_v45  ;;  %vm12952_vm12 = vcmask 1042434   ;;  %vm12954_vm8 = vcmask 1045509   ;;  %7589 = vmatprep.subr.bf16.mxu1 %v8148_v58 }
 0x720   : > { %v4677_v9 = vadd.f32 %v4676_v19, %v4675_v53  ;;  %v4681_v39 = vadd.f32 %v4680_v37, %v4679_v13  ;;  %v4800_v12 = vsel %vm12952_vm12, %v4671_v54, %v4799_v24  ;;  %v4651_v63 = vadd.f32 %v4650_v22, %v4649_v41  ;;  %v12960_v13 = vld [vmem:[#allocation41_spill] sm:$0xff] }
 0x721   : > { %v4687_v3 = vadd.f32 %v4686_v51, %v4685_v48  ;;  %v4692_v6 = vrot.slane %v4691_v17, 2  ;;  %vm12955_vm14 = vcmask 1046534   ;;  %v11637_v44 = vrot.slane %v4734_v34, %v12958_v0 }
 0x722   : > { %v4682_v40 = vrot.slane %v4681_v39, 1  ;;  %v4801_v42 = vsel %vm12940_vm9, %v4677_v9, %v4800_v12  ;;  %v4652_v55 = vrot.slane %v4651_v63, 1  ;;  %7590 = vmatpush3.bf16.msra.mxu1 %v8148_v58  ;;  %v11642_v41 = vrot.slane %v4734_v34, %v12960_v13 }
 0x723   : > { %v4688_v20 = vrot.slane %v4687_v3, 1  ;;  %v4693_v27 = vadd.f32 %v4692_v6, %v4691_v17 }
 0x724   : > { %v4683_v59 = vadd.f32 %v4682_v40, %v4681_v39  ;;  %v4653_v5 = vadd.f32 %v4652_v55, %v4651_v63 }
 0x725   : > { %v4689_v21 = vadd.f32 %v4688_v20, %v4687_v3  ;;  %v4694_v10 = vrot.slane %v4693_v27, 1 }
 0x726   : > { %v4802_v1 = vsel %vm12945_vm13, %v4683_v59, %v4801_v42  ;;  %v4798_v38 = vsel %vm12953_vm15, %v4653_v5, %v4797_v15 }
 0x727   : > { %v8407_v45 = vpop.eup %8406  ;;  %v4695_v11 = vadd.f32 %v4694_v10, %v4693_v27  ;;  %v4803_v47 = vsel %vm12954_vm8, %v4689_v21, %v4802_v1  ;;  %4887 = vmatmul.mubr.f32.gmra.mrb[36].mxu1 %v4798_v38  ;;  %v11668_v38 = vld [vmem:[%s12961_s16] ss:$0 sm:$0xff]  ;;  %s7050_s16 = sshll.u32 %s963_s2, 4  ;;  %s12545_s16 = int_to_ptr.vmem [resolvable:$true] %s7050_s16 }
 0x728   : > { %v4477_v30 = vmul.f32 %v8407_v45, %v11593_v35  ;;  %4892 = vmatprep.mubr.f32.mxu1 %v12936_v60  ;;  %v8149_v35 = vld [vmem:[#allocation16 + $0x28] sm:$0xff]  }
 0x729   : > { %v4804_v7 = vsel %vm12955_vm14, %v4695_v11, %v4803_v47  ;;  %7591 = vmatprep.subr.bf16.mxu1 %v8149_v35 }
 0x72a   : > { %v4509_v49 = vmul.f32 %v4477_v30, %v10903_v25  ;;  %7592 = vmatpush3.bf16.msra.mxu1 %v8149_v35  ;;  %v8151_v25 = vld [vmem:[#allocation16 + $0x38] sm:$0xff]  }
 0x72b   : > { %7593 = vmatprep.subr.bf16.mxu1 %v8150_v28 }
 0x72c   : > { %v4696_v29 = vrot.slane %v4509_v49, 4 }
 0x72e   : > { %v4697_v61 = vadd.f32 %v4696_v29, %v4509_v49  ;;  %7594 = vmatpush3.bf16.msra.mxu1 %v8150_v28 }
 0x72f   : > { %7595 = vmatprep.subr.bf16.mxu1 %v8151_v25 }
 0x730   : > { %v4698_v8 = vrot.slane %v4697_v61, 2 }
 0x732   : > { %v4699_v52 = vadd.f32 %v4698_v8, %v4697_v61  ;;  %7596 = vmatpush3.bf16.msra.mxu1 %v8151_v25 }
 0x734   : > { %v4700_v26 = vrot.slane %v4699_v52, 1 }
 0x736   : > { %v4701_v57 = vadd.f32 %v4700_v26, %v4699_v52 }
 0x738   : > { %v4805_v15 = vsel %vm12956_vm11, %v4701_v57, %v4804_v7 }
 0x739   : > { %4893 = vmatmul.mubr.f32.gmra.mrb[38].mxu1 %v4805_v15 }
 0x7c9   : > { %v4876_v56 = vpop.f32.mrb[32].mxu1 }
 0x7ca   : > { %v4878_v33 = vpop.f32.mrb[33].mxu1  ;;  %v11649_v51 = vadd.f32 %v4876_v56, %v11642_v41 }
 0x7cb   : > { %v4879_v4 = vadd.f32 %v4878_v33, %v11637_v44 }
 0x7cd   : > { %v4903_v31 = vcombine.high %v4879_v4, %v4879_v4  ;;  %v4910_v53 = vrot.slane %v4879_v4, %v12959_v23 }
 0x7cf   : > { %v4917_v48 = vrot.slane %v4903_v31, %v12959_v23  ;;  %v4918_v14 = vcombine.high %v4910_v53, %v4910_v53  ;;  %v4926_v54 = vrot.slane %v4910_v53, %v12959_v23 }
 0x7d1   : > { %v4919_v19 = vcombine.high %v4917_v48, %v4917_v48  ;;  %v4933_v37 = vrot.slane %v4917_v48, %v12959_v23  ;;  %v4940_v24 = vrot.slane %v4918_v14, %v12959_v23  ;;  %v4948_v22 = vcombine.high %v4926_v54, %v4926_v54 }
 0x7d2   : > { %v5102_v17 = vrot.slane %v4926_v54, %v12960_v13 }
 0x7d3   : > { %v4947_v9 = vrot.slane %v4919_v19, %v12959_v23  ;;  %v4949_v39 = vcombine.high %v4933_v37, %v4933_v37  ;;  %v4950_v12 = vcombine.high %v4940_v24, %v4940_v24  ;;  %v5106_v63 = vrot.slane %v4940_v24, %v12960_v13 }
 0x7d4   : > { %v5110_v3 = vrot.slane %v4948_v22, %v12960_v13  ;;  %v5118_v6 = vrot.slane %v4933_v37, %v12960_v13  ;;  %v5259_v40 = vadd.f32 %v5102_v17, %v11649_v51 }
 0x7d5   : > { %v4951_v42 = vcombine.high %v4947_v9, %v4947_v9  ;;  %v5114_v55 = vrot.slane %v4950_v12, %v12960_v13  ;;  %v5122_v20 = vrot.slane %v4947_v9, %v12960_v13  ;;  %v5126_v27 = vrot.slane %v4949_v39, %v12960_v13 }
 0x7d6   : > { %v5260_v59 = vadd.f32 %v5106_v63, %v11649_v51  ;;  %v5261_v5 = vadd.f32 %v5110_v3, %v11649_v51  ;;  %v5263_v21 = vadd.f32 %v5118_v6, %v11649_v51  ;;  %vm5291_vm12 = vcmp.ge.f32.partialorder %v5259_v40, 0.0 }
 0x7d7   : > { %v5130_v10 = vrot.slane %v4951_v42, %v12960_v13  ;;  %v5262_v1 = vadd.f32 %v5114_v55, %v11649_v51  ;;  %v5323_v45 = vmul.f32 0.2, %v5259_v40  ;;  %v5264_v11 = vadd.f32 %v5122_v20, %v11649_v51 }
 0x7d8   : > { %vm5293_vm9 = vcmp.ge.f32.partialorder %v5261_v5, 0.0  ;;  %v5325_v47 = vmul.f32 0.2, %v5261_v5  ;;  %vm5292_vm13 = vcmp.ge.f32.partialorder %v5260_v59, 0.0  ;;  %v5324_v30 = vmul.f32 0.2, %v5260_v59 }
 0x7d9   : > { %vm5294_vm15 = vcmp.ge.f32.partialorder %v5262_v1, 0.0  ;;  %v5326_v7 = vmul.f32 0.2, %v5262_v1  ;;  %v5355_v49 = vsel %vm5291_vm12, %v5259_v40, %v5323_v45  ;;  %vm5295_vm8 = vcmp.ge.f32.partialorder %v5263_v21, 0.0 }
 0x7da   : > { %v5356_v29 = vsel %vm5292_vm13, %v5260_v59, %v5324_v30  ;;  %v5394_v61 = vmul.f32 %v11668_v38, %v5355_v49  ;;  %v5357_v8 = vsel %vm5293_vm9, %v5261_v5, %v5325_v47  ;;  %vm5296_vm14 = vcmp.ge.f32.partialorder %v5264_v11, 0.0 }
 0x7db   : > { %v5395_v52 = vmul.f32 %v11668_v38, %v5356_v29  ;;  %v5358_v26 = vsel %vm5294_vm15, %v5262_v1, %v5326_v7  ;;  %v5396_v57 = vmul.f32 %v11668_v38, %v5357_v8  ;;  %v5327_v15 = vmul.f32 0.2, %v5263_v21 }
 0x7dc   : > { %v5397_v50 = vmul.f32 %v11668_v38, %v5358_v26  ;;  %v5328_v58 = vmul.f32 0.2, %v5264_v11  ;;  %v5265_v35 = vadd.f32 %v5126_v27, %v11649_v51  ;;  %v5266_v28 = vadd.f32 %v5130_v10, %v11649_v51 }
 0x7dd   : > { %v5426_v25 = vpack.c.bf16 %v5395_v52, %v5394_v61  ;;  %v5359_v34 = vsel %vm5295_vm8, %v5263_v21, %v5327_v15 }
 0x7de   : > { %v5427_v0 = vpack.c.bf16 %v5397_v50, %v5396_v57  ;;  %v5360_v56 = vsel %vm5296_vm14, %v5264_v11, %v5328_v58  ;;  %v5398_v33 = vmul.f32 %v11668_v38, %v5359_v34  ;;  %vm5297_vm11 = vcmp.ge.f32.partialorder %v5265_v35, 0.0 }
 0x7df   : > { %7597 = vmatprep.mubr.bf16.mxu1 %v5426_v25  ;;  %v5399_v4 = vmul.f32 %v11668_v38, %v5360_v56  ;;  %vm5298_vm12 = vcmp.ge.f32.partialorder %v5266_v28, 0.0  ;;  %v5329_v31 = vmul.f32 0.2, %v5265_v35  ;;  %v5330_v53 = vmul.f32 0.2, %v5266_v28 }
 0x7e0   : > { %7598 = vmatmul.mubr.bf16.vlgmr.msra.gmra.mrb[40].mxu1 %v5427_v0 }
 0x7e1   : > { %v5428_v48 = vpack.c.bf16 %v5399_v4, %v5398_v33  ;;  %v5361_v14 = vsel %vm5297_vm11, %v5265_v35, %v5329_v31  ;;  %v5362_v54 = vsel %vm5298_vm12, %v5266_v28, %v5330_v53 }
 0x7e2   : > { %v5401_v19 = vmul.f32 %v11668_v38, %v5362_v54  ;;  %v5400_v37 = vmul.f32 %v11668_v38, %v5361_v14 }
 0x7e3   : > { %7601 = vmatprep.mubr.bf16.mxu1 %v5428_v48 }
 0x7e4   : > { %v5429_v24 = vpack.c.bf16 %v5401_v19, %v5400_v37 }
 0x7e8   : > { %7602 = vmatmul.mubr.bf16.gmra.mrb[44].mxu1 %v5429_v24 }
 0x7ed   : > { %v4882_v22 = vpop.f32.mrb[34].mxu1 }
 0x7ee   : > { %v4884_v17 = vpop.f32.mrb[35].mxu1  ;;  %v11688_v27 = vadd.f32 %v4882_v22, %v11642_v41 }
 0x7ef   : > { %v4885_v9 = vadd.f32 %v4884_v17, %v11637_v44 }
 0x7f1   : > { %v4952_v39 = vcombine.high %v4885_v9, %v4885_v9  ;;  %v4959_v12 = vrot.slane %v4885_v9, %v12959_v23 }
 0x7f3   : > { %v4966_v63 = vrot.slane %v4952_v39, %v12959_v23  ;;  %v4967_v3 = vcombine.high %v4959_v12, %v4959_v12  ;;  %v4975_v6 = vrot.slane %v4959_v12, %v12959_v23 }
 0x7f5   : > { %v4968_v40 = vcombine.high %v4966_v63, %v4966_v63  ;;  %v4982_v42 = vrot.slane %v4966_v63, %v12959_v23  ;;  %v4989_v55 = vrot.slane %v4967_v3, %v12959_v23  ;;  %v4997_v20 = vcombine.high %v4975_v6, %v4975_v6 }
 0x7f6   : > { %v5134_v59 = vrot.slane %v4975_v6, %v12960_v13 }
 0x7f7   : > { %v4996_v5 = vrot.slane %v4968_v40, %v12959_v23  ;;  %v4998_v21 = vcombine.high %v4982_v42, %v4982_v42  ;;  %v4999_v10 = vcombine.high %v4989_v55, %v4989_v55  ;;  %v5138_v1 = vrot.slane %v4989_v55, %v12960_v13 }
 0x7f8   : > { %v5142_v45 = vrot.slane %v4997_v20, %v12960_v13  ;;  %v5150_v11 = vrot.slane %v4982_v42, %v12960_v13  ;;  %v5267_v47 = vadd.f32 %v5134_v59, %v11688_v27 }
 0x7f9   : > { %v5000_v30 = vcombine.high %v4996_v5, %v4996_v5  ;;  %v5146_v7 = vrot.slane %v4999_v10, %v12960_v13  ;;  %v5154_v49 = vrot.slane %v4996_v5, %v12960_v13  ;;  %v5158_v29 = vrot.slane %v4998_v21, %v12960_v13 }
 0x7fa   : > { %v5268_v61 = vadd.f32 %v5138_v1, %v11688_v27  ;;  %v5269_v8 = vadd.f32 %v5142_v45, %v11688_v27  ;;  %v5271_v52 = vadd.f32 %v5150_v11, %v11688_v27  ;;  %vm5299_vm9 = vcmp.ge.f32.partialorder %v5267_v47, 0.0  ;;  %v4888_v57 = vpop.f32.mrb[36].mxu1 }
 0x7fb   : > { %v5162_v26 = vrot.slane %v5000_v30, %v12960_v13  ;;  %v5331_v15 = vmul.f32 0.2, %v5267_v47  ;;  %v5270_v50 = vadd.f32 %v5146_v7, %v11688_v27  ;;  %v5272_v58 = vadd.f32 %v5154_v49, %v11688_v27  ;;  %v4890_v28 = vpop.f32.mrb[37].mxu1 }
 0x7fc   : > { %v11706_v35 = vadd.f32 %v4888_v57, %v11642_v41  ;;  %vm5300_vm13 = vcmp.ge.f32.partialorder %v5268_v61, 0.0  ;;  %v5332_v25 = vmul.f32 0.2, %v5268_v61  ;;  %vm5301_vm15 = vcmp.ge.f32.partialorder %v5269_v8, 0.0 }
 0x7fd   : > { %v4891_v34 = vadd.f32 %v4890_v28, %v11637_v44  ;;  %v5363_v0 = vsel %vm5299_vm9, %v5267_v47, %v5331_v15  ;;  %vm5302_vm8 = vcmp.ge.f32.partialorder %v5270_v50, 0.0  ;;  %v5333_v56 = vmul.f32 0.2, %v5269_v8 }
 0x7fe   : > { %v5364_v33 = vsel %vm5300_vm13, %v5268_v61, %v5332_v25  ;;  %v5402_v4 = vmul.f32 %v11668_v38, %v5363_v0  ;;  %v5334_v31 = vmul.f32 0.2, %v5270_v50  ;;  %vm5303_vm14 = vcmp.ge.f32.partialorder %v5271_v52, 0.0 }
 0x7ff   : > { %v5001_v53 = vcombine.high %v4891_v34, %v4891_v34  ;;  %v5008_v48 = vrot.slane %v4891_v34, %v12959_v23  ;;  %v5403_v14 = vmul.f32 %v11668_v38, %v5364_v33  ;;  %v5365_v54 = vsel %vm5301_vm15, %v5269_v8, %v5333_v56 }
 0x800   : > { %v5366_v19 = vsel %vm5302_vm8, %v5270_v50, %v5334_v31  ;;  %v5404_v37 = vmul.f32 %v11668_v38, %v5365_v54  ;;  %vm5304_vm11 = vcmp.ge.f32.partialorder %v5272_v58, 0.0  ;;  %v5335_v24 = vmul.f32 0.2, %v5271_v52 }
 0x801   : > { %v5015_v22 = vrot.slane %v5001_v53, %v12959_v23  ;;  %v5016_v17 = vcombine.high %v5008_v48, %v5008_v48  ;;  %v5024_v9 = vrot.slane %v5008_v48, %v12959_v23  ;;  %v5430_v39 = vpack.c.bf16 %v5403_v14, %v5402_v4 }
 0x802   : > { %v5405_v12 = vmul.f32 %v11668_v38, %v5366_v19  ;;  %v5336_v63 = vmul.f32 0.2, %v5272_v58  ;;  %v5367_v3 = vsel %vm5303_vm14, %v5271_v52, %v5335_v24  ;;  %v5273_v6 = vadd.f32 %v5158_v29, %v11688_v27 }
 0x803   : > { %v5017_v40 = vcombine.high %v5015_v22, %v5015_v22  ;;  %v5031_v42 = vrot.slane %v5015_v22, %v12959_v23  ;;  %v5038_v55 = vrot.slane %v5016_v17, %v12959_v23  ;;  %v5046_v20 = vcombine.high %v5024_v9, %v5024_v9  ;;  %7605 = vmatprep.mubr.bf16.mxu1 %v5430_v39 }
 0x804   : > { %v5166_v59 = vrot.slane %v5024_v9, %v12960_v13  ;;  %v5431_v5 = vpack.c.bf16 %v5405_v12, %v5404_v37  ;;  %v5368_v21 = vsel %vm5304_vm11, %v5272_v58, %v5336_v63  ;;  %v5406_v10 = vmul.f32 %v11668_v38, %v5367_v3 }
 0x805   : > { %v5045_v1 = vrot.slane %v5017_v40, %v12959_v23  ;;  %v5047_v45 = vcombine.high %v5031_v42, %v5031_v42  ;;  %v5048_v11 = vcombine.high %v5038_v55, %v5038_v55  ;;  %v5170_v47 = vrot.slane %v5038_v55, %v12960_v13 }
 0x806   : > { %v5174_v30 = vrot.slane %v5046_v20, %v12960_v13  ;;  %v5182_v7 = vrot.slane %v5031_v42, %v12960_v13  ;;  %v5275_v49 = vadd.f32 %v5166_v59, %v11706_v35  ;;  %7606 = vmatmul.mubr.bf16.gmra.mrb[48].mxu1 %v5431_v5  ;;  %v5407_v29 = vmul.f32 %v11668_v38, %v5368_v21 }
 0x807   : > { %v5049_v61 = vcombine.high %v5045_v1, %v5045_v1  ;;  %v5178_v8 = vrot.slane %v5048_v11, %v12960_v13  ;;  %v5186_v52 = vrot.slane %v5045_v1, %v12960_v13  ;;  %v5190_v57 = vrot.slane %v5047_v45, %v12960_v13 }
 0x808   : > { %v5276_v15 = vadd.f32 %v5170_v47, %v11706_v35  ;;  %v5277_v50 = vadd.f32 %v5174_v30, %v11706_v35  ;;  %v5279_v58 = vadd.f32 %v5182_v7, %v11706_v35  ;;  %v5432_v28 = vpack.c.bf16 %v5407_v29, %v5406_v10 }
 0x809   : > { %v5194_v25 = vrot.slane %v5049_v61, %v12960_v13  ;;  %v5274_v34 = vadd.f32 %v5162_v26, %v11688_v27  ;;  %vm5305_vm12 = vcmp.ge.f32.partialorder %v5273_v6, 0.0  ;;  %v5337_v0 = vmul.f32 0.2, %v5273_v6 }
 0x80a   : > { %7609 = vmatprep.mubr.bf16.mxu1 %v5432_v28  ;;  %vm5307_vm9 = vcmp.ge.f32.partialorder %v5275_v49, 0.0  ;;  %vm5308_vm13 = vcmp.ge.f32.partialorder %v5276_v15, 0.0  ;;  %v5339_v56 = vmul.f32 0.2, %v5275_v49  ;;  %v5340_v33 = vmul.f32 0.2, %v5276_v15 }
 0x80b   : > { %vm5306_vm15 = vcmp.ge.f32.partialorder %v5274_v34, 0.0  ;;  %v5338_v4 = vmul.f32 0.2, %v5274_v34  ;;  %v5369_v31 = vsel %vm5305_vm12, %v5273_v6, %v5337_v0  ;;  %v5278_v53 = vadd.f32 %v5178_v8, %v11706_v35 }
 0x80c   : > { %v5408_v48 = vmul.f32 %v11668_v38, %v5369_v31  ;;  %v4894_v14 = vpop.f32.mrb[38].mxu1  ;;  %v5371_v54 = vsel %vm5307_vm9, %v5275_v49, %v5339_v56  ;;  %v5372_v19 = vsel %vm5308_vm13, %v5276_v15, %v5340_v33  ;;  %vm5309_vm8 = vcmp.ge.f32.partialorder %v5277_v50, 0.0 }
 0x80d   : > { %v5370_v37 = vsel %vm5306_vm15, %v5274_v34, %v5338_v4  ;;  %v11739_v26 = vadd.f32 %v4894_v14, %v11642_v41  ;;  %v4896_v24 = vpop.f32.mrb[39].mxu1  ;;  %v5410_v22 = vmul.f32 %v11668_v38, %v5371_v54  ;;  %v5411_v17 = vmul.f32 %v11668_v38, %v5372_v19 }
 0x80e   : > { %v5409_v9 = vmul.f32 %v11668_v38, %v5370_v37  ;;  %v4897_v39 = vadd.f32 %v4896_v24, %v11637_v44  ;;  %vm5310_vm14 = vcmp.ge.f32.partialorder %v5278_v53, 0.0  ;;  %v5341_v12 = vmul.f32 0.2, %v5277_v50 }
 0x80f   : > { %v5434_v63 = vpack.c.bf16 %v5411_v17, %v5410_v22  ;;  %v5342_v3 = vmul.f32 0.2, %v5278_v53  ;;  %v5280_v6 = vadd.f32 %v5186_v52, %v11706_v35  ;;  %vm5311_vm11 = vcmp.ge.f32.partialorder %v5279_v58, 0.0 }
 0x810   : > { %v5433_v40 = vpack.c.bf16 %v5409_v9, %v5408_v48  ;;  %v5050_v42 = vcombine.high %v4897_v39, %v4897_v39  ;;  %v5057_v41 = vrot.slane %v4897_v39, %v12959_v23  ;;  %v5373_v55 = vsel %vm5309_vm8, %v5277_v50, %v5341_v12 }
 0x811   : > { %v5374_v20 = vsel %vm5310_vm14, %v5278_v53, %v5342_v3  ;;  %v5412_v59 = vmul.f32 %v11668_v38, %v5373_v55  ;;  %vm5312_vm12 = vcmp.ge.f32.partialorder %v5280_v6, 0.0  ;;  %v5343_v5 = vmul.f32 0.2, %v5279_v58 }
 0x812   : > { %7610 = vmatmul.mubr.bf16.gmra.mrb[52].mxu1 %v5433_v40  ;;  %v5064_v44 = vrot.slane %v5050_v42, %v12959_v23  ;;  %v5065_v21 = vcombine.high %v5057_v41, %v5057_v41  ;;  %v5073_v10 = vrot.slane %v5057_v41, %v12959_v23  ;;  %v5413_v1 = vmul.f32 %v11668_v38, %v5374_v20 }
 0x813   : > { %7613 = vmatprep.mubr.bf16.mxu1 %v5434_v63  ;;  %v5344_v45 = vmul.f32 0.2, %v5280_v6  ;;  %v5375_v11 = vsel %vm5311_vm11, %v5279_v58, %v5343_v5  ;;  %v5281_v47 = vadd.f32 %v5190_v57, %v11706_v35  ;;  %v5282_v30 = vadd.f32 %v5194_v25, %v11706_v35 }
 0x814   : > { %v5066_v7 = vcombine.high %v5064_v44, %v5064_v44  ;;  %v5080_v49 = vrot.slane %v5064_v44, %v12959_v23  ;;  %v5087_v29 = vrot.slane %v5065_v21, %v12959_v23  ;;  %v5095_v61 = vcombine.high %v5073_v10, %v5073_v10 }
 0x815   : > { %v5198_v8 = vrot.slane %v5073_v10, %v12960_v13  ;;  %v5435_v52 = vpack.c.bf16 %v5413_v1, %v5412_v59  ;;  %v5376_v15 = vsel %vm5312_vm12, %v5280_v6, %v5344_v45  ;;  %v5414_v50 = vmul.f32 %v11668_v38, %v5375_v11 }
 0x816   : > { %v5094_v28 = vrot.slane %v5066_v7, %v12959_v23  ;;  %v5096_v58 = vcombine.high %v5080_v49, %v5080_v49  ;;  %v5097_v34 = vcombine.high %v5087_v29, %v5087_v29  ;;  %v5202_v57 = vrot.slane %v5087_v29, %v12960_v13 }
 0x817   : > { %v5206_v25 = vrot.slane %v5095_v61, %v12960_v13  ;;  %v5214_v0 = vrot.slane %v5080_v49, %v12960_v13  ;;  %v5283_v56 = vadd.f32 %v5198_v8, %v11739_v26  ;;  %v5415_v33 = vmul.f32 %v11668_v38, %v5376_v15 }
 0x818   : > { %v5098_v4 = vcombine.high %v5094_v28, %v5094_v28  ;;  %v5210_v31 = vrot.slane %v5097_v34, %v12960_v13  ;;  %v5218_v53 = vrot.slane %v5094_v28, %v12960_v13  ;;  %v5222_v48 = vrot.slane %v5096_v58, %v12960_v13 }
 0x819   : > { %v5284_v23 = vadd.f32 %v5202_v57, %v11739_v26  ;;  %v5285_v14 = vadd.f32 %v5206_v25, %v11739_v26  ;;  %v5436_v54 = vpack.c.bf16 %v5415_v33, %v5414_v50  ;;  %v5287_v19 = vadd.f32 %v5214_v0, %v11739_v26  ;;  %v8568_v33 = vld [vmem:[%s9668_s9 + $0x10] sm:$0xff] }
 0x81a   : > { %7614 = vmatmul.mubr.bf16.gmra.mrb[56].mxu1 %v5435_v52  ;;  %vm5313_vm9 = vcmp.ge.f32.partialorder %v5281_v47, 0.0  ;;  %vm5314_vm13 = vcmp.ge.f32.partialorder %v5282_v30, 0.0  ;;  %v5345_v37 = vmul.f32 0.2, %v5281_v47  ;;  %v5346_v24 = vmul.f32 0.2, %v5282_v30 }
 0x81b   : > { %7617 = vmatprep.mubr.bf16.mxu1 %v5436_v54  ;;  %vm5315_vm15 = vcmp.ge.f32.partialorder %v5283_v56, 0.0  ;;  %vm5316_vm8 = vcmp.ge.f32.partialorder %v5284_v23, 0.0  ;;  %v5347_v22 = vmul.f32 0.2, %v5283_v56  ;;  %v5226_v17 = vrot.slane %v5098_v4, %v12960_v13  ;;  %v8570_v54 = vld [vmem:[%s9668_s9 + $0x18] sm:$0xff] }
 0x81c   : > { %v5377_v9 = vsel %vm5313_vm9, %v5281_v47, %v5345_v37  ;;  %v5348_v39 = vmul.f32 0.2, %v5284_v23  ;;  %v5286_v12 = vadd.f32 %v5210_v31, %v11739_v26  ;;  %v5378_v63 = vsel %vm5314_vm13, %v5282_v30, %v5346_v24 }
 0x81d   : > { %v5379_v3 = vsel %vm5315_vm15, %v5283_v56, %v5347_v22  ;;  %vm5317_vm14 = vcmp.ge.f32.partialorder %v5285_v14, 0.0  ;;  %v5349_v6 = vmul.f32 0.2, %v5285_v14  ;;  %v5416_v40 = vmul.f32 %v11668_v38, %v5377_v9  ;;  %v8571_v22 = vld [vmem:[%s9668_s9 + $0x8] sm:$0xff] }
 0x81e   : > { %v5417_v42 = vmul.f32 %v11668_v38, %v5378_v63  ;;  %v5380_v41 = vsel %vm5316_vm8, %v5284_v23, %v5348_v39  ;;  %vm5318_vm11 = vcmp.ge.f32.partialorder %v5286_v12, 0.0  ;;  %v5418_v55 = vmul.f32 %v11668_v38, %v5379_v3 }
 0x81f   : > { %v5419_v20 = vmul.f32 %v11668_v38, %v5380_v41  ;;  %v5350_v59 = vmul.f32 0.2, %v5286_v12  ;;  %v5288_v13 = vadd.f32 %v5218_v53, %v11739_v26  ;;  %v5381_v44 = vsel %vm5317_vm14, %v5285_v14, %v5349_v6  ;;  %v8569_v53 = vld [vmem:[%s9668_s9] sm:$0xff] }
 0x820   : > { %v5437_v5 = vpack.c.bf16 %v5417_v42, %v5416_v40  ;;  %vm5319_vm12 = vcmp.ge.f32.partialorder %v5287_v19, 0.0  ;;  %v5351_v21 = vmul.f32 0.2, %v5287_v19  ;;  %v5290_v30 = vadd.f32 %v5226_v17, %v11739_v26 }
 0x821   : > { %v5438_v10 = vpack.c.bf16 %v5419_v20, %v5418_v55  ;;  %v5382_v1 = vsel %vm5318_vm11, %v5286_v12, %v5350_v59  ;;  %vm5320_vm9 = vcmp.ge.f32.partialorder %v5288_v13, 0.0  ;;  %v5352_v45 = vmul.f32 0.2, %v5288_v13  ;;  %v8572_v20 = vld [vmem:[%s9668_s9 + $0x30] sm:$0xff] }
 0x822   : > { %7618 = vmatmul.mubr.bf16.gmra.mrb[60].mxu1 %v5437_v5  ;;  %v5421_v11 = vmul.f32 %v11668_v38, %v5382_v1  ;;  %v5383_v47 = vsel %vm5319_vm12, %v5287_v19, %v5351_v21  ;;  %v5289_v49 = vadd.f32 %v5222_v48, %v11739_v26  ;;  %v5420_v29 = vmul.f32 %v11668_v38, %v5381_v44  ;;  %v8573_v21 = vld [vmem:[%s9668_s9 + $0x20] sm:$0xff] }
 0x823   : > { %7621 = vmatprep.mubr.bf16.mxu1 %v5438_v10  ;;  %v5384_v7 = vsel %vm5320_vm9, %v5288_v13, %v5352_v45  ;;  %v5422_v8 = vmul.f32 %v11668_v38, %v5383_v47  ;;  %v5354_v52 = vmul.f32 0.2, %v5290_v30  ;;  %vm5322_vm13 = vcmp.ge.f32.partialorder %v5290_v30, 0.0 }
 0x824   : > { %v5423_v61 = vmul.f32 %v11668_v38, %v5384_v7  ;;  %v5439_v15 = vpack.c.bf16 %v5421_v11, %v5420_v29  ;;  %v5353_v28 = vmul.f32 0.2, %v5289_v49  ;;  %vm5321_vm15 = vcmp.ge.f32.partialorder %v5289_v49, 0.0 }
 0x825   : > { %v5386_v58 = vsel %vm5322_vm13, %v5290_v30, %v5354_v52  ;;  %v8574_v30 = vld [vmem:[%s9668_s9 + $0x38] sm:$0xff]  ;;  %v8575_v52 = vld [vmem:[%s9668_s9 + $0x28] sm:$0xff] }
 0x826   : > { %v5440_v50 = vpack.c.bf16 %v5423_v61, %v5422_v8  ;;  %v5385_v34 = vsel %vm5321_vm15, %v5289_v49, %v5353_v28  ;;  %v5425_v57 = vmul.f32 %v11668_v38, %v5386_v58 }
 0x827   : > { %v5424_v25 = vmul.f32 %v11668_v38, %v5385_v34 }
 0x829   : > { %v5441_v0 = vpack.c.bf16 %v5425_v57, %v5424_v25 }
 0x82a   : > { %7622 = vmatmul.mubr.bf16.gmra.mrb[64].mxu1 %v5439_v15 }
 0x82b   : > { %7625 = vmatprep.mubr.bf16.mxu1 %v5440_v50 }
 0x832   : > { %7626 = vmatmul.mubr.bf16.gmra.mrb[68].mxu1 %v5441_v0 }
 0x8b3   : > { %v7599_v56 = vpop.f32.mrb[40].mxu1 }
 0x8b4   : > { %v5669_v4 = vadd.f32 %v8568_v33, %v7599_v56  ;;  %v5540_v31 = vpop.f32.mrb[41].mxu1 }
 0x8b5   : > { %v5667_v48 = vadd.f32 %v8569_v53, %v5540_v31  ;;  %v7600_v23 = vpop.f32.mrb[42].mxu1 }
 0x8b6   : > { %v5711_v14 = vrot.slane %v5669_v4, 4  ;;  %v5670_v19 = vadd.f32 %v8570_v54, %v7600_v23  ;;  %v5543_v37 = vpop.f32.mrb[43].mxu1 }
 0x8b7   : > { %v5699_v24 = vrot.slane %v5667_v48, 4  ;;  %v5668_v17 = vadd.f32 %v8571_v22, %v5543_v37 }
 0x8b8   : > { %v5712_v9 = vmax.f32 %v5669_v4, %v5711_v14  ;;  %v5717_v38 = vrot.slane %v5670_v19, 4 }
 0x8b9   : > { %v5700_v39 = vmax.f32 %v5667_v48, %v5699_v24  ;;  %v5705_v12 = vrot.slane %v5668_v17, 4 }
 0x8ba   : > { %v5713_v63 = vrot.slane %v5712_v9, 2  ;;  %v5718_v3 = vmax.f32 %v5670_v19, %v5717_v38 }
 0x8bb   : > { %v5701_v6 = vrot.slane %v5700_v39, 2  ;;  %v5706_v40 = vmax.f32 %v5668_v17, %v5705_v12  ;;  %v7603_v42 = vpop.f32.mrb[44].mxu1 }
 0x8bc   : > { %v5714_v41 = vmax.f32 %v5712_v9, %v5713_v63  ;;  %v5719_v55 = vrot.slane %v5718_v3, 2  ;;  %v5673_v59 = vadd.f32 %v8572_v20, %v7603_v42  ;;  %v5556_v13 = vpop.f32.mrb[45].mxu1 }
 0x8bd   : > { %v5702_v5 = vmax.f32 %v5700_v39, %v5701_v6  ;;  %v5707_v44 = vrot.slane %v5706_v40, 2  ;;  %v5671_v10 = vadd.f32 %v8573_v21, %v5556_v13  ;;  %v7604_v1 = vpop.f32.mrb[46].mxu1 }
 0x8be   : > { %v5715_v45 = vrot.slane %v5714_v41, 1  ;;  %v5720_v11 = vmax.f32 %v5718_v3, %v5719_v55  ;;  %v5735_v47 = vrot.slane %v5673_v59, 4  ;;  %v5674_v7 = vadd.f32 %v8574_v30, %v7604_v1  ;;  %v5559_v49 = vpop.f32.mrb[47].mxu1 }
 0x8bf   : > { %v5703_v29 = vrot.slane %v5702_v5, 1  ;;  %v5708_v61 = vmax.f32 %v5706_v40, %v5707_v44  ;;  %v5723_v8 = vrot.slane %v5671_v10, 4  ;;  %v5672_v15 = vadd.f32 %v8575_v52, %v5559_v49 }
 0x8c0   : > { %v5716_v50 = vmax.f32 %v5714_v41, %v5715_v45  ;;  %v5721_v28 = vrot.slane %v5720_v11, 1  ;;  %v5736_v58 = vmax.f32 %v5673_v59, %v5735_v47  ;;  %v5741_v34 = vrot.slane %v5674_v7, 4 }
 0x8c1   : > { %v5704_v57 = vmax.f32 %v5702_v5, %v5703_v29  ;;  %v5709_v25 = vrot.slane %v5708_v61, 1  ;;  %v5724_v0 = vmax.f32 %v5671_v10, %v5723_v8  ;;  %v5729_v56 = vrot.slane %v5672_v15, 4 }
 0x8c2   : > { %v5893_v33 = vsub.f32 %v5669_v4, %v5716_v50  ;;  %v5722_v31 = vmax.f32 %v5720_v11, %v5721_v28  ;;  %v5737_v53 = vrot.slane %v5736_v58, 2  ;;  %v5742_v23 = vmax.f32 %v5674_v7, %v5741_v34 }
 0x8c3   : > { %v5891_v14 = vsub.f32 %v5667_v48, %v5704_v57  ;;  %v5710_v54 = vmax.f32 %v5708_v61, %v5709_v25  ;;  %v5725_v37 = vrot.slane %v5724_v0, 2  ;;  %v5730_v24 = vmax.f32 %v5672_v15, %v5729_v56 }
 0x8c4   : > { %v5927_v22 = vmul.f32 1.442695, %v5893_v33  ;;  %v5894_v9 = vsub.f32 %v5670_v19, %v5722_v31  ;;  %v5738_v38 = vmax.f32 %v5736_v58, %v5737_v53  ;;  %v5743_v39 = vrot.slane %v5742_v23, 2 }
 0x8c5   : > { %v5923_v12 = vmul.f32 1.442695, %v5891_v14  ;;  %v5892_v63 = vsub.f32 %v5668_v17, %v5710_v54  ;;  %v5726_v3 = vmax.f32 %v5724_v0, %v5725_v37  ;;  %v5731_v6 = vrot.slane %v5730_v24, 2 }
 0x8c6   : > { %8408 = vpow2.f32 %v5927_v22  ;;  %v5929_v40 = vmul.f32 1.442695, %v5894_v9  ;;  %v5739_v42 = vrot.slane %v5738_v38, 1  ;;  %v5744_v41 = vmax.f32 %v5742_v23, %v5743_v39  ;;  %v8576_v39 = vld [vmem:[%s9668_s9 + $0x50] sm:$0xff] }
 0x8c7   : > { %8410 = vpow2.f32 %v5923_v12  ;;  %v5925_v4 = vmul.f32 1.442695, %v5892_v63  ;;  %v5727_v55 = vrot.slane %v5726_v3, 1  ;;  %v5732_v20 = vmax.f32 %v5730_v24, %v5731_v6 }
 0x8c8   : > { %8412 = vpow2.f32 %v5929_v40  ;;  %v5740_v48 = vmax.f32 %v5738_v38, %v5739_v42  ;;  %v5745_v13 = vrot.slane %v5744_v41, 1 }
 0x8c9   : > { %8414 = vpow2.f32 %v5925_v4  ;;  %v5728_v5 = vmax.f32 %v5726_v3, %v5727_v55  ;;  %v5733_v19 = vrot.slane %v5732_v20, 1  ;;  %v8577_v4 = vld [vmem:[%s9668_s9 + $0x40] sm:$0xff] }
 0x8ca   : > { %v5897_v44 = vsub.f32 %v5673_v59, %v5740_v48  ;;  %v5746_v21 = vmax.f32 %v5744_v41, %v5745_v13 }
 0x8cb   : > { %v5895_v1 = vsub.f32 %v5671_v10, %v5728_v5  ;;  %v5734_v17 = vmax.f32 %v5732_v20, %v5733_v19 }
 0x8cc   : > { %v5935_v45 = vmul.f32 1.442695, %v5897_v44  ;;  %v5898_v11 = vsub.f32 %v5674_v7, %v5746_v21 }
 0x8cd   : > { %v5931_v47 = vmul.f32 1.442695, %v5895_v1  ;;  %v5896_v30 = vsub.f32 %v5672_v15, %v5734_v17 }
 0x8ce   : > { %8416 = vpow2.f32 %v5935_v45  ;;  %v5937_v49 = vmul.f32 1.442695, %v5898_v11 }
 0x8cf   : > { %8418 = vpow2.f32 %v5931_v47  ;;  %v5933_v29 = vmul.f32 1.442695, %v5896_v30 }
 0x8d0   : > { %v8409_v61 = vpop.eup %8408  ;;  %8420 = vpow2.f32 %v5937_v49 }
 0x8d1   : > { %v8411_v8 = vpop.eup %8410  ;;  %v11797_v50 = vsel %vm1007_vm0, 0.0, %v8409_v61  ;;  %8422 = vpow2.f32 %v5933_v29 }
 0x8d2   : > { %v8413_v59 = vpop.eup %8412  ;;  %v6031_v10 = vrot.slane %v11797_v50, 4  ;;  %v11802_v7 = vsel %vm1005_vm1, 0.0, %v8411_v8 }
 0x8d3   : > { %v8415_v15 = vpop.eup %8414  ;;  %v6019_v58 = vrot.slane %v11802_v7, 4  ;;  %v11807_v57 = vsel %vm1008_vm2, 0.0, %v8413_v59 }
 0x8d4   : > { %v6032_v25 = vadd.f32 %v6031_v10, %v11797_v50  ;;  %v6037_v0 = vrot.slane %v11807_v57, 4  ;;  %v11813_v33 = vsel %vm1006_vm3, 0.0, %v8415_v15 }
 0x8d5   : > { %v6020_v31 = vadd.f32 %v6019_v58, %v11802_v7  ;;  %v6025_v53 = vrot.slane %v11813_v33, 4 }
 0x8d6   : > { %v6033_v23 = vrot.slane %v6032_v25, 2  ;;  %v6038_v14 = vadd.f32 %v6037_v0, %v11807_v57 }
 0x8d7   : > { %v6021_v54 = vrot.slane %v6020_v31, 2  ;;  %v6026_v37 = vadd.f32 %v6025_v53, %v11813_v33 }
 0x8d8   : > { %v8417_v22 = vpop.eup %8416  ;;  %v6034_v9 = vadd.f32 %v6033_v23, %v6032_v25  ;;  %v6039_v38 = vrot.slane %v6038_v14, 2 }
 0x8d9   : > { %v7607_v24 = vpop.f32.mrb[48].mxu1  ;;  %v8419_v3 = vpop.eup %8418  ;;  %v6022_v6 = vadd.f32 %v6021_v54, %v6020_v31  ;;  %v6027_v40 = vrot.slane %v6026_v37, 2  ;;  %v11824_v41 = vsel %vm1011_vm4, 0.0, %v8417_v22 }
 0x8da   : > { %v11820_v12 = vadd.f32 %v8576_v39, %v7607_v24  ;;  %v5572_v63 = vpop.f32.mrb[49].mxu1  ;;  %v8421_v48 = vpop.eup %8420  ;;  %v6035_v13 = vrot.slane %v6034_v9, 1  ;;  %v6040_v5 = vadd.f32 %v6039_v38, %v6038_v14  ;;  %v6055_v19 = vrot.slane %v11824_v41, 4 }
 0x8db   : > { %v11827_v55 = vadd.f32 %v8577_v4, %v5572_v63  ;;  %v7608_v20 = vpop.f32.mrb[50].mxu1  ;;  %v11832_v21 = vsel %vm1009_vm5, 0.0, %v8419_v3  ;;  %v8423_v17 = vpop.eup %8422  ;;  %v6023_v45 = vrot.slane %v6022_v6, 1  ;;  %v6028_v11 = vadd.f32 %v6027_v40, %v6026_v37  ;;  %v8578_v4 = vld [vmem:[%s9668_s9 + $0x58] sm:$0xff] }
 0x8dc   : > { %v5575_v1 = vpop.f32.mrb[51].mxu1  ;;  %v6043_v47 = vrot.slane %v11832_v21, 4  ;;  %v11837_v49 = vsel %vm1012_vm6, 0.0, %v8421_v48  ;;  %v6036_v29 = vadd.f32 %v6035_v13, %v6034_v9  ;;  %v6041_v61 = vrot.slane %v6040_v5, 1 }
 0x8dd   : > { %v6056_v8 = vadd.f32 %v6055_v19, %v11824_v41  ;;  %v6061_v52 = vrot.slane %v11837_v49, 4  ;;  %v6024_v59 = vadd.f32 %v6023_v45, %v6022_v6  ;;  %v6029_v10 = vrot.slane %v6028_v11, 1 }
 0x8de   : > { %v6044_v28 = vadd.f32 %v6043_v47, %v11832_v21  ;;  %v11844_v58 = vsel %vm1010_vm7, 0.0, %v8423_v17  ;;  %vm6213_vm0 = vcmp.gt.f32.partialorder %v6036_v29, 0.0  ;;  %v6042_v34 = vadd.f32 %v6041_v61, %v6040_v5  ;;  %v8579_v17 = vld [vmem:[%s9668_s9 + $0x48] sm:$0xff] }
 0x8df   : > { %v6057_v25 = vrot.slane %v6056_v8, 2  ;;  %v6062_v0 = vadd.f32 %v6061_v52, %v11837_v49  ;;  %v6245_v56 = vsel %vm6213_vm0, %v6036_v29, 1.0  ;;  %vm6211_vm1 = vcmp.gt.f32.partialorder %v6024_v59, 0.0 }
 0x8e0   : > { %v6030_v31 = vadd.f32 %v6029_v10, %v6028_v11  ;;  %v6045_v53 = vrot.slane %v6044_v28, 2  ;;  %8424 = vrcp.f32 %v6245_v56  ;;  %v6243_v23 = vsel %vm6211_vm1, %v6024_v59, 1.0 }
 0x8e1   : > { %vm6214_vm2 = vcmp.gt.f32.partialorder %v6042_v34, 0.0  ;;  %v6058_v14 = vadd.f32 %v6057_v25, %v6056_v8  ;;  %8426 = vrcp.f32 %v6243_v23  ;;  %v6063_v9 = vrot.slane %v6062_v0, 2 }
 0x8e2   : > { %v6246_v54 = vsel %vm6214_vm2, %v6042_v34, 1.0  ;;  %vm6212_vm3 = vcmp.gt.f32.partialorder %v6030_v31, 0.0  ;;  %v6046_v37 = vadd.f32 %v6045_v53, %v6044_v28  ;;  %v6049_v39 = vrot.slane %v11844_v58, 4 }
 0x8e3   : > { %8428 = vrcp.f32 %v6246_v54  ;;  %v6244_v24 = vsel %vm6212_vm3, %v6030_v31, 1.0  ;;  %v6059_v22 = vrot.slane %v6058_v14, 1  ;;  %v5759_v63 = vrot.slane %v11820_v12, 4 }
 0x8e4   : > { %8430 = vrcp.f32 %v6244_v24  ;;  %v6047_v38 = vrot.slane %v6046_v37, 1  ;;  %v6064_v40 = vadd.f32 %v6063_v9, %v6062_v0  ;;  %v5747_v42 = vrot.slane %v11827_v55, 4 }
 0x8e5   : > { %v11849_v3 = vpop.f32.mrb[52].mxu1  ;;  %v6060_v6 = vadd.f32 %v6059_v22, %v6058_v14  ;;  %v11853_v48 = vadd.f32 %v8578_v4, %v7608_v20  ;;  %v6050_v19 = vadd.f32 %v6049_v39, %v11844_v58  ;;  %v5760_v44 = vmax.f32 %v11820_v12, %v5759_v63 }
 0x8e6   : > { %v11855_v13 = vpop.f32.mrb[53].mxu1  ;;  %v6048_v5 = vadd.f32 %v6047_v38, %v6046_v37  ;;  %v11860_v45 = vadd.f32 %v8579_v17, %v5575_v1  ;;  %v6065_v47 = vrot.slane %v6064_v40, 1  ;;  %v5748_v30 = vmax.f32 %v11827_v55, %v5747_v42 }
 0x8e7   : > { %v11862_v11 = vpop.f32.mrb[54].mxu1  ;;  %vm6217_vm4 = vcmp.gt.f32.partialorder %v6060_v6, 0.0  ;;  %v5765_v29 = vrot.slane %v11853_v48, 4  ;;  %v6051_v8 = vrot.slane %v6050_v19, 2  ;;  %v5761_v52 = vrot.slane %v5760_v44, 2 }
 0x8e8   : > { %v11866_v20 = vpop.f32.mrb[55].mxu1  ;;  %v6249_v61 = vsel %vm6217_vm4, %v6060_v6, 1.0  ;;  %vm6215_vm5 = vcmp.gt.f32.partialorder %v6048_v5, 0.0  ;;  %v6066_v10 = vadd.f32 %v6065_v47, %v6064_v40  ;;  %v5749_v28 = vrot.slane %v5748_v30, 2 }
 0x8e9   : > { %8432 = vrcp.f32 %v6249_v61  ;;  %v6247_v59 = vsel %vm6215_vm5, %v6048_v5, 1.0  ;;  %v6052_v1 = vadd.f32 %v6051_v8, %v6050_v19  ;;  %v5762_v15 = vmax.f32 %v5760_v44, %v5761_v52 }
 0x8ea   : > { %8434 = vrcp.f32 %v6247_v59  ;;  %v5766_v34 = vmax.f32 %v11853_v48, %v5765_v29  ;;  %v8425_v25 = vpop.eup %8424  ;;  %vm6218_vm6 = vcmp.gt.f32.partialorder %v6066_v10, 0.0  ;;  %v5750_v0 = vmax.f32 %v5748_v30, %v5749_v28 }
 0x8eb   : > { %v5753_v56 = vrot.slane %v11860_v45, 4  ;;  %v8427_v31 = vpop.eup %8426  ;;  %v6309_v53 = vmul.f32 %v8425_v25, %v11797_v50  ;;  %v6250_v23 = vsel %vm6218_vm6, %v6066_v10, 1.0  ;;  %v6053_v14 = vrot.slane %v6052_v1, 1 }
 0x8ec   : > { %v5763_v54 = vrot.slane %v5762_v15, 1  ;;  %v6307_v22 = vmul.f32 %v8427_v31, %v11802_v7  ;;  %8436 = vrcp.f32 %v6250_v23  ;;  %v5751_v9 = vrot.slane %v5750_v0, 1 }
 0x8ed   : > { %v11871_v37 = vpop.f32.mrb[56].mxu1  ;;  %v8429_v24 = vpop.eup %8428  ;;  %v5767_v38 = vrot.slane %v5766_v34, 2  ;;  %v6341_v6 = vmul.f32 %v6309_v53, %v11649_v51  ;;  %v6054_v42 = vadd.f32 %v6053_v14, %v6052_v1  ;;  %vm12986_vm3 = vcmp.lt.f32.partialorder %v12929_v36, 0.0 }
 0x8ee   : > { %v11874_v39 = vpop.f32.mrb[57].mxu1  ;;  %v8431_v63 = vpop.eup %8430  ;;  %v6310_v40 = vmul.f32 %v8429_v24, %v11807_v57  ;;  %v5764_v50 = vmax.f32 %v5762_v15, %v5763_v54  ;;  %v6339_v5 = vmul.f32 %v6307_v22, %v11649_v51  ;;  %v5752_v44 = vmax.f32 %v5750_v0, %v5751_v9 }
 0x8ef   : > { %v11878_v4 = vpop.f32.mrb[58].mxu1  ;;  %v6308_v19 = vmul.f32 %v8431_v63, %v11813_v33  ;;  %v5768_v7 = vmax.f32 %v5766_v34, %v5767_v38  ;;  %v6383_v47 = vrot.slane %v6341_v6, 4  ;;  %vm6216_vm7 = vcmp.gt.f32.partialorder %v6054_v42, 0.0 }
 0x8f0   : > { %v11882_v17 = vpop.f32.mrb[59].mxu1  ;;  %v6342_v30 = vmul.f32 %v6310_v40, %v11649_v51  ;;  %v5901_v29 = vsub.f32 %v11820_v12, %v5764_v50  ;;  %v6371_v61 = vrot.slane %v6339_v5, 4  ;;  %v6248_v8 = vsel %vm6216_vm7, %v6054_v42, 1.0 }
 0x8f1   : > { %v6340_v57 = vmul.f32 %v6308_v19, %v11649_v51  ;;  %v5899_v52 = vsub.f32 %v11827_v55, %v5752_v44  ;;  %v6384_v59 = vadd.f32 %v6383_v47, %v6341_v6  ;;  %8438 = vrcp.f32 %v6248_v8 }
 0x8f2   : > { %v6389_v10 = vrot.slane %v6342_v30, 4  ;;  %v5943_v33 = vmul.f32 1.442695, %v5901_v29  ;;  %v6372_v1 = vadd.f32 %v6371_v61, %v6339_v5  ;;  %v5769_v25 = vrot.slane %v5768_v7, 1 }
 0x8f3   : > { %v8433_v28 = vpop.eup %8432  ;;  %v6377_v15 = vrot.slane %v6340_v57, 4  ;;  %v5939_v34 = vmul.f32 1.442695, %v5899_v52  ;;  %v6385_v31 = vrot.slane %v6384_v59, 2  ;;  %v5754_v47 = vmax.f32 %v11860_v45, %v5753_v56  ;;  %v8580_v52 = vld [vmem:[%s9668_s9 + $0x70] sm:$0xff] }
 0x8f4   : > { %v8435_v0 = vpop.eup %8434  ;;  %v6390_v53 = vadd.f32 %v6389_v10, %v6342_v30  ;;  %v6313_v12 = vmul.f32 %v8433_v28, %v11824_v41  ;;  %8440 = vpow2.f32 %v5943_v33  ;;  %v6373_v14 = vrot.slane %v6372_v1, 2 }
 0x8f5   : > { %v11889_v23 = vpop.f32.mrb[60].mxu1  ;;  %v6378_v54 = vadd.f32 %v6377_v15, %v6340_v57  ;;  %v6311_v55 = vmul.f32 %v8435_v0, %v11832_v21  ;;  %8442 = vpow2.f32 %v5939_v34  ;;  %v5770_v38 = vmax.f32 %v5768_v7, %v5769_v25 }
 0x8f6   : > { %v11892_v24 = vpop.f32.mrb[61].mxu1  ;;  %v6391_v22 = vrot.slane %v6390_v53, 2  ;;  %v6345_v9 = vmul.f32 %v6313_v12, %v11649_v51  ;;  %v8437_v6 = vpop.eup %8436  ;;  %v6386_v40 = vadd.f32 %v6385_v31, %v6384_v59  ;;  %v6374_v41 = vadd.f32 %v6373_v14, %v6372_v1 }
 0x8f7   : > { %v11895_v63 = vpop.f32.mrb[62].mxu1  ;;  %v6379_v42 = vrot.slane %v6378_v54, 2  ;;  %v6343_v50 = vmul.f32 %v6311_v55, %v11649_v51  ;;  %v6314_v44 = vmul.f32 %v8437_v6, %v11837_v49  ;;  %v5902_v61 = vsub.f32 %v11853_v48, %v5770_v38 }
 0x8f8   : > { %v11898_v5 = vpop.f32.mrb[63].mxu1  ;;  %v6392_v19 = vadd.f32 %v6391_v22, %v6390_v53  ;;  %v6407_v21 = vrot.slane %v6345_v9, 4  ;;  %v6375_v7 = vrot.slane %v6374_v41, 1  ;;  %v11908_v59 = vadd.f32 %v8580_v52, %v11849_v3 }
 0x8f9   : > { %v6380_v30 = vadd.f32 %v6379_v42, %v6378_v54  ;;  %v6395_v29 = vrot.slane %v6343_v50, 4  ;;  %v6346_v8 = vmul.f32 %v6314_v44, %v11649_v51  ;;  %v6387_v10 = vrot.slane %v6386_v40, 1  ;;  %v12971_v42 = vld [vmem:[#allocation50_spill] sm:$0xff] }
 0x8fa   : > { %v6408_v57 = vadd.f32 %v6407_v21, %v6345_v9  ;;  %v5945_v49 = vmul.f32 1.442695, %v5902_v61  ;;  %v6393_v15 = vrot.slane %v6392_v19, 1  ;;  %v5755_v25 = vrot.slane %v5754_v47, 2 }
 0x8fb   : > { %v6381_v33 = vrot.slane %v6380_v30, 1  ;;  %v6396_v28 = vadd.f32 %v6395_v29, %v6343_v50  ;;  %v8439_v1 = vpop.eup %8438  ;;  %v6413_v56 = vrot.slane %v6346_v8, 4  ;;  %v6376_v31 = vadd.f32 %v6375_v7, %v6374_v41 }
 0x8fc   : > { %v6409_v34 = vrot.slane %v6408_v57, 2  ;;  %8444 = vpow2.f32 %v5945_v49  ;;  %v6312_v3 = vmul.f32 %v8439_v1, %v11844_v58  ;;  %v5756_v54 = vmax.f32 %v5754_v47, %v5755_v25  ;;  %v12974_v47 = vld [vmem:[#allocation51_spill] sm:$0xff] }
 0x8fd   : > { %v11910_v0 = vpop.f32.mrb[64].mxu1  ;;  %v6382_v48 = vadd.f32 %v6381_v33, %v6380_v30  ;;  %v6397_v53 = vrot.slane %v6396_v28, 2  ;;  %v5783_v55 = vrot.slane %v11908_v59, 4  ;;  %v6414_v41 = vadd.f32 %v6413_v56, %v6346_v8 }
 0x8fe   : > { %v11912_v12 = vpop.f32.mrb[65].mxu1  ;;  %v8441_v14 = vpop.eup %8440  ;;  %v11921_v6 = vadd.f32 %v6409_v34, %v6408_v57  ;;  %vm12972_vm8 = vcmp.lt.f32.partialorder %v12971_v42, 0.0  ;;  %v11929_v58 = vadd.f32 %v6387_v10, %v6386_v40  ;;  %vm12975_vm14 = vcmp.lt.f32.partialorder %v12974_v47, 0.0  ;;  %v8581_v10 = vld [vmem:[%s9668_s9 + $0x60] sm:$0xff] }
 0x8ff   : > { %v11916_v22 = vpop.f32.mrb[66].mxu1  ;;  %v8443_v9 = vpop.eup %8442  ;;  %v11919_v38 = vsel %vm2910_vm10, %v6382_v48, %v6376_v31  ;;  %v11925_v50 = vsel %vm12972_vm8, 0.0, %v8441_v14  ;;  %v11936_v30 = vadd.f32 %v6393_v15, %v6392_v19  ;;  %v11938_v29 = vadd.f32 %v6397_v53, %v6396_v28  ;;  %v8583_v14 = vld [vmem:[%s9668_s9 + $0x68] sm:$0xff] }
 0x900   : > { %12970 = vst [vmem:[#allocation68_spill] sm:$0xff] %v11919_v38  ;;  %v11927_v21 = vpop.f32.mrb[67].mxu1  ;;  %12973 = vst [vmem:[#allocation69_spill] sm:$0xff] %v11929_v58  ;;  %v6079_v44 = vrot.slane %v11925_v50, 4  ;;  %v11934_v7 = vsel %vm12975_vm14, 0.0, %v8443_v9  ;;  %v5757_v57 = vrot.slane %v5756_v54, 1  ;;  %v6344_v8 = vmul.f32 %v6312_v3, %v11649_v51 }
 0x901   : > { %12976 = vst [vmem:[#allocation56_spill] sm:$0xff] %v11936_v30  ;;  %v6067_v61 = vrot.slane %v11934_v7, 4  ;;  %v5784_v40 = vmax.f32 %v11908_v59, %v5783_v55  ;;  %v11946_v33 = vadd.f32 %v8581_v10, %v11855_v13  ;;  %v6415_v49 = vrot.slane %v6414_v41, 2  ;;  %v8582_v51 = vld [vmem:[%s9668_s9 + $0x78] sm:$0xff] }
 0x902   : > { %v6080_v52 = vadd.f32 %v6079_v44, %v11925_v50  ;;  %v5758_v1 = vmax.f32 %v5756_v54, %v5757_v57  ;;  %v11953_v25 = vadd.f32 %v8582_v51, %v11862_v11  ;;  %v11961_v3 = vadd.f32 %v8583_v14, %v11866_v20  ;;  %v12977_v51 = vld [vmem:[#allocation52_spill] sm:$0xff] }
 0x903   : > { %v6068_v28 = vadd.f32 %v6067_v61, %v11934_v7  ;;  %v5785_v34 = vrot.slane %v5784_v40, 2  ;;  %v5771_v56 = vrot.slane %v11946_v33, 4  ;;  %v6401_v61 = vrot.slane %v6344_v8, 4 }
 0x904   : > { %v6081_v15 = vrot.slane %v6080_v52, 2  ;;  %v5900_v53 = vsub.f32 %v11860_v45, %v5758_v1  ;;  %v5789_v11 = vrot.slane %v11953_v25, 4  ;;  %v5777_v45 = vrot.slane %v11961_v3, 4 }
 0x905   : > { %v11955_v31 = vpop.f32.mrb[68].mxu1  ;;  %v6069_v13 = vrot.slane %v6068_v28, 2  ;;  %v5786_v9 = vmax.f32 %v5784_v40, %v5785_v34  ;;  %v5772_v42 = vmax.f32 %v11946_v33, %v5771_v56  ;;  %vm12978_vm11 = vcmp.lt.f32.partialorder %v12977_v51, 0.0 }
 0x906   : > { %v11963_v54 = vpop.f32.mrb[69].mxu1  ;;  %v6082_v55 = vadd.f32 %v6081_v15, %v6080_v52  ;;  %v8445_v47 = vpop.eup %8444  ;;  %v5941_v10 = vmul.f32 1.442695, %v5900_v53  ;;  %v11976_v15 = vadd.f32 %v6415_v49, %v6414_v41  ;;  %v5790_v53 = vmax.f32 %v11953_v25, %v5789_v11 }
 0x907   : > { %v11967_v44 = vpop.f32.mrb[70].mxu1  ;;  %v6070_v57 = vadd.f32 %v6069_v13, %v6068_v28  ;;  %v11974_v14 = vsel %vm12978_vm11, 0.0, %v8445_v47  ;;  %v5787_v52 = vrot.slane %v5786_v9, 1  ;;  %v5773_v40 = vrot.slane %v5772_v42, 2 }
 0x908   : > { %v11970_v1 = vpop.f32.mrb[71].mxu1  ;;  %v6083_v20 = vrot.slane %v6082_v55, 1  ;;  %v6085_v56 = vrot.slane %v11974_v14, 4  ;;  %8446 = vpow2.f32 %v5941_v10  ;;  %v6402_v48 = vadd.f32 %v6401_v61, %v6344_v8 }
 0x909   : > { %v6071_v34 = vrot.slane %v6070_v57, 1  ;;  %v5788_v28 = vmax.f32 %v5786_v9, %v5787_v52  ;;  %v5774_v13 = vmax.f32 %v5772_v42, %v5773_v40  ;;  %v5778_v47 = vmax.f32 %v11961_v3, %v5777_v45  ;;  %v8584_v45 = vld [vmem:[%s9668_s9 + $0x90] sm:$0xff] }
 0x90a   : > { %v6084_v19 = vadd.f32 %v6083_v20, %v6082_v55  ;;  %v6086_v58 = vadd.f32 %v6085_v56, %v11974_v14  ;;  %v5791_v49 = vrot.slane %v5790_v53, 2  ;;  %v11986_v20 = vadd.f32 %v8584_v45, %v11871_v37 }
 0x90b   : > { %v6072_v30 = vadd.f32 %v6071_v34, %v6070_v57  ;;  %v5905_v51 = vsub.f32 %v11908_v59, %v5788_v28  ;;  %v5775_v41 = vrot.slane %v5774_v13, 1  ;;  %v5779_v9 = vrot.slane %v5778_v47, 2  ;;  %v8586_v34 = vld [vmem:[%s9668_s9 + $0x98] sm:$0xff] }
 0x90c   : > { %vm6221_vm12 = vcmp.gt.f32.partialorder %v6084_v19, 0.0  ;;  %v6087_v55 = vrot.slane %v6086_v58, 2  ;;  %v5792_v57 = vmax.f32 %v5790_v53, %v5791_v49  ;;  %v11994_v56 = vadd.f32 %v8586_v34, %v11878_v4 }
 0x90d   : > { %v6253_v38 = vsel %vm6221_vm12, %v6084_v19, 1.0  ;;  %vm6219_vm9 = vcmp.gt.f32.partialorder %v6072_v30, 0.0  ;;  %v5951_v8 = vmul.f32 1.442695, %v5905_v51  ;;  %v5776_v11 = vmax.f32 %v5774_v13, %v5775_v41  ;;  %v8585_v19 = vld [vmem:[%s9668_s9 + $0x80] sm:$0xff]  ;;  %v12979_v41 = vld [vmem:[#allocation53_spill] sm:$0xff] }
 0x90e   : > { %8448 = vrcp.f32 %v6253_v38  ;;  %v6251_v42 = vsel %vm6219_vm9, %v6072_v30, 1.0  ;;  %v6088_v61 = vadd.f32 %v6087_v55, %v6086_v58  ;;  %v5780_v10 = vmax.f32 %v5778_v47, %v5779_v9 }
 0x90f   : > { %8450 = vrcp.f32 %v6251_v42  ;;  %v5903_v59 = vsub.f32 %v11946_v33, %v5776_v11  ;;  %v11990_v52 = vadd.f32 %v8585_v19, %v11874_v39  ;;  %v5793_v30 = vrot.slane %v5792_v57, 1 }
 0x910   : > { %8452 = vpow2.f32 %v5951_v8  ;;  %v6089_v38 = vrot.slane %v6088_v61, 1  ;;  %v5781_v40 = vrot.slane %v5780_v10, 1  ;;  %v6403_v58 = vrot.slane %v6402_v48, 2 }
 0x911   : > { %v5947_v28 = vmul.f32 1.442695, %v5903_v59  ;;  %v5807_v13 = vrot.slane %v11986_v20, 4  ;;  %v5795_v33 = vrot.slane %v11990_v52, 4  ;;  %v5794_v47 = vmax.f32 %v5792_v57, %v5793_v30 }
 0x912   : > { %v8447_v53 = vpop.eup %8446  ;;  %v6090_v37 = vadd.f32 %v6089_v38, %v6088_v61  ;;  %v5782_v51 = vmax.f32 %v5780_v10, %v5781_v40  ;;  %v5813_v39 = vrot.slane %v11994_v56, 4  ;;  %vm12980_vm13 = vcmp.lt.f32.partialorder %v12979_v41, 0.0  ;;  %v12981_v41 = vld [vmem:[#allocation54_spill] sm:$0xff] }
 0x913   : > { %v12001_v49 = vsel %vm12980_vm13, 0.0, %v8447_v53  ;;  %8454 = vpow2.f32 %v5947_v28  ;;  %v5808_v4 = vmax.f32 %v11986_v20, %v5807_v13  ;;  %v5796_v55 = vmax.f32 %v11990_v52, %v5795_v33  ;;  %v8587_v33 = vld [vmem:[%s9668_s9 + $0x88] sm:$0xff] }
 0x914   : > { %vm6222_vm15 = vcmp.gt.f32.partialorder %v6090_v37, 0.0  ;;  %v6073_v9 = vrot.slane %v12001_v49, 4  ;;  %v5906_v42 = vsub.f32 %v11953_v25, %v5794_v47  ;;  %v5904_v8 = vsub.f32 %v11961_v3, %v5782_v51 }
 0x915   : > { %v6254_v11 = vsel %vm6222_vm15, %v6090_v37, 1.0  ;;  %v5809_v61 = vrot.slane %v5808_v4, 2  ;;  %v5797_v57 = vrot.slane %v5796_v55, 2  ;;  %v5814_v10 = vmax.f32 %v11994_v56, %v5813_v39 }
 0x916   : > { %8456 = vrcp.f32 %v6254_v11  ;;  %v6074_v59 = vadd.f32 %v6073_v9, %v12001_v49  ;;  %v5953_v45 = vmul.f32 1.442695, %v5906_v42  ;;  %v5949_v19 = vmul.f32 1.442695, %v5904_v8 }
 0x917   : > { %v6404_v30 = vadd.f32 %v6403_v58, %v6402_v48  ;;  %v5810_v40 = vmax.f32 %v5808_v4, %v5809_v61  ;;  %v5798_v34 = vmax.f32 %v5796_v55, %v5797_v57  ;;  %v5815_v28 = vrot.slane %v5814_v10, 2 }
 0x918   : > { %v8449_v38 = vpop.eup %8448  ;;  %v6075_v3 = vrot.slane %v6074_v59, 2  ;;  %8458 = vpow2.f32 %v5953_v45  ;;  %v12013_v53 = vadd.f32 %v8587_v33, %v11882_v17  ;;  %vm12982_vm0 = vcmp.lt.f32.partialorder %v12981_v41, 0.0 }
 0x919   : > { %v8451_v13 = vpop.eup %8450  ;;  %v6317_v25 = vmul.f32 %v8449_v38, %v11925_v50  ;;  %8460 = vpow2.f32 %v5949_v19  ;;  %v5811_v51 = vrot.slane %v5810_v40, 1  ;;  %v5799_v39 = vrot.slane %v5798_v34, 1 }
 0x91a   : > { %v8453_v37 = vpop.eup %8452  ;;  %v6315_v47 = vmul.f32 %v8451_v13, %v11934_v7  ;;  %v6076_v58 = vadd.f32 %v6075_v3, %v6074_v59  ;;  %v5816_v50 = vmax.f32 %v5814_v10, %v5815_v28  ;;  %v6405_v55 = vrot.slane %v6404_v30, 1  ;;  %v12984_v13 = vld [vmem:[#allocation55_spill] sm:$0xff] }
 0x91b   : > { %v6349_v48 = vmul.f32 %v6317_v25, %v11688_v27  ;;  %v12019_v4 = vsel %vm12982_vm0, 0.0, %v8453_v37  ;;  %v5812_v42 = vmax.f32 %v5810_v40, %v5811_v51  ;;  %v5800_v11 = vmax.f32 %v5798_v34, %v5799_v39 }
 0x91c   : > { %v6347_v9 = vmul.f32 %v6315_v47, %v11688_v27  ;;  %v6103_v17 = vrot.slane %v12019_v4, 4  ;;  %v6077_v8 = vrot.slane %v6076_v58, 1  ;;  %v5817_v7 = vrot.slane %v5816_v50, 1 }
 0x91d   : > { %v5801_v61 = vrot.slane %v12013_v53, 4  ;;  %v8455_v57 = vpop.eup %8454  ;;  %v12983_v59 = vrot.slane %v11938_v29, 1  ;;  %v6431_v19 = vrot.slane %v6349_v48, 4  ;;  %vm12985_vm1 = vcmp.lt.f32.partialorder %v12984_v13, 0.0 }
 0x91e   : > { %v6419_v10 = vrot.slane %v6347_v9, 4  ;;  %v6104_v38 = vadd.f32 %v6103_v17, %v12019_v4  ;;  %v6078_v28 = vadd.f32 %v6077_v8, %v6076_v58  ;;  %v12032_v40 = vsel %vm12985_vm1, 0.0, %v8455_v57  ;;  %v8588_v58 = vld [vmem:[%s9668_s9 + $0xb0] sm:$0xff]  ;;  %v12987_v57 = vld [vmem:[#allocation57_spill] sm:$0xff] }
 0x91f   : > { %v12027_v45 = vadd.f32 %v12983_v59, %v11938_v29  ;;  %v5909_v34 = vsub.f32 %v11986_v20, %v5812_v42  ;;  %v5818_v25 = vmax.f32 %v5816_v50, %v5817_v7  ;;  %v12035_v3 = vadd.f32 %v6405_v55, %v6404_v30 }
 0x920   : > { %v6420_v33 = vadd.f32 %v6419_v10, %v6347_v9  ;;  %v6105_v37 = vrot.slane %v6104_v38, 2  ;;  %v6091_v29 = vrot.slane %v12032_v40, 4  ;;  %v8457_v47 = vpop.eup %8456  ;;  %vm6220_vm2 = vcmp.gt.f32.partialorder %v6078_v28, 0.0 }
 0x921   : > { %v5907_v51 = vsub.f32 %v11990_v52, %v5800_v11  ;;  %v5802_v39 = vmax.f32 %v12013_v53, %v5801_v61  ;;  %v12042_v41 = vadd.f32 %v8588_v58, %v11889_v23  ;;  %v6432_v17 = vadd.f32 %v6431_v19, %v6349_v48 }
 0x922   : > { %v6318_v20 = vmul.f32 %v8457_v47, %v11974_v14  ;;  %v6252_v50 = vsel %vm6220_vm2, %v6078_v28, 1.0  ;;  %v6106_v30 = vadd.f32 %v6105_v37, %v6104_v38  ;;  %v8459_v55 = vpop.eup %8458  ;;  %v6092_v9 = vadd.f32 %v6091_v29, %v12032_v40 }
 0x923   : > { %8462 = vrcp.f32 %v6252_v50  ;;  %v5959_v42 = vmul.f32 1.442695, %v5909_v34  ;;  %v5910_v8 = vsub.f32 %v11994_v56, %v5818_v25  ;;  %v8461_v7 = vpop.eup %8460  ;;  %v6421_v52 = vrot.slane %v6420_v33, 2 }
 0x924   : > { %v6350_v11 = vmul.f32 %v6318_v20, %v11688_v27  ;;  %v6107_v61 = vrot.slane %v6106_v30, 1  ;;  %v12050_v23 = vsel %vm12986_vm3, 0.0, %v8459_v55  ;;  %v6093_v48 = vrot.slane %v6092_v9, 2 }
 0x925   : > { %v6109_v14 = vrot.slane %v12050_v23, 4  ;;  %vm12988_vm4 = vcmp.lt.f32.partialorder %v12987_v57, 0.0  ;;  %v5955_v19 = vmul.f32 1.442695, %v5907_v51  ;;  %v6433_v10 = vrot.slane %v6432_v17, 2 }
 0x926   : > { %v12055_v59 = vsel %vm12988_vm4, 0.0, %v8461_v7  ;;  %v6437_v38 = vrot.slane %v6350_v11, 4  ;;  %v6108_v56 = vadd.f32 %v6107_v61, %v6106_v30  ;;  %v6094_v13 = vadd.f32 %v6093_v48, %v6092_v9 }
 0x927   : > { %v6097_v28 = vrot.slane %v12055_v59, 4  ;;  %v6110_v34 = vadd.f32 %v6109_v14, %v12050_v23  ;;  %8464 = vpow2.f32 %v5959_v42  ;;  %v5961_v36 = vmul.f32 1.442695, %v5910_v8 }
 0x928   : > { %v6422_v25 = vadd.f32 %v6421_v52, %v6420_v33  ;;  %v6438_v37 = vadd.f32 %v6437_v38, %v6350_v11  ;;  %vm6225_vm5 = vcmp.gt.f32.partialorder %v6108_v56, 0.0  ;;  %v6095_v58 = vrot.slane %v6094_v13, 1 }
 0x929   : > { %v6098_v29 = vadd.f32 %v6097_v28, %v12055_v59  ;;  %v6257_v47 = vsel %vm6225_vm5, %v6108_v56, 1.0  ;;  %v6111_v20 = vrot.slane %v6110_v34, 2  ;;  %8466 = vpow2.f32 %v5955_v19 }
 0x92a   : > { %v12060_v51 = vadd.f32 %v6433_v10, %v6432_v17  ;;  %8468 = vrcp.f32 %v6257_v47  ;;  %v5803_v30 = vrot.slane %v5802_v39, 2  ;;  %v6096_v55 = vadd.f32 %v6095_v58, %v6094_v13  ;;  %v8589_v17 = vld [vmem:[%s9668_s9 + $0xa0] sm:$0xff] }
 0x92b   : > { %v6099_v50 = vrot.slane %v6098_v29, 2  ;;  %v6112_v9 = vadd.f32 %v6111_v20, %v6110_v34  ;;  %8470 = vpow2.f32 %v5961_v36  ;;  %v5831_v42 = vrot.slane %v12042_v41, 4 }
 0x92c   : > { %v6423_v33 = vrot.slane %v6422_v25, 1  ;;  %v6439_v8 = vrot.slane %v6438_v37, 2  ;;  %v5804_v52 = vmax.f32 %v5802_v39, %v5803_v30  ;;  %vm6223_vm6 = vcmp.gt.f32.partialorder %v6096_v55, 0.0  ;;  %v12989_v30 = vld [vmem:[#allocation58_spill] sm:$0xff] }
 0x92d   : > { %v6100_v7 = vadd.f32 %v6099_v50, %v6098_v29  ;;  %v8463_v11 = vpop.eup %8462  ;;  %v6113_v61 = vrot.slane %v6112_v9, 1  ;;  %v5832_v48 = vmax.f32 %v12042_v41, %v5831_v42  ;;  %v12066_v14 = vadd.f32 %v8589_v17, %v11892_v24 }
 0x92e   : > { %v6435_v57 = vrot.slane %v12060_v51, 1  ;;  %v6316_v19 = vmul.f32 %v8463_v11, %v12001_v49  ;;  %v6255_v10 = vsel %vm6223_vm6, %v6096_v55, 1.0  ;;  %v5805_v28 = vrot.slane %v5804_v52, 1 }
 0x92f   : > { %v6101_v38 = vrot.slane %v6100_v7, 1  ;;  %8472 = vrcp.f32 %v6255_v10  ;;  %v6114_v56 = vadd.f32 %v6113_v61, %v6112_v9  ;;  %v5833_v13 = vrot.slane %v5832_v48, 2 }
 0x930   : > { %v12070_v39 = vadd.f32 %v6423_v33, %v6422_v25  ;;  %v12072_v34 = vadd.f32 %v6439_v8, %v6438_v37  ;;  %v6348_v36 = vmul.f32 %v6316_v19, %v11688_v27  ;;  %v5806_v24 = vmax.f32 %v5804_v52, %v5805_v28 }
 0x931   : > { %v6102_v29 = vadd.f32 %v6101_v38, %v6100_v7  ;;  %v8465_v47 = vpop.eup %8464  ;;  %vm6226_vm7 = vcmp.gt.f32.partialorder %v6114_v56, 0.0  ;;  %v5834_v58 = vmax.f32 %v5832_v48, %v5833_v13  ;;  %v5819_v20 = vrot.slane %v12066_v14, 4  ;;  %v12991_v7 = vld [vmem:[#allocation59_spill] sm:$0xff] }
 0x932   : > { %v6425_v49 = vrot.slane %v6348_v36, 4  ;;  %v6258_v50 = vsel %vm6226_vm7, %v6114_v56, 1.0  ;;  %vm12990_vm14 = vcmp.lt.f32.partialorder %v12989_v30, 0.0  ;;  %v5908_v42 = vsub.f32 %v12013_v53, %v5806_v24  ;;  %v12993_v56 = vld [vmem:[#allocation60_spill] sm:$0xff] }
 0x933   : > { %vm6224_vm8 = vcmp.gt.f32.partialorder %v6102_v29, 0.0  ;;  %v12078_v55 = vsel %vm12990_vm14, 0.0, %v8465_v47  ;;  %v8467_v25 = vpop.eup %8466  ;;  %8474 = vrcp.f32 %v6258_v50  ;;  %vm12992_vm11 = vcmp.lt.f32.partialorder %v12991_v7, 0.0 }
 0x934   : > { %v6256_v37 = vsel %vm6224_vm8, %v6102_v29, 1.0  ;;  %v6127_v9 = vrot.slane %v12078_v55, 4  ;;  %v8469_v33 = vpop.eup %8468  ;;  %v6426_v8 = vadd.f32 %v6425_v49, %v6348_v36  ;;  %v12084_v52 = vsel %vm12992_vm11, 0.0, %v8467_v25 }
 0x935   : > { %8476 = vrcp.f32 %v6256_v37  ;;  %v5835_v11 = vrot.slane %v5834_v58, 1  ;;  %v8471_v61 = vpop.eup %8470  ;;  %v6321_v48 = vmul.f32 %v8469_v33, %v12019_v4  ;;  %v6115_v19 = vrot.slane %v12084_v52, 4 }
 0x936   : > { %v6128_v17 = vadd.f32 %v6127_v9, %v12078_v55  ;;  %v5957_v10 = vmul.f32 1.442695, %v5908_v42  ;;  %v6427_v38 = vrot.slane %v6426_v8, 2  ;;  %vm12994_vm12 = vcmp.lt.f32.partialorder %v12993_v56, 0.0 }
 0x937   : > { %v12091_v53 = vsel %vm12994_vm12, 0.0, %v8471_v61  ;;  %v5836_v28 = vmax.f32 %v5834_v58, %v5835_v11  ;;  %v5820_v13 = vmax.f32 %v12066_v14, %v5819_v20  ;;  %v6353_v36 = vmul.f32 %v6321_v48, %v11688_v27 }
 0x938   : > { %v6129_v29 = vrot.slane %v6128_v17, 2  ;;  %v6116_v47 = vadd.f32 %v6115_v19, %v12084_v52  ;;  %v6133_v4 = vrot.slane %v12091_v53, 4  ;;  %v6428_v24 = vadd.f32 %v6427_v38, %v6426_v8 }
 0x939   : > { %8478 = vpow2.f32 %v5957_v10  ;;  %v5913_v49 = vsub.f32 %v12042_v41, %v5836_v28  ;;  %v5821_v50 = vrot.slane %v5820_v13, 2  ;;  %v8473_v30 = vpop.eup %8472  ;;  %v6455_v25 = vrot.slane %v6353_v36, 4 }
 0x93a   : > { %v6130_v37 = vadd.f32 %v6129_v29, %v6128_v17  ;;  %v6117_v9 = vrot.slane %v6116_v47, 2  ;;  %v6134_v58 = vadd.f32 %v6133_v4, %v12091_v53  ;;  %v6429_v42 = vrot.slane %v6428_v24, 1  ;;  %v8590_v29 = vld [vmem:[%s9668_s9 + $0xb8] sm:$0xff] }
 0x93b   : > { %v6319_v20 = vmul.f32 %v8473_v30, %v12032_v40  ;;  %v5967_v33 = vmul.f32 1.442695, %v5913_v49  ;;  %v5822_v7 = vmax.f32 %v5820_v13, %v5821_v50  ;;  %v6456_v11 = vadd.f32 %v6455_v25, %v6353_v36 }
 0x93c   : > { %v6131_v61 = vrot.slane %v6130_v37, 1  ;;  %v6118_v48 = vadd.f32 %v6117_v9, %v6116_v47  ;;  %v6135_v8 = vrot.slane %v6134_v58, 2  ;;  %v6430_v19 = vadd.f32 %v6429_v42, %v6428_v24 }
 0x93d   : > { %v6351_v41 = vmul.f32 %v6319_v20, %v11688_v27  ;;  %8480 = vpow2.f32 %v5967_v33  ;;  %v5823_v10 = vrot.slane %v5822_v7, 1  ;;  %v8475_v38 = vpop.eup %8474  ;;  %v12103_v4 = vadd.f32 %v8590_v29, %v11895_v63 }
 0x93e   : > { %v6132_v17 = vadd.f32 %v6131_v61, %v6130_v37  ;;  %v6119_v56 = vrot.slane %v6118_v48, 1  ;;  %v6136_v28 = vadd.f32 %v6135_v8, %v6134_v58  ;;  %v12107_v13 = vsel %vm2910_vm10, %v6430_v19, %v12070_v39 }
 0x93f   : > { %v8477_v40 = vpop.eup %8476  ;;  %v6457_v36 = vrot.slane %v6456_v11, 2  ;;  %v6443_v47 = vrot.slane %v6351_v41, 4  ;;  %v6322_v24 = vmul.f32 %v8475_v38, %v12050_v23  ;;  %v5824_v30 = vmax.f32 %v5822_v7, %v5823_v10  ;;  %v12995_v7 = vld [vmem:[#allocation61_spill] sm:$0xff] }
 0x940   : > { %v6320_v49 = vmul.f32 %v8477_v40, %v12055_v59  ;;  %vm6229_vm9 = vcmp.gt.f32.partialorder %v6132_v17, 0.0  ;;  %v6120_v50 = vadd.f32 %v6119_v56, %v6118_v48  ;;  %v6137_v63 = vrot.slane %v6136_v28, 1 }
 0x941   : > { %v6444_v25 = vadd.f32 %v6443_v47, %v6351_v41  ;;  %v6354_v37 = vmul.f32 %v6322_v24, %v11688_v27  ;;  %v6261_v9 = vsel %vm6229_vm9, %v6132_v17, 1.0  ;;  %v5837_v39 = vrot.slane %v12103_v4, 4 }
 0x942   : > { %v6352_v58 = vmul.f32 %v6320_v49, %v11688_v27  ;;  %8482 = vrcp.f32 %v6261_v9  ;;  %vm6227_vm13 = vcmp.gt.f32.partialorder %v6120_v50, 0.0  ;;  %v6441_v20 = vrot.slane %v12072_v34, 1  ;;  %v8591_v9 = vld [vmem:[%s9668_s9 + $0xa8] sm:$0xff] }
 0x943   : > { %v8479_v42 = vpop.eup %8478  ;;  %v6445_v23 = vrot.slane %v6444_v25, 2  ;;  %v6259_v33 = vsel %vm6227_vm13, %v6120_v50, 1.0  ;;  %v6138_v59 = vadd.f32 %v6137_v63, %v6136_v28  ;;  %vm12996_vm15 = vcmp.lt.f32.partialorder %v12995_v7, 0.0 }
 0x944   : > { %v6449_v61 = vrot.slane %v6352_v58, 4  ;;  %8484 = vrcp.f32 %v6259_v33  ;;  %v12117_v48 = vsel %vm12996_vm15, 0.0, %v8479_v42  ;;  %v5911_v8 = vsub.f32 %v12066_v14, %v5824_v30 }
 0x945   : > { %v12120_v19 = vadd.f32 %v6457_v36, %v6456_v11  ;;  %v6461_v27 = vrot.slane %v6354_v37, 4  ;;  %vm6230_vm0 = vcmp.gt.f32.partialorder %v6138_v59, 0.0  ;;  %v6121_v41 = vrot.slane %v12117_v48, 4  ;;  %v12997_v36 = vld [vmem:[#allocation62_spill] sm:$0xff] }
 0x946   : > { %v6450_v10 = vadd.f32 %v6449_v61, %v6352_v58  ;;  %v6262_v38 = vsel %vm6230_vm0, %v6138_v59, 1.0  ;;  %v5963_v17 = vmul.f32 1.442695, %v5911_v8  ;;  %v5838_v56 = vmax.f32 %v12103_v4, %v5837_v39  ;;  %v8592_v58 = vld [vmem:[%s9668_s9 + $0xd0] sm:$0xff] }
 0x947   : > { %v8481_v28 = vpop.eup %8480  ;;  %v12127_v29 = vadd.f32 %v6435_v57, %v12060_v51  ;;  %v12129_v14 = vadd.f32 %v6445_v23, %v6444_v25  ;;  %8486 = vrcp.f32 %v6262_v38  ;;  %v6122_v11 = vadd.f32 %v6121_v41, %v12117_v48  ;;  %v8593_v23 = vld [vmem:[%s9668_s9 + $0xc0] sm:$0xff] }
 0x948   : > { %v6451_v40 = vrot.slane %v6450_v10, 2  ;;  %vm12998_vm1 = vcmp.lt.f32.partialorder %v12997_v36, 0.0  ;;  %8488 = vpow2.f32 %v5963_v17  ;;  %v5839_v24 = vrot.slane %v5838_v56, 2 }
 0x949   : > { %v12134_v47 = vsel %vm12998_vm1, 0.0, %v8481_v28  ;;  %v12137_v49 = vadd.f32 %v6441_v20, %v12072_v34  ;;  %v6459_v51 = vrot.slane %v12120_v19, 1  ;;  %v6123_v57 = vrot.slane %v6122_v11, 2  ;;  %v8594_v28 = vld [vmem:[%s9668_s9 + $0xd8] sm:$0xff] }
 0x94a   : > { %v6151_v50 = vrot.slane %v12134_v47, 4  ;;  %v12141_v30 = vadd.f32 %v6461_v27, %v6354_v37  ;;  %v5840_v25 = vmax.f32 %v5838_v56, %v5839_v24  ;;  %v12145_v63 = vadd.f32 %v8591_v9, %v11898_v5 }
 0x94b   : > { %v12149_v39 = vadd.f32 %v8592_v58, %v11910_v0  ;;  %v6447_v42 = vrot.slane %v12129_v14, 1  ;;  %v6124_v34 = vadd.f32 %v6123_v57, %v6122_v11  ;;  %v12155_v33 = vadd.f32 %v8593_v23, %v11912_v12 }
 0x94c   : > { %v6152_v20 = vadd.f32 %v6151_v50, %v12134_v47  ;;  %v8483_v37 = vpop.eup %8482  ;;  %v12157_v59 = vadd.f32 %v6451_v40, %v6450_v10  ;;  %v5841_v61 = vrot.slane %v5840_v25, 1  ;;  %v5825_v5 = vrot.slane %v12145_v63, 4 }
 0x94d   : > { %v5855_v7 = vrot.slane %v12149_v39, 4  ;;  %v6325_v0 = vmul.f32 %v8483_v37, %v12078_v55  ;;  %v6125_v8 = vrot.slane %v6124_v34, 1  ;;  %v5843_v41 = vrot.slane %v12155_v33, 4 }
 0x94e   : > { %v6153_v27 = vrot.slane %v6152_v20, 2  ;;  %v8485_v38 = vpop.eup %8484  ;;  %v5842_v17 = vmax.f32 %v5840_v25, %v5841_v61  ;;  %v5826_v56 = vmax.f32 %v12145_v63, %v5825_v5  ;;  %v12167_v10 = vadd.f32 %v8594_v28, %v11916_v22 }
 0x94f   : > { %v5856_v12 = vmax.f32 %v12149_v39, %v5855_v7  ;;  %v6357_v11 = vmul.f32 %v6325_v0, %v11706_v35  ;;  %v6323_v40 = vmul.f32 %v8485_v38, %v12084_v52  ;;  %v6126_v36 = vadd.f32 %v6125_v8, %v6124_v34  ;;  %v12999_v8 = vld [vmem:[#allocation63_spill] sm:$0xff] }
 0x950   : > { %v6154_v55 = vadd.f32 %v6153_v27, %v6152_v20  ;;  %v5914_v24 = vsub.f32 %v12103_v4, %v5842_v17  ;;  %v5827_v57 = vrot.slane %v5826_v56, 2  ;;  %v5844_v25 = vmax.f32 %v12155_v33, %v5843_v41 }
 0x951   : > { %v5857_v50 = vrot.slane %v5856_v12, 2  ;;  %v8487_v9 = vpop.eup %8486  ;;  %v6479_v58 = vrot.slane %v6357_v11, 4  ;;  %v6355_v23 = vmul.f32 %v6323_v40, %v11706_v35  ;;  %vm6228_vm2 = vcmp.gt.f32.partialorder %v6126_v36, 0.0 }
 0x952   : > { %v6155_v37 = vrot.slane %v6154_v55, 1  ;;  %v8489_v22 = vpop.eup %8488  ;;  %v6326_v61 = vmul.f32 %v8487_v9, %v12091_v53  ;;  %v6260_v5 = vsel %vm6228_vm2, %v6126_v36, 1.0  ;;  %v5969_v7 = vmul.f32 1.442695, %v5914_v24 }
 0x953   : > { %v5828_v52 = vmax.f32 %v5826_v56, %v5827_v57  ;;  %v6480_v34 = vadd.f32 %v6479_v58, %v6357_v11  ;;  %v6467_v20 = vrot.slane %v6355_v23, 4  ;;  %8490 = vrcp.f32 %v6260_v5 }
 0x954   : > { %v6156_v4 = vadd.f32 %v6155_v37, %v6154_v55  ;;  %v6358_v0 = vmul.f32 %v6326_v61, %v11706_v35  ;;  %vm13000_vm3 = vcmp.lt.f32.partialorder %v12999_v8, 0.0  ;;  %8492 = vpow2.f32 %v5969_v7 }
 0x955   : > { %v12178_v27 = vsel %vm13000_vm3, 0.0, %v8489_v22  ;;  %v5829_v41 = vrot.slane %v5828_v52, 1  ;;  %v6481_v38 = vrot.slane %v6480_v34, 2  ;;  %v6468_v17 = vadd.f32 %v6467_v20, %v6355_v23 }
 0x956   : > { %vm6233_vm4 = vcmp.gt.f32.partialorder %v6156_v4, 0.0  ;;  %v6139_v53 = vrot.slane %v12178_v27, 4  ;;  %v6485_v28 = vrot.slane %v6358_v0, 4  ;;  %v5858_v11 = vmax.f32 %v5856_v12, %v5857_v50 }
 0x957   : > { %v6265_v40 = vsel %vm6233_vm4, %v6156_v4, 1.0  ;;  %v5830_v56 = vmax.f32 %v5828_v52, %v5829_v41  ;;  %v6463_v36 = vrot.slane %v12141_v30, 2  ;;  %v6453_v55 = vrot.slane %v12157_v59, 1 }
 0x958   : > { %8494 = vrcp.f32 %v6265_v40  ;;  %v6140_v24 = vadd.f32 %v6139_v53, %v12178_v27  ;;  %v6482_v57 = vadd.f32 %v6481_v38, %v6480_v34  ;;  %v5859_v58 = vrot.slane %v5858_v11, 1 }
 0x959   : > { %v5912_v9 = vsub.f32 %v12145_v63, %v5830_v56  ;;  %v5845_v37 = vrot.slane %v5844_v25, 2  ;;  %v12186_v23 = vadd.f32 %v6447_v42, %v12129_v14  ;;  %v6469_v22 = vrot.slane %v6468_v17, 2 }
 0x95a   : > { %v6141_v61 = vrot.slane %v6140_v24, 2  ;;  %v5861_v5 = vrot.slane %v12167_v10, 4  ;;  %v6486_v12 = vadd.f32 %v6485_v28, %v6358_v0  ;;  %v5860_v7 = vmax.f32 %v5858_v11, %v5859_v58 }
 0x95b   : > { %v5965_v50 = vmul.f32 1.442695, %v5912_v9  ;;  %v5846_v52 = vmax.f32 %v5844_v25, %v5845_v37  ;;  %v12190_v20 = vadd.f32 %v6463_v36, %v12141_v30  ;;  %v12193_v34 = vadd.f32 %v6453_v55, %v12157_v59  ;;  %v8595_v25 = vld [vmem:[%s9668_s9 + $0xc8] sm:$0xff] }
 0x95c   : > { %v6142_v63 = vadd.f32 %v6141_v61, %v6140_v24  ;;  %v5862_v4 = vmax.f32 %v12167_v10, %v5861_v5  ;;  %v6483_v14 = vrot.slane %v6482_v57, 1  ;;  %v5917_v42 = vsub.f32 %v12149_v39, %v5860_v7  ;;  %v6676_v7 = vld [vmem:[#allocation19] sm:$0xff] }
 0x95d   : > { %8496 = vpow2.f32 %v5965_v50  ;;  %v5847_v8 = vrot.slane %v5846_v52, 1  ;;  %v8491_v41 = vpop.eup %8490  ;;  %v12197_v0 = vadd.f32 %v6469_v22, %v6468_v17  ;;  %v12201_v30 = vadd.f32 %v8595_v25, %v11927_v21 }
 0x95e   : > { %v6143_v38 = vrot.slane %v6142_v63, 1  ;;  %v5863_v53 = vrot.slane %v5862_v4, 2  ;;  %v8493_v28 = vpop.eup %8492  ;;  %v6487_v59 = vrot.slane %v6486_v12, 2  ;;  %v6324_v40 = vmul.f32 %v8491_v41, %v12117_v48 }
 0x95f   : > { %v5975_v56 = vmul.f32 1.442695, %v5917_v42  ;;  %v5848_v11 = vmax.f32 %v5846_v52, %v5847_v8  ;;  %vm13001_vm5 = vcmp.lt.f32.partialorder %v12937_v62, 0.0  ;;  %v5849_v17 = vrot.slane %v12201_v30, 4 }
 0x960   : > { %v6144_v36 = vadd.f32 %v6143_v38, %v6142_v63  ;;  %v12206_v39 = vsel %vm13001_vm5, 0.0, %v8493_v28  ;;  %v5864_v55 = vmax.f32 %v5862_v4, %v5863_v53  ;;  %v12209_v24 = vadd.f32 %v6483_v14, %v6482_v57  ;;  %v6677_v57 = vld [vmem:[#allocation19 + $0x8] sm:$0xff] }
 0x961   : > { %v6356_v9 = vmul.f32 %v6324_v40, %v11706_v35  ;;  %v6157_v21 = vrot.slane %v12206_v39, 4  ;;  %8498 = vpow2.f32 %v5975_v56  ;;  %v5915_v48 = vsub.f32 %v12155_v33, %v5848_v11  ;;  %v8596_v40 = vld [vmem:[%s9668_s9 + $0xf0] sm:$0xff]  ;;  %v13002_v56 = vld [vmem:[#allocation65_spill] sm:$0xff] }
 0x962   : > { %v8495_v58 = vpop.eup %8494  ;;  %vm6231_vm6 = vcmp.gt.f32.partialorder %v6144_v36, 0.0  ;;  %v5865_v37 = vrot.slane %v5864_v55, 1  ;;  %v5850_v22 = vmax.f32 %v12201_v30, %v5849_v17  ;;  %v6488_v62 = vadd.f32 %v6487_v59, %v6486_v12 }
 0x963   : > { %v6473_v61 = vrot.slane %v6356_v9, 4  ;;  %v6263_v5 = vsel %vm6231_vm6, %v6144_v36, 1.0  ;;  %v6158_v50 = vadd.f32 %v6157_v21, %v12206_v39  ;;  %v5971_v52 = vmul.f32 1.442695, %v5915_v48 }
 0x964   : > { %8500 = vrcp.f32 %v6263_v5  ;;  %v5866_v63 = vmax.f32 %v5864_v55, %v5865_v37  ;;  %v5851_v4 = vrot.slane %v5850_v22, 2  ;;  %v6329_v42 = vmul.f32 %v8495_v58, %v12134_v47  ;;  %v8597_v55 = vld [vmem:[%s9668_s9 + $0xe0] sm:$0xff] }
 0x965   : > { %v6474_v14 = vadd.f32 %v6473_v61, %v6356_v9  ;;  %v6159_v8 = vrot.slane %v6158_v50, 2  ;;  %8502 = vpow2.f32 %v5971_v52  ;;  %v9083_v41 = vmov 0.0|0.0  }
 0x966   : > { %v5918_v33 = vsub.f32 %v12167_v10, %v5866_v63  ;;  %v5852_v12 = vmax.f32 %v5850_v22, %v5851_v4  ;;  %7865 = vmatprep.subr.bf16.mxu0 %v9083_v41  ;;  %v7866_v38 = vpack.c.bf16 %v6677_v57, %v6676_v7  ;;  %7913 = vmatprep.subr.bf16.mxu1 %v9083_v41  ;;  %v6471_v25 = vrot.slane %v12197_v0, 1  ;;  %v13004_v57 = vld [vmem:[#allocation66_spill] sm:$0xff] }
 0x967   : > { %v8497_v53 = vpop.eup %8496  ;;  %v6489_v28 = vrot.slane %v6488_v62, 1  ;;  %v6160_v59 = vadd.f32 %v6159_v8, %v6158_v50  ;;  %v12223_v47 = vadd.f32 %v8596_v40, %v11955_v31  ;;  %vm13003_vm7 = vcmp.lt.f32.partialorder %v13002_v56, 0.0 }
 0x968   : > { %v12227_v10 = vsel %vm13003_vm7, 0.0, %v8497_v53  ;;  %v5977_v11 = vmul.f32 1.442695, %v5918_v33  ;;  %v5853_v36 = vrot.slane %v5852_v12, 1  ;;  %7867 = vmatpush3.bf16.msra.mxu0 %v7866_v38  ;;  %v12231_v17 = vadd.f32 %v8597_v55, %v11963_v54 }
 0x969   : > { %v6475_v9 = vrot.slane %v6474_v14, 2  ;;  %v6361_v21 = vmul.f32 %v6329_v42, %v11706_v35  ;;  %v6161_v58 = vrot.slane %v6160_v59, 1  ;;  %v6145_v48 = vrot.slane %v12227_v10, 4  ;;  %7868 = vmatprep.subr.bf16.mxu0 %v9083_v41 }
 0x96a   : > { %8504 = vpow2.f32 %v5977_v11  ;;  %v5854_v31 = vmax.f32 %v5852_v12, %v5853_v36  ;;  %v5879_v37 = vrot.slane %v12223_v47, 4  ;;  %v5867_v22 = vrot.slane %v12231_v17, 4  ;;  %v8598_v11 = vld [vmem:[%s9668_s9 + $0xf8] sm:$0xff] }
 0x96b   : > { %v8499_v61 = vpop.eup %8498  ;;  %v12239_v5 = vadd.f32 %v6471_v25, %v12197_v0  ;;  %v12241_v54 = vadd.f32 %v6489_v28, %v6488_v62  ;;  %v6162_v50 = vadd.f32 %v6161_v58, %v6160_v59  ;;  %v6146_v7 = vadd.f32 %v6145_v48, %v12227_v10  ;;  %v13006_v58 = vld [vmem:[#allocation67_spill] sm:$0xff] }
 0x96c   : > { %vm13005_vm8 = vcmp.lt.f32.partialorder %v13004_v57, 0.0  ;;  %v5916_v63 = vsub.f32 %v12201_v30, %v5854_v31  ;;  %v5880_v4 = vmax.f32 %v12223_v47, %v5879_v37  ;;  %v5868_v42 = vmax.f32 %v12231_v17, %v5867_v22 }
 0x96d   : > { %v12246_v52 = vsel %vm13005_vm8, 0.0, %v8499_v61  ;;  %v12251_v8 = vadd.f32 %v6475_v9, %v6474_v14  ;;  %v6503_v33 = vrot.slane %v6361_v21, 4  ;;  %vm6234_vm14 = vcmp.gt.f32.partialorder %v6162_v50, 0.0 }
 0x96e   : > { %v6147_v0 = vrot.slane %v6146_v7, 2  ;;  %v8501_v62 = vpop.eup %8500  ;;  %v6266_v12 = vsel %vm6234_vm14, %v6162_v50, 1.0  ;;  %v6175_v38 = vrot.slane %v12246_v52, 4  ;;  %v5973_v53 = vmul.f32 1.442695, %v5916_v63  ;;  %v8599_v63 = vld [vmem:[%s9668_s9 + $0xe8] sm:$0xff] }
 0x96f   : > { %v5881_v25 = vrot.slane %v5880_v4, 2  ;;  %v6327_v28 = vmul.f32 %v8501_v62, %v12178_v27  ;;  %8506 = vrcp.f32 %v6266_v12  ;;  %v5869_v59 = vrot.slane %v5868_v42, 2  ;;  %v8503_v40 = vpop.eup %8502  ;;  %s12369_s9 = scalar_select %p964_p10, %s12805_s1, 1 }
 0x970   : > { %v6148_v30 = vadd.f32 %v6147_v0, %v6146_v7  ;;  %v6176_v56 = vadd.f32 %v6175_v38, %v12246_v52  ;;  %8508 = vpow2.f32 %v5973_v53  ;;  %v12258_v36 = vadd.f32 %v8598_v11, %v11967_v44  ;;  %s9085_s1 = smov [#allocation23]  }
 0x971   : > { %v5882_v14 = vmax.f32 %v5880_v4, %v5881_v25  ;;  %v6359_v55 = vmul.f32 %v6327_v28, %v11706_v35  ;;  %vm13007_vm11 = vcmp.lt.f32.partialorder %v13006_v58, 0.0  ;;  %v5870_v27 = vmax.f32 %v5868_v42, %v5869_v59  ;;  %s7307_s14 = sshll.u32 %s12369_s9, 2 }
 0x972   : > { %v6149_v9 = vrot.slane %v6148_v30, 1  ;;  %v12263_v48 = vsel %vm13007_vm11, 0.0, %v8503_v40  ;;  %v6177_v31 = vrot.slane %v6176_v56, 2  ;;  %v5885_v61 = vrot.slane %v12258_v36, 4  ;;  %s967_s5 = scalar_lea.vmem %s13014_s4, %s7307_s14  ;;  %s7037_s4 = scalar_lea.sflag [#allocation4], %s9656_s19 }
 0x973   : > { %v6163_v37 = vrot.slane %v12263_v48, 4  ;;  %v5883_v22 = vrot.slane %v5882_v14, 1  ;;  %v6491_v50 = vrot.slane %v6359_v55, 4  ;;  %v5871_v57 = vrot.slane %v5870_v27, 1 }
 0x974   : > { %v6150_v7 = vadd.f32 %v6149_v9, %v6148_v30  ;;  %v12269_v44 = vadd.f32 %v8599_v63, %v11970_v1  ;;  %v8505_v4 = vpop.eup %8504  ;;  %v6178_v0 = vadd.f32 %v6177_v31, %v6176_v56  ;;  %v5886_v42 = vmax.f32 %v12258_v36, %v5885_v61 }
 0x975   : > { %v6164_v62 = vadd.f32 %v6163_v37, %v12263_v48  ;;  %v5884_v12 = vmax.f32 %v5882_v14, %v5883_v22  ;;  %v6492_v38 = vadd.f32 %v6491_v50, %v6359_v55  ;;  %vm13008_vm9 = vcmp.lt.f32.partialorder %v12917_v2, 0.0 }
 0x976   : > { %vm6232_vm12 = vcmp.gt.f32.partialorder %v6150_v7, 0.0  ;;  %v12275_v53 = vsel %vm13008_vm9, 0.0, %v8505_v4  ;;  %v5872_v25 = vmax.f32 %v5870_v27, %v5871_v57  ;;  %v6179_v30 = vrot.slane %v6178_v0, 1 }
 0x977   : > { %v6264_v28 = vsel %vm6232_vm12, %v6150_v7, 1.0  ;;  %v6165_v59 = vrot.slane %v6164_v62, 2  ;;  %v6181_v1 = vrot.slane %v12275_v53, 4  ;;  %v6504_v40 = vadd.f32 %v6503_v33, %v6361_v21 }
 0x978   : > { %8510 = vrcp.f32 %v6264_v28  ;;  %v5921_v56 = vsub.f32 %v12223_v47, %v5884_v12  ;;  %v5919_v14 = vsub.f32 %v12231_v17, %v5872_v25  ;;  %v6493_v11 = vrot.slane %v6492_v38, 2 }
 0x979   : > { %v6180_v9 = vadd.f32 %v6179_v30, %v6178_v0  ;;  %v6166_v55 = vadd.f32 %v6165_v59, %v6164_v62  ;;  %v6182_v58 = vadd.f32 %v6181_v1, %v12275_v53  ;;  %v8507_v2 = vpop.eup %8506  ;;  %v5887_v27 = vrot.slane %v5886_v42, 2  ;;  %v6678_v0 = vld [vmem:[#allocation19 + $0x10] sm:$0xff]  ;;  %v6679_v62 = vld [vmem:[#allocation19 + $0x18] sm:$0xff]  ;;  %v6680_v59 = vld [vmem:[#allocation19 + $0x20] sm:$0xff] }
 0x97a   : > { %v5983_v31 = vmul.f32 1.442695, %v5921_v56  ;;  %v5979_v37 = vmul.f32 1.442695, %v5919_v14  ;;  %v5873_v22 = vrot.slane %v12269_v44, 4  ;;  %v8509_v61 = vpop.eup %8508  ;;  %v6330_v50 = vmul.f32 %v8507_v2, %v12206_v39  ;;  %v6681_v1 = vld [vmem:[#allocation19 + $0x28] sm:$0xff] }
 0x97b   : > { %vm6237_vm13 = vcmp.gt.f32.partialorder %v6180_v9, 0.0  ;;  %v6167_v21 = vrot.slane %v6166_v55, 1  ;;  %v6183_v33 = vrot.slane %v6182_v58, 2  ;;  %v6477_v47 = vrot.slane %v12251_v8, 1 }
 0x97c   : > { %v6269_v17 = vsel %vm6237_vm13, %v6180_v9, 1.0  ;;  %vm13009_vm15 = vcmp.lt.f32.partialorder %v12919_v16, 0.0  ;;  %8512 = vpow2.f32 %v5983_v31  ;;  %v6494_v57 = vadd.f32 %v6493_v11, %v6492_v38 }
 0x97d   : > { %v12286_v7 = vsel %vm13009_vm15, 0.0, %v8509_v61  ;;  %8514 = vrcp.f32 %v6269_v17  ;;  %v6168_v63 = vadd.f32 %v6167_v21, %v6166_v55  ;;  %v6184_v4 = vadd.f32 %v6183_v33, %v6182_v58  ;;  %v6682_v21 = vld [vmem:[#allocation19 + $0x30] sm:$0xff]  ;;  %v6683_v33 = vld [vmem:[#allocation19 + $0x38] sm:$0xff] }
 0x97e   : > { %v6362_v12 = vmul.f32 %v6330_v50, %v11706_v35  ;;  %v6169_v39 = vrot.slane %v12286_v7, 4  ;;  %8516 = vpow2.f32 %v5979_v37  ;;  %v5888_v25 = vmax.f32 %v5886_v42, %v5887_v27 }
 0x97f   : > { %v6505_v28 = vrot.slane %v6504_v40, 2  ;;  %vm6235_vm0 = vcmp.gt.f32.partialorder %v6168_v63, 0.0  ;;  %v6185_v30 = vrot.slane %v6184_v4, 1  ;;  %v5874_v16 = vmax.f32 %v12269_v44, %v5873_v22 }
 0x980   : > { %v6267_v56 = vsel %vm6235_vm0, %v6168_v63, 1.0  ;;  %v6170_v38 = vadd.f32 %v6169_v39, %v12286_v7  ;;  %v5889_v14 = vrot.slane %v5888_v25, 1  ;;  %v7869_v11 = vpack.c.bf16 %v6679_v62, %v6678_v0 }
 0x981   : > { %v6495_v9 = vrot.slane %v6494_v57, 1  ;;  %8518 = vrcp.f32 %v6267_v56  ;;  %v6186_v55 = vadd.f32 %v6185_v30, %v6184_v4  ;;  %v5875_v58 = vrot.slane %v5874_v16, 2 }
 0x982   : > { %v8511_v2 = vpop.eup %8510  ;;  %v6509_v31 = vrot.slane %v6362_v12, 4  ;;  %v6171_v37 = vrot.slane %v6170_v38, 2  ;;  %v5890_v42 = vmax.f32 %v5888_v25, %v5889_v14  ;;  %7870 = vmatpush3.bf16.msra.mxu0 %v7869_v11  ;;  %v7872_v27 = vpack.c.bf16 %v6681_v1, %v6680_v59  ;;  %v6684_v59 = vld [vmem:[#allocation19 + $0x40] sm:$0xff] }
 0x983   : > { %v12293_v61 = vadd.f32 %v6477_v47, %v12251_v8  ;;  %v6328_v22 = vmul.f32 %v8511_v2, %v12227_v10  ;;  %vm6238_vm1 = vcmp.gt.f32.partialorder %v6186_v55, 0.0  ;;  %v5876_v50 = vmax.f32 %v5874_v16, %v5875_v58  ;;  %7871 = vmatprep.subr.bf16.mxu0 %v9083_v41  ;;  %v12321_v58 = vld [vmem:[#allocation19 + $0x60] sm:$0xff] }
 0x984   : > { %v12297_v17 = vadd.f32 %v6505_v28, %v6504_v40  ;;  %v6270_v63 = vsel %vm6238_vm1, %v6186_v55, 1.0  ;;  %v6172_v4 = vadd.f32 %v6171_v37, %v6170_v38  ;;  %v5922_v0 = vsub.f32 %v12258_v36, %v5890_v42  ;;  %v6685_v40 = vld [vmem:[#allocation19 + $0x48] sm:$0xff]  ;;  %v6687_v55 = vld [vmem:[#allocation19 + $0x58] sm:$0xff] }
 0x985   : > { %v12300_v62 = vadd.f32 %v6495_v9, %v6494_v57  ;;  %v6360_v39 = vmul.f32 %v6328_v22, %v11706_v35  ;;  %8520 = vrcp.f32 %v6270_v63  ;;  %v5877_v8 = vrot.slane %v5876_v50, 1  ;;  %v12326_v42 = vld [vmem:[#allocation19 + $0x68] sm:$0xff]  ;;  %v12334_v63 = vld [vmem:[#allocation17] sm:$0xff] }
 0x986   : > { %v8513_v47 = vpop.eup %8512  ;;  %v12303_v10 = vadd.f32 %v6509_v31, %v6362_v12  ;;  %v6173_v25 = vrot.slane %v6172_v4, 1  ;;  %v5985_v30 = vmul.f32 1.442695, %v5922_v0  ;;  %7873 = vmatpush3.bf16.msra.mxu0 %v7872_v27  ;;  %v7875_v16 = vpack.c.bf16 %v6683_v33, %v6682_v21  ;;  %v12330_v27 = vld [vmem:[#allocation19 + $0x78] sm:$0xff] }
 0x987   : > { %v8515_v28 = vpop.eup %8514  ;;  %v6497_v1 = vrot.slane %v6360_v39, 4  ;;  %vm13010_vm2 = vcmp.lt.f32.partialorder %v10484_v32, 0.0  ;;  %v5878_v57 = vmax.f32 %v5876_v50, %v5877_v8  ;;  %7874 = vmatprep.subr.bf16.mxu0 %v9083_v41  ;;  %vm9084_vm3 = vmmov 0   ;;  %v12338_v8 = vld [vmem:[#allocation17 + $0x8] sm:$0xff] }
 0x988   : > { %v12307_v36 = vsel %vm13010_vm2, 0.0, %v8513_v47  ;;  %v8517_v35 = vpop.eup %8516  ;;  %v6333_v56 = vmul.f32 %v8515_v28, %v12246_v52  ;;  %v6174_v12 = vadd.f32 %v6173_v25, %v6172_v4  ;;  %8522 = vpow2.f32 %v5985_v30  ;;  %7661 = vmatprep.mubr.msk.f32.mxu0 %vm9084_vm3, %v12936_v60  ;;  %7731 = vmatprep.mubr.msk.f32.mxu1 %vm9084_vm3, %v12936_v60  ;;  %v6686_v52 = vld [vmem:[#allocation19 + $0x50] sm:$0xff]  ;;  %v12342_v25 = vld [vmem:[#allocation17 + $0x18] sm:$0xff] }
 0x989   : > { %v6199_v38 = vrot.slane %v12307_v36, 4  ;;  %v6498_v32 = vadd.f32 %v6497_v1, %v6360_v39  ;;  %vm13011_vm4 = vcmp.lt.f32.partialorder %v10491_v43, 0.0  ;;  %v5920_v11 = vsub.f32 %v12269_v44, %v5878_v57  ;;  %v12328_v43 = vld [vmem:[#allocation19 + $0x70] sm:$0xff] }
 0x98a   : > { %v12318_v14 = vsel %vm13011_vm4, 0.0, %v8517_v35  ;;  %v7878_v9 = vpack.c.bf16 %v6685_v40, %v6684_v59  ;;  %v6365_v2 = vmul.f32 %v6333_v56, %v11739_v26  ;;  %vm6236_vm5 = vcmp.gt.f32.partialorder %v6174_v12, 0.0  ;;  %7876 = vmatpush3.bf16.msra.mxu0 %v7875_v16  ;;  %v12340_v47 = vld [vmem:[#allocation17 + $0x10] sm:$0xff]  ;;  %v12347_v40 = vld [vmem:[#allocation17 + $0x20] sm:$0xff]  ;;  %v12352_v35 = vld [vmem:[#allocation17 + $0x28] sm:$0xff] }
 0x98b   : > { %v6200_v31 = vadd.f32 %v6199_v38, %v12307_v36  ;;  %v6187_v37 = vrot.slane %v12318_v14, 4  ;;  %v8519_v44 = vpop.eup %8518  ;;  %v6511_v22 = vrot.slane %v12303_v10, 2  ;;  %v6499_v50 = vrot.slane %v6498_v32, 2  ;;  %7877 = vmatprep.subr.bf16.mxu0 %v9083_v41  ;;  %v12354_v56 = vld [vmem:[#allocation17 + $0x30] sm:$0xff] }
 0x98c   : > { %v6268_v21 = vsel %vm6236_vm5, %v6174_v12, 1.0  ;;  %v5981_v33 = vmul.f32 1.442695, %v5920_v11  ;;  %v6527_v4 = vrot.slane %v6365_v2, 4  ;;  %v6331_v0 = vmul.f32 %v8519_v44, %v12263_v48  ;;  %v12356_v12 = vld [vmem:[#allocation17 + $0x38] sm:$0xff] }
 0x98d   : > { %8524 = vrcp.f32 %v6268_v21  ;;  %v6201_v39 = vrot.slane %v6200_v31, 2  ;;  %v12344_v30 = vadd.f32 %v6499_v50, %v6498_v32  ;;  %v6188_v16 = vadd.f32 %v6187_v37, %v12318_v14  ;;  %v12371_v37 = vld [vmem:[#allocation17 + $0x40] sm:$0xff] }
 0x98e   : > { %8526 = vpow2.f32 %v5981_v33  ;;  %v7881_v59 = vpack.c.bf16 %v6687_v55, %v6686_v52  ;;  %v6528_v28 = vadd.f32 %v6527_v4, %v6365_v2  ;;  %v6363_v48 = vmul.f32 %v6331_v0, %v11739_v26  ;;  %7879 = vmatpush3.bf16.msra.mxu0 %v7878_v9 }
 0x98f   : > { %v6202_v1 = vadd.f32 %v6201_v39, %v6200_v31  ;;  %v7884_v57 = vpack.c.bf16 %v12326_v42, %v12321_v58  ;;  %v8521_v38 = vpop.eup %8520  ;;  %v6189_v32 = vrot.slane %v6188_v16, 2  ;;  %7880 = vmatprep.subr.bf16.mxu0 %v9083_v41  ;;  %v7887_v11 = vpack.c.bf16 %v12330_v27, %v12328_v43  ;;  %v12373_v42 = vld [vmem:[#allocation17 + $0x48] sm:$0xff] }
 0x990   : > { %v7890_v52 = vpack.c.bf16 %v12338_v8, %v12334_v63  ;;  %v7893_v9 = vpack.c.bf16 %v12342_v25, %v12340_v47  ;;  %v6529_v55 = vrot.slane %v6528_v28, 2  ;;  %v6515_v58 = vrot.slane %v6363_v48, 4 }
 0x991   : > { %v6334_v2 = vmul.f32 %v8521_v38, %v12275_v53  ;;  %v6203_v31 = vrot.slane %v6202_v1, 1  ;;  %v6501_v43 = vrot.slane %v12344_v30, 1  ;;  %v6190_v27 = vadd.f32 %v6189_v32, %v6188_v16 }
 0x992   : > { %v8523_v21 = vpop.eup %8522  ;;  %v6530_v53 = vadd.f32 %v6529_v55, %v6528_v28  ;;  %v6516_v33 = vadd.f32 %v6515_v58, %v6363_v48  ;;  %7882 = vmatpush3.bf16.msra.mxu0 %v7881_v59  ;;  %vm13012_vm6 = vcmp.lt.f32.partialorder %v12949_v46, 0.0  ;;  %v13013_v32 = vrot.slane %v11921_v6, 1 }
 0x993   : > { %v6366_v4 = vmul.f32 %v6334_v2, %v11739_v26  ;;  %v6204_v0 = vadd.f32 %v6203_v31, %v6202_v1  ;;  %v6191_v39 = vrot.slane %v6190_v27, 1  ;;  %v12383_v38 = vsel %vm13012_vm6, 0.0, %v8523_v21  ;;  %7883 = vmatprep.subr.bf16.mxu0 %v9083_v41 }
 0x994   : > { %v12391_v50 = vadd.f32 %v13013_v32, %v11921_v6  ;;  %v6517_v28 = vrot.slane %v6516_v33, 2  ;;  %v6417_v59 = vrot.slane %v11976_v15, 1  ;;  %v6205_v55 = vrot.slane %v12383_v38, 4 }
 0x995   : > { %v6533_v48 = vrot.slane %v6366_v4, 4  ;;  %vm6241_vm7 = vcmp.gt.f32.partialorder %v6204_v0, 0.0  ;;  %v6192_v46 = vadd.f32 %v6191_v39, %v6190_v27  ;;  %v12399_v58 = vadd.f32 %v6459_v51, %v12120_v19 }
 0x996   : > { %v6273_v1 = vsel %vm6241_vm7, %v6204_v0, 1.0  ;;  %v6531_v31 = vrot.slane %v6530_v53, 1  ;;  %v6518_v21 = vadd.f32 %v6517_v28, %v6516_v33  ;;  %7885 = vmatpush3.bf16.msra.mxu0 %v7884_v57  ;;  %v6206_v0 = vadd.f32 %v6205_v55, %v12383_v38  ;;  %v6675_v55 = vld [vmem:[%s967_s5] sm:$0xf]  ;;  %s8970_s5 = scalar_lea.vmem %s12545_s16, 64 }
 0x997   : > { %v8525_v2 = vpop.eup %8524  ;;  %v6534_v6 = vadd.f32 %v6533_v48, %v6366_v4  ;;  %8528 = vrcp.f32 %v6273_v1  ;;  %vm6239_vm8 = vcmp.gt.f32.partialorder %v6192_v46, 0.0  ;;  %7886 = vmatprep.subr.bf16.mxu0 %v9083_v41  ;;  %v6465_v19 = vrot.slane %v12190_v20, 1  ;;  %p8971_p11 = scmp.ne.s32.totalorder %s12545_s16, %s8970_s5 }
 0x998   : > { %v8527_v32 = vpop.eup %8526  ;;  %v6332_v16 = vmul.f32 %v8525_v2, %v12286_v7  ;;  %v6519_v51 = vrot.slane %v6518_v21, 1  ;;  %v6271_v33 = vsel %vm6239_vm8, %v6192_v46, 1.0  ;;  %vm13015_vm14 = vcmp.lt.f32.partialorder %v10533_v18, 0.0 }
 0x999   : > { %v6535_v27 = vrot.slane %v6534_v6, 2  ;;  %v12410_v57 = vsel %vm13015_vm14, 0.0, %v8527_v32  ;;  %8530 = vrcp.f32 %v6271_v33  ;;  %v6207_v4 = vrot.slane %v6206_v0, 2  ;;  %p8972_p2 = pnand %p8971_p11, %p13053_p6 }
 0x99a   : > { %v6364_v7 = vmul.f32 %v6332_v16, %v11739_v26  ;;  %v6193_v39 = vrot.slane %v12410_v57, 4  ;;  %v12414_v28 = vadd.f32 %v6531_v31, %v6530_v53  ;;  %v12416_v48 = vadd.f32 %v6519_v51, %v6518_v21  ;;  %7888 = vmatpush3.bf16.msra.mxu0 %v7887_v11  ;;  %v13016_v31 = vld [vmem:[#allocation68_spill] sm:$0xff]  ;;  %v13017_v21 = vld [vmem:[#allocation69_spill] sm:$0xff] }
 0x99b   : > { %v6536_v1 = vadd.f32 %v6535_v27, %v6534_v6  ;;  %v6418_v2 = vadd.f32 %v6417_v59, %v11976_v15  ;;  %v6208_v44 = vadd.f32 %v6207_v4, %v6206_v0  ;;  %7889 = vmatprep.subr.bf16.mxu0 %v9083_v41  ;;  %v6466_v16 = vadd.f32 %v6465_v19, %v12190_v20  ;;  %p8973_p13 = pneg %p8972_p2 }
 0x99c   : > { %v6521_v46 = vrot.slane %v6364_v7, 4  ;;  %v6194_v18 = vadd.f32 %v6193_v39, %v12410_v57  ;;  %v6502_v32 = vadd.f32 %v6501_v43, %v12344_v30  ;;  %v6507_v53 = vrot.slane %v12297_v17, 1  ;;  %v13020_v30 = vld [vmem:[#allocation56_spill] sm:$0xff] }
 0x99d   : > { %vm13018_vm11 = vcmask 1042434   ;;  %v6537_v11 = vrot.slane %v6536_v1, 1  ;;  %v6209_v0 = vrot.slane %v6208_v44, 1  ;;  %7662 = vmatmul.mubr.f32.vlgmr.msra.gmra.mrb[48].mxu0 %v6675_v55  ;;  %v6512_v20 = vadd.f32 %v6511_v22, %v12303_v10  ;;  %v6564_v55 = vld [vmem:[%s9674_s0 + $0x8] sm:$0xff] }
 0x99e   : > { %v6600_v6 = vsel %vm13018_vm11, %v13017_v21, %v13016_v31  ;;  %vm13019_vm12 = vmmov %vm13018_vm11  ;;  %v6522_v59 = vadd.f32 %v6521_v46, %v6364_v7  ;;  %v6195_v51 = vrot.slane %v6194_v18, 2  ;;  %7891 = vmatpush3.bf16.msra.mxu0 %v7890_v52  ;;  %7696 = vmatprep.mubr.msk.f32.mxu0 %vm9084_vm3, %v12936_v60  ;;  %vm13021_vm9 = vcmask 1043459   ;;  %v6848_v21 = vld [vmem:[#allocation20] sm:$0xff] }
 0x99f   : > { %v6607_v15 = vsel %vm13019_vm12, %v12127_v29, %v12107_v13  ;;  %v6601_v43 = vsel %vm13021_vm9, %v13020_v30, %v6600_v6  ;;  %vm13022_vm13 = vmmov %vm13021_vm9  ;;  %v6210_v19 = vadd.f32 %v6209_v0, %v6208_v44  ;;  %7892 = vmatprep.subr.bf16.mxu0 %v9083_v41  ;;  %vm13023_vm15 = vcmask 1044484   ;;  %v6849_v6 = vld [vmem:[#allocation20 + $0x8] sm:$0xff] }
 0x9a0   : > { %v6608_v13 = vsel %vm13022_vm13, %v12137_v49, %v6607_v15  ;;  %v6523_v29 = vrot.slane %v6522_v59, 2  ;;  %v6196_v27 = vadd.f32 %v6195_v51, %v6194_v18  ;;  %v6602_v63 = vsel %vm13023_vm15, %v12027_v45, %v6601_v43  ;;  %vm13025_vm1 = vmmov %vm13023_vm15  ;;  %v6669_v43 = vld [vmem:[#allocation17 + $0x50] sm:$0xff] }
 0x9a1   : > { %v8529_v8 = vpop.eup %8528  ;;  %v6508_v52 = vadd.f32 %v6507_v53, %v12297_v17  ;;  %vm13024_vm0 = vcmask 1045509   ;;  %v6609_v22 = vsel %vm13025_vm1, %v12186_v23, %v6608_v13  ;;  %v6613_v49 = vsel %vm2910_vm10, %v12293_v61, %v12239_v5  ;;  %vm13028_vm6 = vmmov %vm13018_vm11  ;;  %v6670_v13 = vld [vmem:[#allocation17 + $0x58] sm:$0xff] }
 0x9a2   : > { %v6603_v10 = vsel %vm13024_vm0, %v12035_v3, %v6602_v63  ;;  %v6538_v44 = vadd.f32 %v6537_v11, %v6536_v1  ;;  %v6524_v33 = vadd.f32 %v6523_v29, %v6522_v59  ;;  %vm6242_vm2 = vcmp.gt.f32.partialorder %v6210_v19, 0.0  ;;  %7894 = vmatpush3.bf16.msra.mxu0 %v7893_v9  ;;  %vm13027_vm5 = vmmov %vm13024_vm0  ;;  %v6563_v1 = vld [vmem:[%s9674_s0] sm:$0xff] }
 0x9a3   : > { %v6197_v7 = vrot.slane %v6196_v27, 1  ;;  %v6274_v4 = vsel %vm6242_vm2, %v6210_v19, 1.0  ;;  %vm13026_vm4 = vcmask 1046534   ;;  %v6610_v3 = vsel %vm13027_vm5, %v12193_v34, %v6609_v22  ;;  %v8531_v5 = vpop.eup %8530  ;;  %7895 = vmatprep.subr.bf16.mxu0 %v9083_v41  ;;  %vm13031_vm14 = vmmov %vm13021_vm9  ;;  %v6852_v22 = vld [vmem:[#allocation20 + $0x20] sm:$0xff] }
 0x9a4   : > { %v6604_v45 = vsel %vm13026_vm4, %v12391_v50, %v6603_v10  ;;  %v6614_v23 = vsel %vm13028_vm6, %v12209_v24, %v6613_v49  ;;  %v6525_v61 = vrot.slane %v6524_v33, 1  ;;  %8532 = vrcp.f32 %v6274_v4  ;;  %vm13030_vm8 = vmmov %vm13026_vm4  ;;  %v6853_v49 = vld [vmem:[#allocation20 + $0x28] sm:$0xff] }
 0x9a5   : > { %v6198_v17 = vadd.f32 %v6197_v7, %v6196_v27  ;;  %v6513_v39 = vrot.slane %v6512_v20, 1  ;;  %v6335_v47 = vmul.f32 %v8531_v5, %v12318_v14  ;;  %vm13029_vm7 = vcmask 1047559   ;;  %vm13034_vm9 = vmmov %vm13025_vm1 }
 0x9a6   : > { %v6605_v25 = vsel %vm13029_vm7, %v6418_v2, %v6604_v45  ;;  %v6611_v34 = vsel %vm13030_vm8, %v12399_v58, %v6610_v3  ;;  %v6615_v9 = vsel %vm13031_vm14, %v12241_v54, %v6614_v23  ;;  %v6526_v24 = vadd.f32 %v6525_v61, %v6524_v33  ;;  %vm13032_vm12 = vmmov %vm13029_vm7  ;;  %v6671_v3 = vld [vmem:[#allocation17 + $0x60] sm:$0xff]  ;;  %v6672_v23 = vld [vmem:[#allocation17 + $0x68] sm:$0xff] }
 0x9a7   : > { %v6337_v50 = vmul.f32 %v8529_v8, %v12307_v36  ;;  %vm6240_vm11 = vcmp.gt.f32.partialorder %v6198_v17, 0.0  ;;  %v6612_v46 = vsel %vm13032_vm12, %v6466_v16, %v6611_v34  ;;  %v6367_v18 = vmul.f32 %v6335_v47, %v11739_v26  ;;  %v6565_v36 = vld [vmem:[%s9674_s0 + $0x10] sm:$0xff]  ;;  %vm13035_vm13 = vmmov %vm13024_vm0 }
 0x9a8   : > { %v6272_v53 = vsel %vm6240_vm11, %v6198_v17, 1.0  ;;  %v13033_v14 = vpack.c.bf16 %v12352_v35, %v12347_v40  ;;  %v6616_v58 = vsel %vm13034_vm9, %v12300_v62, %v6615_v9  ;;  %v6631_v2 = vmul.f32 %v6605_v25, %v6563_v1  ;;  %vm13036_vm15 = vmmov %vm13026_vm4  ;;  %v6854_v9 = vld [vmem:[#allocation20 + $0x30] sm:$0xff] }
 0x9a9   : > { %8534 = vrcp.f32 %v6272_v53  ;;  %v6514_v54 = vadd.f32 %v6513_v39, %v6512_v20  ;;  %v6617_v31 = vsel %vm13035_vm13, %v6502_v32, %v6616_v58  ;;  %v6620_v16 = vsel %vm2910_vm10, %v6526_v24, %v12416_v48  ;;  %vm13037_vm0 = vmmov %vm13028_vm6  ;;  %v6850_v32 = vld [vmem:[#allocation20 + $0x10] sm:$0xff]  ;;  %v6851_v20 = vld [vmem:[#allocation20 + $0x18] sm:$0xff] }
 0x9aa   : > { %7897 = vmatpush3.bf16.msra.mxu0 %v13033_v14  ;;  %v6539_v15 = vrot.slane %v6367_v18, 4  ;;  %v6618_v40 = vsel %vm13036_vm15, %v6508_v52, %v6617_v31  ;;  %v6621_v35 = vsel %vm13037_vm0, %v12414_v28, %v6620_v16  ;;  %v6632_v62 = vmul.f32 %v6612_v46, %v6564_v55  ;;  %vm13038_vm1 = vmmov %vm13029_vm7  ;;  %v6673_v14 = vld [vmem:[#allocation17 + $0x70] sm:$0xff]  ;;  %v6674_v58 = vld [vmem:[#allocation17 + $0x78] sm:$0xff] }
 0x9ab   : > { %7898 = vmatprep.subr.bf16.mxu0 %v9083_v41  ;;  %v6369_v11 = vmul.f32 %v6337_v50, %v11739_v26  ;;  %v6619_v59 = vsel %vm13038_vm1, %v6514_v54, %v6618_v40  ;;  %vm13039_vm2 = vmmov %vm13031_vm14  ;;  %v6635_v51 = vrot.slane %v6631_v2, 4  ;;  %v13040_v48 = vpack.c.bf16 %v12356_v12, %v12354_v56 }
 0x9ac   : > { %v6622_v0 = vsel %vm13039_vm2, %v6538_v44, %v6621_v35  ;;  %v6540_v30 = vadd.f32 %v6539_v15, %v6367_v18  ;;  %v6633_v29 = vmul.f32 %v6619_v59, %v6565_v36  ;;  %v6641_v19 = vrot.slane %v6632_v62, 4  ;;  %vm13042_vm4 = vmmov %vm13034_vm9 }
 0x9ad   : > { %v7914_v28 = vpack.c.bf16 %v6849_v6, %v6848_v21  ;;  %v6636_v27 = vadd.f32 %v6635_v51, %v6631_v2  ;;  %v7917_v10 = vpack.c.bf16 %v6851_v20, %v6850_v32  ;;  %v6551_v33 = vrot.slane %v6369_v11, 4  ;;  %vm13043_vm5 = vmmov %vm13037_vm0 }
 0x9ae   : > { %7900 = vmatpush3.bf16.msra.mxu0 %v13040_v48  ;;  %v6541_v63 = vrot.slane %v6540_v30, 2  ;;  %v6642_v8 = vadd.f32 %v6641_v19, %v6632_v62  ;;  %v6647_v52 = vrot.slane %v6633_v29, 4  ;;  %v8533_v44 = vpop.eup %8532  ;;  %v7905_v7 = vpack.c.bf16 %v6670_v13, %v6669_v43  ;;  %vm13045_vm6 = vmmov %vm13030_vm8 }
 0x9af   : > { %7901 = vmatprep.subr.bf16.mxu0 %v9083_v41  ;;  %7915 = vmatpush3.bf16.msra.mxu1 %v7914_v28  ;;  %v6637_v56 = vrot.slane %v6636_v27, 2  ;;  %v6338_v4 = vmul.f32 %v8533_v44, %v12383_v38  ;;  %v13041_v45 = vpack.c.bf16 %v12373_v42, %v12371_v37  ;;  %v7920_v39 = vpack.c.bf16 %v6853_v49, %v6852_v22  ;;  %v6855_v38 = vld [vmem:[#allocation20 + $0x38] sm:$0xff]  ;;  %vm13046_vm7 = vmmov %vm13038_vm1 }
 0x9b0   : > { %7916 = vmatprep.subr.bf16.mxu1 %v9083_v41  ;;  %v6542_v12 = vadd.f32 %v6541_v63, %v6540_v30  ;;  %v6643_v5 = vrot.slane %v6642_v8, 2  ;;  %v6648_v61 = vadd.f32 %v6647_v52, %v6633_v29  ;;  %v6552_v50 = vadd.f32 %v6551_v33, %v6369_v11  ;;  %vm13047_vm8 = vmmov %vm13039_vm2 }
 0x9b1   : > { %v6638_v17 = vadd.f32 %v6637_v56, %v6636_v27  ;;  %v6370_v47 = vmul.f32 %v6338_v4, %v11739_v26  ;;  %v7908_v37 = vpack.c.bf16 %v6672_v23, %v6671_v3  ;;  %v7923_v36 = vpack.c.bf16 %v6855_v38, %v6854_v9  ;;  %v6566_v27 = vld [vmem:[%s9674_s0 + $0x18] sm:$0xff]  ;;  %v6856_v4 = vld [vmem:[#allocation20 + $0x40] sm:$0xff]  ;;  %v6858_v3 = vld [vmem:[#allocation20 + $0x50] sm:$0xff]  ;;  %s8974_s0 = sshll.u32 %s9085_s1, 4  ;;  %s8975_s0 = int_to_ptr.vmem [resolvable:$false] %s8974_s0 }
 0x9b2   : > { %7903 = vmatpush3.bf16.msra.mxu0 %v13041_v45  ;;  %v6543_v1 = vrot.slane %v6542_v12, 1  ;;  %v6644_v25 = vadd.f32 %v6643_v5, %v6642_v8  ;;  %v6649_v34 = vrot.slane %v6648_v61, 2  ;;  %v6553_v15 = vrot.slane %v6552_v50, 2  ;;  %v6857_v45 = vld [vmem:[#allocation20 + $0x48] sm:$0xff]  ;;  %v6859_v5 = vld [vmem:[#allocation20 + $0x58] sm:$0xff]  ;;  %v6944_v38 = vld [vmem:[#allocation22 + $0x10] sm:$0xff]  ;;  %p8977_p1 = scmp.lt.s32.totalorder %s12545_s16, %s8975_s0 }
 0x9b3   : > { %7904 = vmatprep.subr.bf16.mxu0 %v9083_v41  ;;  %7918 = vmatpush3.bf16.msra.mxu1 %v7917_v10  ;;  %v8535_v24 = vpop.eup %8534  ;;  %v6639_v42 = vrot.slane %v6638_v17, 1  ;;  %v6557_v55 = vrot.slane %v6370_v47, 4  ;;  %v7911_v35 = vpack.c.bf16 %v6674_v58, %v6673_v14  ;;  %v7926_v23 = vpack.c.bf16 %v6857_v45, %v6856_v4  ;;  %v6943_v9 = vld [vmem:[#allocation22 + $0x8] sm:$0xff]  ;;  %v6950_v58 = vld [vmem:[#allocation22 + $0x40] sm:$0xff]  ;;  %s8976_s8 = scalar_lea.vmem %s8975_s0, 128 }
 0x9b4   : > { %7919 = vmatprep.subr.bf16.mxu1 %v9083_v41  ;;  %v6336_v46 = vmul.f32 %v8535_v24, %v12410_v57  ;;  %v6544_v18 = vadd.f32 %v6543_v1, %v6542_v12  ;;  %v6645_v53 = vrot.slane %v6644_v25, 1  ;;  %v6650_v54 = vadd.f32 %v6649_v34, %v6648_v61  ;;  %p8978_p0 = scmp.lt.s32.totalorder %s8976_s8, %s8970_s5 }
 0x9b5   : > { %v6640_v2 = vadd.f32 %v6639_v42, %v6638_v17  ;;  %v6558_v31 = vadd.f32 %v6557_v55, %v6370_v47  ;;  %v7929_v61 = vpack.c.bf16 %v6859_v5, %v6858_v3  ;;  %v6860_v17 = vld [vmem:[#allocation20 + $0x60] sm:$0xff]  ;;  %v6862_v47 = vld [vmem:[#allocation20 + $0x70] sm:$0xff]  ;;  %v6947_v55 = vld [vmem:[#allocation22 + $0x28] sm:$0xff] }
 0x9b6   : > { %7906 = vmatpush3.bf16.msra.mxu0 %v7905_v7  ;;  %v6368_v16 = vmul.f32 %v6336_v46, %v11739_v26  ;;  %v6623_v21 = vsel %vm13042_vm4, %v6544_v18, %v6622_v0  ;;  %v6646_v6 = vadd.f32 %v6645_v53, %v6644_v25  ;;  %v6651_v40 = vrot.slane %v6650_v54, 1  ;;  %v6863_v25 = vld [vmem:[#allocation20 + $0x78] sm:$0xff]  ;;  %v6946_v42 = vld [vmem:[#allocation22 + $0x20] sm:$0xff]  ;;  %v6948_v18 = vld [vmem:[#allocation22 + $0x30] sm:$0xff]  ;;  %p8979_p5 = por %p8978_p0, %p8977_p1 }
 0x9b7   : > { %7907 = vmatprep.subr.bf16.mxu0 %v9083_v41  ;;  %7921 = vmatpush3.bf16.msra.mxu1 %v7920_v39  ;;  %v6559_v62 = vrot.slane %v6558_v31, 2  ;;  %v6554_v26 = vadd.f32 %v6553_v15, %v6552_v50  ;;  %v6861_v39 = vld [vmem:[#allocation20 + $0x68] sm:$0xff]  ;;  %v7935_v34 = vpack.c.bf16 %v6863_v25, %v6862_v47  ;;  %v6945_v50 = vld [vmem:[#allocation22 + $0x18] sm:$0xff]  ;;  %v7944_v46 = vpack.c.bf16 %v6947_v55, %v6946_v42 }
 0x9b8   : > { %7922 = vmatprep.subr.bf16.mxu1 %v9083_v41  ;;  %v6545_v57 = vrot.slane %v6368_v16, 4  ;;  %v6766_v11 = vsel %vm2910_vm10, %v6646_v6, %v6640_v2  ;;  %v6652_v59 = vadd.f32 %v6651_v40, %v6650_v54  ;;  %vm13044_vm10 = vmmov %vm13035_vm13  ;;  %v7932_v1 = vpack.c.bf16 %v6861_v39, %v6860_v17  ;;  %v6949_v53 = vld [vmem:[#allocation22 + $0x38] sm:$0xff]  ;;  %v6951_v2 = vld [vmem:[#allocation22 + $0x48] sm:$0xff]  ;;  %p8980_p7 = pnand %p8979_p5, %p8973_p13 }
 0x9b9   : > { %v6560_v20 = vadd.f32 %v6559_v62, %v6558_v31  ;;  %v6555_v48 = vrot.slane %v6554_v26, 1  ;;  %v7947_v14 = vpack.c.bf16 %v6949_v53, %v6948_v18  ;;  %v7950_v54 = vpack.c.bf16 %v6951_v2, %v6950_v58  ;;  %v6953_v31 = vld [vmem:[#allocation22 + $0x58] sm:$0xff]  ;;  %v6955_v6 = vld [vmem:[#allocation22 + $0x68] sm:$0xff]  ;;  %v7335_v62 = vld [vmem:[%s13048_s28] ss:$0 sm:$0xff] }
 0x9ba   : > { %7909 = vmatpush3.bf16.msra.mxu0 %v7908_v37  ;;  %v6546_v51 = vadd.f32 %v6545_v57, %v6368_v16  ;;  %v6767_v0 = vsel %vm13043_vm5, %v6652_v59, %v6766_v11  ;;  %v7941_v37 = vpack.c.bf16 %v6945_v50, %v6944_v38 }
 0x9bb   : > { %7910 = vmatprep.subr.bf16.mxu0 %v9083_v41  ;;  %7924 = vmatpush3.bf16.msra.mxu1 %v7923_v36  ;;  %v6561_v13 = vrot.slane %v6560_v20, 1  ;;  %v6556_v19 = vadd.f32 %v6555_v48, %v6554_v26  ;;  %v6952_v36 = vld [vmem:[#allocation22 + $0x50] sm:$0xff] }
 0x9bc   : > { %7925 = vmatprep.subr.bf16.mxu1 %v9083_v41  ;;  %v6547_v32 = vrot.slane %v6546_v51, 2  ;;  %v7953_v16 = vpack.c.bf16 %v6953_v31, %v6952_v36  ;;  %v6956_v26 = vld [vmem:[#allocation22 + $0x70] sm:$0xff] }
 0x9bd   : > { %v6562_v28 = vadd.f32 %v6561_v13, %v6560_v20  ;;  %v7337_v13 = vld [vmem:[%s13051_s20] ss:$0 sm:$0xff] }
 0x9be   : > { %7912 = vmatpush3.bf16.msra.mxu0 %v7911_v35  ;;  %v6548_v30 = vadd.f32 %v6547_v32, %v6546_v51 }
 0x9bf   : > { %7937 = vmatprep.subr.bf16.mxu0 %v9083_v41  ;;  %7927 = vmatpush3.bf16.msra.mxu1 %v7926_v23 }
 0x9c0   : > { %v6549_v43 = vrot.slane %v6548_v30, 1  ;;  %7928 = vmatprep.subr.bf16.mxu1 %v9083_v41 }
 0x9c2   : > { %v6550_v29 = vadd.f32 %v6549_v43, %v6548_v30 }
 0x9c3   : > { %7930 = vmatpush3.bf16.msra.mxu1 %v7929_v61 }
 0x9c4   : > { %v6624_v63 = vsel %vm13044_vm10, %v6550_v29, %v6623_v21  ;;  %7931 = vmatprep.subr.bf16.mxu1 %v9083_v41  ;;  %v6954_v21 = vld [vmem:[#allocation22 + $0x60] sm:$0xff] }
 0x9c5   : > { %v6625_v8 = vsel %vm13045_vm6, %v6556_v19, %v6624_v63  ;;  %v7956_v15 = vpack.c.bf16 %v6955_v6, %v6954_v21 }
 0x9c6   : > { %v6626_v52 = vsel %vm13046_vm7, %v6562_v28, %v6625_v8 }
 0x9c7   : > { %v6634_v10 = vmul.f32 %v6626_v52, %v6566_v27  ;;  %7933 = vmatpush3.bf16.msra.mxu1 %v7932_v1 }
 0x9c8   : > { %7934 = vmatprep.subr.bf16.mxu1 %v9083_v41 }
 0x9c9   : > { %v6653_v22 = vrot.slane %v6634_v10, 4 }
 0x9cb   : > { %v6654_v49 = vadd.f32 %v6653_v22, %v6634_v10  ;;  %7936 = vmatpush3.bf16.msra.mxu1 %v7935_v34 }
 0x9cd   : > { %v6655_v44 = vrot.slane %v6654_v49, 2 }
 0x9cf   : > { %v6656_v33 = vadd.f32 %v6655_v44, %v6654_v49 }
 0x9d1   : > { %v6657_v7 = vrot.slane %v6656_v33, 1 }
 0x9d3   : > { %v6658_v56 = vadd.f32 %v6657_v7, %v6656_v33 }
 0x9d5   : > { %v6768_v12 = vsel %vm13047_vm8, %v6658_v56, %v6767_v0  ;;  %v6957_v0 = vld [vmem:[#allocation22 + $0x78] sm:$0xff] }
 0x9d6   : > { %7697 = vmatmul.mubr.f32.vlgmr.msra.gmra.mrb[50].mxu0 %v6768_v12  ;;  %v7959_v32 = vpack.c.bf16 %v6957_v0, %v6956_v26 }
 0x9d7   : > { %7766 = vmatprep.mubr.msk.f32.mxu0 %vm9084_vm3, %v12936_v60  ;;  %v6942_v60 = vld [vmem:[#allocation22] sm:$0xff] }
 0x9d8   : > { %v7938_v24 = vpack.c.bf16 %v6943_v9, %v6942_v60 }
 0x9da   : > { %7939 = vmatpush3.bf16.msra.mxu0 %v7938_v24 }
 0x9db   : > { %7940 = vmatprep.subr.bf16.mxu0 %v9083_v41 }
 0x9de   : > { %7942 = vmatpush3.bf16.msra.mxu0 %v7941_v37 }
 0x9df   : > { %7943 = vmatprep.subr.bf16.mxu0 %v9083_v41 }
 0x9e2   : > { %7945 = vmatpush3.bf16.msra.mxu0 %v7944_v46 }
 0x9e3   : > { %7946 = vmatprep.subr.bf16.mxu0 %v9083_v41 }
 0x9e6   : > { %7948 = vmatpush3.bf16.msra.mxu0 %v7947_v14 }
 0x9e7   : > { %7949 = vmatprep.subr.bf16.mxu0 %v9083_v41 }
 0x9ea   : > { %7951 = vmatpush3.bf16.msra.mxu0 %v7950_v54 }
 0x9eb   : > { %7952 = vmatprep.subr.bf16.mxu0 %v9083_v41 }
 0x9ee   : > { %7954 = vmatpush3.bf16.msra.mxu0 %v7953_v16 }
 0x9ef   : > { %7955 = vmatprep.subr.bf16.mxu0 %v9083_v41 }
 0x9f2   : > { %7957 = vmatpush3.bf16.msra.mxu0 %v7956_v15 }
 0x9f3   : > { %7958 = vmatprep.subr.bf16.mxu0 %v9083_v41  ;;  %v7336_v41 = vld [vmem:[%s13049_s6] ss:$0 sm:$0xff] }
 0x9f6   : > { %7960 = vmatpush3.bf16.msra.mxu0 %v7959_v32 }
 0xa70   : > { %v6758_v40 = vpop.f32.mrb[48].mxu0 }
 0xa71   : > { %v7663_v57 = vpop.f32.mrb[49].mxu0 }
 0xaa9   : > { %v6836_v35 = vpop.f32.mrb[50].mxu0 }
 0xaaa   : > { %v6837_v11 = vadd.f32 %v6836_v35, %v6758_v40  ;;  %v7698_v59 = vpop.f32.mrb[51].mxu0 }
 0xaac   : > { %v6847_v51 = vadd.f32 %v7335_v62, %v6837_v11 }
 0xaae   : > { %7732 = vmatmul.mubr.f32.vlgmr.msra.gmra.mrb[72].mxu1 %v6847_v51 }
 0xb81   : > { %v6937_v20 = vpop.f32.mrb[72].mxu1 }
 0xb82   : > { %v6938_v30 = vadd.f32 %v7336_v41, %v6937_v20  ;;  %v7733_v48 = vpop.f32.mrb[73].mxu1 }
 0xb84   : > { %v6941_v43 = vmax.f32 %v6938_v30, 0.0 }
 0xb86   : > { %7767 = vmatmul.mubr.f32.vlgmr.msra.gmra.mrb[52].mxu0 %v6941_v43 }
 0xc59   : > { %v7031_v29 = vpop.f32.mrb[52].mxu0 }
 0xc5a   : > { %v7032_v19 = vadd.f32 %v7337_v13, %v7031_v29  ;;  %v7768_v28 = vpop.f32.mrb[53].mxu0 }
 0xc5c   : > { %7035 = vst [vmem:[%s963_s2] sm:$0xf] %v7032_v19 }
 0xc5d   : > { %8983 = shalt.err (!%p8980_p7)
}
 0xc5e   : > { %s8984_s19 = scalar_lea.hbm %s12543_s24, 64  ;;  %s8988_s27 = scalar_lea.hbm %s13052_s29, 128 }
 0xc5f   : > { %p8985_p8 = scmp.ne.s32.totalorder %s12543_s24, %s8984_s19  ;;  %p8989_p4 = scmp.lt.u32.totalorder %s12543_s24, %s13052_s29 }
 0xc60   : > { %p8990_p12 = scmp.lt.u32.totalorder %s8988_s27, %s8984_s19  ;;  %p8992_p11 = scmp.lt.u32.totalorder %s8984_s19, %s12543_s24 }
 0xc61   : > { %p8986_p3 = pnand %p8985_p8, %p13053_p6 }
 0xc62   : > { %p8991_p10 = por %p8990_p12, %p8989_p4 }
 0xc63   : > { %p8987_p9 = pneg %p8986_p3 }
 0xc64   : > { %p8993_p2 = por %p8992_p11, %p8991_p10 }
 0xc66   : > { %p8994_p13 = pnand %p8993_p2, %p8987_p9 }
 0xc68   : > { %8997 = shalt.err (!%p8994_p13)
}
 0xc69   : > { %8007 = dma.vmem_to_hbm [thread:$0]  (%p13053_p6), %s12545_s16, 64, %s12543_s24, %s7037_s4  }
 0xc6a PF: > { %s13054_s23 = sld [smem:[#allocation32_spill]]  ;;  %s13055_s22 = sld [smem:[#allocation38_spill]] }
 0xc6b   : > { %p13057_p0 = scmp.ge.s32.totalorder %s9060_s25, 2 }
 0xc70   : > { %s7062_s20 = sand.u32 1, %s13054_s23   ;;  %p13056_p1 = scmp.ne.s32.totalorder %s13055_s22, 0 }
 0xc71   : > { %s7063_s12 = scalar_lea.sflag [#allocation4], %s7062_s20 }
 0xc72   : > { %p8051_p5 = pnand %p13057_p0, %p13056_p1 }
 0xc74   : > { %9043 = dma.done.wait (!%p8051_p5), %s7063_s12, 64  }
 0xc75   : > { %9045 = vsyncadd (!%p8051_p5), %s7063_s12, 4294967232  ;;  %s13058_s25 = sld [smem:[#allocation35_spill]]  ;;  %s13059_s2 = sld [smem:[#allocation33_spill]] }
 0xc76   : > { %s13060_s24 = sld [smem:[#allocation36_spill]]  ;;  %s13061_s4 = smov %s9052_s30 }
 0xc7b   : > { %p44_p7 = scmp.ge.s32.totalorder %s13058_s25, 4   ;;  %s13062_s30 = smov %s13059_s2 }
 0xc7d   :  { %46 = sbr.rel (!%p44_p7) target bundleno = 33 (0x21), region = 224 }
 0xc84   :  { %7068 = vsyncpa [#allocation3], 1 }
 0xc85   :  { %7070 = vsyncpa [#allocation3 + $0x1], 1 }
 0xc86   :  { %7071 = vsyncpa [#allocation6], 1 }
 0xc87   :  { %7073 = vsyncpa [#allocation6 + $0x1], 1 }
 0xc88   :  { %7074 = vsyncpa [#allocation9], 1 }
 0xc89   :  { %7075 = vsyncpa [#allocation12], 1 }
 0xc8a   :  { %7076 = vsyncpa [#allocation15], 1 }
 0xc8b   :  { %7077 = vsyncpa [#allocation18], 1 }
 0xc8c   :  { %7078 = vsyncpa [#allocation21], 1 }
 0xc8d   :  { %7079 = vsyncpa [#allocation4], 1 }
 0xc8e   :  { %7081 = vsyncpa [#allocation4 + $0x1], 1 }

</bundles_post_ra>
